<compile_context>
chip_gen: v5e
topology: v5e:2x2
jax: 0.10.0
libtpu: 0.0.40
codegen_flags: <defaults>
</compile_context>

<pallas_src>
import functools

import numpy as np
import jax
import jax.numpy as jnp
from jax.experimental import pallas as pl
from jax.experimental.pallas import tpu as pltpu

NEG_SLOPE = 0.2          # LeakyReLU slope used by the discriminator
CPAD = 128               # every channel dim is zero-padded to one full lane reg
KSIZE = 3                # 3x3 convs, padding=1
# (cin, cout, stride) for the synthesized Discriminator_DEFAULT layers.
LAYER_SPECS = [(3, 8, 1), (8, 16, 2), (16, 32, 2), (32, 1, 1)]


# ---------------------------------------------------------------------------
# Fused kernel: discriminator (4 convs) + relativistic BCE losses, grid = image
# ---------------------------------------------------------------------------
def _fused_disc_loss_kernel(x_ref,
                            g0_ref, w0_ref, b0_ref,
                            g1_ref, w1_ref, b1_ref,
                            g2_ref, w2_ref, b2_ref,
                            g3_ref, w3_ref, b3_ref,
                            adv_g_ref, adv_d_ref,
                            logits_ref,
                            *, n_sr, n_total):
    step = pl.program_id(0)

    @pl.when(step == 0)
    def _init():
        adv_g_ref[...] = jnp.zeros_like(adv_g_ref)
        adv_d_ref[...] = jnp.zeros_like(adv_d_ref)

    layers = ((g0_ref, w0_ref, b0_ref, True),
              (g1_ref, w1_ref, b1_ref, True),
              (g2_ref, w2_ref, b2_ref, True),
              (g3_ref, w3_ref, b3_ref, False))   # no activation on logit conv

    act = x_ref[0]                                     # (H*W, CPAD) f32
    for g_ref, w_ref, b_ref, apply_act in layers:
        n_taps, p_out, _ = g_ref.shape
        act_bf = act.astype(jnp.bfloat16)
        acc = jnp.zeros((p_out, CPAD), jnp.float32)
        for t in range(n_taps):                        # unrolled 3x3 taps
            # 0/1 gather matrix implements the (dy,dx) shift + zero padding
            # (and the stride-2 downsample) as a plain MXU matmul.
            gathered = jnp.dot(g_ref[t], act_bf,
                               preferred_element_type=jnp.float32)
            acc = acc + jnp.dot(gathered.astype(jnp.bfloat16), w_ref[t],
                                preferred_element_type=jnp.float32)
        acc = acc + b_ref[...]                         # (1, CPAD) broadcast
        if apply_act:
            act = jnp.where(acc >= 0.0, acc, NEG_SLOPE * acc)
        else:
            act = acc

    # Patch logits of this image sit in lane 0; padded lanes are exactly zero
    # (zero weight columns / zero bias).  Keep them in VMEM scratch across steps.
    logits_ref[step] = act[:, 0:1]                     # (P_last, 1) f32

    @pl.when(step == n_total - 1)
    def _finalize():
        lg = logits_ref[...]                           # (n_total, P_last, 1)
        sr = lg[0:n_sr]
        hr = lg[n_sr:n_total]
        mean_sr = jnp.mean(sr)                         # torch.mean over full tensor
        mean_hr = jnp.mean(hr)
        x_hr = hr - mean_sr                            # hr_output - rel_sr
        x_sr = sr - mean_hr                            # sr_output - rel_hr
        # Numerically stable softplus; softplus(-x) = softplus(x) - x so only two
        # exp/log1p chains hit the EUP.
        sp_hr = jnp.maximum(x_hr, 0.0) + jnp.log1p(jnp.exp(-jnp.abs(x_hr)))
        sp_sr = jnp.maximum(x_sr, 0.0) + jnp.log1p(jnp.exp(-jnp.abs(x_sr)))
        # _forward_impl_G: 0.5*BCE(x_hr, fake) + 0.5*BCE(x_sr, real)
        adv_g = 0.5 * jnp.mean(sp_hr) + 0.5 * jnp.mean(sp_sr - x_sr)
        # _forward_impl_D: 0.5*BCE(x_hr, real) + 0.5*BCE(x_sr, fake)
        adv_d = 0.5 * jnp.mean(sp_hr - x_hr) + 0.5 * jnp.mean(sp_sr)
        adv_g_ref[...] = jnp.zeros((1, 1), jnp.float32) + adv_g
        adv_d_ref[...] = jnp.zeros((1, 1), jnp.float32) + adv_d


# ---------------------------------------------------------------------------
# Host-side (static) packing: gather matrices, folded weights, padded biases
# ---------------------------------------------------------------------------
def _build_gather_matrices(h, w, stride):
    """G[t, p_out, p_in] = 1 iff output pixel p_out reads input pixel p_in for
    kernel tap t=(dy,dx) of a 3x3/pad-1 conv with the given stride (else 0)."""
    ho = (h + 2 - KSIZE) // stride + 1
    wo = (w + 2 - KSIZE) // stride + 1
    g = np.zeros((KSIZE * KSIZE, ho * wo, h * w), np.float32)
    for dy in range(KSIZE):
        for dx in range(KSIZE):
            t = dy * KSIZE + dx
            for io in range(ho):
                ii = io * stride + dy - 1
                if not (0 <= ii < h):
                    continue
                for jo in range(wo):
                    jj = jo * stride + dx - 1
                    if 0 <= jj < w:
                        g[t, io * wo + jo, ii * w + jj] = 1.0
    return g, ho, wo


def init_discriminator_params(key):
    """Deterministic PyTorch-style Conv2d weights for the synthesized D."""
    params = []
    for cin, cout, _ in LAYER_SPECS:
        key, kw, kb = jax.random.split(key, 3)
        fan_in = cin * KSIZE * KSIZE
        wt = jax.random.normal(kw, (cout, cin, KSIZE, KSIZE), jnp.float32)
        wt = wt / float(np.sqrt(fan_in))
        bt = 0.01 * jax.random.normal(kb, (cout,), jnp.float32)
        params.append((wt, bt))
    return params


def pack_discriminator(params, h, w):
    """Permute PyTorch (Cout,Cin,ky,kx) weights once into per-tap (CPAD,CPAD)
    bf16 matrices (channel-last, zero-padded to 128 lanes), pad biases, and
    build the static gather matrices for every layer."""
    packed = []
    for (wt, bt), (cin, cout, stride) in zip(params, LAYER_SPECS):
        g, h, w = _build_gather_matrices(h, w, stride)
        w_taps = np.zeros((KSIZE * KSIZE, CPAD, CPAD), np.float32)
        w_np = np.asarray(wt).transpose(2, 3, 1, 0).reshape(KSIZE * KSIZE, cin, cout)
        w_taps[:, :cin, :cout] = w_np
        b_pad = np.zeros((1, CPAD), np.float32)
        b_pad[0, :cout] = np.asarray(bt)
        packed += [jnp.asarray(g, jnp.bfloat16),          # (9, Pout, Pin)
                   jnp.asarray(w_taps, jnp.bfloat16),     # (9, CPAD, CPAD)
                   jnp.asarray(b_pad, jnp.float32)]       # (1, CPAD)
    return packed


# ---------------------------------------------------------------------------
# Forward: mirrors AdversarialLoss.forward -> (coef*adv_G, coef*adv_D)
# ---------------------------------------------------------------------------
def adversarial_loss_forward(sr, hr, coef, packed):
    n_sr = sr.shape[0]
    n_total = n_sr + hr.shape[0]
    _, cin, h, w = sr.shape
    p_in = h * w
    p_last = packed[-3].shape[1]          # patch logits per image (last layer Pout)

    # NCHW -> NHWC once (PyTorch inputs are NCHW), pad channels to a full
    # 128-lane register, flatten spatial dims: every kernel operand is a
    # lane-dense 2D matrix.  One pass over concat([sr, hr]).
    x = jnp.concatenate([sr, hr], axis=0)
    x = jnp.transpose(x, (0, 2, 3, 1))
    x = jnp.pad(x, ((0, 0), (0, 0), (0, 0), (0, CPAD - cin)))
    x = x.reshape(n_total, p_in, CPAD)

    const_specs = []
    for arr in packed:                    # weights / gathers / biases stay resident
        if arr.ndim == 3:
            const_specs.append(pl.BlockSpec(arr.shape, lambda b: (0, 0, 0)))
        else:
            const_specs.append(pl.BlockSpec(arr.shape, lambda b: (0, 0)))

    kernel = functools.partial(_fused_disc_loss_kernel,
                               n_sr=n_sr, n_total=n_total)
    adv_g, adv_d = pl.pallas_call(
        kernel,
        out_shape=(jax.ShapeDtypeStruct((1, 1), jnp.float32),
                   jax.ShapeDtypeStruct((1, 1), jnp.float32)),
        grid=(n_total,),
        in_specs=[pl.BlockSpec((1, p_in, CPAD), lambda b: (b, 0, 0))] + const_specs,
        out_specs=(pl.BlockSpec((1, 1), lambda b: (0, 0)),
                   pl.BlockSpec((1, 1), lambda b: (0, 0))),
        scratch_shapes=[pltpu.VMEM((n_total, p_last, 1), jnp.float32)],
        compiler_params=pltpu.CompilerParams(
            # The batch axis is sequential by design: the fused loss finalize at
            # the last step needs every image's logits (kept in VMEM scratch).
            dimension_semantics=("arbitrary",),
            vmem_limit_bytes=32 * 1024 * 1024),
    )(x, *packed)
    return coef * adv_g[0, 0], coef * adv_d[0, 0]


# ---------------------------------------------------------------------------
if __name__ == "__main__":
    key = jax.random.PRNGKey(0)
    k_params, k_sr, k_hr = jax.random.split(key, 3)

    params = init_discriminator_params(k_params)

    # Small SR / HR image batches, NCHW (PyTorch convention).
    sr = jax.random.normal(k_sr, (2, 3, 16, 16), jnp.float32)
    hr = jax.random.normal(k_hr, (2, 3, 16, 16), jnp.float32)
    coef = jnp.float32(0.1)

    packed = pack_discriminator(params, sr.shape[2], sr.shape[3])

    fwd = jax.jit(adversarial_loss_forward)
    adv_g, adv_d = fwd(sr, hr, coef, packed)
    jax.block_until_ready((adv_g, adv_d))
    print("KERNEL_OK")
</pallas_src>

<mosaic_0001>
module attributes {stable_mosaic.version = 11 : i64} {
  func.func @_fused_disc_loss_kernel(%arg0: i32, %arg1: memref<1x256x128xf32, #tpu.memory_space<vmem>>, %arg2: memref<9x256x256xbf16, #tpu.memory_space<vmem>>, %arg3: memref<9x128x128xbf16, #tpu.memory_space<vmem>>, %arg4: memref<1x128xf32, #tpu.memory_space<vmem>>, %arg5: memref<9x64x256xbf16, #tpu.memory_space<vmem>>, %arg6: memref<9x128x128xbf16, #tpu.memory_space<vmem>>, %arg7: memref<1x128xf32, #tpu.memory_space<vmem>>, %arg8: memref<9x16x64xbf16, #tpu.memory_space<vmem>>, %arg9: memref<9x128x128xbf16, #tpu.memory_space<vmem>>, %arg10: memref<1x128xf32, #tpu.memory_space<vmem>>, %arg11: memref<9x16x16xbf16, #tpu.memory_space<vmem>>, %arg12: memref<9x128x128xbf16, #tpu.memory_space<vmem>>, %arg13: memref<1x128xf32, #tpu.memory_space<vmem>>, %arg14: memref<1x1xf32, #tpu.memory_space<vmem>>, %arg15: memref<1x1xf32, #tpu.memory_space<vmem>>, %arg16: memref<4x16x1xf32, #tpu.memory_space<vmem>>) attributes {dimension_semantics = [#tpu.dimension_semantics<arbitrary>], iteration_bounds = array<i64: 4>, scalar_prefetch = 0 : i64, scratch_operands = 1 : i64, tpu.core_type = #tpu.core_type<tc>, window_params = [{transform_indices = @transform_0, window_bounds = array<i64: 1, 256, 128>}, {pipeline_mode = #tpu.pipeline_mode<synchronous>, transform_indices = @transform_1, window_bounds = array<i64: 9, 256, 256>}, {pipeline_mode = #tpu.pipeline_mode<synchronous>, transform_indices = @transform_2, window_bounds = array<i64: 9, 128, 128>}, {pipeline_mode = #tpu.pipeline_mode<synchronous>, transform_indices = @transform_3, window_bounds = array<i64: 1, 128>}, {pipeline_mode = #tpu.pipeline_mode<synchronous>, transform_indices = @transform_4, window_bounds = array<i64: 9, 64, 256>}, {pipeline_mode = #tpu.pipeline_mode<synchronous>, transform_indices = @transform_5, window_bounds = array<i64: 9, 128, 128>}, {pipeline_mode = #tpu.pipeline_mode<synchronous>, transform_indices = @transform_6, window_bounds = array<i64: 1, 128>}, {pipeline_mode = #tpu.pipeline_mode<synchronous>, transform_indices = @transform_7, window_bounds = array<i64: 9, 16, 64>}, {pipeline_mode = #tpu.pipeline_mode<synchronous>, transform_indices = @transform_8, window_bounds = array<i64: 9, 128, 128>}, {pipeline_mode = #tpu.pipeline_mode<synchronous>, transform_indices = @transform_9, window_bounds = array<i64: 1, 128>}, {pipeline_mode = #tpu.pipeline_mode<synchronous>, transform_indices = @transform_10, window_bounds = array<i64: 9, 16, 16>}, {pipeline_mode = #tpu.pipeline_mode<synchronous>, transform_indices = @transform_11, window_bounds = array<i64: 9, 128, 128>}, {pipeline_mode = #tpu.pipeline_mode<synchronous>, transform_indices = @transform_12, window_bounds = array<i64: 1, 128>}, {pipeline_mode = #tpu.pipeline_mode<synchronous>, transform_indices = @transform_13, window_bounds = array<i64: 1, 1>}, {pipeline_mode = #tpu.pipeline_mode<synchronous>, transform_indices = @transform_14, window_bounds = array<i64: 1, 1>}]} {
    %c0_i32 = arith.constant 0 : i32
    %0 = arith.cmpi eq, %arg0, %c0_i32 : i32
    %1 = arith.extui %0 : i1 to i32
    %c0_i32_0 = arith.constant 0 : i32
    %2 = arith.cmpi ne, %1, %c0_i32_0 : i32
    scf.if %2 {
      %cst_303 = arith.constant 0.000000e+00 : f32
      %336 = vector.broadcast %cst_303 : f32 to vector<1x1xf32>
      %c0_304 = arith.constant 0 : index
      %c0_305 = arith.constant 0 : index
      %337 = vector.load %arg14[%c0_304, %c0_305] : memref<1x1xf32, #tpu.memory_space<vmem>>, vector<1x1xf32>
      tpu.vector_store %arg14[%c0_304, %c0_305], %336 {strides = array<i32>} : memref<1x1xf32, #tpu.memory_space<vmem>>, vector<1x1xf32>,
      %cst_306 = arith.constant 0.000000e+00 : f32
      %338 = vector.broadcast %cst_306 : f32 to vector<1x1xf32>
      %c0_307 = arith.constant 0 : index
      %c0_308 = arith.constant 0 : index
      %339 = vector.load %arg15[%c0_307, %c0_308] : memref<1x1xf32, #tpu.memory_space<vmem>>, vector<1x1xf32>
      tpu.vector_store %arg15[%c0_307, %c0_308], %338 {strides = array<i32>} : memref<1x1xf32, #tpu.memory_space<vmem>>, vector<1x1xf32>,
    } else {
    }
    %c0 = arith.constant 0 : index
    %c0_1 = arith.constant 0 : index
    %c0_2 = arith.constant 0 : index
    %3 = vector.load %arg1[%c0, %c0_1, %c0_2] : memref<1x256x128xf32, #tpu.memory_space<vmem>>, vector<1x256x128xf32>
    %4 = vector.shape_cast %3 : vector<1x256x128xf32> to vector<256x128xf32>
    %5 = arith.truncf %4 : vector<256x128xf32> to vector<256x128xbf16>
    %cst = arith.constant 0.000000e+00 : f32
    %6 = vector.broadcast %cst : f32 to vector<256x128xf32>
    %c0_3 = arith.constant 0 : index
    %c0_4 = arith.constant 0 : index
    %c0_5 = arith.constant 0 : index
    %7 = vector.load %arg2[%c0_3, %c0_4, %c0_5] : memref<9x256x256xbf16, #tpu.memory_space<vmem>>, vector<1x256x256xbf16>
    %8 = vector.shape_cast %7 : vector<1x256x256xbf16> to vector<256x256xbf16>
    %cst_6 = arith.constant dense<0.000000e+00> : vector<256x128xf32>
    %9 = tpu.matmul %8, %5, %cst_6 {dimension_numbers = #tpu.dot_dimension_numbers<[1], [0], [0], [1], [0, 0, 1, 1], [], []>} : vector<256x256xbf16>, vector<256x128xbf16>, vector<256x128xf32> -> vector<256x128xf32>
    %10 = arith.truncf %9 : vector<256x128xf32> to vector<256x128xbf16>
    %c0_7 = arith.constant 0 : index
    %c0_8 = arith.constant 0 : index
    %c0_9 = arith.constant 0 : index
    %11 = vector.load %arg3[%c0_7, %c0_8, %c0_9] : memref<9x128x128xbf16, #tpu.memory_space<vmem>>, vector<1x128x128xbf16>
    %12 = vector.shape_cast %11 : vector<1x128x128xbf16> to vector<128x128xbf16>
    %cst_10 = arith.constant dense<0.000000e+00> : vector<256x128xf32>
    %13 = tpu.matmul %10, %12, %cst_10 {dimension_numbers = #tpu.dot_dimension_numbers<[1], [0], [0], [1], [0, 0, 1, 1], [], []>} : vector<256x128xbf16>, vector<128x128xbf16>, vector<256x128xf32> -> vector<256x128xf32>
    %14 = arith.addf %6, %13 : vector<256x128xf32>
    %c1 = arith.constant 1 : index
    %c0_11 = arith.constant 0 : index
    %c0_12 = arith.constant 0 : index
    %15 = vector.load %arg2[%c1, %c0_11, %c0_12] : memref<9x256x256xbf16, #tpu.memory_space<vmem>>, vector<1x256x256xbf16>
    %16 = vector.shape_cast %15 : vector<1x256x256xbf16> to vector<256x256xbf16>
    %cst_13 = arith.constant dense<0.000000e+00> : vector<256x128xf32>
    %17 = tpu.matmul %16, %5, %cst_13 {dimension_numbers = #tpu.dot_dimension_numbers<[1], [0], [0], [1], [0, 0, 1, 1], [], []>} : vector<256x256xbf16>, vector<256x128xbf16>, vector<256x128xf32> -> vector<256x128xf32>
    %18 = arith.truncf %17 : vector<256x128xf32> to vector<256x128xbf16>
    %c1_14 = arith.constant 1 : index
    %c0_15 = arith.constant 0 : index
    %c0_16 = arith.constant 0 : index
    %19 = vector.load %arg3[%c1_14, %c0_15, %c0_16] : memref<9x128x128xbf16, #tpu.memory_space<vmem>>, vector<1x128x128xbf16>
    %20 = vector.shape_cast %19 : vector<1x128x128xbf16> to vector<128x128xbf16>
    %cst_17 = arith.constant dense<0.000000e+00> : vector<256x128xf32>
    %21 = tpu.matmul %18, %20, %cst_17 {dimension_numbers = #tpu.dot_dimension_numbers<[1], [0], [0], [1], [0, 0, 1, 1], [], []>} : vector<256x128xbf16>, vector<128x128xbf16>, vector<256x128xf32> -> vector<256x128xf32>
    %22 = arith.addf %14, %21 : vector<256x128xf32>
    %c2 = arith.constant 2 : index
    %c0_18 = arith.constant 0 : index
    %c0_19 = arith.constant 0 : index
    %23 = vector.load %arg2[%c2, %c0_18, %c0_19] : memref<9x256x256xbf16, #tpu.memory_space<vmem>>, vector<1x256x256xbf16>
    %24 = vector.shape_cast %23 : vector<1x256x256xbf16> to vector<256x256xbf16>
    %cst_20 = arith.constant dense<0.000000e+00> : vector<256x128xf32>
    %25 = tpu.matmul %24, %5, %cst_20 {dimension_numbers = #tpu.dot_dimension_numbers<[1], [0], [0], [1], [0, 0, 1, 1], [], []>} : vector<256x256xbf16>, vector<256x128xbf16>, vector<256x128xf32> -> vector<256x128xf32>
    %26 = arith.truncf %25 : vector<256x128xf32> to vector<256x128xbf16>
    %c2_21 = arith.constant 2 : index
    %c0_22 = arith.constant 0 : index
    %c0_23 = arith.constant 0 : index
    %27 = vector.load %arg3[%c2_21, %c0_22, %c0_23] : memref<9x128x128xbf16, #tpu.memory_space<vmem>>, vector<1x128x128xbf16>
    %28 = vector.shape_cast %27 : vector<1x128x128xbf16> to vector<128x128xbf16>
    %cst_24 = arith.constant dense<0.000000e+00> : vector<256x128xf32>
    %29 = tpu.matmul %26, %28, %cst_24 {dimension_numbers = #tpu.dot_dimension_numbers<[1], [0], [0], [1], [0, 0, 1, 1], [], []>} : vector<256x128xbf16>, vector<128x128xbf16>, vector<256x128xf32> -> vector<256x128xf32>
    %30 = arith.addf %22, %29 : vector<256x128xf32>
    %c3 = arith.constant 3 : index
    %c0_25 = arith.constant 0 : index
    %c0_26 = arith.constant 0 : index
    %31 = vector.load %arg2[%c3, %c0_25, %c0_26] : memref<9x256x256xbf16, #tpu.memory_space<vmem>>, vector<1x256x256xbf16>
    %32 = vector.shape_cast %31 : vector<1x256x256xbf16> to vector<256x256xbf16>
    %cst_27 = arith.constant dense<0.000000e+00> : vector<256x128xf32>
    %33 = tpu.matmul %32, %5, %cst_27 {dimension_numbers = #tpu.dot_dimension_numbers<[1], [0], [0], [1], [0, 0, 1, 1], [], []>} : vector<256x256xbf16>, vector<256x128xbf16>, vector<256x128xf32> -> vector<256x128xf32>
    %34 = arith.truncf %33 : vector<256x128xf32> to vector<256x128xbf16>
    %c3_28 = arith.constant 3 : index
    %c0_29 = arith.constant 0 : index
    %c0_30 = arith.constant 0 : index
    %35 = vector.load %arg3[%c3_28, %c0_29, %c0_30] : memref<9x128x128xbf16, #tpu.memory_space<vmem>>, vector<1x128x128xbf16>
    %36 = vector.shape_cast %35 : vector<1x128x128xbf16> to vector<128x128xbf16>
    %cst_31 = arith.constant dense<0.000000e+00> : vector<256x128xf32>
    %37 = tpu.matmul %34, %36, %cst_31 {dimension_numbers = #tpu.dot_dimension_numbers<[1], [0], [0], [1], [0, 0, 1, 1], [], []>} : vector<256x128xbf16>, vector<128x128xbf16>, vector<256x128xf32> -> vector<256x128xf32>
    %38 = arith.addf %30, %37 : vector<256x128xf32>
    %c4 = arith.constant 4 : index
    %c0_32 = arith.constant 0 : index
    %c0_33 = arith.constant 0 : index
    %39 = vector.load %arg2[%c4, %c0_32, %c0_33] : memref<9x256x256xbf16, #tpu.memory_space<vmem>>, vector<1x256x256xbf16>
    %40 = vector.shape_cast %39 : vector<1x256x256xbf16> to vector<256x256xbf16>
    %cst_34 = arith.constant dense<0.000000e+00> : vector<256x128xf32>
    %41 = tpu.matmul %40, %5, %cst_34 {dimension_numbers = #tpu.dot_dimension_numbers<[1], [0], [0], [1], [0, 0, 1, 1], [], []>} : vector<256x256xbf16>, vector<256x128xbf16>, vector<256x128xf32> -> vector<256x128xf32>
    %42 = arith.truncf %41 : vector<256x128xf32> to vector<256x128xbf16>
    %c4_35 = arith.constant 4 : index
    %c0_36 = arith.constant 0 : index
    %c0_37 = arith.constant 0 : index
    %43 = vector.load %arg3[%c4_35, %c0_36, %c0_37] : memref<9x128x128xbf16, #tpu.memory_space<vmem>>, vector<1x128x128xbf16>
    %44 = vector.shape_cast %43 : vector<1x128x128xbf16> to vector<128x128xbf16>
    %cst_38 = arith.constant dense<0.000000e+00> : vector<256x128xf32>
    %45 = tpu.matmul %42, %44, %cst_38 {dimension_numbers = #tpu.dot_dimension_numbers<[1], [0], [0], [1], [0, 0, 1, 1], [], []>} : vector<256x128xbf16>, vector<128x128xbf16>, vector<256x128xf32> -> vector<256x128xf32>
    %46 = arith.addf %38, %45 : vector<256x128xf32>
    %c5 = arith.constant 5 : index
    %c0_39 = arith.constant 0 : index
    %c0_40 = arith.constant 0 : index
    %47 = vector.load %arg2[%c5, %c0_39, %c0_40] : memref<9x256x256xbf16, #tpu.memory_space<vmem>>, vector<1x256x256xbf16>
    %48 = vector.shape_cast %47 : vector<1x256x256xbf16> to vector<256x256xbf16>
    %cst_41 = arith.constant dense<0.000000e+00> : vector<256x128xf32>
    %49 = tpu.matmul %48, %5, %cst_41 {dimension_numbers = #tpu.dot_dimension_numbers<[1], [0], [0], [1], [0, 0, 1, 1], [], []>} : vector<256x256xbf16>, vector<256x128xbf16>, vector<256x128xf32> -> vector<256x128xf32>
    %50 = arith.truncf %49 : vector<256x128xf32> to vector<256x128xbf16>
    %c5_42 = arith.constant 5 : index
    %c0_43 = arith.constant 0 : index
    %c0_44 = arith.constant 0 : index
    %51 = vector.load %arg3[%c5_42, %c0_43, %c0_44] : memref<9x128x128xbf16, #tpu.memory_space<vmem>>, vector<1x128x128xbf16>
    %52 = vector.shape_cast %51 : vector<1x128x128xbf16> to vector<128x128xbf16>
    %cst_45 = arith.constant dense<0.000000e+00> : vector<256x128xf32>
    %53 = tpu.matmul %50, %52, %cst_45 {dimension_numbers = #tpu.dot_dimension_numbers<[1], [0], [0], [1], [0, 0, 1, 1], [], []>} : vector<256x128xbf16>, vector<128x128xbf16>, vector<256x128xf32> -> vector<256x128xf32>
    %54 = arith.addf %46, %53 : vector<256x128xf32>
    %c6 = arith.constant 6 : index
    %c0_46 = arith.constant 0 : index
    %c0_47 = arith.constant 0 : index
    %55 = vector.load %arg2[%c6, %c0_46, %c0_47] : memref<9x256x256xbf16, #tpu.memory_space<vmem>>, vector<1x256x256xbf16>
    %56 = vector.shape_cast %55 : vector<1x256x256xbf16> to vector<256x256xbf16>
    %cst_48 = arith.constant dense<0.000000e+00> : vector<256x128xf32>
    %57 = tpu.matmul %56, %5, %cst_48 {dimension_numbers = #tpu.dot_dimension_numbers<[1], [0], [0], [1], [0, 0, 1, 1], [], []>} : vector<256x256xbf16>, vector<256x128xbf16>, vector<256x128xf32> -> vector<256x128xf32>
    %58 = arith.truncf %57 : vector<256x128xf32> to vector<256x128xbf16>
    %c6_49 = arith.constant 6 : index
    %c0_50 = arith.constant 0 : index
    %c0_51 = arith.constant 0 : index
    %59 = vector.load %arg3[%c6_49, %c0_50, %c0_51] : memref<9x128x128xbf16, #tpu.memory_space<vmem>>, vector<1x128x128xbf16>
    %60 = vector.shape_cast %59 : vector<1x128x128xbf16> to vector<128x128xbf16>
    %cst_52 = arith.constant dense<0.000000e+00> : vector<256x128xf32>
    %61 = tpu.matmul %58, %60, %cst_52 {dimension_numbers = #tpu.dot_dimension_numbers<[1], [0], [0], [1], [0, 0, 1, 1], [], []>} : vector<256x128xbf16>, vector<128x128xbf16>, vector<256x128xf32> -> vector<256x128xf32>
    %62 = arith.addf %54, %61 : vector<256x128xf32>
    %c7 = arith.constant 7 : index
    %c0_53 = arith.constant 0 : index
    %c0_54 = arith.constant 0 : index
    %63 = vector.load %arg2[%c7, %c0_53, %c0_54] : memref<9x256x256xbf16, #tpu.memory_space<vmem>>, vector<1x256x256xbf16>
    %64 = vector.shape_cast %63 : vector<1x256x256xbf16> to vector<256x256xbf16>
    %cst_55 = arith.constant dense<0.000000e+00> : vector<256x128xf32>
    %65 = tpu.matmul %64, %5, %cst_55 {dimension_numbers = #tpu.dot_dimension_numbers<[1], [0], [0], [1], [0, 0, 1, 1], [], []>} : vector<256x256xbf16>, vector<256x128xbf16>, vector<256x128xf32> -> vector<256x128xf32>
    %66 = arith.truncf %65 : vector<256x128xf32> to vector<256x128xbf16>
    %c7_56 = arith.constant 7 : index
    %c0_57 = arith.constant 0 : index
    %c0_58 = arith.constant 0 : index
    %67 = vector.load %arg3[%c7_56, %c0_57, %c0_58] : memref<9x128x128xbf16, #tpu.memory_space<vmem>>, vector<1x128x128xbf16>
    %68 = vector.shape_cast %67 : vector<1x128x128xbf16> to vector<128x128xbf16>
    %cst_59 = arith.constant dense<0.000000e+00> : vector<256x128xf32>
    %69 = tpu.matmul %66, %68, %cst_59 {dimension_numbers = #tpu.dot_dimension_numbers<[1], [0], [0], [1], [0, 0, 1, 1], [], []>} : vector<256x128xbf16>, vector<128x128xbf16>, vector<256x128xf32> -> vector<256x128xf32>
    %70 = arith.addf %62, %69 : vector<256x128xf32>
    %c8 = arith.constant 8 : index
    %c0_60 = arith.constant 0 : index
    %c0_61 = arith.constant 0 : index
    %71 = vector.load %arg2[%c8, %c0_60, %c0_61] : memref<9x256x256xbf16, #tpu.memory_space<vmem>>, vector<1x256x256xbf16>
    %72 = vector.shape_cast %71 : vector<1x256x256xbf16> to vector<256x256xbf16>
    %cst_62 = arith.constant dense<0.000000e+00> : vector<256x128xf32>
    %73 = tpu.matmul %72, %5, %cst_62 {dimension_numbers = #tpu.dot_dimension_numbers<[1], [0], [0], [1], [0, 0, 1, 1], [], []>} : vector<256x256xbf16>, vector<256x128xbf16>, vector<256x128xf32> -> vector<256x128xf32>
    %74 = arith.truncf %73 : vector<256x128xf32> to vector<256x128xbf16>
    %c8_63 = arith.constant 8 : index
    %c0_64 = arith.constant 0 : index
    %c0_65 = arith.constant 0 : index
    %75 = vector.load %arg3[%c8_63, %c0_64, %c0_65] : memref<9x128x128xbf16, #tpu.memory_space<vmem>>, vector<1x128x128xbf16>
    %76 = vector.shape_cast %75 : vector<1x128x128xbf16> to vector<128x128xbf16>
    %cst_66 = arith.constant dense<0.000000e+00> : vector<256x128xf32>
    %77 = tpu.matmul %74, %76, %cst_66 {dimension_numbers = #tpu.dot_dimension_numbers<[1], [0], [0], [1], [0, 0, 1, 1], [], []>} : vector<256x128xbf16>, vector<128x128xbf16>, vector<256x128xf32> -> vector<256x128xf32>
    %78 = arith.addf %70, %77 : vector<256x128xf32>
    %c0_67 = arith.constant 0 : index
    %c0_68 = arith.constant 0 : index
    %79 = vector.load %arg4[%c0_67, %c0_68] : memref<1x128xf32, #tpu.memory_space<vmem>>, vector<1x128xf32>
    %80 = vector.broadcast %79 : vector<1x128xf32> to vector<256x128xf32>
    %81 = arith.addf %78, %80 : vector<256x128xf32>
    %cst_69 = arith.constant 0.000000e+00 : f32
    %82 = vector.broadcast %cst_69 : f32 to vector<256x128xf32>
    %83 = arith.cmpf oge, %81, %82 : vector<256x128xf32>
    %cst_70 = arith.constant 2.000000e-01 : f32
    %84 = vector.broadcast %cst_70 : f32 to vector<256x128xf32>
    %85 = arith.mulf %84, %81 : vector<256x128xf32>
    %86 = arith.select %83, %81, %85 : vector<256x128xi1>, vector<256x128xf32>
    %87 = arith.truncf %86 : vector<256x128xf32> to vector<256x128xbf16>
    %cst_71 = arith.constant 0.000000e+00 : f32
    %88 = vector.broadcast %cst_71 : f32 to vector<64x128xf32>
    %c0_72 = arith.constant 0 : index
    %c0_73 = arith.constant 0 : index
    %c0_74 = arith.constant 0 : index
    %89 = vector.load %arg5[%c0_72, %c0_73, %c0_74] : memref<9x64x256xbf16, #tpu.memory_space<vmem>>, vector<1x64x256xbf16>
    %90 = vector.shape_cast %89 : vector<1x64x256xbf16> to vector<64x256xbf16>
    %cst_75 = arith.constant dense<0.000000e+00> : vector<64x128xf32>
    %91 = tpu.matmul %90, %87, %cst_75 {dimension_numbers = #tpu.dot_dimension_numbers<[1], [0], [0], [1], [0, 0, 1, 1], [], []>} : vector<64x256xbf16>, vector<256x128xbf16>, vector<64x128xf32> -> vector<64x128xf32>
    %92 = arith.truncf %91 : vector<64x128xf32> to vector<64x128xbf16>
    %c0_76 = arith.constant 0 : index
    %c0_77 = arith.constant 0 : index
    %c0_78 = arith.constant 0 : index
    %93 = vector.load %arg6[%c0_76, %c0_77, %c0_78] : memref<9x128x128xbf16, #tpu.memory_space<vmem>>, vector<1x128x128xbf16>
    %94 = vector.shape_cast %93 : vector<1x128x128xbf16> to vector<128x128xbf16>
    %cst_79 = arith.constant dense<0.000000e+00> : vector<64x128xf32>
    %95 = tpu.matmul %92, %94, %cst_79 {dimension_numbers = #tpu.dot_dimension_numbers<[1], [0], [0], [1], [0, 0, 1, 1], [], []>} : vector<64x128xbf16>, vector<128x128xbf16>, vector<64x128xf32> -> vector<64x128xf32>
    %96 = arith.addf %88, %95 : vector<64x128xf32>
    %c1_80 = arith.constant 1 : index
    %c0_81 = arith.constant 0 : index
    %c0_82 = arith.constant 0 : index
    %97 = vector.load %arg5[%c1_80, %c0_81, %c0_82] : memref<9x64x256xbf16, #tpu.memory_space<vmem>>, vector<1x64x256xbf16>
    %98 = vector.shape_cast %97 : vector<1x64x256xbf16> to vector<64x256xbf16>
    %cst_83 = arith.constant dense<0.000000e+00> : vector<64x128xf32>
    %99 = tpu.matmul %98, %87, %cst_83 {dimension_numbers = #tpu.dot_dimension_numbers<[1], [0], [0], [1], [0, 0, 1, 1], [], []>} : vector<64x256xbf16>, vector<256x128xbf16>, vector<64x128xf32> -> vector<64x128xf32>
    %100 = arith.truncf %99 : vector<64x128xf32> to vector<64x128xbf16>
    %c1_84 = arith.constant 1 : index
    %c0_85 = arith.constant 0 : index
    %c0_86 = arith.constant 0 : index
    %101 = vector.load %arg6[%c1_84, %c0_85, %c0_86] : memref<9x128x128xbf16, #tpu.memory_space<vmem>>, vector<1x128x128xbf16>
    %102 = vector.shape_cast %101 : vector<1x128x128xbf16> to vector<128x128xbf16>
    %cst_87 = arith.constant dense<0.000000e+00> : vector<64x128xf32>
    %103 = tpu.matmul %100, %102, %cst_87 {dimension_numbers = #tpu.dot_dimension_numbers<[1], [0], [0], [1], [0, 0, 1, 1], [], []>} : vector<64x128xbf16>, vector<128x128xbf16>, vector<64x128xf32> -> vector<64x128xf32>
    %104 = arith.addf %96, %103 : vector<64x128xf32>
    %c2_88 = arith.constant 2 : index
    %c0_89 = arith.constant 0 : index
    %c0_90 = arith.constant 0 : index
    %105 = vector.load %arg5[%c2_88, %c0_89, %c0_90] : memref<9x64x256xbf16, #tpu.memory_space<vmem>>, vector<1x64x256xbf16>
    %106 = vector.shape_cast %105 : vector<1x64x256xbf16> to vector<64x256xbf16>
    %cst_91 = arith.constant dense<0.000000e+00> : vector<64x128xf32>
    %107 = tpu.matmul %106, %87, %cst_91 {dimension_numbers = #tpu.dot_dimension_numbers<[1], [0], [0], [1], [0, 0, 1, 1], [], []>} : vector<64x256xbf16>, vector<256x128xbf16>, vector<64x128xf32> -> vector<64x128xf32>
    %108 = arith.truncf %107 : vector<64x128xf32> to vector<64x128xbf16>
    %c2_92 = arith.constant 2 : index
    %c0_93 = arith.constant 0 : index
    %c0_94 = arith.constant 0 : index
    %109 = vector.load %arg6[%c2_92, %c0_93, %c0_94] : memref<9x128x128xbf16, #tpu.memory_space<vmem>>, vector<1x128x128xbf16>
    %110 = vector.shape_cast %109 : vector<1x128x128xbf16> to vector<128x128xbf16>
    %cst_95 = arith.constant dense<0.000000e+00> : vector<64x128xf32>
    %111 = tpu.matmul %108, %110, %cst_95 {dimension_numbers = #tpu.dot_dimension_numbers<[1], [0], [0], [1], [0, 0, 1, 1], [], []>} : vector<64x128xbf16>, vector<128x128xbf16>, vector<64x128xf32> -> vector<64x128xf32>
    %112 = arith.addf %104, %111 : vector<64x128xf32>
    %c3_96 = arith.constant 3 : index
    %c0_97 = arith.constant 0 : index
    %c0_98 = arith.constant 0 : index
    %113 = vector.load %arg5[%c3_96, %c0_97, %c0_98] : memref<9x64x256xbf16, #tpu.memory_space<vmem>>, vector<1x64x256xbf16>
    %114 = vector.shape_cast %113 : vector<1x64x256xbf16> to vector<64x256xbf16>
    %cst_99 = arith.constant dense<0.000000e+00> : vector<64x128xf32>
    %115 = tpu.matmul %114, %87, %cst_99 {dimension_numbers = #tpu.dot_dimension_numbers<[1], [0], [0], [1], [0, 0, 1, 1], [], []>} : vector<64x256xbf16>, vector<256x128xbf16>, vector<64x128xf32> -> vector<64x128xf32>
    %116 = arith.truncf %115 : vector<64x128xf32> to vector<64x128xbf16>
    %c3_100 = arith.constant 3 : index
    %c0_101 = arith.constant 0 : index
    %c0_102 = arith.constant 0 : index
    %117 = vector.load %arg6[%c3_100, %c0_101, %c0_102] : memref<9x128x128xbf16, #tpu.memory_space<vmem>>, vector<1x128x128xbf16>
    %118 = vector.shape_cast %117 : vector<1x128x128xbf16> to vector<128x128xbf16>
    %cst_103 = arith.constant dense<0.000000e+00> : vector<64x128xf32>
    %119 = tpu.matmul %116, %118, %cst_103 {dimension_numbers = #tpu.dot_dimension_numbers<[1], [0], [0], [1], [0, 0, 1, 1], [], []>} : vector<64x128xbf16>, vector<128x128xbf16>, vector<64x128xf32> -> vector<64x128xf32>
    %120 = arith.addf %112, %119 : vector<64x128xf32>
    %c4_104 = arith.constant 4 : index
    %c0_105 = arith.constant 0 : index
    %c0_106 = arith.constant 0 : index
    %121 = vector.load %arg5[%c4_104, %c0_105, %c0_106] : memref<9x64x256xbf16, #tpu.memory_space<vmem>>, vector<1x64x256xbf16>
    %122 = vector.shape_cast %121 : vector<1x64x256xbf16> to vector<64x256xbf16>
    %cst_107 = arith.constant dense<0.000000e+00> : vector<64x128xf32>
    %123 = tpu.matmul %122, %87, %cst_107 {dimension_numbers = #tpu.dot_dimension_numbers<[1], [0], [0], [1], [0, 0, 1, 1], [], []>} : vector<64x256xbf16>, vector<256x128xbf16>, vector<64x128xf32> -> vector<64x128xf32>
    %124 = arith.truncf %123 : vector<64x128xf32> to vector<64x128xbf16>
    %c4_108 = arith.constant 4 : index
    %c0_109 = arith.constant 0 : index
    %c0_110 = arith.constant 0 : index
    %125 = vector.load %arg6[%c4_108, %c0_109, %c0_110] : memref<9x128x128xbf16, #tpu.memory_space<vmem>>, vector<1x128x128xbf16>
    %126 = vector.shape_cast %125 : vector<1x128x128xbf16> to vector<128x128xbf16>
    %cst_111 = arith.constant dense<0.000000e+00> : vector<64x128xf32>
    %127 = tpu.matmul %124, %126, %cst_111 {dimension_numbers = #tpu.dot_dimension_numbers<[1], [0], [0], [1], [0, 0, 1, 1], [], []>} : vector<64x128xbf16>, vector<128x128xbf16>, vector<64x128xf32> -> vector<64x128xf32>
    %128 = arith.addf %120, %127 : vector<64x128xf32>
    %c5_112 = arith.constant 5 : index
    %c0_113 = arith.constant 0 : index
    %c0_114 = arith.constant 0 : index
    %129 = vector.load %arg5[%c5_112, %c0_113, %c0_114] : memref<9x64x256xbf16, #tpu.memory_space<vmem>>, vector<1x64x256xbf16>
    %130 = vector.shape_cast %129 : vector<1x64x256xbf16> to vector<64x256xbf16>
    %cst_115 = arith.constant dense<0.000000e+00> : vector<64x128xf32>
    %131 = tpu.matmul %130, %87, %cst_115 {dimension_numbers = #tpu.dot_dimension_numbers<[1], [0], [0], [1], [0, 0, 1, 1], [], []>} : vector<64x256xbf16>, vector<256x128xbf16>, vector<64x128xf32> -> vector<64x128xf32>
    %132 = arith.truncf %131 : vector<64x128xf32> to vector<64x128xbf16>
    %c5_116 = arith.constant 5 : index
    %c0_117 = arith.constant 0 : index
    %c0_118 = arith.constant 0 : index
    %133 = vector.load %arg6[%c5_116, %c0_117, %c0_118] : memref<9x128x128xbf16, #tpu.memory_space<vmem>>, vector<1x128x128xbf16>
    %134 = vector.shape_cast %133 : vector<1x128x128xbf16> to vector<128x128xbf16>
    %cst_119 = arith.constant dense<0.000000e+00> : vector<64x128xf32>
    %135 = tpu.matmul %132, %134, %cst_119 {dimension_numbers = #tpu.dot_dimension_numbers<[1], [0], [0], [1], [0, 0, 1, 1], [], []>} : vector<64x128xbf16>, vector<128x128xbf16>, vector<64x128xf32> -> vector<64x128xf32>
    %136 = arith.addf %128, %135 : vector<64x128xf32>
    %c6_120 = arith.constant 6 : index
    %c0_121 = arith.constant 0 : index
    %c0_122 = arith.constant 0 : index
    %137 = vector.load %arg5[%c6_120, %c0_121, %c0_122] : memref<9x64x256xbf16, #tpu.memory_space<vmem>>, vector<1x64x256xbf16>
    %138 = vector.shape_cast %137 : vector<1x64x256xbf16> to vector<64x256xbf16>
    %cst_123 = arith.constant dense<0.000000e+00> : vector<64x128xf32>
    %139 = tpu.matmul %138, %87, %cst_123 {dimension_numbers = #tpu.dot_dimension_numbers<[1], [0], [0], [1], [0, 0, 1, 1], [], []>} : vector<64x256xbf16>, vector<256x128xbf16>, vector<64x128xf32> -> vector<64x128xf32>
    %140 = arith.truncf %139 : vector<64x128xf32> to vector<64x128xbf16>
    %c6_124 = arith.constant 6 : index
    %c0_125 = arith.constant 0 : index
    %c0_126 = arith.constant 0 : index
    %141 = vector.load %arg6[%c6_124, %c0_125, %c0_126] : memref<9x128x128xbf16, #tpu.memory_space<vmem>>, vector<1x128x128xbf16>
    %142 = vector.shape_cast %141 : vector<1x128x128xbf16> to vector<128x128xbf16>
    %cst_127 = arith.constant dense<0.000000e+00> : vector<64x128xf32>
    %143 = tpu.matmul %140, %142, %cst_127 {dimension_numbers = #tpu.dot_dimension_numbers<[1], [0], [0], [1], [0, 0, 1, 1], [], []>} : vector<64x128xbf16>, vector<128x128xbf16>, vector<64x128xf32> -> vector<64x128xf32>
    %144 = arith.addf %136, %143 : vector<64x128xf32>
    %c7_128 = arith.constant 7 : index
    %c0_129 = arith.constant 0 : index
    %c0_130 = arith.constant 0 : index
    %145 = vector.load %arg5[%c7_128, %c0_129, %c0_130] : memref<9x64x256xbf16, #tpu.memory_space<vmem>>, vector<1x64x256xbf16>
    %146 = vector.shape_cast %145 : vector<1x64x256xbf16> to vector<64x256xbf16>
    %cst_131 = arith.constant dense<0.000000e+00> : vector<64x128xf32>
    %147 = tpu.matmul %146, %87, %cst_131 {dimension_numbers = #tpu.dot_dimension_numbers<[1], [0], [0], [1], [0, 0, 1, 1], [], []>} : vector<64x256xbf16>, vector<256x128xbf16>, vector<64x128xf32> -> vector<64x128xf32>
    %148 = arith.truncf %147 : vector<64x128xf32> to vector<64x128xbf16>
    %c7_132 = arith.constant 7 : index
    %c0_133 = arith.constant 0 : index
    %c0_134 = arith.constant 0 : index
    %149 = vector.load %arg6[%c7_132, %c0_133, %c0_134] : memref<9x128x128xbf16, #tpu.memory_space<vmem>>, vector<1x128x128xbf16>
    %150 = vector.shape_cast %149 : vector<1x128x128xbf16> to vector<128x128xbf16>
    %cst_135 = arith.constant dense<0.000000e+00> : vector<64x128xf32>
    %151 = tpu.matmul %148, %150, %cst_135 {dimension_numbers = #tpu.dot_dimension_numbers<[1], [0], [0], [1], [0, 0, 1, 1], [], []>} : vector<64x128xbf16>, vector<128x128xbf16>, vector<64x128xf32> -> vector<64x128xf32>
    %152 = arith.addf %144, %151 : vector<64x128xf32>
    %c8_136 = arith.constant 8 : index
    %c0_137 = arith.constant 0 : index
    %c0_138 = arith.constant 0 : index
    %153 = vector.load %arg5[%c8_136, %c0_137, %c0_138] : memref<9x64x256xbf16, #tpu.memory_space<vmem>>, vector<1x64x256xbf16>
    %154 = vector.shape_cast %153 : vector<1x64x256xbf16> to vector<64x256xbf16>
    %cst_139 = arith.constant dense<0.000000e+00> : vector<64x128xf32>
    %155 = tpu.matmul %154, %87, %cst_139 {dimension_numbers = #tpu.dot_dimension_numbers<[1], [0], [0], [1], [0, 0, 1, 1], [], []>} : vector<64x256xbf16>, vector<256x128xbf16>, vector<64x128xf32> -> vector<64x128xf32>
    %156 = arith.truncf %155 : vector<64x128xf32> to vector<64x128xbf16>
    %c8_140 = arith.constant 8 : index
    %c0_141 = arith.constant 0 : index
    %c0_142 = arith.constant 0 : index
    %157 = vector.load %arg6[%c8_140, %c0_141, %c0_142] : memref<9x128x128xbf16, #tpu.memory_space<vmem>>, vector<1x128x128xbf16>
    %158 = vector.shape_cast %157 : vector<1x128x128xbf16> to vector<128x128xbf16>
    %cst_143 = arith.constant dense<0.000000e+00> : vector<64x128xf32>
    %159 = tpu.matmul %156, %158, %cst_143 {dimension_numbers = #tpu.dot_dimension_numbers<[1], [0], [0], [1], [0, 0, 1, 1], [], []>} : vector<64x128xbf16>, vector<128x128xbf16>, vector<64x128xf32> -> vector<64x128xf32>
    %160 = arith.addf %152, %159 : vector<64x128xf32>
    %c0_144 = arith.constant 0 : index
    %c0_145 = arith.constant 0 : index
    %161 = vector.load %arg7[%c0_144, %c0_145] : memref<1x128xf32, #tpu.memory_space<vmem>>, vector<1x128xf32>
    %162 = vector.broadcast %161 : vector<1x128xf32> to vector<64x128xf32>
    %163 = arith.addf %160, %162 : vector<64x128xf32>
    %cst_146 = arith.constant 0.000000e+00 : f32
    %164 = vector.broadcast %cst_146 : f32 to vector<64x128xf32>
    %165 = arith.cmpf oge, %163, %164 : vector<64x128xf32>
    %cst_147 = arith.constant 2.000000e-01 : f32
    %166 = vector.broadcast %cst_147 : f32 to vector<64x128xf32>
    %167 = arith.mulf %166, %163 : vector<64x128xf32>
    %168 = arith.select %165, %163, %167 : vector<64x128xi1>, vector<64x128xf32>
    %169 = arith.truncf %168 : vector<64x128xf32> to vector<64x128xbf16>
    %cst_148 = arith.constant 0.000000e+00 : f32
    %170 = vector.broadcast %cst_148 : f32 to vector<16x128xf32>
    %c0_149 = arith.constant 0 : index
    %c0_150 = arith.constant 0 : index
    %c0_151 = arith.constant 0 : index
    %171 = vector.load %arg8[%c0_149, %c0_150, %c0_151] : memref<9x16x64xbf16, #tpu.memory_space<vmem>>, vector<1x16x64xbf16>
    %172 = vector.shape_cast %171 : vector<1x16x64xbf16> to vector<16x64xbf16>
    %cst_152 = arith.constant dense<0.000000e+00> : vector<16x128xf32>
    %173 = tpu.matmul %172, %169, %cst_152 {dimension_numbers = #tpu.dot_dimension_numbers<[1], [0], [0], [1], [0, 0, 1, 1], [], []>} : vector<16x64xbf16>, vector<64x128xbf16>, vector<16x128xf32> -> vector<16x128xf32>
    %174 = arith.truncf %173 : vector<16x128xf32> to vector<16x128xbf16>
    %c0_153 = arith.constant 0 : index
    %c0_154 = arith.constant 0 : index
    %c0_155 = arith.constant 0 : index
    %175 = vector.load %arg9[%c0_153, %c0_154, %c0_155] : memref<9x128x128xbf16, #tpu.memory_space<vmem>>, vector<1x128x128xbf16>
    %176 = vector.shape_cast %175 : vector<1x128x128xbf16> to vector<128x128xbf16>
    %cst_156 = arith.constant dense<0.000000e+00> : vector<16x128xf32>
    %177 = tpu.matmul %174, %176, %cst_156 {dimension_numbers = #tpu.dot_dimension_numbers<[1], [0], [0], [1], [0, 0, 1, 1], [], []>} : vector<16x128xbf16>, vector<128x128xbf16>, vector<16x128xf32> -> vector<16x128xf32>
    %178 = arith.addf %170, %177 : vector<16x128xf32>
    %c1_157 = arith.constant 1 : index
    %c0_158 = arith.constant 0 : index
    %c0_159 = arith.constant 0 : index
    %179 = vector.load %arg8[%c1_157, %c0_158, %c0_159] : memref<9x16x64xbf16, #tpu.memory_space<vmem>>, vector<1x16x64xbf16>
    %180 = vector.shape_cast %179 : vector<1x16x64xbf16> to vector<16x64xbf16>
    %cst_160 = arith.constant dense<0.000000e+00> : vector<16x128xf32>
    %181 = tpu.matmul %180, %169, %cst_160 {dimension_numbers = #tpu.dot_dimension_numbers<[1], [0], [0], [1], [0, 0, 1, 1], [], []>} : vector<16x64xbf16>, vector<64x128xbf16>, vector<16x128xf32> -> vector<16x128xf32>
    %182 = arith.truncf %181 : vector<16x128xf32> to vector<16x128xbf16>
    %c1_161 = arith.constant 1 : index
    %c0_162 = arith.constant 0 : index
    %c0_163 = arith.constant 0 : index
    %183 = vector.load %arg9[%c1_161, %c0_162, %c0_163] : memref<9x128x128xbf16, #tpu.memory_space<vmem>>, vector<1x128x128xbf16>
    %184 = vector.shape_cast %183 : vector<1x128x128xbf16> to vector<128x128xbf16>
    %cst_164 = arith.constant dense<0.000000e+00> : vector<16x128xf32>
    %185 = tpu.matmul %182, %184, %cst_164 {dimension_numbers = #tpu.dot_dimension_numbers<[1], [0], [0], [1], [0, 0, 1, 1], [], []>} : vector<16x128xbf16>, vector<128x128xbf16>, vector<16x128xf32> -> vector<16x128xf32>
    %186 = arith.addf %178, %185 : vector<16x128xf32>
    %c2_165 = arith.constant 2 : index
    %c0_166 = arith.constant 0 : index
    %c0_167 = arith.constant 0 : index
    %187 = vector.load %arg8[%c2_165, %c0_166, %c0_167] : memref<9x16x64xbf16, #tpu.memory_space<vmem>>, vector<1x16x64xbf16>
    %188 = vector.shape_cast %187 : vector<1x16x64xbf16> to vector<16x64xbf16>
    %cst_168 = arith.constant dense<0.000000e+00> : vector<16x128xf32>
    %189 = tpu.matmul %188, %169, %cst_168 {dimension_numbers = #tpu.dot_dimension_numbers<[1], [0], [0], [1], [0, 0, 1, 1], [], []>} : vector<16x64xbf16>, vector<64x128xbf16>, vector<16x128xf32> -> vector<16x128xf32>
    %190 = arith.truncf %189 : vector<16x128xf32> to vector<16x128xbf16>
    %c2_169 = arith.constant 2 : index
    %c0_170 = arith.constant 0 : index
    %c0_171 = arith.constant 0 : index
    %191 = vector.load %arg9[%c2_169, %c0_170, %c0_171] : memref<9x128x128xbf16, #tpu.memory_space<vmem>>, vector<1x128x128xbf16>
    %192 = vector.shape_cast %191 : vector<1x128x128xbf16> to vector<128x128xbf16>
    %cst_172 = arith.constant dense<0.000000e+00> : vector<16x128xf32>
    %193 = tpu.matmul %190, %192, %cst_172 {dimension_numbers = #tpu.dot_dimension_numbers<[1], [0], [0], [1], [0, 0, 1, 1], [], []>} : vector<16x128xbf16>, vector<128x128xbf16>, vector<16x128xf32> -> vector<16x128xf32>
    %194 = arith.addf %186, %193 : vector<16x128xf32>
    %c3_173 = arith.constant 3 : index
    %c0_174 = arith.constant 0 : index
    %c0_175 = arith.constant 0 : index
    %195 = vector.load %arg8[%c3_173, %c0_174, %c0_175] : memref<9x16x64xbf16, #tpu.memory_space<vmem>>, vector<1x16x64xbf16>
    %196 = vector.shape_cast %195 : vector<1x16x64xbf16> to vector<16x64xbf16>
    %cst_176 = arith.constant dense<0.000000e+00> : vector<16x128xf32>
    %197 = tpu.matmul %196, %169, %cst_176 {dimension_numbers = #tpu.dot_dimension_numbers<[1], [0], [0], [1], [0, 0, 1, 1], [], []>} : vector<16x64xbf16>, vector<64x128xbf16>, vector<16x128xf32> -> vector<16x128xf32>
    %198 = arith.truncf %197 : vector<16x128xf32> to vector<16x128xbf16>
    %c3_177 = arith.constant 3 : index
    %c0_178 = arith.constant 0 : index
    %c0_179 = arith.constant 0 : index
    %199 = vector.load %arg9[%c3_177, %c0_178, %c0_179] : memref<9x128x128xbf16, #tpu.memory_space<vmem>>, vector<1x128x128xbf16>
    %200 = vector.shape_cast %199 : vector<1x128x128xbf16> to vector<128x128xbf16>
    %cst_180 = arith.constant dense<0.000000e+00> : vector<16x128xf32>
    %201 = tpu.matmul %198, %200, %cst_180 {dimension_numbers = #tpu.dot_dimension_numbers<[1], [0], [0], [1], [0, 0, 1, 1], [], []>} : vector<16x128xbf16>, vector<128x128xbf16>, vector<16x128xf32> -> vector<16x128xf32>
    %202 = arith.addf %194, %201 : vector<16x128xf32>
    %c4_181 = arith.constant 4 : index
    %c0_182 = arith.constant 0 : index
    %c0_183 = arith.constant 0 : index
    %203 = vector.load %arg8[%c4_181, %c0_182, %c0_183] : memref<9x16x64xbf16, #tpu.memory_space<vmem>>, vector<1x16x64xbf16>
    %204 = vector.shape_cast %203 : vector<1x16x64xbf16> to vector<16x64xbf16>
    %cst_184 = arith.constant dense<0.000000e+00> : vector<16x128xf32>
    %205 = tpu.matmul %204, %169, %cst_184 {dimension_numbers = #tpu.dot_dimension_numbers<[1], [0], [0], [1], [0, 0, 1, 1], [], []>} : vector<16x64xbf16>, vector<64x128xbf16>, vector<16x128xf32> -> vector<16x128xf32>
    %206 = arith.truncf %205 : vector<16x128xf32> to vector<16x128xbf16>
    %c4_185 = arith.constant 4 : index
    %c0_186 = arith.constant 0 : index
    %c0_187 = arith.constant 0 : index
    %207 = vector.load %arg9[%c4_185, %c0_186, %c0_187] : memref<9x128x128xbf16, #tpu.memory_space<vmem>>, vector<1x128x128xbf16>
    %208 = vector.shape_cast %207 : vector<1x128x128xbf16> to vector<128x128xbf16>
    %cst_188 = arith.constant dense<0.000000e+00> : vector<16x128xf32>
    %209 = tpu.matmul %206, %208, %cst_188 {dimension_numbers = #tpu.dot_dimension_numbers<[1], [0], [0], [1], [0, 0, 1, 1], [], []>} : vector<16x128xbf16>, vector<128x128xbf16>, vector<16x128xf32> -> vector<16x128xf32>
    %210 = arith.addf %202, %209 : vector<16x128xf32>
    %c5_189 = arith.constant 5 : index
    %c0_190 = arith.constant 0 : index
    %c0_191 = arith.constant 0 : index
    %211 = vector.load %arg8[%c5_189, %c0_190, %c0_191] : memref<9x16x64xbf16, #tpu.memory_space<vmem>>, vector<1x16x64xbf16>
    %212 = vector.shape_cast %211 : vector<1x16x64xbf16> to vector<16x64xbf16>
    %cst_192 = arith.constant dense<0.000000e+00> : vector<16x128xf32>
    %213 = tpu.matmul %212, %169, %cst_192 {dimension_numbers = #tpu.dot_dimension_numbers<[1], [0], [0], [1], [0, 0, 1, 1], [], []>} : vector<16x64xbf16>, vector<64x128xbf16>, vector<16x128xf32> -> vector<16x128xf32>
    %214 = arith.truncf %213 : vector<16x128xf32> to vector<16x128xbf16>
    %c5_193 = arith.constant 5 : index
    %c0_194 = arith.constant 0 : index
    %c0_195 = arith.constant 0 : index
    %215 = vector.load %arg9[%c5_193, %c0_194, %c0_195] : memref<9x128x128xbf16, #tpu.memory_space<vmem>>, vector<1x128x128xbf16>
    %216 = vector.shape_cast %215 : vector<1x128x128xbf16> to vector<128x128xbf16>
    %cst_196 = arith.constant dense<0.000000e+00> : vector<16x128xf32>
    %217 = tpu.matmul %214, %216, %cst_196 {dimension_numbers = #tpu.dot_dimension_numbers<[1], [0], [0], [1], [0, 0, 1, 1], [], []>} : vector<16x128xbf16>, vector<128x128xbf16>, vector<16x128xf32> -> vector<16x128xf32>
    %218 = arith.addf %210, %217 : vector<16x128xf32>
    %c6_197 = arith.constant 6 : index
    %c0_198 = arith.constant 0 : index
    %c0_199 = arith.constant 0 : index
    %219 = vector.load %arg8[%c6_197, %c0_198, %c0_199] : memref<9x16x64xbf16, #tpu.memory_space<vmem>>, vector<1x16x64xbf16>
    %220 = vector.shape_cast %219 : vector<1x16x64xbf16> to vector<16x64xbf16>
    %cst_200 = arith.constant dense<0.000000e+00> : vector<16x128xf32>
    %221 = tpu.matmul %220, %169, %cst_200 {dimension_numbers = #tpu.dot_dimension_numbers<[1], [0], [0], [1], [0, 0, 1, 1], [], []>} : vector<16x64xbf16>, vector<64x128xbf16>, vector<16x128xf32> -> vector<16x128xf32>
    %222 = arith.truncf %221 : vector<16x128xf32> to vector<16x128xbf16>
    %c6_201 = arith.constant 6 : index
    %c0_202 = arith.constant 0 : index
    %c0_203 = arith.constant 0 : index
    %223 = vector.load %arg9[%c6_201, %c0_202, %c0_203] : memref<9x128x128xbf16, #tpu.memory_space<vmem>>, vector<1x128x128xbf16>
    %224 = vector.shape_cast %223 : vector<1x128x128xbf16> to vector<128x128xbf16>
    %cst_204 = arith.constant dense<0.000000e+00> : vector<16x128xf32>
    %225 = tpu.matmul %222, %224, %cst_204 {dimension_numbers = #tpu.dot_dimension_numbers<[1], [0], [0], [1], [0, 0, 1, 1], [], []>} : vector<16x128xbf16>, vector<128x128xbf16>, vector<16x128xf32> -> vector<16x128xf32>
    %226 = arith.addf %218, %225 : vector<16x128xf32>
    %c7_205 = arith.constant 7 : index
    %c0_206 = arith.constant 0 : index
    %c0_207 = arith.constant 0 : index
    %227 = vector.load %arg8[%c7_205, %c0_206, %c0_207] : memref<9x16x64xbf16, #tpu.memory_space<vmem>>, vector<1x16x64xbf16>
    %228 = vector.shape_cast %227 : vector<1x16x64xbf16> to vector<16x64xbf16>
    %cst_208 = arith.constant dense<0.000000e+00> : vector<16x128xf32>
    %229 = tpu.matmul %228, %169, %cst_208 {dimension_numbers = #tpu.dot_dimension_numbers<[1], [0], [0], [1], [0, 0, 1, 1], [], []>} : vector<16x64xbf16>, vector<64x128xbf16>, vector<16x128xf32> -> vector<16x128xf32>
    %230 = arith.truncf %229 : vector<16x128xf32> to vector<16x128xbf16>
    %c7_209 = arith.constant 7 : index
    %c0_210 = arith.constant 0 : index
    %c0_211 = arith.constant 0 : index
    %231 = vector.load %arg9[%c7_209, %c0_210, %c0_211] : memref<9x128x128xbf16, #tpu.memory_space<vmem>>, vector<1x128x128xbf16>
    %232 = vector.shape_cast %231 : vector<1x128x128xbf16> to vector<128x128xbf16>
    %cst_212 = arith.constant dense<0.000000e+00> : vector<16x128xf32>
    %233 = tpu.matmul %230, %232, %cst_212 {dimension_numbers = #tpu.dot_dimension_numbers<[1], [0], [0], [1], [0, 0, 1, 1], [], []>} : vector<16x128xbf16>, vector<128x128xbf16>, vector<16x128xf32> -> vector<16x128xf32>
    %234 = arith.addf %226, %233 : vector<16x128xf32>
    %c8_213 = arith.constant 8 : index
    %c0_214 = arith.constant 0 : index
    %c0_215 = arith.constant 0 : index
    %235 = vector.load %arg8[%c8_213, %c0_214, %c0_215] : memref<9x16x64xbf16, #tpu.memory_space<vmem>>, vector<1x16x64xbf16>
    %236 = vector.shape_cast %235 : vector<1x16x64xbf16> to vector<16x64xbf16>
    %cst_216 = arith.constant dense<0.000000e+00> : vector<16x128xf32>
    %237 = tpu.matmul %236, %169, %cst_216 {dimension_numbers = #tpu.dot_dimension_numbers<[1], [0], [0], [1], [0, 0, 1, 1], [], []>} : vector<16x64xbf16>, vector<64x128xbf16>, vector<16x128xf32> -> vector<16x128xf32>
    %238 = arith.truncf %237 : vector<16x128xf32> to vector<16x128xbf16>
    %c8_217 = arith.constant 8 : index
    %c0_218 = arith.constant 0 : index
    %c0_219 = arith.constant 0 : index
    %239 = vector.load %arg9[%c8_217, %c0_218, %c0_219] : memref<9x128x128xbf16, #tpu.memory_space<vmem>>, vector<1x128x128xbf16>
    %240 = vector.shape_cast %239 : vector<1x128x128xbf16> to vector<128x128xbf16>
    %cst_220 = arith.constant dense<0.000000e+00> : vector<16x128xf32>
    %241 = tpu.matmul %238, %240, %cst_220 {dimension_numbers = #tpu.dot_dimension_numbers<[1], [0], [0], [1], [0, 0, 1, 1], [], []>} : vector<16x128xbf16>, vector<128x128xbf16>, vector<16x128xf32> -> vector<16x128xf32>
    %242 = arith.addf %234, %241 : vector<16x128xf32>
    %c0_221 = arith.constant 0 : index
    %c0_222 = arith.constant 0 : index
    %243 = vector.load %arg10[%c0_221, %c0_222] : memref<1x128xf32, #tpu.memory_space<vmem>>, vector<1x128xf32>
    %244 = vector.broadcast %243 : vector<1x128xf32> to vector<16x128xf32>
    %245 = arith.addf %242, %244 : vector<16x128xf32>
    %cst_223 = arith.constant 0.000000e+00 : f32
    %246 = vector.broadcast %cst_223 : f32 to vector<16x128xf32>
    %247 = arith.cmpf oge, %245, %246 : vector<16x128xf32>
    %cst_224 = arith.constant 2.000000e-01 : f32
    %248 = vector.broadcast %cst_224 : f32 to vector<16x128xf32>
    %249 = arith.mulf %248, %245 : vector<16x128xf32>
    %250 = arith.select %247, %245, %249 : vector<16x128xi1>, vector<16x128xf32>
    %251 = arith.truncf %250 : vector<16x128xf32> to vector<16x128xbf16>
    %cst_225 = arith.constant 0.000000e+00 : f32
    %252 = vector.broadcast %cst_225 : f32 to vector<16x128xf32>
    %c0_226 = arith.constant 0 : index
    %c0_227 = arith.constant 0 : index
    %c0_228 = arith.constant 0 : index
    %253 = vector.load %arg11[%c0_226, %c0_227, %c0_228] : memref<9x16x16xbf16, #tpu.memory_space<vmem>>, vector<1x16x16xbf16>
    %254 = vector.shape_cast %253 : vector<1x16x16xbf16> to vector<16x16xbf16>
    %cst_229 = arith.constant dense<0.000000e+00> : vector<16x128xf32>
    %255 = tpu.matmul %254, %251, %cst_229 {dimension_numbers = #tpu.dot_dimension_numbers<[1], [0], [0], [1], [0, 0, 1, 1], [], []>} : vector<16x16xbf16>, vector<16x128xbf16>, vector<16x128xf32> -> vector<16x128xf32>
    %256 = arith.truncf %255 : vector<16x128xf32> to vector<16x128xbf16>
    %c0_230 = arith.constant 0 : index
    %c0_231 = arith.constant 0 : index
    %c0_232 = arith.constant 0 : index
    %257 = vector.load %arg12[%c0_230, %c0_231, %c0_232] : memref<9x128x128xbf16, #tpu.memory_space<vmem>>, vector<1x128x128xbf16>
    %258 = vector.shape_cast %257 : vector<1x128x128xbf16> to vector<128x128xbf16>
    %cst_233 = arith.constant dense<0.000000e+00> : vector<16x128xf32>
    %259 = tpu.matmul %256, %258, %cst_233 {dimension_numbers = #tpu.dot_dimension_numbers<[1], [0], [0], [1], [0, 0, 1, 1], [], []>} : vector<16x128xbf16>, vector<128x128xbf16>, vector<16x128xf32> -> vector<16x128xf32>
    %260 = arith.addf %252, %259 : vector<16x128xf32>
    %c1_234 = arith.constant 1 : index
    %c0_235 = arith.constant 0 : index
    %c0_236 = arith.constant 0 : index
    %261 = vector.load %arg11[%c1_234, %c0_235, %c0_236] : memref<9x16x16xbf16, #tpu.memory_space<vmem>>, vector<1x16x16xbf16>
    %262 = vector.shape_cast %261 : vector<1x16x16xbf16> to vector<16x16xbf16>
    %cst_237 = arith.constant dense<0.000000e+00> : vector<16x128xf32>
    %263 = tpu.matmul %262, %251, %cst_237 {dimension_numbers = #tpu.dot_dimension_numbers<[1], [0], [0], [1], [0, 0, 1, 1], [], []>} : vector<16x16xbf16>, vector<16x128xbf16>, vector<16x128xf32> -> vector<16x128xf32>
    %264 = arith.truncf %263 : vector<16x128xf32> to vector<16x128xbf16>
    %c1_238 = arith.constant 1 : index
    %c0_239 = arith.constant 0 : index
    %c0_240 = arith.constant 0 : index
    %265 = vector.load %arg12[%c1_238, %c0_239, %c0_240] : memref<9x128x128xbf16, #tpu.memory_space<vmem>>, vector<1x128x128xbf16>
    %266 = vector.shape_cast %265 : vector<1x128x128xbf16> to vector<128x128xbf16>
    %cst_241 = arith.constant dense<0.000000e+00> : vector<16x128xf32>
    %267 = tpu.matmul %264, %266, %cst_241 {dimension_numbers = #tpu.dot_dimension_numbers<[1], [0], [0], [1], [0, 0, 1, 1], [], []>} : vector<16x128xbf16>, vector<128x128xbf16>, vector<16x128xf32> -> vector<16x128xf32>
    %268 = arith.addf %260, %267 : vector<16x128xf32>
    %c2_242 = arith.constant 2 : index
    %c0_243 = arith.constant 0 : index
    %c0_244 = arith.constant 0 : index
    %269 = vector.load %arg11[%c2_242, %c0_243, %c0_244] : memref<9x16x16xbf16, #tpu.memory_space<vmem>>, vector<1x16x16xbf16>
    %270 = vector.shape_cast %269 : vector<1x16x16xbf16> to vector<16x16xbf16>
    %cst_245 = arith.constant dense<0.000000e+00> : vector<16x128xf32>
    %271 = tpu.matmul %270, %251, %cst_245 {dimension_numbers = #tpu.dot_dimension_numbers<[1], [0], [0], [1], [0, 0, 1, 1], [], []>} : vector<16x16xbf16>, vector<16x128xbf16>, vector<16x128xf32> -> vector<16x128xf32>
    %272 = arith.truncf %271 : vector<16x128xf32> to vector<16x128xbf16>
    %c2_246 = arith.constant 2 : index
    %c0_247 = arith.constant 0 : index
    %c0_248 = arith.constant 0 : index
    %273 = vector.load %arg12[%c2_246, %c0_247, %c0_248] : memref<9x128x128xbf16, #tpu.memory_space<vmem>>, vector<1x128x128xbf16>
    %274 = vector.shape_cast %273 : vector<1x128x128xbf16> to vector<128x128xbf16>
    %cst_249 = arith.constant dense<0.000000e+00> : vector<16x128xf32>
    %275 = tpu.matmul %272, %274, %cst_249 {dimension_numbers = #tpu.dot_dimension_numbers<[1], [0], [0], [1], [0, 0, 1, 1], [], []>} : vector<16x128xbf16>, vector<128x128xbf16>, vector<16x128xf32> -> vector<16x128xf32>
    %276 = arith.addf %268, %275 : vector<16x128xf32>
    %c3_250 = arith.constant 3 : index
    %c0_251 = arith.constant 0 : index
    %c0_252 = arith.constant 0 : index
    %277 = vector.load %arg11[%c3_250, %c0_251, %c0_252] : memref<9x16x16xbf16, #tpu.memory_space<vmem>>, vector<1x16x16xbf16>
    %278 = vector.shape_cast %277 : vector<1x16x16xbf16> to vector<16x16xbf16>
    %cst_253 = arith.constant dense<0.000000e+00> : vector<16x128xf32>
    %279 = tpu.matmul %278, %251, %cst_253 {dimension_numbers = #tpu.dot_dimension_numbers<[1], [0], [0], [1], [0, 0, 1, 1], [], []>} : vector<16x16xbf16>, vector<16x128xbf16>, vector<16x128xf32> -> vector<16x128xf32>
    %280 = arith.truncf %279 : vector<16x128xf32> to vector<16x128xbf16>
    %c3_254 = arith.constant 3 : index
    %c0_255 = arith.constant 0 : index
    %c0_256 = arith.constant 0 : index
    %281 = vector.load %arg12[%c3_254, %c0_255, %c0_256] : memref<9x128x128xbf16, #tpu.memory_space<vmem>>, vector<1x128x128xbf16>
    %282 = vector.shape_cast %281 : vector<1x128x128xbf16> to vector<128x128xbf16>
    %cst_257 = arith.constant dense<0.000000e+00> : vector<16x128xf32>
    %283 = tpu.matmul %280, %282, %cst_257 {dimension_numbers = #tpu.dot_dimension_numbers<[1], [0], [0], [1], [0, 0, 1, 1], [], []>} : vector<16x128xbf16>, vector<128x128xbf16>, vector<16x128xf32> -> vector<16x128xf32>
    %284 = arith.addf %276, %283 : vector<16x128xf32>
    %c4_258 = arith.constant 4 : index
    %c0_259 = arith.constant 0 : index
    %c0_260 = arith.constant 0 : index
    %285 = vector.load %arg11[%c4_258, %c0_259, %c0_260] : memref<9x16x16xbf16, #tpu.memory_space<vmem>>, vector<1x16x16xbf16>
    %286 = vector.shape_cast %285 : vector<1x16x16xbf16> to vector<16x16xbf16>
    %cst_261 = arith.constant dense<0.000000e+00> : vector<16x128xf32>
    %287 = tpu.matmul %286, %251, %cst_261 {dimension_numbers = #tpu.dot_dimension_numbers<[1], [0], [0], [1], [0, 0, 1, 1], [], []>} : vector<16x16xbf16>, vector<16x128xbf16>, vector<16x128xf32> -> vector<16x128xf32>
    %288 = arith.truncf %287 : vector<16x128xf32> to vector<16x128xbf16>
    %c4_262 = arith.constant 4 : index
    %c0_263 = arith.constant 0 : index
    %c0_264 = arith.constant 0 : index
    %289 = vector.load %arg12[%c4_262, %c0_263, %c0_264] : memref<9x128x128xbf16, #tpu.memory_space<vmem>>, vector<1x128x128xbf16>
    %290 = vector.shape_cast %289 : vector<1x128x128xbf16> to vector<128x128xbf16>
    %cst_265 = arith.constant dense<0.000000e+00> : vector<16x128xf32>
    %291 = tpu.matmul %288, %290, %cst_265 {dimension_numbers = #tpu.dot_dimension_numbers<[1], [0], [0], [1], [0, 0, 1, 1], [], []>} : vector<16x128xbf16>, vector<128x128xbf16>, vector<16x128xf32> -> vector<16x128xf32>
    %292 = arith.addf %284, %291 : vector<16x128xf32>
    %c5_266 = arith.constant 5 : index
    %c0_267 = arith.constant 0 : index
    %c0_268 = arith.constant 0 : index
    %293 = vector.load %arg11[%c5_266, %c0_267, %c0_268] : memref<9x16x16xbf16, #tpu.memory_space<vmem>>, vector<1x16x16xbf16>
    %294 = vector.shape_cast %293 : vector<1x16x16xbf16> to vector<16x16xbf16>
    %cst_269 = arith.constant dense<0.000000e+00> : vector<16x128xf32>
    %295 = tpu.matmul %294, %251, %cst_269 {dimension_numbers = #tpu.dot_dimension_numbers<[1], [0], [0], [1], [0, 0, 1, 1], [], []>} : vector<16x16xbf16>, vector<16x128xbf16>, vector<16x128xf32> -> vector<16x128xf32>
    %296 = arith.truncf %295 : vector<16x128xf32> to vector<16x128xbf16>
    %c5_270 = arith.constant 5 : index
    %c0_271 = arith.constant 0 : index
    %c0_272 = arith.constant 0 : index
    %297 = vector.load %arg12[%c5_270, %c0_271, %c0_272] : memref<9x128x128xbf16, #tpu.memory_space<vmem>>, vector<1x128x128xbf16>
    %298 = vector.shape_cast %297 : vector<1x128x128xbf16> to vector<128x128xbf16>
    %cst_273 = arith.constant dense<0.000000e+00> : vector<16x128xf32>
    %299 = tpu.matmul %296, %298, %cst_273 {dimension_numbers = #tpu.dot_dimension_numbers<[1], [0], [0], [1], [0, 0, 1, 1], [], []>} : vector<16x128xbf16>, vector<128x128xbf16>, vector<16x128xf32> -> vector<16x128xf32>
    %300 = arith.addf %292, %299 : vector<16x128xf32>
    %c6_274 = arith.constant 6 : index
    %c0_275 = arith.constant 0 : index
    %c0_276 = arith.constant 0 : index
    %301 = vector.load %arg11[%c6_274, %c0_275, %c0_276] : memref<9x16x16xbf16, #tpu.memory_space<vmem>>, vector<1x16x16xbf16>
    %302 = vector.shape_cast %301 : vector<1x16x16xbf16> to vector<16x16xbf16>
    %cst_277 = arith.constant dense<0.000000e+00> : vector<16x128xf32>
    %303 = tpu.matmul %302, %251, %cst_277 {dimension_numbers = #tpu.dot_dimension_numbers<[1], [0], [0], [1], [0, 0, 1, 1], [], []>} : vector<16x16xbf16>, vector<16x128xbf16>, vector<16x128xf32> -> vector<16x128xf32>
    %304 = arith.truncf %303 : vector<16x128xf32> to vector<16x128xbf16>
    %c6_278 = arith.constant 6 : index
    %c0_279 = arith.constant 0 : index
    %c0_280 = arith.constant 0 : index
    %305 = vector.load %arg12[%c6_278, %c0_279, %c0_280] : memref<9x128x128xbf16, #tpu.memory_space<vmem>>, vector<1x128x128xbf16>
    %306 = vector.shape_cast %305 : vector<1x128x128xbf16> to vector<128x128xbf16>
    %cst_281 = arith.constant dense<0.000000e+00> : vector<16x128xf32>
    %307 = tpu.matmul %304, %306, %cst_281 {dimension_numbers = #tpu.dot_dimension_numbers<[1], [0], [0], [1], [0, 0, 1, 1], [], []>} : vector<16x128xbf16>, vector<128x128xbf16>, vector<16x128xf32> -> vector<16x128xf32>
    %308 = arith.addf %300, %307 : vector<16x128xf32>
    %c7_282 = arith.constant 7 : index
    %c0_283 = arith.constant 0 : index
    %c0_284 = arith.constant 0 : index
    %309 = vector.load %arg11[%c7_282, %c0_283, %c0_284] : memref<9x16x16xbf16, #tpu.memory_space<vmem>>, vector<1x16x16xbf16>
    %310 = vector.shape_cast %309 : vector<1x16x16xbf16> to vector<16x16xbf16>
    %cst_285 = arith.constant dense<0.000000e+00> : vector<16x128xf32>
    %311 = tpu.matmul %310, %251, %cst_285 {dimension_numbers = #tpu.dot_dimension_numbers<[1], [0], [0], [1], [0, 0, 1, 1], [], []>} : vector<16x16xbf16>, vector<16x128xbf16>, vector<16x128xf32> -> vector<16x128xf32>
    %312 = arith.truncf %311 : vector<16x128xf32> to vector<16x128xbf16>
    %c7_286 = arith.constant 7 : index
    %c0_287 = arith.constant 0 : index
    %c0_288 = arith.constant 0 : index
    %313 = vector.load %arg12[%c7_286, %c0_287, %c0_288] : memref<9x128x128xbf16, #tpu.memory_space<vmem>>, vector<1x128x128xbf16>
    %314 = vector.shape_cast %313 : vector<1x128x128xbf16> to vector<128x128xbf16>
    %cst_289 = arith.constant dense<0.000000e+00> : vector<16x128xf32>
    %315 = tpu.matmul %312, %314, %cst_289 {dimension_numbers = #tpu.dot_dimension_numbers<[1], [0], [0], [1], [0, 0, 1, 1], [], []>} : vector<16x128xbf16>, vector<128x128xbf16>, vector<16x128xf32> -> vector<16x128xf32>
    %316 = arith.addf %308, %315 : vector<16x128xf32>
    %c8_290 = arith.constant 8 : index
    %c0_291 = arith.constant 0 : index
    %c0_292 = arith.constant 0 : index
    %317 = vector.load %arg11[%c8_290, %c0_291, %c0_292] : memref<9x16x16xbf16, #tpu.memory_space<vmem>>, vector<1x16x16xbf16>
    %318 = vector.shape_cast %317 : vector<1x16x16xbf16> to vector<16x16xbf16>
    %cst_293 = arith.constant dense<0.000000e+00> : vector<16x128xf32>
    %319 = tpu.matmul %318, %251, %cst_293 {dimension_numbers = #tpu.dot_dimension_numbers<[1], [0], [0], [1], [0, 0, 1, 1], [], []>} : vector<16x16xbf16>, vector<16x128xbf16>, vector<16x128xf32> -> vector<16x128xf32>
    %320 = arith.truncf %319 : vector<16x128xf32> to vector<16x128xbf16>
    %c8_294 = arith.constant 8 : index
    %c0_295 = arith.constant 0 : index
    %c0_296 = arith.constant 0 : index
    %321 = vector.load %arg12[%c8_294, %c0_295, %c0_296] : memref<9x128x128xbf16, #tpu.memory_space<vmem>>, vector<1x128x128xbf16>
    %322 = vector.shape_cast %321 : vector<1x128x128xbf16> to vector<128x128xbf16>
    %cst_297 = arith.constant dense<0.000000e+00> : vector<16x128xf32>
    %323 = tpu.matmul %320, %322, %cst_297 {dimension_numbers = #tpu.dot_dimension_numbers<[1], [0], [0], [1], [0, 0, 1, 1], [], []>} : vector<16x128xbf16>, vector<128x128xbf16>, vector<16x128xf32> -> vector<16x128xf32>
    %324 = arith.addf %316, %323 : vector<16x128xf32>
    %c0_298 = arith.constant 0 : index
    %c0_299 = arith.constant 0 : index
    %325 = vector.load %arg13[%c0_298, %c0_299] : memref<1x128xf32, #tpu.memory_space<vmem>>, vector<1x128xf32>
    %326 = vector.broadcast %325 : vector<1x128xf32> to vector<16x128xf32>
    %327 = arith.addf %324, %326 : vector<16x128xf32>
    %328 = vector.extract_strided_slice %327 {offsets = [0, 0], sizes = [16, 1], strides = [1, 1]} : vector<16x128xf32> to vector<16x1xf32>
    %329 = arith.index_cast %arg0 : i32 to index
    %c0_300 = arith.constant 0 : index
    %c0_301 = arith.constant 0 : index
    %330 = vector.load %arg16[%329, %c0_300, %c0_301] : memref<4x16x1xf32, #tpu.memory_space<vmem>>, vector<1x16x1xf32>
    %331 = vector.shape_cast %330 : vector<1x16x1xf32> to vector<16x1xf32>
    %332 = vector.shape_cast %328 : vector<16x1xf32> to vector<1x16x1xf32>
    tpu.vector_store %arg16[%329, %c0_300, %c0_301], %332 {strides = array<i32>} : memref<4x16x1xf32, #tpu.memory_space<vmem>>, vector<1x16x1xf32>,
    %c3_i32 = arith.constant 3 : i32
    %333 = arith.cmpi eq, %arg0, %c3_i32 : i32
    %334 = arith.extui %333 : i1 to i32
    %c0_i32_302 = arith.constant 0 : i32
    %335 = arith.cmpi ne, %334, %c0_i32_302 : i32
    scf.if %335 {
      %c0_303 = arith.constant 0 : index
      %c0_304 = arith.constant 0 : index
      %c0_305 = arith.constant 0 : index
      %336 = vector.load %arg16[%c0_303, %c0_304, %c0_305] : memref<4x16x1xf32, #tpu.memory_space<vmem>>, vector<4x16x1xf32>
      %337 = vector.extract_strided_slice %336 {offsets = [0, 0, 0], sizes = [2, 16, 1], strides = [1, 1, 1]} : vector<4x16x1xf32> to vector<2x16x1xf32>
      %338 = vector.extract_strided_slice %336 {offsets = [2, 0, 0], sizes = [2, 16, 1], strides = [1, 1, 1]} : vector<4x16x1xf32> to vector<2x16x1xf32>
      %339 = vector.shape_cast %337 : vector<2x16x1xf32> to vector<1x2x16x1xf32>
      %cst_306 = arith.constant dense<0.000000e+00> : vector<1xf32>
      %340 = vector.multi_reduction <add>, %339, %cst_306 [1, 2, 3] : vector<1x2x16x1xf32> to vector<1xf32>
      %341 = vector.shape_cast %340 : vector<1xf32> to vector<1x1x1x1xf32>
      %342 = vector.extract %341[0, 0, 0, 0] : f32 from vector<1x1x1x1xf32>
      %cst_307 = arith.constant 3.200000e+01 : f32
      %343 = arith.divf %342, %cst_307 : f32
      %344 = vector.shape_cast %338 : vector<2x16x1xf32> to vector<1x2x16x1xf32>
      %cst_308 = arith.constant dense<0.000000e+00> : vector<1xf32>
      %345 = vector.multi_reduction <add>, %344, %cst_308 [1, 2, 3] : vector<1x2x16x1xf32> to vector<1xf32>
      %346 = vector.shape_cast %345 : vector<1xf32> to vector<1x1x1x1xf32>
      %347 = vector.extract %346[0, 0, 0, 0] : f32 from vector<1x1x1x1xf32>
      %cst_309 = arith.constant 3.200000e+01 : f32
      %348 = arith.divf %347, %cst_309 : f32
      %349 = vector.broadcast %343 : f32 to vector<2x16x1xf32>
      %350 = arith.subf %338, %349 : vector<2x16x1xf32>
      %351 = vector.broadcast %348 : f32 to vector<2x16x1xf32>
      %352 = arith.subf %337, %351 : vector<2x16x1xf32>
      %cst_310 = arith.constant 0.000000e+00 : f32
      %353 = vector.broadcast %cst_310 : f32 to vector<2x16x1xf32>
      %354 = arith.maximumf %350, %353 : vector<2x16x1xf32>
      %355 = math.absf %350 : vector<2x16x1xf32>
      %cst_311 = arith.constant 0.000000e+00 : f32
      %356 = vector.broadcast %cst_311 : f32 to vector<2x16x1xf32>
      %357 = arith.subf %356, %355 : vector<2x16x1xf32>
      %358 = math.exp %357 : vector<2x16x1xf32>
      %359 = math.log1p %358 : vector<2x16x1xf32>
      %360 = arith.addf %354, %359 : vector<2x16x1xf32>
      %cst_312 = arith.constant 0.000000e+00 : f32
      %361 = vector.broadcast %cst_312 : f32 to vector<2x16x1xf32>
      %362 = arith.maximumf %352, %361 : vector<2x16x1xf32>
      %363 = math.absf %352 : vector<2x16x1xf32>
      %cst_313 = arith.constant 0.000000e+00 : f32
      %364 = vector.broadcast %cst_313 : f32 to vector<2x16x1xf32>
      %365 = arith.subf %364, %363 : vector<2x16x1xf32>
      %366 = math.exp %365 : vector<2x16x1xf32>
      %367 = math.log1p %366 : vector<2x16x1xf32>
      %368 = arith.addf %362, %367 : vector<2x16x1xf32>
      %369 = vector.shape_cast %360 : vector<2x16x1xf32> to vector<1x2x16x1xf32>
      %cst_314 = arith.constant dense<0.000000e+00> : vector<1xf32>
      %370 = vector.multi_reduction <add>, %369, %cst_314 [1, 2, 3] : vector<1x2x16x1xf32> to vector<1xf32>
      %371 = vector.shape_cast %370 : vector<1xf32> to vector<1x1x1x1xf32>
      %372 = vector.extract %371[0, 0, 0, 0] : f32 from vector<1x1x1x1xf32>
      %cst_315 = arith.constant 3.200000e+01 : f32
      %373 = arith.divf %372, %cst_315 : f32
      %cst_316 = arith.constant 5.000000e-01 : f32
      %374 = arith.mulf %cst_316, %373 : f32
      %375 = arith.subf %368, %352 : vector<2x16x1xf32>
      %376 = vector.shape_cast %375 : vector<2x16x1xf32> to vector<1x2x16x1xf32>
      %cst_317 = arith.constant dense<0.000000e+00> : vector<1xf32>
      %377 = vector.multi_reduction <add>, %376, %cst_317 [1, 2, 3] : vector<1x2x16x1xf32> to vector<1xf32>
      %378 = vector.shape_cast %377 : vector<1xf32> to vector<1x1x1x1xf32>
      %379 = vector.extract %378[0, 0, 0, 0] : f32 from vector<1x1x1x1xf32>
      %cst_318 = arith.constant 3.200000e+01 : f32
      %380 = arith.divf %379, %cst_318 : f32
      %cst_319 = arith.constant 5.000000e-01 : f32
      %381 = arith.mulf %cst_319, %380 : f32
      %382 = arith.addf %374, %381 : f32
      %383 = arith.subf %360, %350 : vector<2x16x1xf32>
      %384 = vector.shape_cast %383 : vector<2x16x1xf32> to vector<1x2x16x1xf32>
      %cst_320 = arith.constant dense<0.000000e+00> : vector<1xf32>
      %385 = vector.multi_reduction <add>, %384, %cst_320 [1, 2, 3] : vector<1x2x16x1xf32> to vector<1xf32>
      %386 = vector.shape_cast %385 : vector<1xf32> to vector<1x1x1x1xf32>
      %387 = vector.extract %386[0, 0, 0, 0] : f32 from vector<1x1x1x1xf32>
      %cst_321 = arith.constant 3.200000e+01 : f32
      %388 = arith.divf %387, %cst_321 : f32
      %cst_322 = arith.constant 5.000000e-01 : f32
      %389 = arith.mulf %cst_322, %388 : f32
      %390 = vector.shape_cast %368 : vector<2x16x1xf32> to vector<1x2x16x1xf32>
      %cst_323 = arith.constant dense<0.000000e+00> : vector<1xf32>
      %391 = vector.multi_reduction <add>, %390, %cst_323 [1, 2, 3] : vector<1x2x16x1xf32> to vector<1xf32>
      %392 = vector.shape_cast %391 : vector<1xf32> to vector<1x1x1x1xf32>
      %393 = vector.extract %392[0, 0, 0, 0] : f32 from vector<1x1x1x1xf32>
      %cst_324 = arith.constant 3.200000e+01 : f32
      %394 = arith.divf %393, %cst_324 : f32
      %cst_325 = arith.constant 5.000000e-01 : f32
      %395 = arith.mulf %cst_325, %394 : f32
      %396 = arith.addf %389, %395 : f32
      %cst_326 = arith.constant 0.000000e+00 : f32
      %397 = vector.broadcast %cst_326 : f32 to vector<1x1xf32>
      %398 = vector.broadcast %382 : f32 to vector<1x1xf32>
      %399 = arith.addf %397, %398 : vector<1x1xf32>
      %c0_327 = arith.constant 0 : index
      %c0_328 = arith.constant 0 : index
      %400 = vector.load %arg14[%c0_327, %c0_328] : memref<1x1xf32, #tpu.memory_space<vmem>>, vector<1x1xf32>
      tpu.vector_store %arg14[%c0_327, %c0_328], %399 {strides = array<i32>} : memref<1x1xf32, #tpu.memory_space<vmem>>, vector<1x1xf32>,
      %cst_329 = arith.constant 0.000000e+00 : f32
      %401 = vector.broadcast %cst_329 : f32 to vector<1x1xf32>
      %402 = vector.broadcast %396 : f32 to vector<1x1xf32>
      %403 = arith.addf %401, %402 : vector<1x1xf32>
      %c0_330 = arith.constant 0 : index
      %c0_331 = arith.constant 0 : index
      %404 = vector.load %arg15[%c0_330, %c0_331] : memref<1x1xf32, #tpu.memory_space<vmem>>, vector<1x1xf32>
      tpu.vector_store %arg15[%c0_330, %c0_331], %403 {strides = array<i32>} : memref<1x1xf32, #tpu.memory_space<vmem>>, vector<1x1xf32>,
    } else {
    }
    return
  }
  func.func @transform_0(%arg0: i32) -> (i32, i32, i32) {
    %c0_i32 = arith.constant 0 : i32
    %c0_i32_0 = arith.constant 0 : i32
    %c0_i32_1 = arith.constant 0 : i32
    return %arg0, %c0_i32, %c0_i32_0 : i32, i32, i32
  }
  func.func @transform_1(%arg0: i32) -> (i32, i32, i32) {
    %c0_i32 = arith.constant 0 : i32
    %c0_i32_0 = arith.constant 0 : i32
    %c0_i32_1 = arith.constant 0 : i32
    %c0_i32_2 = arith.constant 0 : i32
    return %c0_i32, %c0_i32_0, %c0_i32_1 : i32, i32, i32
  }
  func.func @transform_2(%arg0: i32) -> (i32, i32, i32) {
    %c0_i32 = arith.constant 0 : i32
    %c0_i32_0 = arith.constant 0 : i32
    %c0_i32_1 = arith.constant 0 : i32
    %c0_i32_2 = arith.constant 0 : i32
    return %c0_i32, %c0_i32_0, %c0_i32_1 : i32, i32, i32
  }
  func.func @transform_3(%arg0: i32) -> (i32, i32) {
    %c0_i32 = arith.constant 0 : i32
    %c0_i32_0 = arith.constant 0 : i32
    %c0_i32_1 = arith.constant 0 : i32
    return %c0_i32, %c0_i32_0 : i32, i32
  }
  func.func @transform_4(%arg0: i32) -> (i32, i32, i32) {
    %c0_i32 = arith.constant 0 : i32
    %c0_i32_0 = arith.constant 0 : i32
    %c0_i32_1 = arith.constant 0 : i32
    %c0_i32_2 = arith.constant 0 : i32
    return %c0_i32, %c0_i32_0, %c0_i32_1 : i32, i32, i32
  }
  func.func @transform_5(%arg0: i32) -> (i32, i32, i32) {
    %c0_i32 = arith.constant 0 : i32
    %c0_i32_0 = arith.constant 0 : i32
    %c0_i32_1 = arith.constant 0 : i32
    %c0_i32_2 = arith.constant 0 : i32
    return %c0_i32, %c0_i32_0, %c0_i32_1 : i32, i32, i32
  }
  func.func @transform_6(%arg0: i32) -> (i32, i32) {
    %c0_i32 = arith.constant 0 : i32
    %c0_i32_0 = arith.constant 0 : i32
    %c0_i32_1 = arith.constant 0 : i32
    return %c0_i32, %c0_i32_0 : i32, i32
  }
  func.func @transform_7(%arg0: i32) -> (i32, i32, i32) {
    %c0_i32 = arith.constant 0 : i32
    %c0_i32_0 = arith.constant 0 : i32
    %c0_i32_1 = arith.constant 0 : i32
    %c0_i32_2 = arith.constant 0 : i32
    return %c0_i32, %c0_i32_0, %c0_i32_1 : i32, i32, i32
  }
  func.func @transform_8(%arg0: i32) -> (i32, i32, i32) {
    %c0_i32 = arith.constant 0 : i32
    %c0_i32_0 = arith.constant 0 : i32
    %c0_i32_1 = arith.constant 0 : i32
    %c0_i32_2 = arith.constant 0 : i32
    return %c0_i32, %c0_i32_0, %c0_i32_1 : i32, i32, i32
  }
  func.func @transform_9(%arg0: i32) -> (i32, i32) {
    %c0_i32 = arith.constant 0 : i32
    %c0_i32_0 = arith.constant 0 : i32
    %c0_i32_1 = arith.constant 0 : i32
    return %c0_i32, %c0_i32_0 : i32, i32
  }
  func.func @transform_10(%arg0: i32) -> (i32, i32, i32) {
    %c0_i32 = arith.constant 0 : i32
    %c0_i32_0 = arith.constant 0 : i32
    %c0_i32_1 = arith.constant 0 : i32
    %c0_i32_2 = arith.constant 0 : i32
    return %c0_i32, %c0_i32_0, %c0_i32_1 : i32, i32, i32
  }
  func.func @transform_11(%arg0: i32) -> (i32, i32, i32) {
    %c0_i32 = arith.constant 0 : i32
    %c0_i32_0 = arith.constant 0 : i32
    %c0_i32_1 = arith.constant 0 : i32
    %c0_i32_2 = arith.constant 0 : i32
    return %c0_i32, %c0_i32_0, %c0_i32_1 : i32, i32, i32
  }
  func.func @transform_12(%arg0: i32) -> (i32, i32) {
    %c0_i32 = arith.constant 0 : i32
    %c0_i32_0 = arith.constant 0 : i32
    %c0_i32_1 = arith.constant 0 : i32
    return %c0_i32, %c0_i32_0 : i32, i32
  }
  func.func @transform_13(%arg0: i32) -> (i32, i32) {
    %c0_i32 = arith.constant 0 : i32
    %c0_i32_0 = arith.constant 0 : i32
    %c0_i32_1 = arith.constant 0 : i32
    return %c0_i32, %c0_i32_0 : i32, i32
  }
  func.func @transform_14(%arg0: i32) -> (i32, i32) {
    %c0_i32 = arith.constant 0 : i32
    %c0_i32_0 = arith.constant 0 : i32
    %c0_i32_1 = arith.constant 0 : i32
    return %c0_i32, %c0_i32_0 : i32, i32
  }
}

</mosaic_0001>

<bundles_post_ra>
// kernel: adversarial_loss_forward.1
= control target key start
LH: loop header
LB: loop body
LE: loop exit
PB: predicated region body
PF: predicated region fallthrough
CT: control target
= control target key end

     0   :  { %s19039_s0 = inlined_call_operand.vmem [shape: f32[4,256,128], index: 0, kind: input, shape index: {}]   ;;  %s19040_s1 = inlined_call_operand.vmem [shape: bf16[9,256,256], index: 1, kind: input, shape index: {}]   ;;  %s19041_s2 = inlined_call_operand.vmem [shape: bf16[9,128,128], index: 2, kind: input, shape index: {}]   ;;  %s19042_s3 = inlined_call_operand.vmem [shape: f32[1,128], index: 3, kind: input, shape index: {}]   ;;  %s19043_s4 = inlined_call_operand.vmem [shape: bf16[9,64,256], index: 4, kind: input, shape index: {}]   ;;  %s19044_s5 = inlined_call_operand.hbm [shape: bf16[9,128,128], index: 5, kind: input, shape index: {}]   ;;  %s19045_s6 = inlined_call_operand.vmem [shape: f32[1,128], index: 6, kind: input, shape index: {}]   ;;  %s19046_s7 = inlined_call_operand.vmem [shape: bf16[9,16,64], index: 7, kind: input, shape index: {}]   ;;  %s19047_s8 = inlined_call_operand.hbm [shape: bf16[9,128,128], index: 8, kind: input, shape index: {}]   ;;  %s19048_s9 = inlined_call_operand.vmem [shape: f32[1,128], index: 9, kind: input, shape index: {}]   ;;  %s19049_s10 = inlined_call_operand.vmem [shape: bf16[9,16,16], index: 10, kind: input, shape index: {}]   ;;  %s19050_s11 = inlined_call_operand.hbm [shape: bf16[9,128,128], index: 11, kind: input, shape index: {}]   ;;  %s19051_s12 = inlined_call_operand.vmem [shape: f32[1,128], index: 12, kind: input, shape index: {}]   ;;  %s19052_s13 = inlined_call_operand.hbm [shape: f32[1,1], index: 13, kind: output, shape index: {0}]   ;;  %s19053_s14 = inlined_call_operand.hbm [shape: f32[1,1], index: 14, kind: output, shape index: {1}]  }
   0x1   :  { %19065 = sst [smem:[#allocation36_spill]] %s19039_s0 }
   0x2   :  { %20 = vsyncpa [#allocation4], 0 }
   0x3   :  { %21 = vsyncpa [#allocation7], 0 }
   0x4   :  { %22 = vsyncpa [#allocation5], 0 }
   0x5   :  { %23 = vsyncpa [#allocation11], 0  ;;  %s14316_s29 = smov 0  }
   0x6 LB: > { %s14322_s30 = sadd.s32 4294967295, %s14230_s29   ;;  %p10096_p0 = scmp.ge.s32.totalorder %s14230_s29, 1  ;;  %s14230_s29 = sphi %s14316_s29, %s29_s29  }
   0x7   : > { %p354_p1 = scmp.lt.s32.totalorder %s14230_s29, 5  ;;  %p10097_p2 = scmp.ne.s32.totalorder %s14322_s30, 0 }
   0x8   : > { %p13997_p3 = scmp.eq.s32.totalorder %s14322_s30, 0  ;;  %s397_s17 = sshll.u32 %s19047_s8, 4  ;;  %s398_s17 = int_to_ptr.hbm [resolvable:$true] %s397_s17 }
   0x9   : > { %p14331_p4 = pnand %p10096_p0, %p354_p1  ;;  %s377_s21 = sshll.u32 %s19044_s5, 4  ;;  %s378_s21 = int_to_ptr.hbm [resolvable:$true] %s377_s21 }
   0xa   : > { %s14232_s22 = smov [#allocation6]   ;;  %s14233_s24 = smov [#allocation3]  }
   0xb   : > { %p13987_p5 = pneg %p14331_p4  ;;  %s399_s23 = sshll.u32 %s14232_s22, 4  ;;  %s400_s23 = int_to_ptr.vmem [resolvable:$true] %s399_s23 }
   0xc   : > { %s379_s25 = sshll.u32 %s14233_s24, 4  ;;  %s417_s28 = sshll.u32 %s19050_s11, 4  ;;  %s380_s25 = int_to_ptr.vmem [resolvable:$true] %s379_s25  ;;  %s418_s28 = int_to_ptr.hbm [resolvable:$true] %s417_s28 }
   0xd   : > { %p13988_p6 = pnand %p13997_p3, %p13987_p5  ;;  %s14234_s15 = smov 64  }
   0xe   : > { %s14235_s16 = smov 4   ;;  %s14236_s19 = smov [#allocation8]  }
   0xf   : > { %13993 = dma.hbm_to_vmem [thread:$0]  (!%p13988_p6), %s398_s17, 9216, %s400_s23, [#allocation7], %s14234_s15, %s14234_s15, %s14235_s16  }
  0x10   : > { %13990 = dma.hbm_to_vmem [thread:$0]  (!%p13988_p6), %s378_s21, 9216, %s380_s25, [#allocation4], %s14234_s15, %s14234_s15, %s14235_s16  }
  0x11   : > { %s419_s20 = sshll.u32 %s14236_s19, 4  ;;  %446 = sbr.rel (%p14331_p4) target bundleno = 5168 (0x1430), region = 72  ;;  %s420_s20 = int_to_ptr.vmem [resolvable:$true] %s419_s20 }
  0x12   : > { %13996 = dma.hbm_to_vmem [thread:$0]  (!%p13988_p6), %s418_s28, 9216, %s420_s20, [#allocation7], %s14234_s15, %s14234_s15, %s14235_s16  }
  0x16   : > { %14213 = dma.done.wait (%p13997_p3), [#allocation4], 9216  }
  0x17   : > { %14215 = vsyncadd (%p13997_p3), [#allocation4], 4294958080 }
  0x18   : > { %14217 = dma.done.wait (%p13997_p3), [#allocation7], 18432  }
  0x19   : > { %14219 = vsyncadd (%p13997_p3), [#allocation7], 4294948864  ;;  %p498_p7 = scmp.lt.s32.totalorder %s14322_s30, 3  ;;  %s19067_s0 = sld [smem:[#allocation36_spill]] }
  0x1b   : > { %s499_s17 = scalar_select %p498_p7, %s14322_s30, 3 }
  0x1c   : > { %507 = sbr.rel (%p10097_p2) target bundleno = 36 (0x24), region = 88 }
  0x1d   : > { %s13278_s21 = sshll.u32 %s499_s17, 8 }
  0x1f   : > { %s14360_s23 = scalar_lea.vmem %s19067_s0, %s13278_s21 }
  0x21   : > { %vm508_vm0 = vcmask 0   ;;  %v14237_v0 = vmov 0.0  }
  0x22   : > { %509 = vst.msk [vmem:[#allocation9] sm:$0x1] %vm508_vm0, %v14237_v0 }
  0x23   : > { %510 = vst.msk [vmem:[#allocation10] sm:$0x1] %vm508_vm0, %v14237_v0 }
  0x24 PF: > { %v525_v1 = vld [vmem:[%s14360_s23 + $0x70] sm:$0xff]  ;;  %v526_v2 = vld [vmem:[%s14360_s23 + $0x78] sm:$0xff]  ;;  %v523_v6 = vld [vmem:[%s14360_s23 + $0x60] sm:$0xff]  ;;  %s13270_s28 = sshll.u32 %s14322_s30, 4  ;;  %p13271_p8 = scmp.ne.s32.totalorder %s14322_s30, 3 }
  0x25   : > { %v541_v3 = vld [vmem:[%s14360_s23 + $0xf0] sm:$0xff]  ;;  %v14367_v4 = vpack.c.bf16 %v526_v2, %v525_v1  ;;  %v542_v5 = vld [vmem:[%s14360_s23 + $0xf8] sm:$0xff]  ;;  %v524_v7 = vld [vmem:[%s14360_s23 + $0x68] sm:$0xff]  ;;  %s9673_s15 = scalar_lea.vmem [#allocation2], %s13270_s28 }
  0x26   : > { %v14372_v8 = vpack.c.bf16 %v542_v5, %v541_v3  ;;  %v539_v9 = vld [vmem:[%s14360_s23 + $0xe0] sm:$0xff]  ;;  %v540_v10 = vld [vmem:[%s14360_s23 + $0xe8] sm:$0xff]  ;;  %v14378_v11 = vpack.c.bf16 %v524_v7, %v523_v6  ;;  %v521_v13 = vld [vmem:[%s14360_s23 + $0x50] sm:$0xff] }
  0x27   : > { %751 = vmatpush.bf16.msra.mxu0 %v14367_v4  ;;  %1154 = vmatpush.bf16.msra.mxu2 %v14367_v4  ;;  %v14381_v12 = vpack.c.bf16 %v540_v10, %v539_v9  ;;  %v522_v14 = vld [vmem:[%s14360_s23 + $0x58] sm:$0xff]  ;;  %v537_v15 = vld [vmem:[%s14360_s23 + $0xd0] sm:$0xff]  ;;  %v519_v19 = vld [vmem:[%s14360_s23 + $0x40] sm:$0xff] }
  0x28   : > { %840 = vmatpush.bf16.msra.mxu1 %v14372_v8  ;;  %1243 = vmatpush.bf16.msra.mxu3 %v14372_v8  ;;  %v538_v16 = vld [vmem:[%s14360_s23 + $0xd8] sm:$0xff]  ;;  %v14390_v17 = vpack.c.bf16 %v522_v14, %v521_v13  ;;  %v520_v20 = vld [vmem:[%s14360_s23 + $0x48] sm:$0xff]  ;;  %v535_v21 = vld [vmem:[%s14360_s23 + $0xc0] sm:$0xff] }
  0x29   : > { %v14393_v18 = vpack.c.bf16 %v538_v16, %v537_v15  ;;  %v536_v22 = vld [vmem:[%s14360_s23 + $0xc8] sm:$0xff]  ;;  %v14402_v23 = vpack.c.bf16 %v520_v20, %v519_v19  ;;  %v517_v25 = vld [vmem:[%s14360_s23 + $0x30] sm:$0xff]  ;;  %v518_v26 = vld [vmem:[%s14360_s23 + $0x38] sm:$0xff] }
  0x2a   : > { %v14405_v24 = vpack.c.bf16 %v536_v22, %v535_v21  ;;  %v533_v27 = vld [vmem:[%s14360_s23 + $0xb0] sm:$0xff]  ;;  %v534_v28 = vld [vmem:[%s14360_s23 + $0xb8] sm:$0xff]  ;;  %v14414_v29 = vpack.c.bf16 %v518_v26, %v517_v25  ;;  %v515_v31 = vld [vmem:[%s14360_s23 + $0x20] sm:$0xff] }
  0x2b   : > { %752 = vmatpush.bf16.msra.mxu0 %v14378_v11  ;;  %1155 = vmatpush.bf16.msra.mxu2 %v14378_v11  ;;  %19068 = vst [vmem:[#allocation16_spill] sm:$0xff] %v14402_v23  ;;  %v14417_v30 = vpack.c.bf16 %v534_v28, %v533_v27  ;;  %v516_v32 = vld [vmem:[%s14360_s23 + $0x28] sm:$0xff]  ;;  %v531_v33 = vld [vmem:[%s14360_s23 + $0xa0] sm:$0xff]  ;;  %v513_v37 = vld [vmem:[%s14360_s23 + $0x10] sm:$0xff] }
  0x2c   : > { %841 = vmatpush.bf16.msra.mxu1 %v14381_v12  ;;  %1244 = vmatpush.bf16.msra.mxu3 %v14381_v12  ;;  %v532_v34 = vld [vmem:[%s14360_s23 + $0xa8] sm:$0xff]  ;;  %v14426_v35 = vpack.c.bf16 %v516_v32, %v515_v31  ;;  %v514_v38 = vld [vmem:[%s14360_s23 + $0x18] sm:$0xff]  ;;  %v529_v39 = vld [vmem:[%s14360_s23 + $0x90] sm:$0xff] }
  0x2d   : > { %v14429_v36 = vpack.c.bf16 %v532_v34, %v531_v33  ;;  %v530_v40 = vld [vmem:[%s14360_s23 + $0x98] sm:$0xff]  ;;  %v14438_v41 = vpack.c.bf16 %v514_v38, %v513_v37  ;;  %v511_v43 = vld [vmem:[%s14360_s23] sm:$0xff]  ;;  %v512_v44 = vld [vmem:[%s14360_s23 + $0x8] sm:$0xff] }
  0x2e   : > { %19069 = vst [vmem:[#allocation17_spill] sm:$0xff] %v14426_v35  ;;  %v14441_v42 = vpack.c.bf16 %v530_v40, %v529_v39  ;;  %v527_v45 = vld [vmem:[%s14360_s23 + $0x80] sm:$0xff]  ;;  %v528_v46 = vld [vmem:[%s14360_s23 + $0x88] sm:$0xff]  ;;  %v14453_v48 = vpack.c.bf16 %v512_v44, %v511_v43  ;;  %v10118_v58 = vld [vmem:[%s19040_s1 + $0x10] sm:$0xf] }
  0x2f   : > { %753 = vmatpush.bf16.msra.mxu0 %v14390_v17  ;;  %1156 = vmatpush.bf16.msra.mxu2 %v14390_v17  ;;  %19070 = vst [vmem:[#allocation18_spill] sm:$0xff] %v14429_v36  ;;  %v10110_v47 = vld [vmem:[%s19040_s1] sm:$0xf]  ;;  %v13280_v49 = vld [vmem:[%s19040_s1 + $0x4] sm:$0xf0]  ;;  %v14465_v52 = vpack.c.bf16 %v528_v46, %v527_v45 }
  0x30   : > { %842 = vmatpush.bf16.msra.mxu1 %v14393_v18  ;;  %1245 = vmatpush.bf16.msra.mxu3 %v14393_v18  ;;  %19071 = vst [vmem:[#allocation19_spill] sm:$0xff] %v14438_v41  ;;  %v10270_v50 = vld [vmem:[%s19040_s1 + $0x100] sm:$0xf]  ;;  %v13320_v51 = vld [vmem:[%s19040_s1 + $0x104] sm:$0xf0]  ;;  %v10111_v55 = vor.u32 %v13280_v49, %v10110_v47 }
  0x31   : > { %19072 = vst [vmem:[#allocation20_spill] sm:$0xff] %v14441_v42  ;;  %v13279_v53 = vld [vmem:[%s19040_s1 + $0x4] sm:$0xf]  ;;  %v10112_v54 = vld [vmem:[%s19040_s1 + $0x8] sm:$0xf0]  ;;  %v10271_v56 = vor.u32 %v13320_v51, %v10270_v50 }
  0x32   : > { %19073 = vst [vmem:[#allocation21_spill] sm:$0xff] %v14453_v48  ;;  %v10115_v57 = vor.u32 %v13279_v53, %v10112_v54  ;;  %v13282_v59 = vld [vmem:[%s19040_s1 + $0x14] sm:$0xf0]  ;;  %v10278_v60 = vld [vmem:[%s19040_s1 + $0x110] sm:$0xf] }
  0x33   : > { %754 = vmatpush.bf16.msra.mxu0 %v14402_v23  ;;  %1157 = vmatpush.bf16.msra.mxu2 %v14402_v23  ;;  %19074 = vst [vmem:[#allocation22_spill] sm:$0xff] %v14465_v52  ;;  %v13322_v61 = vld [vmem:[%s19040_s1 + $0x114] sm:$0xf0]  ;;  %v13281_v62 = vld [vmem:[%s19040_s1 + $0x14] sm:$0xf]  ;;  %v10119_v0 = vor.u32 %v13282_v59, %v10118_v58 }
  0x34   : > { %843 = vmatpush.bf16.msra.mxu1 %v14405_v24  ;;  %1246 = vmatpush.bf16.msra.mxu3 %v14405_v24  ;;  %v10120_v63 = vld [vmem:[%s19040_s1 + $0x18] sm:$0xf0]  ;;  %v10279_v1 = vor.u32 %v13322_v61, %v10278_v60  ;;  %v10126_v3 = vld [vmem:[%s19040_s1 + $0x20] sm:$0xf]  ;;  %v13284_v5 = vld [vmem:[%s19040_s1 + $0x24] sm:$0xf0] }
  0x35   : > { %v10123_v2 = vor.u32 %v13281_v62, %v10120_v63  ;;  %v10286_v6 = vld [vmem:[%s19040_s1 + $0x120] sm:$0xf]  ;;  %v13324_v7 = vld [vmem:[%s19040_s1 + $0x124] sm:$0xf0]  ;;  %v13283_v9 = vld [vmem:[%s19040_s1 + $0x24] sm:$0xf]  ;;  %v10127_v13 = vor.u32 %v13284_v5, %v10126_v3 }
  0x36   : > { %v10128_v10 = vld [vmem:[%s19040_s1 + $0x28] sm:$0xf0]  ;;  %v10287_v14 = vor.u32 %v13324_v7, %v10286_v6  ;;  %v10134_v16 = vld [vmem:[%s19040_s1 + $0x30] sm:$0xf]  ;;  %v13286_v19 = vld [vmem:[%s19040_s1 + $0x34] sm:$0xf0] }
  0x37   : > { %755 = vmatpush.bf16.msra.mxu0 %v14414_v29  ;;  %1158 = vmatpush.bf16.msra.mxu2 %v14414_v29  ;;  %v10131_v15 = vor.u32 %v13283_v9, %v10128_v10  ;;  %v10294_v20 = vld [vmem:[%s19040_s1 + $0x130] sm:$0xf]  ;;  %v13326_v21 = vld [vmem:[%s19040_s1 + $0x134] sm:$0xf0]  ;;  %v13285_v22 = vld [vmem:[%s19040_s1 + $0x34] sm:$0xf]  ;;  %v10135_v26 = vor.u32 %v13286_v19, %v10134_v16 }
  0x38   : > { %844 = vmatpush.bf16.msra.mxu1 %v14417_v30  ;;  %1247 = vmatpush.bf16.msra.mxu3 %v14417_v30  ;;  %v10136_v25 = vld [vmem:[%s19040_s1 + $0x38] sm:$0xf0]  ;;  %v10295_v27 = vor.u32 %v13326_v21, %v10294_v20  ;;  %v10142_v31 = vld [vmem:[%s19040_s1 + $0x40] sm:$0xf]  ;;  %v13288_v32 = vld [vmem:[%s19040_s1 + $0x44] sm:$0xf0] }
  0x39   : > { %v10139_v28 = vor.u32 %v13285_v22, %v10136_v25  ;;  %v10302_v33 = vld [vmem:[%s19040_s1 + $0x140] sm:$0xf]  ;;  %v13328_v34 = vld [vmem:[%s19040_s1 + $0x144] sm:$0xf0]  ;;  %v13287_v37 = vld [vmem:[%s19040_s1 + $0x44] sm:$0xf]  ;;  %v10143_v39 = vor.u32 %v13288_v32, %v10142_v31 }
  0x3a   : > { %v10144_v38 = vld [vmem:[%s19040_s1 + $0x48] sm:$0xf0]  ;;  %v10303_v40 = vor.u32 %v13328_v34, %v10302_v33  ;;  %v13319_v44 = vld [vmem:[%s19040_s1 + $0x104] sm:$0xf]  ;;  %v10150_v47 = vld [vmem:[%s19040_s1 + $0x50] sm:$0xf] }
  0x3b   : > { %756 = vmatpush.bf16.msra.mxu0 %v14426_v35  ;;  %1159 = vmatpush.bf16.msra.mxu2 %v14426_v35  ;;  %v10147_v43 = vor.u32 %v13287_v37, %v10144_v38  ;;  %v10272_v45 = vld [vmem:[%s19040_s1 + $0x108] sm:$0xf0]  ;;  %v13290_v49 = vld [vmem:[%s19040_s1 + $0x54] sm:$0xf0]  ;;  %v10310_v50 = vld [vmem:[%s19040_s1 + $0x150] sm:$0xf] }
  0x3c   : > { %845 = vmatpush.bf16.msra.mxu1 %v14429_v36  ;;  %1248 = vmatpush.bf16.msra.mxu3 %v14429_v36  ;;  %v10275_v46 = vor.u32 %v13319_v44, %v10272_v45  ;;  %v13330_v51 = vld [vmem:[%s19040_s1 + $0x154] sm:$0xf0]  ;;  %v13289_v53 = vld [vmem:[%s19040_s1 + $0x54] sm:$0xf]  ;;  %v10152_v54 = vld [vmem:[%s19040_s1 + $0x58] sm:$0xf0] }
  0x3d   : > { %v13321_v58 = vld [vmem:[%s19040_s1 + $0x114] sm:$0xf]  ;;  %v10280_v59 = vld [vmem:[%s19040_s1 + $0x118] sm:$0xf0]  ;;  %v10158_v61 = vld [vmem:[%s19040_s1 + $0x60] sm:$0xf] }
  0x3e   : > { %v10283_v60 = vor.u32 %v13321_v58, %v10280_v59  ;;  %v13292_v62 = vld [vmem:[%s19040_s1 + $0x64] sm:$0xf0]  ;;  %v10318_v63 = vld [vmem:[%s19040_s1 + $0x160] sm:$0xf]  ;;  %v13323_v7 = vld [vmem:[%s19040_s1 + $0x124] sm:$0xf] }
  0x3f   : > { %757 = vmatpush.bf16.msra.mxu0 %v14438_v41  ;;  %1160 = vmatpush.bf16.msra.mxu2 %v14438_v41  ;;  %v10159_v3 = vor.u32 %v13292_v62, %v10158_v61  ;;  %v10288_v9 = vld [vmem:[%s19040_s1 + $0x128] sm:$0xf0]  ;;  %v13334_v16 = vld [vmem:[%s19040_s1 + $0x174] sm:$0xf0]  ;;  %v13293_v19 = vld [vmem:[%s19040_s1 + $0x74] sm:$0xf] }
  0x40   : > { %846 = vmatpush.bf16.msra.mxu1 %v14441_v42  ;;  %1249 = vmatpush.bf16.msra.mxu3 %v14441_v42  ;;  %v10291_v10 = vor.u32 %v13323_v7, %v10288_v9  ;;  %v10168_v20 = vld [vmem:[%s19040_s1 + $0x78] sm:$0xf0]  ;;  %v10174_v31 = vld [vmem:[%s19040_s1 + $0x80] sm:$0xf]  ;;  %v13296_v32 = vld [vmem:[%s19040_s1 + $0x84] sm:$0xf0] }
  0x41   : > { %v10171_v25 = vor.u32 %v13293_v19, %v10168_v20  ;;  %v10334_v33 = vld [vmem:[%s19040_s1 + $0x180] sm:$0xf]  ;;  %v13336_v34 = vld [vmem:[%s19040_s1 + $0x184] sm:$0xf0]  ;;  %v13295_v37 = vld [vmem:[%s19040_s1 + $0x84] sm:$0xf] }
  0x42   : > { %v10176_v38 = vld [vmem:[%s19040_s1 + $0x88] sm:$0xf0]  ;;  %v13298_v59 = vld [vmem:[%s19040_s1 + $0x94] sm:$0xf0]  ;;  %v13297_v62 = vld [vmem:[%s19040_s1 + $0x94] sm:$0xf] }
  0x43   : > { %758 = vmatpush.bf16.msra.mxu0 %v14453_v48  ;;  %1161 = vmatpush.bf16.msra.mxu2 %v14453_v48  ;;  %v10179_v44 = vor.u32 %v13295_v37, %v10176_v38  ;;  %v13338_v61 = vld [vmem:[%s19040_s1 + $0x194] sm:$0xf0]  ;;  %v13329_v9 = vld [vmem:[%s19040_s1 + $0x154] sm:$0xf]  ;;  %v10190_v20 = vld [vmem:[%s19040_s1 + $0xa0] sm:$0xf] }
  0x44   : > { %847 = vmatpush.bf16.msra.mxu1 %v14465_v52  ;;  %1250 = vmatpush.bf16.msra.mxu3 %v14465_v52 }
  0x46   : > { %759 = vmatmul.bf16.vlgmr.msra.gmra.mxu0 %v10111_v55  ;;  %1162 = vmatmul.bf16.vlgmr.msra.gmra.mxu2 %v10271_v56  ;;  %v10151_v55 = vor.u32 %v13290_v49, %v10150_v47  ;;  %v10311_v56 = vor.u32 %v13330_v51, %v10310_v50  ;;  %v13327_v47 = vld [vmem:[%s19040_s1 + $0x144] sm:$0xf]  ;;  %v10304_v49 = vld [vmem:[%s19040_s1 + $0x148] sm:$0xf0]  ;;  %v13358_v50 = vld [vmem:[%s19041_s2 + $0x78] sm:$0xff] }
  0x47   : > { %1832 = vmatpush.bf16.msrb.mxu2 %v14367_v4  ;;  %848 = vmatmul.bf16.vlgmr.msra.gmra.mxu1 %v10115_v57  ;;  %v10155_v57 = vor.u32 %v13289_v53, %v10152_v54  ;;  %v10307_v51 = vor.u32 %v13327_v47, %v10304_v49 }
  0x48   : > { %1921 = vmatpush.bf16.msrb.mxu3 %v14372_v8  ;;  %1413 = vmatpush.bf16.msrb.mxu0 %v13358_v50 }
  0x49   : > { %1251 = vmatmul.bf16.vlgmr.msra.gmra.mxu3 %v10275_v46 }
  0x4b   : > { %1833 = vmatpush.bf16.msrb.mxu2 %v14378_v11 }
  0x4c   : > { %1922 = vmatpush.bf16.msrb.mxu3 %v14381_v12 }
  0x4f   : > { %1834 = vmatpush.bf16.msrb.mxu2 %v14390_v17 }
  0x50   : > { %1923 = vmatpush.bf16.msrb.mxu3 %v14393_v18 }
  0x53   : > { %1835 = vmatpush.bf16.msrb.mxu2 %v14402_v23 }
  0x54   : > { %1924 = vmatpush.bf16.msrb.mxu3 %v14405_v24 }
  0x56   : > { %764 = vmatmul.bf16.gmra.mxu0 %v10119_v0  ;;  %1167 = vmatmul.bf16.gmra.mxu2 %v10279_v1  ;;  %v13332_v0 = vld [vmem:[%s19040_s1 + $0x164] sm:$0xf0]  ;;  %v13291_v1 = vld [vmem:[%s19040_s1 + $0x64] sm:$0xf] }
  0x57   : > { %1836 = vmatpush.bf16.msrb.mxu2 %v14414_v29  ;;  %853 = vmatmul.bf16.gmra.mxu1 %v10123_v2  ;;  %v10160_v2 = vld [vmem:[%s19040_s1 + $0x68] sm:$0xf0]  ;;  %v10319_v5 = vor.u32 %v13332_v0, %v10318_v63  ;;  %v10184_v63 = vld [vmem:[%s19040_s1 + $0x98] sm:$0xf0] }
  0x58   : > { %1925 = vmatpush.bf16.msrb.mxu3 %v14417_v30  ;;  %v10163_v6 = vor.u32 %v13291_v1, %v10160_v2 }
  0x59   : > { %1256 = vmatmul.bf16.gmra.mxu3 %v10283_v60  ;;  %v10342_v60 = vld [vmem:[%s19040_s1 + $0x190] sm:$0xf] }
  0x5a   : > { %v10343_v2 = vor.u32 %v13338_v61, %v10342_v60  ;;  %v13342_v60 = vld [vmem:[%s19040_s1 + $0x1b4] sm:$0xf0]  ;;  %v13301_v61 = vld [vmem:[%s19040_s1 + $0xb4] sm:$0xf] }
  0x5b   : > { %1837 = vmatpush.bf16.msrb.mxu2 %v14426_v35 }
  0x5c   : > { %1926 = vmatpush.bf16.msrb.mxu3 %v14429_v36 }
  0x5f   : > { %1838 = vmatpush.bf16.msrb.mxu2 %v14438_v41 }
  0x60   : > { %1927 = vmatpush.bf16.msrb.mxu3 %v14441_v42 }
  0x63   : > { %1839 = vmatpush.bf16.msrb.mxu2 %v14453_v48 }
  0x64   : > { %1928 = vmatpush.bf16.msrb.mxu3 %v14465_v52 }
  0x66   : > { %769 = vmatmul.bf16.gmra.mxu0 %v10127_v13  ;;  %1172 = vmatmul.bf16.gmra.mxu2 %v10287_v14  ;;  %v10166_v13 = vld [vmem:[%s19040_s1 + $0x70] sm:$0xf]  ;;  %v13294_v14 = vld [vmem:[%s19040_s1 + $0x74] sm:$0xf0] }
  0x67   : > { %2494 = vmatpush.bf16.msra.mxu2 %v14372_v8  ;;  %858 = vmatmul.bf16.gmra.mxu1 %v10131_v15  ;;  %v10326_v15 = vld [vmem:[%s19040_s1 + $0x170] sm:$0xf]  ;;  %v10167_v21 = vor.u32 %v13294_v14, %v10166_v13 }
  0x68   : > { %v10327_v22 = vor.u32 %v13334_v16, %v10326_v15 }
  0x69   : > { %1261 = vmatmul.bf16.gmra.mxu3 %v10291_v10  ;;  %v10312_v10 = vld [vmem:[%s19040_s1 + $0x158] sm:$0xf0] }
  0x6a   : > { %v10315_v13 = vor.u32 %v13329_v9, %v10312_v10  ;;  %v13333_v10 = vld [vmem:[%s19040_s1 + $0x174] sm:$0xf] }
  0x6b   : > { %2495 = vmatpush.bf16.msra.mxu2 %v14381_v12 }
  0x6f   : > { %2496 = vmatpush.bf16.msra.mxu2 %v14393_v18 }
  0x73   : > { %2497 = vmatpush.bf16.msra.mxu2 %v14405_v24 }
  0x76   : > { %774 = vmatmul.bf16.gmra.mxu0 %v10135_v26  ;;  %1177 = vmatmul.bf16.gmra.mxu2 %v10295_v27  ;;  %v13325_v26 = vld [vmem:[%s19040_s1 + $0x134] sm:$0xf]  ;;  %v10296_v27 = vld [vmem:[%s19040_s1 + $0x138] sm:$0xf0] }
  0x77   : > { %2498 = vmatpush.bf16.msra.mxu2 %v14417_v30  ;;  %863 = vmatmul.bf16.gmra.mxu1 %v10139_v28  ;;  %v10299_v28 = vor.u32 %v13325_v26, %v10296_v27  ;;  %v13340_v26 = vld [vmem:[%s19040_s1 + $0x1a4] sm:$0xf0]  ;;  %v13299_v27 = vld [vmem:[%s19040_s1 + $0xa4] sm:$0xf] }
  0x79   : > { %1266 = vmatmul.bf16.gmra.mxu3 %v10299_v28  ;;  %v10192_v28 = vld [vmem:[%s19040_s1 + $0xa8] sm:$0xf0] }
  0x7a   : > { %v10195_v37 = vor.u32 %v13299_v27, %v10192_v28  ;;  %v13304_v28 = vld [vmem:[%s19040_s1 + $0xc4] sm:$0xf0] }
  0x7b   : > { %2499 = vmatpush.bf16.msra.mxu2 %v14429_v36 }
  0x7f   : > { %2500 = vmatpush.bf16.msra.mxu2 %v14441_v42 }
  0x83   : > { %2501 = vmatpush.bf16.msra.mxu2 %v14465_v52 }
  0x86   : > { %779 = vmatmul.bf16.gmra.mxu0 %v10143_v39  ;;  %1182 = vmatmul.bf16.gmra.mxu2 %v10303_v40  ;;  %v10175_v39 = vor.u32 %v13296_v32, %v10174_v31  ;;  %v10335_v40 = vor.u32 %v13336_v34, %v10334_v33 }
  0x87   : > { %868 = vmatmul.bf16.gmra.mxu1 %v10147_v43 }
  0x89   : > { %1271 = vmatmul.bf16.gmra.mxu3 %v10307_v51 }
  0x96   : > { %784 = vmatmul.bf16.gmra.mxu0 %v10151_v55  ;;  %1187 = vmatmul.bf16.gmra.mxu2 %v10311_v56 }
  0x97   : > { %873 = vmatmul.bf16.gmra.mxu1 %v10155_v57  ;;  %v10182_v57 = vld [vmem:[%s19040_s1 + $0x90] sm:$0xf] }
  0x98   : > { %v10183_v1 = vor.u32 %v13298_v59, %v10182_v57  ;;  %v13302_v57 = vld [vmem:[%s19040_s1 + $0xb4] sm:$0xf0]  ;;  %v10358_v59 = vld [vmem:[%s19040_s1 + $0x1b0] sm:$0xf] }
  0x99   : > { %1276 = vmatmul.bf16.gmra.mxu3 %v10315_v13  ;;  %v10328_v13 = vld [vmem:[%s19040_s1 + $0x178] sm:$0xf0] }
  0xa6   : > { %789 = vmatmul.bf16.gmra.mxu0 %v10159_v3  ;;  %1192 = vmatmul.bf16.gmra.mxu2 %v10319_v5  ;;  %v10187_v5 = vor.u32 %v13297_v62, %v10184_v63  ;;  %v10200_v62 = vld [vmem:[%s19040_s1 + $0xb8] sm:$0xf0] }
  0xa7   : > { %878 = vmatmul.bf16.gmra.mxu1 %v10163_v6 }
  0xb6   : > { %794 = vmatmul.bf16.gmra.mxu0 %v10167_v21  ;;  %1197 = vmatmul.bf16.gmra.mxu2 %v10327_v22  ;;  %v13300_v22 = vld [vmem:[%s19040_s1 + $0xa4] sm:$0xf0] }
  0xb7   : > { %883 = vmatmul.bf16.gmra.mxu1 %v10171_v25  ;;  %v10350_v25 = vld [vmem:[%s19040_s1 + $0x1a0] sm:$0xf]  ;;  %v10191_v32 = vor.u32 %v13300_v22, %v10190_v20 }
  0xb8   : > { %v10351_v33 = vor.u32 %v13340_v26, %v10350_v25  ;;  %v10206_v26 = vld [vmem:[%s19040_s1 + $0xc0] sm:$0xf] }
  0xc3   : > { %v760_v43 = vpop.f32.mrf.mxu0 }
  0xc4   : > { %v849_v45 = vpop.f32.mrf.mxu1 }
  0xc5   : > { %v14670_v46 = vadd.f32 %v849_v45, %v760_v43  ;;  %v10320_v43 = vld [vmem:[%s19040_s1 + $0x168] sm:$0xf0] }
  0xc6   : > { %799 = vmatmul.bf16.gmra.mxu0 %v10175_v39  ;;  %1202 = vmatmul.bf16.gmra.mxu2 %v10335_v40  ;;  %v13331_v40 = vld [vmem:[%s19040_s1 + $0x164] sm:$0xf] }
  0xc7   : > { %888 = vmatmul.bf16.gmra.mxu1 %v10179_v44  ;;  %v13357_v44 = vld [vmem:[%s19041_s2 + $0x70] sm:$0xff]  ;;  %v10323_v45 = vor.u32 %v13331_v40, %v10320_v43  ;;  %v10207_v40 = vor.u32 %v13304_v28, %v10206_v26  ;;  %v13346_v26 = vld [vmem:[%s19040_s1 + $0x1d4] sm:$0xf0] }
  0xc8   : > { %1414 = vmatpush.bf16.msrb.mxu0 %v13357_v44  ;;  %v13305_v28 = vld [vmem:[%s19040_s1 + $0xd4] sm:$0xf] }
  0xc9   : > { %v14681_v53 = vpop.f32.mrf.mxu2  ;;  %1281 = vmatmul.bf16.gmra.mxu3 %v10323_v45 }
  0xcb   : > { %v762_v54 = vpop.f32.mrf.mxu0 }
  0xcc   : > { %v851_v55 = vpop.f32.mrf.mxu1 }
  0xcd   : > { %v14683_v56 = vadd.f32 %v851_v55, %v762_v54  ;;  %v10198_v54 = vld [vmem:[%s19040_s1 + $0xb0] sm:$0xf] }
  0xcf   : > { %v929_v58 = vpack.c.bf16 %v14683_v56, %v14670_v46  ;;  %v10518_v56 = vld [vmem:[%s19040_s1 + $0x210] sm:$0xf] }
  0xd1   : > { %v14705_v0 = vpop.f32.mrf.mxu2 }
  0xd3   : > { %v765_v3 = vpop.f32.mrf.mxu0 }
  0xd4   : > { %v854_v6 = vpop.f32.mrf.mxu1 }
  0xd5   : > { %v14707_v7 = vadd.f32 %v854_v6, %v765_v3 }
  0xd6   : > { %804 = vmatmul.bf16.gmra.mxu0 %v10183_v1  ;;  %1207 = vmatmul.bf16.gmra.mxu2 %v10343_v2  ;;  %v10199_v1 = vor.u32 %v13302_v57, %v10198_v54  ;;  %v10359_v2 = vor.u32 %v13342_v60, %v10358_v59  ;;  %v13318_v54 = vld [vmem:[%s19041_s2 + $0x38] sm:$0xff]  ;;  %v13335_v57 = vld [vmem:[%s19040_s1 + $0x184] sm:$0xf]  ;;  %v10336_v59 = vld [vmem:[%s19040_s1 + $0x188] sm:$0xf0] }
  0xd7   : > { %893 = vmatmul.bf16.gmra.mxu1 %v10187_v5  ;;  %v10203_v5 = vor.u32 %v13301_v61, %v10200_v62  ;;  %v13356_v60 = vld [vmem:[%s19041_s2 + $0x68] sm:$0xff]  ;;  %v10339_v61 = vor.u32 %v13335_v57, %v10336_v59 }
  0xd8   : > { %1550 = vmatpush.bf16.msrb.mxu1 %v13318_v54  ;;  %1415 = vmatpush.bf16.msrb.mxu0 %v13356_v60 }
  0xd9   : > { %v14715_v14 = vpop.f32.mrf.mxu2 }
  0xdb   : > { %v767_v15 = vpop.f32.mrf.mxu0 }
  0xdc   : > { %v856_v16 = vpop.f32.mrf.mxu1 }
  0xdd   : > { %v14717_v19 = vadd.f32 %v856_v16, %v767_v15  ;;  %v10331_v15 = vor.u32 %v13333_v10, %v10328_v13  ;;  %v10214_v10 = vld [vmem:[%s19040_s1 + $0xd0] sm:$0xf]  ;;  %v13316_v13 = vld [vmem:[%s19041_s2 + $0x28] sm:$0xff] }
  0xdf   : > { %v930_v21 = vpack.c.bf16 %v14717_v19, %v14707_v7  ;;  %1286 = vmatmul.bf16.gmra.mxu3 %v10331_v15  ;;  %v10526_v19 = vld [vmem:[%s19040_s1 + $0x220] sm:$0xf] }
  0xe1   : > { %v14739_v31 = vpop.f32.mrf.mxu2 }
  0xe3   : > { %v770_v34 = vpop.f32.mrf.mxu0 }
  0xe4   : > { %v859_v38 = vpop.f32.mrf.mxu1 }
  0xe5   : > { %v14741_v39 = vadd.f32 %v859_v38, %v770_v34  ;;  %v13303_v34 = vld [vmem:[%s19040_s1 + $0xc4] sm:$0xf] }
  0xe6   : > { %809 = vmatmul.bf16.gmra.mxu0 %v10191_v32  ;;  %1212 = vmatmul.bf16.gmra.mxu2 %v10351_v33  ;;  %v10366_v32 = vld [vmem:[%s19040_s1 + $0x1c0] sm:$0xf]  ;;  %v13344_v33 = vld [vmem:[%s19040_s1 + $0x1c4] sm:$0xf0] }
  0xe7   : > { %898 = vmatmul.bf16.gmra.mxu1 %v10195_v37  ;;  %v10208_v37 = vld [vmem:[%s19040_s1 + $0xc8] sm:$0xf0]  ;;  %v10367_v43 = vor.u32 %v13344_v33, %v10366_v32  ;;  %v10216_v32 = vld [vmem:[%s19040_s1 + $0xd8] sm:$0xf0] }
  0xe8   : > { %v10211_v45 = vor.u32 %v13303_v34, %v10208_v37 }
  0xe9   : > { %v14752_v47 = vpop.f32.mrf.mxu2 }
  0xeb   : > { %v772_v49 = vpop.f32.mrf.mxu0 }
  0xec   : > { %v861_v50 = vpop.f32.mrf.mxu1 }
  0xed   : > { %v14754_v51 = vadd.f32 %v861_v50, %v772_v49 }
  0xef   : > { %1291 = vmatmul.bf16.gmra.mxu3 %v10339_v61  ;;  %v13354_v61 = vld [vmem:[%s19041_s2 + $0x58] sm:$0xff] }
  0xf1   : > { %v14776_v63 = vpop.f32.mrf.mxu2 }
  0xf3   : > { %v775_v3 = vpop.f32.mrf.mxu0 }
  0xf4   : > { %v864_v6 = vpop.f32.mrf.mxu1 }
  0xf5   : > { %v14778_v9 = vadd.f32 %v864_v6, %v775_v3 }
  0xf6   : > { %814 = vmatmul.bf16.gmra.mxu0 %v10199_v1  ;;  %1217 = vmatmul.bf16.gmra.mxu2 %v10359_v2  ;;  %v13317_v1 = vld [vmem:[%s19041_s2 + $0x30] sm:$0xff] }
  0xf7   : > { %903 = vmatmul.bf16.gmra.mxu1 %v10203_v5  ;;  %v1252_v5 = vpop.f32.mrf.mxu3 }
  0xf8   : > { %1551 = vmatpush.bf16.msrb.mxu1 %v13317_v1  ;;  %v13337_v1 = vld [vmem:[%s19040_s1 + $0x194] sm:$0xf] }
  0xf9   : > { %v14786_v16 = vpop.f32.mrf.mxu2 }
  0xfb   : > { %v777_v20 = vpop.f32.mrf.mxu0 }
  0xfc   : > { %v866_v22 = vpop.f32.mrf.mxu1  ;;  %1552 = vmatpush.bf16.msrb.mxu1 %v13316_v13  ;;  %v13313_v13 = vld [vmem:[%s19041_s2 + $0x10] sm:$0xff] }
  0xfd   : > { %v14788_v25 = vadd.f32 %v866_v22, %v777_v20  ;;  %v13306_v20 = vld [vmem:[%s19040_s1 + $0xd4] sm:$0xf0]  ;;  %v10374_v22 = vld [vmem:[%s19040_s1 + $0x1d0] sm:$0xf] }
  0xfe   : > { %v10215_v34 = vor.u32 %v13306_v20, %v10214_v10  ;;  %v10375_v37 = vor.u32 %v13346_v26, %v10374_v22  ;;  %v13353_v10 = vld [vmem:[%s19041_s2 + $0x50] sm:$0xff] }
  0xff   : > { %v1254_v57 = vpop.f32.mrf.mxu3 }
 0x100   : > { %v14870_v60 = vadd.f32 %v1254_v57, %v14705_v0  ;;  %v10344_v0 = vld [vmem:[%s19040_s1 + $0x198] sm:$0xf0]  ;;  %v10224_v57 = vld [vmem:[%s19040_s1 + $0xe8] sm:$0xf0] }
 0x101   : > { %v14810_v38 = vpop.f32.mrf.mxu2 }
 0x103   : > { %v780_v44 = vpop.f32.mrf.mxu0 }
 0x104   : > { %v869_v49 = vpop.f32.mrf.mxu1 }
 0x105   : > { %v14812_v50 = vadd.f32 %v869_v49, %v780_v44  ;;  %v14865_v49 = vadd.f32 %v1252_v5, %v14681_v53  ;;  %v13314_v53 = vld [vmem:[%s19041_s2 + $0x18] sm:$0xff] }
 0x106   : > { %819 = vmatmul.bf16.gmra.mxu0 %v10207_v40  ;;  %1222 = vmatmul.bf16.gmra.mxu2 %v10367_v43  ;;  %v13355_v40 = vld [vmem:[%s19041_s2 + $0x60] sm:$0xff] }
 0x107   : > { %908 = vmatmul.bf16.gmra.mxu1 %v10211_v45  ;;  %v13315_v43 = vld [vmem:[%s19041_s2 + $0x20] sm:$0xff]  ;;  %v10219_v45 = vor.u32 %v13305_v28, %v10216_v32  ;;  %1416 = vmatpush.bf16.msrb.mxu0 %v13355_v40  ;;  %v1257_v26 = vpop.f32.mrf.mxu3 }
 0x108   : > { %1553 = vmatpush.bf16.msrb.mxu1 %v13315_v43  ;;  %v10222_v32 = vld [vmem:[%s19040_s1 + $0xe0] sm:$0xf]  ;;  %v13308_v43 = vld [vmem:[%s19040_s1 + $0xe4] sm:$0xf0] }
 0x109   : > { %v14826_v62 = vpop.f32.mrf.mxu2 }
 0x10b   : > { %v782_v2 = vpop.f32.mrf.mxu0  ;;  %1417 = vmatpush.bf16.msrb.mxu0 %v13354_v61 }
 0x10c   : > { %v871_v3 = vpop.f32.mrf.mxu1  ;;  %1554 = vmatpush.bf16.msrb.mxu1 %v13314_v53  ;;  %v10223_v53 = vor.u32 %v13308_v43, %v10222_v32  ;;  %v13339_v43 = vld [vmem:[%s19040_s1 + $0x1a4] sm:$0xf] }
 0x10d   : > { %v14831_v6 = vadd.f32 %v871_v3, %v782_v2  ;;  %v1332_v2 = vpack.c.bf16 %v14870_v60, %v14865_v49  ;;  %v10347_v3 = vor.u32 %v13337_v1, %v10344_v0  ;;  %v13351_v0 = vld [vmem:[%s19041_s2 + $0x40] sm:$0xff] }
 0x10f   : > { %1296 = vmatmul.bf16.gmra.mxu3 %v10347_v3  ;;  %1418 = vmatpush.bf16.msrb.mxu0 %v13353_v10  ;;  %v13311_v3 = vld [vmem:[%s19041_s2] sm:$0xff] }
 0x110   : > { %1555 = vmatpush.bf16.msrb.mxu1 %v13313_v13 }
 0x111   : > { %v14856_v33 = vpop.f32.mrf.mxu2 }
 0x113   : > { %v785_v44 = vpop.f32.mrf.mxu0 }
 0x114   : > { %v874_v54 = vpop.f32.mrf.mxu1 }
 0x115   : > { %v14867_v59 = vadd.f32 %v874_v54, %v785_v44  ;;  %v10382_v44 = vld [vmem:[%s19040_s1 + $0x1e0] sm:$0xf]  ;;  %v13307_v54 = vld [vmem:[%s19040_s1 + $0xe4] sm:$0xf] }
 0x116   : > { %824 = vmatmul.bf16.gmra.mxu0 %v10215_v34  ;;  %1227 = vmatmul.bf16.gmra.mxu2 %v10375_v37  ;;  %v13352_v34 = vld [vmem:[%s19041_s2 + $0x48] sm:$0xff]  ;;  %v10227_v13 = vor.u32 %v13307_v54, %v10224_v57 }
 0x117   : > { %913 = vmatmul.bf16.gmra.mxu1 %v10219_v45  ;;  %v13312_v37 = vld [vmem:[%s19041_s2 + $0x8] sm:$0xff]  ;;  %1419 = vmatpush.bf16.msrb.mxu0 %v13352_v34  ;;  %v1259_v34 = vpop.f32.mrf.mxu3 }
 0x118   : > { %v13348_v45 = vld [vmem:[%s19040_s1 + $0x1e4] sm:$0xf0]  ;;  %1556 = vmatpush.bf16.msrb.mxu1 %v13312_v37  ;;  %v14936_v32 = vadd.f32 %v1259_v34, %v14739_v31  ;;  %v10232_v34 = vld [vmem:[%s19040_s1 + $0xf8] sm:$0xf0] }
 0x119   : > { %v14886_v5 = vpop.f32.mrf.mxu2  ;;  %v10383_v1 = vor.u32 %v13348_v45, %v10382_v44 }
 0x11b   : > { %v787_v20 = vpop.f32.mrf.mxu0  ;;  %1420 = vmatpush.bf16.msrb.mxu0 %v13351_v0 }
 0x11c   : > { %v876_v22 = vpop.f32.mrf.mxu1  ;;  %1557 = vmatpush.bf16.msrb.mxu1 %v13311_v3  ;;  %v13310_v3 = vld [vmem:[%s19040_s1 + $0xf4] sm:$0xf0] }
 0x11d   : > { %v14894_v28 = vadd.f32 %v876_v22, %v787_v20  ;;  %v14931_v20 = vadd.f32 %v1257_v26, %v14715_v14  ;;  %v10352_v14 = vld [vmem:[%s19040_s1 + $0x1a8] sm:$0xf0] }
 0x11e   : > { %v10355_v44 = vor.u32 %v13339_v43, %v10352_v14 }
 0x11f   : > { %v1333_v26 = vpack.c.bf16 %v14936_v32, %v14931_v20  ;;  %v1262_v57 = vpop.f32.mrf.mxu3 }
 0x120   : > { %2405 = vmatpush.bf16.msra.mxu1 %v14367_v4  ;;  %1301 = vmatmul.bf16.gmra.mxu3 %v10355_v44  ;;  %v14977_v0 = vadd.f32 %v1262_v57, %v14752_v47  ;;  %v10360_v47 = vld [vmem:[%s19040_s1 + $0x1b8] sm:$0xf0] }
 0x121   : > { %v14922_v61 = vpop.f32.mrf.mxu2 }
 0x123   : > { %v790_v10 = vpop.f32.mrf.mxu0 }
 0x124   : > { %v879_v22 = vpop.f32.mrf.mxu1  ;;  %2406 = vmatpush.bf16.msra.mxu1 %v14378_v11 }
 0x125   : > { %v14933_v37 = vadd.f32 %v879_v22, %v790_v10  ;;  %v10390_v10 = vld [vmem:[%s19040_s1 + $0x1f0] sm:$0xf]  ;;  %v13309_v22 = vld [vmem:[%s19040_s1 + $0xf4] sm:$0xf] }
 0x126   : > { %829 = vmatmul.bf16.gmra.mxu0 %v10223_v53  ;;  %1232 = vmatmul.bf16.gmra.mxu2 %v10383_v1  ;;  %v10230_v1 = vld [vmem:[%s19040_s1 + $0xf0] sm:$0xf] }
 0x127   : > { %918 = vmatmul.bf16.gmra.mxu1 %v10227_v13  ;;  %v13350_v13 = vld [vmem:[%s19040_s1 + $0x1f4] sm:$0xf0]  ;;  %v10231_v14 = vor.u32 %v13310_v3, %v10230_v1  ;;  %v1264_v15 = vpop.f32.mrf.mxu3  ;;  %v13341_v1 = vld [vmem:[%s19040_s1 + $0x1b4] sm:$0xf] }
 0x128   : > { %2407 = vmatpush.bf16.msra.mxu1 %v14390_v17  ;;  %v10391_v44 = vor.u32 %v13350_v13, %v10390_v10  ;;  %v14982_v55 = vadd.f32 %v1264_v15, %v14776_v63  ;;  %v10363_v57 = vor.u32 %v13341_v1, %v10360_v47 }
 0x129   : > { %v14947_v45 = vpop.f32.mrf.mxu2 }
 0x12b   : > { %v792_v31 = vpop.f32.mrf.mxu0 }
 0x12c   : > { %v881_v54 = vpop.f32.mrf.mxu1  ;;  %2408 = vmatpush.bf16.msra.mxu1 %v14402_v23 }
 0x12d   : > { %v14950_v53 = vadd.f32 %v881_v54, %v792_v31  ;;  %v10235_v54 = vor.u32 %v13309_v22, %v10232_v34  ;;  %v10510_v34 = vld [vmem:[%s19040_s1 + $0x200] sm:$0xf] }
 0x12f   : > { %v1267_v10 = vpop.f32.mrf.mxu3 }
 0x130   : > { %2409 = vmatpush.bf16.msra.mxu1 %v14414_v29  ;;  %1306 = vmatmul.bf16.gmra.mxu3 %v10363_v57  ;;  %v15011_v1 = vadd.f32 %v1267_v10, %v14786_v16  ;;  %v10368_v16 = vld [vmem:[%s19040_s1 + $0x1c8] sm:$0xf0] }
 0x131   : > { %v14973_v43 = vpop.f32.mrf.mxu2 }
 0x133   : > { %v795_v31 = vpop.f32.mrf.mxu0 }
 0x134   : > { %v884_v40 = vpop.f32.mrf.mxu1  ;;  %2410 = vmatpush.bf16.msra.mxu1 %v14426_v35 }
 0x135   : > { %v14979_v27 = vadd.f32 %v884_v40, %v795_v31  ;;  %v1334_v40 = vpack.c.bf16 %v14982_v55, %v14977_v0 }
 0x136   : > { %834 = vmatmul.bf16.gmra.mxu0 %v10231_v14  ;;  %1237 = vmatmul.bf16.gmra.mxu2 %v10391_v44  ;;  %v13360_v14 = vld [vmem:[%s19040_s1 + $0x204] sm:$0xf0] }
 0x137   : > { %923 = vmatmul.bf16.gmra.mxu1 %v10235_v54  ;;  %v10511_v31 = vor.u32 %v13360_v14, %v10510_v34  ;;  %v1269_v57 = vpop.f32.mrf.mxu3  ;;  %v13343_v34 = vld [vmem:[%s19040_s1 + $0x1c4] sm:$0xf] }
 0x138   : > { %2411 = vmatpush.bf16.msra.mxu1 %v14438_v41  ;;  %v10371_v10 = vor.u32 %v13343_v34, %v10368_v16 }
 0x139   : > { %v14993_v3 = vpop.f32.mrf.mxu2 }
 0x13b   : > { %v797_v63 = vpop.f32.mrf.mxu0 }
 0x13c   : > { %v886_v15 = vpop.f32.mrf.mxu1  ;;  %2412 = vmatpush.bf16.msra.mxu1 %v14453_v48 }
 0x13d   : > { %v14996_v13 = vadd.f32 %v886_v15, %v797_v63  ;;  %v15016_v15 = vadd.f32 %v1269_v57, %v14810_v38 }
 0x13f   : > { %v936_v22 = vpack.c.bf16 %v14996_v13, %v14979_v27  ;;  %v1335_v38 = vpack.c.bf16 %v15016_v15, %v15011_v1  ;;  %v1272_v14 = vpop.f32.mrf.mxu3  ;;  %v10574_v27 = vld [vmem:[%s19040_s1 + $0x280] sm:$0xf]  ;;  %v13376_v13 = vld [vmem:[%s19040_s1 + $0x284] sm:$0xf0] }
 0x140   : > { %1311 = vmatmul.bf16.gmra.mxu3 %v10371_v10  ;;  %v15050_v34 = vadd.f32 %v1272_v14, %v14826_v62  ;;  %v10376_v62 = vld [vmem:[%s19040_s1 + $0x1d8] sm:$0xf0] }
 0x141   : > { %v15007_v44 = vpop.f32.mrf.mxu2 }
 0x143   : > { %v800_v54 = vpop.f32.mrf.mxu0 }
 0x144   : > { %v889_v47 = vpop.f32.mrf.mxu1 }
 0x145   : > { %v15013_v63 = vadd.f32 %v889_v47, %v800_v54 }
 0x146   : > { %1421 = vmatmul.bf16.vlgmr.msrb.gmra.mxu0 %v1332_v2  ;;  %1840 = vmatmul.bf16.vlgmr.msrb.gmra.mxu2 %v10511_v31 }
 0x147   : > { %1558 = vmatmul.bf16.vlgmr.msrb.gmra.mxu1 %v929_v58  ;;  %v13362_v58 = vld [vmem:[%s19040_s1 + $0x214] sm:$0xf0]  ;;  %v1274_v10 = vpop.f32.mrf.mxu3 }
 0x148   : > { %3067 = vmatpush.bf16.msrb.mxu1 %v14372_v8  ;;  %v10519_v47 = vor.u32 %v13362_v58, %v10518_v56  ;;  %v13345_v56 = vld [vmem:[%s19040_s1 + $0x1d4] sm:$0xf] }
 0x149   : > { %v15033_v49 = vpop.f32.mrf.mxu2  ;;  %v10379_v14 = vor.u32 %v13345_v56, %v10376_v62 }
 0x14b   : > { %v802_v60 = vpop.f32.mrf.mxu0 }
 0x14c   : > { %v891_v2 = vpop.f32.mrf.mxu1  ;;  %3068 = vmatpush.bf16.msrb.mxu1 %v14381_v12 }
 0x14d   : > { %v15036_v31 = vadd.f32 %v891_v2, %v802_v60  ;;  %v15056_v2 = vadd.f32 %v1274_v10, %v14856_v33 }
 0x14f   : > { %v937_v46 = vpack.c.bf16 %v15036_v31, %v15013_v63  ;;  %v1336_v33 = vpack.c.bf16 %v15056_v2, %v15050_v34  ;;  %v1277_v58 = vpop.f32.mrf.mxu3  ;;  %v10582_v63 = vld [vmem:[%s19040_s1 + $0x290] sm:$0xf]  ;;  %v13378_v31 = vld [vmem:[%s19040_s1 + $0x294] sm:$0xf0] }
 0x150   : > { %3069 = vmatpush.bf16.msrb.mxu1 %v14393_v18  ;;  %1316 = vmatmul.bf16.gmra.mxu3 %v10379_v14  ;;  %v15090_v56 = vadd.f32 %v1277_v58, %v14886_v5  ;;  %v10384_v5 = vld [vmem:[%s19040_s1 + $0x1e8] sm:$0xf0]  ;;  %v19075_v58 = vpack.c.bf16 %v14754_v51, %v14741_v39  ;;  %v10534_v39 = vld [vmem:[%s19040_s1 + $0x230] sm:$0xf]  ;;  %v13366_v51 = vld [vmem:[%s19040_s1 + $0x234] sm:$0xf0] }
 0x151   : > { %v15047_v54 = vpop.f32.mrf.mxu2 }
 0x153   : > { %v805_v57 = vpop.f32.mrf.mxu0 }
 0x154   : > { %v894_v16 = vpop.f32.mrf.mxu1  ;;  %3070 = vmatpush.bf16.msrb.mxu1 %v14405_v24 }
 0x155   : > { %v15053_v60 = vadd.f32 %v894_v16, %v805_v57 }
 0x156   : > { %1426 = vmatmul.bf16.gmra.mxu0 %v1333_v26  ;;  %1845 = vmatmul.bf16.gmra.mxu2 %v10519_v47 }
 0x157   : > { %1563 = vmatmul.bf16.gmra.mxu1 %v930_v21  ;;  %v13364_v21 = vld [vmem:[%s19040_s1 + $0x224] sm:$0xf0]  ;;  %v1279_v14 = vpop.f32.mrf.mxu3 }
 0x158   : > { %3071 = vmatpush.bf16.msrb.mxu1 %v14417_v30  ;;  %v10527_v16 = vor.u32 %v13364_v21, %v10526_v19  ;;  %v13347_v19 = vld [vmem:[%s19040_s1 + $0x1e4] sm:$0xf] }
 0x159   : > { %v15073_v20 = vpop.f32.mrf.mxu2  ;;  %v10387_v21 = vor.u32 %v13347_v19, %v10384_v5  ;;  %v10535_v19 = vor.u32 %v13366_v51, %v10534_v39  ;;  %v13349_v39 = vld [vmem:[%s19040_s1 + $0x1f4] sm:$0xf] }
 0x15b   : > { %v807_v32 = vpop.f32.mrf.mxu0 }
 0x15c   : > { %v896_v26 = vpop.f32.mrf.mxu1  ;;  %3072 = vmatpush.bf16.msrb.mxu1 %v14429_v36 }
 0x15d   : > { %v15076_v47 = vadd.f32 %v896_v26, %v807_v32  ;;  %v15096_v26 = vadd.f32 %v1279_v14, %v14922_v61 }
 0x15f   : > { %v938_v7 = vpack.c.bf16 %v15076_v47, %v15053_v60  ;;  %v1337_v61 = vpack.c.bf16 %v15096_v26, %v15090_v56  ;;  %v13380_v60 = vld [vmem:[%s19040_s1 + $0x2a4] sm:$0xf0] }
 0x160   : > { %3073 = vmatpush.bf16.msrb.mxu1 %v14441_v42  ;;  %1321 = vmatmul.bf16.gmra.mxu3 %v10387_v21 }
 0x161   : > { %v15087_v57 = vpop.f32.mrf.mxu2 }
 0x163   : > { %v810_v10 = vpop.f32.mrf.mxu0 }
 0x164   : > { %v899_v62 = vpop.f32.mrf.mxu1  ;;  %3074 = vmatpush.bf16.msrb.mxu1 %v14465_v52 }
 0x165   : > { %v15093_v32 = vadd.f32 %v899_v62, %v810_v10 }
 0x166   : > { %1431 = vmatmul.bf16.gmra.mxu0 %v1334_v40  ;;  %1850 = vmatmul.bf16.gmra.mxu2 %v10527_v16  ;;  %v1282_v40 = vpop.f32.mrf.mxu3 }
 0x167   : > { %1568 = vmatmul.bf16.gmra.mxu1 %v19075_v58  ;;  %v15127_v58 = vadd.f32 %v1282_v40, %v14947_v45  ;;  %v10392_v45 = vld [vmem:[%s19040_s1 + $0x1f8] sm:$0xf0]  ;;  %v19076_v40 = vpack.c.bf16 %v14788_v25, %v14778_v9  ;;  %v10542_v9 = vld [vmem:[%s19040_s1 + $0x240] sm:$0xf]  ;;  %v13368_v25 = vld [vmem:[%s19040_s1 + $0x244] sm:$0xf0] }
 0x168   : > { %v10395_v51 = vor.u32 %v13349_v39, %v10392_v45  ;;  %v10543_v39 = vor.u32 %v13368_v25, %v10542_v9  ;;  %v13359_v9 = vld [vmem:[%s19040_s1 + $0x204] sm:$0xf] }
 0x169   : > { %v15112_v10 = vpop.f32.mrf.mxu2 }
 0x16b   : > { %v812_v55 = vpop.f32.mrf.mxu0 }
 0x16c   : > { %v901_v0 = vpop.f32.mrf.mxu1 }
 0x16d   : > { %v15114_v16 = vadd.f32 %v901_v0, %v812_v55 }
 0x16e   : > { %v1284_v55 = vpop.f32.mrf.mxu3 }
 0x16f   : > { %v15132_v62 = vadd.f32 %v1284_v55, %v14973_v43 }
 0x170   : > { %1326 = vmatmul.bf16.gmra.mxu3 %v10395_v51 }
 0x171   : > { %v15124_v14 = vpop.f32.mrf.mxu2  ;;  %v1338_v43 = vpack.c.bf16 %v15132_v62, %v15127_v58 }
 0x173   : > { %v815_v5 = vpop.f32.mrf.mxu0 }
 0x174   : > { %v904_v21 = vpop.f32.mrf.mxu1 }
 0x175   : > { %v15129_v0 = vadd.f32 %v904_v21, %v815_v5 }
 0x176   : > { %1436 = vmatmul.bf16.gmra.mxu0 %v1335_v38  ;;  %1855 = vmatmul.bf16.gmra.mxu2 %v10535_v19  ;;  %v1287_v38 = vpop.f32.mrf.mxu3 }
 0x177   : > { %1573 = vmatmul.bf16.gmra.mxu1 %v19076_v40  ;;  %v15163_v40 = vadd.f32 %v1287_v38, %v14993_v3  ;;  %v10512_v3 = vld [vmem:[%s19040_s1 + $0x208] sm:$0xf0]  ;;  %v19077_v38 = vpack.c.bf16 %v14831_v6, %v14812_v50  ;;  %v10550_v50 = vld [vmem:[%s19040_s1 + $0x250] sm:$0xf]  ;;  %v13370_v6 = vld [vmem:[%s19040_s1 + $0x254] sm:$0xf0] }
 0x178   : > { %v10515_v25 = vor.u32 %v13359_v9, %v10512_v3  ;;  %v10551_v9 = vor.u32 %v13370_v6, %v10550_v50  ;;  %v13361_v50 = vld [vmem:[%s19040_s1 + $0x214] sm:$0xf] }
 0x179   : > { %v15148_v5 = vpop.f32.mrf.mxu2 }
 0x17b   : > { %v817_v1 = vpop.f32.mrf.mxu0 }
 0x17c   : > { %v906_v15 = vpop.f32.mrf.mxu1 }
 0x17d   : > { %v15150_v19 = vadd.f32 %v906_v15, %v817_v1 }
 0x17e   : > { %v1289_v1 = vpop.f32.mrf.mxu3 }
 0x17f   : > { %v15168_v21 = vadd.f32 %v1289_v1, %v15007_v44 }
 0x180   : > { %1929 = vmatmul.bf16.vlgmr.msrb.gmra.mxu3 %v10515_v25 }
 0x181   : > { %v15160_v55 = vpop.f32.mrf.mxu2  ;;  %v1339_v44 = vpack.c.bf16 %v15168_v21, %v15163_v40 }
 0x183   : > { %v820_v45 = vpop.f32.mrf.mxu0 }
 0x184   : > { %v909_v51 = vpop.f32.mrf.mxu1 }
 0x185   : > { %v15165_v15 = vadd.f32 %v909_v51, %v820_v45 }
 0x186   : > { %1441 = vmatmul.bf16.gmra.mxu0 %v1336_v33  ;;  %1860 = vmatmul.bf16.gmra.mxu2 %v10543_v39  ;;  %v1292_v33 = vpop.f32.mrf.mxu3 }
 0x187   : > { %1578 = vmatmul.bf16.gmra.mxu1 %v19077_v38  ;;  %v15199_v38 = vadd.f32 %v1292_v33, %v15033_v49  ;;  %v10520_v49 = vld [vmem:[%s19040_s1 + $0x218] sm:$0xf0]  ;;  %v19078_v33 = vpack.c.bf16 %v14894_v28, %v14867_v59  ;;  %v10558_v59 = vld [vmem:[%s19040_s1 + $0x260] sm:$0xf]  ;;  %v13372_v28 = vld [vmem:[%s19040_s1 + $0x264] sm:$0xf0] }
 0x188   : > { %v10523_v6 = vor.u32 %v13361_v50, %v10520_v49  ;;  %v10559_v50 = vor.u32 %v13372_v28, %v10558_v59  ;;  %v13363_v59 = vld [vmem:[%s19040_s1 + $0x224] sm:$0xf] }
 0x189   : > { %v15184_v45 = vpop.f32.mrf.mxu2 }
 0x18b   : > { %v822_v34 = vpop.f32.mrf.mxu0 }
 0x18c   : > { %v911_v2 = vpop.f32.mrf.mxu1 }
 0x18d   : > { %v15186_v39 = vadd.f32 %v911_v2, %v822_v34 }
 0x18e   : > { %v1294_v34 = vpop.f32.mrf.mxu3 }
 0x18f   : > { %v15204_v51 = vadd.f32 %v1294_v34, %v15047_v54 }
 0x190   : > { %1934 = vmatmul.bf16.gmra.mxu3 %v10523_v6 }
 0x191   : > { %v15196_v1 = vpop.f32.mrf.mxu2  ;;  %v1340_v54 = vpack.c.bf16 %v15204_v51, %v15199_v38  ;;  %v13398_v51 = vld [vmem:[%s19041_s2 + $0xb8] sm:$0xff] }
 0x192   : > { %2091 = vmatpush.bf16.msra.mxu0 %v13398_v51 }
 0x193   : > { %v825_v3 = vpop.f32.mrf.mxu0 }
 0x194   : > { %v914_v25 = vpop.f32.mrf.mxu1 }
 0x195   : > { %v15201_v2 = vadd.f32 %v914_v25, %v825_v3 }
 0x196   : > { %1446 = vmatmul.bf16.gmra.mxu0 %v1337_v61  ;;  %1865 = vmatmul.bf16.gmra.mxu2 %v10551_v9  ;;  %v1297_v9 = vpop.f32.mrf.mxu3 }
 0x197   : > { %1583 = vmatmul.bf16.gmra.mxu1 %v19078_v33  ;;  %v15235_v6 = vadd.f32 %v1297_v9, %v15073_v20  ;;  %v10528_v20 = vld [vmem:[%s19040_s1 + $0x228] sm:$0xf0]  ;;  %v19079_v9 = vpack.c.bf16 %v14950_v53, %v14933_v37  ;;  %v10566_v37 = vld [vmem:[%s19040_s1 + $0x270] sm:$0xf]  ;;  %v13374_v53 = vld [vmem:[%s19040_s1 + $0x274] sm:$0xf0] }
 0x198   : > { %v10531_v28 = vor.u32 %v13363_v59, %v10528_v20  ;;  %v10567_v59 = vor.u32 %v13374_v53, %v10566_v37  ;;  %v13365_v37 = vld [vmem:[%s19040_s1 + $0x234] sm:$0xf] }
 0x199   : > { %v15220_v3 = vpop.f32.mrf.mxu2 }
 0x19b   : > { %v827_v56 = vpop.f32.mrf.mxu0 }
 0x19c   : > { %v916_v26 = vpop.f32.mrf.mxu1 }
 0x19d   : > { %v15222_v61 = vadd.f32 %v916_v26, %v827_v56 }
 0x19e   : > { %v1299_v26 = vpop.f32.mrf.mxu3 }
 0x19f   : > { %v15243_v25 = vadd.f32 %v1299_v26, %v15087_v57 }
 0x1a0   : > { %1939 = vmatmul.bf16.gmra.mxu3 %v10531_v28 }
 0x1a1   : > { %v15232_v34 = vpop.f32.mrf.mxu2  ;;  %v1341_v62 = vpack.c.bf16 %v15243_v25, %v15235_v6 }
 0x1a3   : > { %v830_v49 = vpop.f32.mrf.mxu0 }
 0x1a4   : > { %v919_v33 = vpop.f32.mrf.mxu1 }
 0x1a5   : > { %v15237_v56 = vadd.f32 %v919_v33, %v830_v49 }
 0x1a6   : > { %1451 = vmatmul.bf16.gmra.mxu0 %v1338_v43  ;;  %1870 = vmatmul.bf16.gmra.mxu2 %v10559_v50  ;;  %v1302_v49 = vpop.f32.mrf.mxu3 }
 0x1a7   : > { %1588 = vmatmul.bf16.gmra.mxu1 %v19079_v9  ;;  %v15271_v28 = vadd.f32 %v1302_v49, %v15112_v10  ;;  %v10536_v10 = vld [vmem:[%s19040_s1 + $0x238] sm:$0xf0] }
 0x1a8   : > { %v10539_v49 = vor.u32 %v13365_v37, %v10536_v10 }
 0x1a9   : > { %v15256_v58 = vpop.f32.mrf.mxu2 }
 0x1ab   : > { %v832_v57 = vpop.f32.mrf.mxu0 }
 0x1ac   : > { %v921_v43 = vpop.f32.mrf.mxu1 }
 0x1ad   : > { %v15258_v50 = vadd.f32 %v921_v43, %v832_v57 }
 0x1ae   : > { %v1304_v43 = vpop.f32.mrf.mxu3 }
 0x1af   : > { %v15279_v33 = vadd.f32 %v1304_v43, %v15124_v14 }
 0x1b0   : > { %1944 = vmatmul.bf16.gmra.mxu3 %v10539_v49 }
 0x1b1   : > { %v15268_v26 = vpop.f32.mrf.mxu2  ;;  %v1342_v21 = vpack.c.bf16 %v15279_v33, %v15271_v28  ;;  %v13397_v33 = vld [vmem:[%s19041_s2 + $0xb0] sm:$0xff] }
 0x1b2   : > { %2092 = vmatpush.bf16.msra.mxu0 %v13397_v33 }
 0x1b3   : > { %v835_v20 = vpop.f32.mrf.mxu0 }
 0x1b4   : > { %v924_v9 = vpop.f32.mrf.mxu1 }
 0x1b5   : > { %v15273_v57 = vadd.f32 %v924_v9, %v835_v20  ;;  %v10575_v9 = vor.u32 %v13376_v13, %v10574_v27  ;;  %v13367_v27 = vld [vmem:[%s19040_s1 + $0x244] sm:$0xf] }
 0x1b6   : > { %1456 = vmatmul.bf16.gmra.mxu0 %v1339_v44  ;;  %1875 = vmatmul.bf16.gmra.mxu2 %v10567_v59  ;;  %v1307_v59 = vpop.f32.mrf.mxu3 }
 0x1b7   : > { %1593 = vmatmul.bf16.gmra.mxu1 %v936_v22  ;;  %v15307_v10 = vadd.f32 %v1307_v59, %v15148_v5  ;;  %v10544_v5 = vld [vmem:[%s19040_s1 + $0x248] sm:$0xf0] }
 0x1b8   : > { %v10547_v38 = vor.u32 %v13367_v27, %v10544_v5 }
 0x1b9   : > { %v15292_v40 = vpop.f32.mrf.mxu2 }
 0x1bb   : > { %v837_v14 = vpop.f32.mrf.mxu0 }
 0x1bc   : > { %v926_v44 = vpop.f32.mrf.mxu1 }
 0x1bd   : > { %v15294_v53 = vadd.f32 %v926_v44, %v837_v14 }
 0x1be   : > { %v1309_v14 = vpop.f32.mrf.mxu3 }
 0x1bf   : > { %v944_v20 = vpack.c.bf16 %v15294_v53, %v15273_v57  ;;  %v15315_v44 = vadd.f32 %v1309_v14, %v15160_v55  ;;  %v13399_v57 = vld [vmem:[%s19040_s1 + $0x304] sm:$0xf]  ;;  %v10720_v53 = vld [vmem:[%s19040_s1 + $0x308] sm:$0xf0] }
 0x1c0   : > { %1949 = vmatmul.bf16.gmra.mxu3 %v10547_v38 }
 0x1c1   : > { %v15304_v22 = vpop.f32.mrf.mxu2  ;;  %v1343_v55 = vpack.c.bf16 %v15315_v44, %v15307_v10 }
 0x1c3   : > { %v1422_v43 = vpop.f32.mrf.mxu0 }
 0x1c4   : > { %v1559_v37 = vpop.f32.mrf.mxu1 }
 0x1c5   : > { %v15309_v49 = vadd.f32 %v1559_v37, %v1422_v43  ;;  %v10583_v37 = vor.u32 %v13378_v31, %v10582_v63 }
 0x1c6   : > { %1461 = vmatmul.bf16.gmra.mxu0 %v1340_v54  ;;  %1880 = vmatmul.bf16.gmra.mxu2 %v10575_v9  ;;  %v1312_v43 = vpop.f32.mrf.mxu3 }
 0x1c7   : > { %1598 = vmatmul.bf16.gmra.mxu1 %v937_v46  ;;  %v15344_v5 = vadd.f32 %v1312_v43, %v15184_v45  ;;  %v10552_v45 = vld [vmem:[%s19040_s1 + $0x258] sm:$0xf0] }
 0x1c9   : > { %v15331_v54 = vpop.f32.mrf.mxu2 }
 0x1cb   : > { %v1424_v59 = vpop.f32.mrf.mxu0 }
 0x1cc   : > { %v1561_v13 = vpop.f32.mrf.mxu1 }
 0x1cd   : > { %v15333_v9 = vadd.f32 %v1561_v13, %v1424_v59  ;;  %v13369_v13 = vld [vmem:[%s19040_s1 + $0x254] sm:$0xf] }
 0x1ce   : > { %v1314_v38 = vpop.f32.mrf.mxu3  ;;  %v10555_v43 = vor.u32 %v13369_v13, %v10552_v45 }
 0x1cf   : > { %v15352_v59 = vadd.f32 %v1314_v38, %v15196_v1 }
 0x1d0   : > { %1954 = vmatmul.bf16.gmra.mxu3 %v10555_v43 }
 0x1d1   : > { %v15341_v46 = vpop.f32.mrf.mxu2  ;;  %v1344_v25 = vpack.c.bf16 %v15352_v59, %v15344_v5  ;;  %v13396_v5 = vld [vmem:[%s19041_s2 + $0xa8] sm:$0xff] }
 0x1d2   : > { %2093 = vmatpush.bf16.msra.mxu0 %v13396_v5 }
 0x1d3   : > { %v1427_v14 = vpop.f32.mrf.mxu0 }
 0x1d4   : > { %v1564_v27 = vpop.f32.mrf.mxu1 }
 0x1d5   : > { %v15346_v51 = vadd.f32 %v1564_v27, %v1427_v14 }
 0x1d6   : > { %1466 = vmatmul.bf16.gmra.mxu0 %v1341_v62  ;;  %1885 = vmatmul.bf16.gmra.mxu2 %v10583_v37  ;;  %v1317_v31 = vpop.f32.mrf.mxu3  ;;  %v10590_v37 = vld [vmem:[%s19040_s1 + $0x2a0] sm:$0xf] }
 0x1d7   : > { %1603 = vmatmul.bf16.gmra.mxu1 %v938_v7  ;;  %v10591_v7 = vor.u32 %v13380_v60, %v10590_v37  ;;  %v15378_v38 = vadd.f32 %v1317_v31, %v15220_v3  ;;  %v10560_v3 = vld [vmem:[%s19040_s1 + $0x268] sm:$0xf0] }
 0x1d9   : > { %v15365_v6 = vpop.f32.mrf.mxu2 }
 0x1db   : > { %v1429_v1 = vpop.f32.mrf.mxu0 }
 0x1dc   : > { %v1566_v62 = vpop.f32.mrf.mxu1 }
 0x1dd   : > { %v15367_v63 = vadd.f32 %v1566_v62, %v1429_v1  ;;  %v13371_v1 = vld [vmem:[%s19040_s1 + $0x264] sm:$0xf]  ;;  %v19080_v62 = vpack.c.bf16 %v15114_v16, %v15093_v32  ;;  %v10598_v32 = vld [vmem:[%s19040_s1 + $0x2b0] sm:$0xf]  ;;  %v13382_v16 = vld [vmem:[%s19040_s1 + $0x2b4] sm:$0xf0] }
 0x1de   : > { %v1319_v45 = vpop.f32.mrf.mxu3  ;;  %v10563_v28 = vor.u32 %v13371_v1, %v10560_v3 }
 0x1df   : > { %v15386_v43 = vadd.f32 %v1319_v45, %v15232_v34 }
 0x1e0   : > { %1959 = vmatmul.bf16.gmra.mxu3 %v10563_v28 }
 0x1e1   : > { %v15375_v47 = vpop.f32.mrf.mxu2  ;;  %v1345_v34 = vpack.c.bf16 %v15386_v43, %v15378_v38  ;;  %v19083_v38 = vpack.c.bf16 %v15222_v61, %v15201_v2  ;;  %v13392_v2 = vld [vmem:[%s19041_s2 + $0x88] sm:$0xff]  ;;  %v10622_v61 = vld [vmem:[%s19040_s1 + $0x2e0] sm:$0xf] }
 0x1e3   : > { %v1432_v14 = vpop.f32.mrf.mxu0 }
 0x1e4   : > { %v1569_v27 = vpop.f32.mrf.mxu1 }
 0x1e5   : > { %v15380_v13 = vadd.f32 %v1569_v27, %v1432_v14  ;;  %v10599_v27 = vor.u32 %v13382_v16, %v10598_v32 }
 0x1e6   : > { %1471 = vmatmul.bf16.gmra.mxu0 %v1342_v21  ;;  %1890 = vmatmul.bf16.gmra.mxu2 %v10591_v7  ;;  %v1322_v7 = vpop.f32.mrf.mxu3 }
 0x1e7   : > { %1608 = vmatmul.bf16.gmra.mxu1 %v19080_v62  ;;  %v15415_v3 = vadd.f32 %v1322_v7, %v15256_v58  ;;  %v10568_v58 = vld [vmem:[%s19040_s1 + $0x278] sm:$0xf0] }
 0x1e9   : > { %v15402_v21 = vpop.f32.mrf.mxu2 }
 0x1eb   : > { %v1434_v31 = vpop.f32.mrf.mxu0 }
 0x1ec   : > { %v1571_v37 = vpop.f32.mrf.mxu1 }
 0x1ed   : > { %v15404_v60 = vadd.f32 %v1571_v37, %v1434_v31  ;;  %v13373_v31 = vld [vmem:[%s19040_s1 + $0x274] sm:$0xf]  ;;  %v19081_v37 = vpack.c.bf16 %v15150_v19, %v15129_v0  ;;  %v13384_v0 = vld [vmem:[%s19040_s1 + $0x2c4] sm:$0xf0] }
 0x1ee   : > { %v1324_v33 = vpop.f32.mrf.mxu3  ;;  %v10571_v7 = vor.u32 %v13373_v31, %v10568_v58 }
 0x1ef   : > { %v15423_v28 = vadd.f32 %v1324_v33, %v15268_v26 }
 0x1f0   : > { %1964 = vmatmul.bf16.gmra.mxu3 %v10571_v7 }
 0x1f1   : > { %v15412_v14 = vpop.f32.mrf.mxu2  ;;  %v1346_v10 = vpack.c.bf16 %v15423_v28, %v15415_v3 }
 0x1f3   : > { %v1437_v45 = vpop.f32.mrf.mxu0 }
 0x1f4   : > { %v1574_v1 = vpop.f32.mrf.mxu1 }
 0x1f5   : > { %v15417_v62 = vadd.f32 %v1574_v1, %v1437_v45 }
 0x1f6   : > { %1476 = vmatmul.bf16.gmra.mxu0 %v1343_v55  ;;  %1895 = vmatmul.bf16.gmra.mxu2 %v10599_v27  ;;  %v1327_v16 = vpop.f32.mrf.mxu3  ;;  %v10606_v27 = vld [vmem:[%s19040_s1 + $0x2c0] sm:$0xf] }
 0x1f7   : > { %1613 = vmatmul.bf16.gmra.mxu1 %v19081_v37  ;;  %v10607_v45 = vor.u32 %v13384_v0, %v10606_v27  ;;  %v15449_v31 = vadd.f32 %v1327_v16, %v15292_v40  ;;  %v10576_v40 = vld [vmem:[%s19040_s1 + $0x288] sm:$0xf0] }
 0x1f9   : > { %v15436_v44 = vpop.f32.mrf.mxu2 }
 0x1fb   : > { %v1439_v26 = vpop.f32.mrf.mxu0 }
 0x1fc   : > { %v1576_v55 = vpop.f32.mrf.mxu1 }
 0x1fd   : > { %v15438_v32 = vadd.f32 %v1576_v55, %v1439_v26  ;;  %v13375_v26 = vld [vmem:[%s19040_s1 + $0x284] sm:$0xf]  ;;  %v19082_v55 = vpack.c.bf16 %v15186_v39, %v15165_v15  ;;  %v10614_v15 = vld [vmem:[%s19040_s1 + $0x2d0] sm:$0xf]  ;;  %v13386_v39 = vld [vmem:[%s19040_s1 + $0x2d4] sm:$0xf0] }
 0x1fe   : > { %v1329_v37 = vpop.f32.mrf.mxu3  ;;  %v10579_v59 = vor.u32 %v13375_v26, %v10576_v40 }
 0x1ff   : > { %v15457_v7 = vadd.f32 %v1329_v37, %v15304_v22  ;;  %v13395_v37 = vld [vmem:[%s19041_s2 + $0xa0] sm:$0xff] }
 0x200   : > { %1969 = vmatmul.bf16.gmra.mxu3 %v10579_v59  ;;  %2094 = vmatpush.bf16.msra.mxu0 %v13395_v37 }
 0x201   : > { %v15446_v19 = vpop.f32.mrf.mxu2  ;;  %v1347_v22 = vpack.c.bf16 %v15457_v7, %v15449_v31 }
 0x203   : > { %v1442_v1 = vpop.f32.mrf.mxu0 }
 0x204   : > { %v1579_v33 = vpop.f32.mrf.mxu1 }
 0x205   : > { %v15451_v58 = vadd.f32 %v1579_v33, %v1442_v1  ;;  %v10615_v33 = vor.u32 %v13386_v39, %v10614_v15  ;;  %v13393_v15 = vld [vmem:[%s19041_s2 + $0x90] sm:$0xff] }
 0x206   : > { %1481 = vmatmul.bf16.gmra.mxu0 %v1344_v25  ;;  %1900 = vmatmul.bf16.gmra.mxu2 %v10607_v45  ;;  %v1930_v45 = vpop.f32.mrf.mxu3 }
 0x207   : > { %1618 = vmatmul.bf16.gmra.mxu1 %v19082_v55  ;;  %v15489_v55 = vadd.f32 %v1930_v45, %v15331_v54  ;;  %v13377_v54 = vld [vmem:[%s19040_s1 + $0x294] sm:$0xf]  ;;  %v10584_v45 = vld [vmem:[%s19040_s1 + $0x298] sm:$0xf0] }
 0x208   : > { %v10587_v43 = vor.u32 %v13377_v54, %v10584_v45  ;;  %v13391_v54 = vld [vmem:[%s19041_s2 + $0x80] sm:$0xff] }
 0x209   : > { %v15473_v25 = vpop.f32.mrf.mxu2 }
 0x20b   : > { %v1444_v16 = vpop.f32.mrf.mxu0 }
 0x20c   : > { %v1581_v27 = vpop.f32.mrf.mxu1 }
 0x20d   : > { %v15475_v0 = vadd.f32 %v1581_v27, %v1444_v16  ;;  %v13394_v27 = vld [vmem:[%s19041_s2 + $0x98] sm:$0xff] }
 0x20e   : > { %v1932_v59 = vpop.f32.mrf.mxu3  ;;  %2095 = vmatpush.bf16.msra.mxu0 %v13394_v27 }
 0x20f   : > { %v15497_v16 = vadd.f32 %v1932_v59, %v15341_v46 }
 0x210   : > { %1974 = vmatmul.bf16.gmra.mxu3 %v10587_v43 }
 0x211   : > { %v15483_v1 = vpop.f32.mrf.mxu2  ;;  %v2010_v46 = vpack.c.bf16 %v15497_v16, %v15489_v55 }
 0x212   : > { %2096 = vmatpush.bf16.msra.mxu0 %v13393_v15 }
 0x213   : > { %v1447_v26 = vpop.f32.mrf.mxu0 }
 0x214   : > { %v1584_v40 = vpop.f32.mrf.mxu1 }
 0x215   : > { %v15491_v5 = vadd.f32 %v1584_v40, %v1447_v26  ;;  %v13388_v40 = vld [vmem:[%s19040_s1 + $0x2e4] sm:$0xf0] }
 0x216   : > { %1486 = vmatmul.bf16.gmra.mxu0 %v1345_v34  ;;  %1905 = vmatmul.bf16.gmra.mxu2 %v10615_v33  ;;  %v1935_v26 = vpop.f32.mrf.mxu3  ;;  %v10623_v27 = vor.u32 %v13388_v40, %v10622_v61 }
 0x217   : > { %1623 = vmatmul.bf16.gmra.mxu1 %v19083_v38  ;;  %2097 = vmatpush.bf16.msra.mxu0 %v13392_v2  ;;  %v15535_v43 = vadd.f32 %v1935_v26, %v15365_v6  ;;  %v13379_v2 = vld [vmem:[%s19040_s1 + $0x2a4] sm:$0xf]  ;;  %v10592_v6 = vld [vmem:[%s19040_s1 + $0x2a8] sm:$0xf0]  ;;  %v19084_v26 = vpack.c.bf16 %v15258_v50, %v15237_v56  ;;  %v10630_v56 = vld [vmem:[%s19040_s1 + $0x2f0] sm:$0xf] }
 0x218   : > { %v10595_v61 = vor.u32 %v13379_v2, %v10592_v6  ;;  %v13390_v50 = vld [vmem:[%s19040_s1 + $0x2f4] sm:$0xf0] }
 0x219   : > { %v15513_v34 = vpop.f32.mrf.mxu2 }
 0x21b   : > { %v1449_v39 = vpop.f32.mrf.mxu0  ;;  %2098 = vmatpush.bf16.msra.mxu0 %v13391_v54 }
 0x21c   : > { %v1586_v33 = vpop.f32.mrf.mxu1 }
 0x21d   : > { %v15518_v37 = vadd.f32 %v1586_v33, %v1449_v39 }
 0x21e   : > { %v1937_v39 = vpop.f32.mrf.mxu3 }
 0x21f   : > { %2978 = vmatpush.bf16.msrb.mxu0 %v14367_v4  ;;  %v15544_v33 = vadd.f32 %v1937_v39, %v15375_v47 }
 0x220   : > { %1979 = vmatmul.bf16.gmra.mxu3 %v10595_v61 }
 0x221   : > { %v15529_v59 = vpop.f32.mrf.mxu2  ;;  %v2011_v3 = vpack.c.bf16 %v15544_v33, %v15535_v43 }
 0x223   : > { %v1452_v45 = vpop.f32.mrf.mxu0  ;;  %2979 = vmatpush.bf16.msrb.mxu0 %v14378_v11 }
 0x224   : > { %v1589_v38 = vpop.f32.mrf.mxu1 }
 0x225   : > { %v15537_v15 = vadd.f32 %v1589_v38, %v1452_v45  ;;  %v10631_v45 = vor.u32 %v13390_v50, %v10630_v56  ;;  %v13400_v50 = vld [vmem:[%s19040_s1 + $0x304] sm:$0xf0] }
 0x226   : > { %1491 = vmatmul.bf16.gmra.mxu0 %v1346_v10  ;;  %1910 = vmatmul.bf16.gmra.mxu2 %v10623_v27  ;;  %v1940_v27 = vpop.f32.mrf.mxu3 }
 0x227   : > { %1628 = vmatmul.bf16.gmra.mxu1 %v19084_v26  ;;  %2980 = vmatpush.bf16.msrb.mxu0 %v14390_v17  ;;  %v15573_v2 = vadd.f32 %v1940_v27, %v15402_v21  ;;  %v10600_v21 = vld [vmem:[%s19040_s1 + $0x2b8] sm:$0xf0] }
 0x229   : > { %v15557_v28 = vpop.f32.mrf.mxu2 }
 0x22b   : > { %v1454_v47 = vpop.f32.mrf.mxu0  ;;  %2981 = vmatpush.bf16.msrb.mxu0 %v14402_v23 }
 0x22c   : > { %v1591_v10 = vpop.f32.mrf.mxu1 }
 0x22d   : > { %v15560_v40 = vadd.f32 %v1591_v10, %v1454_v47  ;;  %v13381_v47 = vld [vmem:[%s19040_s1 + $0x2b4] sm:$0xf] }
 0x22e   : > { %v1942_v26 = vpop.f32.mrf.mxu3  ;;  %v10603_v10 = vor.u32 %v13381_v47, %v10600_v21 }
 0x22f   : > { %2982 = vmatpush.bf16.msrb.mxu0 %v14414_v29  ;;  %v15582_v61 = vadd.f32 %v1942_v26, %v15412_v14 }
 0x230   : > { %1984 = vmatmul.bf16.gmra.mxu3 %v10603_v10 }
 0x231   : > { %v15569_v54 = vpop.f32.mrf.mxu2 }
 0x233   : > { %v1457_v38 = vpop.f32.mrf.mxu0  ;;  %2983 = vmatpush.bf16.msrb.mxu0 %v14426_v35 }
 0x234   : > { %v1594_v39 = vpop.f32.mrf.mxu1 }
 0x235   : > { %v15575_v6 = vadd.f32 %v1594_v39, %v1457_v38  ;;  %v10723_v38 = vor.u32 %v13399_v57, %v10720_v53  ;;  %v13383_v57 = vld [vmem:[%s19040_s1 + $0x2c4] sm:$0xf] }
 0x236   : > { %1496 = vmatmul.bf16.gmra.mxu0 %v1347_v22  ;;  %1915 = vmatmul.bf16.gmra.mxu2 %v10631_v45  ;;  %v1945_v56 = vpop.f32.mrf.mxu3 }
 0x237   : > { %1633 = vmatmul.bf16.gmra.mxu1 %v944_v20  ;;  %2984 = vmatpush.bf16.msrb.mxu0 %v14438_v41  ;;  %v10718_v20 = vld [vmem:[%s19040_s1 + $0x300] sm:$0xf]  ;;  %v15617_v21 = vadd.f32 %v1945_v56, %v15436_v44  ;;  %v10608_v44 = vld [vmem:[%s19040_s1 + $0x2c8] sm:$0xf0] }
 0x238   : > { %v10719_v26 = vor.u32 %v13400_v50, %v10718_v20  ;;  %v10611_v56 = vor.u32 %v13383_v57, %v10608_v44  ;;  %v13401_v50 = vld [vmem:[%s19040_s1 + $0x314] sm:$0xf] }
 0x239   : > { %v15595_v7 = vpop.f32.mrf.mxu2 }
 0x23b   : > { %v1459_v14 = vpop.f32.mrf.mxu0  ;;  %2985 = vmatpush.bf16.msrb.mxu0 %v14453_v48 }
 0x23c   : > { %v1596_v22 = vpop.f32.mrf.mxu1 }
 0x23d   : > { %v15598_v27 = vadd.f32 %v1596_v22, %v1459_v14 }
 0x23e   : > { %v1947_v14 = vpop.f32.mrf.mxu3 }
 0x23f   : > { %v15625_v22 = vadd.f32 %v1947_v14, %v15446_v19 }
 0x240   : > { %1989 = vmatmul.bf16.gmra.mxu3 %v10611_v56 }
 0x241   : > { %v15613_v45 = vpop.f32.mrf.mxu2 }
 0x243   : > { %v1462_v39 = vpop.f32.mrf.mxu0 }
 0x244   : > { %v1599_v47 = vpop.f32.mrf.mxu1 }
 0x245   : > { %v15619_v10 = vadd.f32 %v1599_v47, %v1462_v39  ;;  %v10726_v39 = vld [vmem:[%s19040_s1 + $0x310] sm:$0xf] }
 0x246   : > { %2099 = vmatmul.bf16.vlgmr.msra.gmra.mxu0 %v2010_v46  ;;  %2502 = vmatmul.bf16.vlgmr.msra.gmra.mxu2 %v10723_v38  ;;  %v1950_v20 = vpop.f32.mrf.mxu3  ;;  %v10728_v38 = vld [vmem:[%s19040_s1 + $0x318] sm:$0xf0] }
 0x247   : > { %2413 = vmatmul.bf16.vlgmr.msra.gmra.mxu1 %v10719_v26  ;;  %3640 = vmatpush.bf16.msra.mxu0 %v14372_v8  ;;  %v13402_v26 = vld [vmem:[%s19040_s1 + $0x314] sm:$0xf0]  ;;  %v10731_v14 = vor.u32 %v13401_v50, %v10728_v38  ;;  %v13385_v50 = vld [vmem:[%s19040_s1 + $0x2d4] sm:$0xf] }
 0x248   : > { %v10727_v44 = vor.u32 %v13402_v26, %v10726_v39  ;;  %v13403_v39 = vld [vmem:[%s19040_s1 + $0x324] sm:$0xf]  ;;  %v10736_v26 = vld [vmem:[%s19040_s1 + $0x328] sm:$0xf0] }
 0x249   : > { %v15636_v16 = vpop.f32.mrf.mxu2 }
 0x24b   : > { %v1464_v19 = vpop.f32.mrf.mxu0  ;;  %3641 = vmatpush.bf16.msra.mxu0 %v14381_v12 }
 0x24c   : > { %v1601_v46 = vpop.f32.mrf.mxu1 }
 0x24d   : > { %v15639_v53 = vadd.f32 %v1601_v46, %v1464_v19  ;;  %v15658_v19 = vadd.f32 %v1950_v20, %v15473_v25  ;;  %v10616_v25 = vld [vmem:[%s19040_s1 + $0x2d8] sm:$0xf0] }
 0x24e   : > { %v1952_v55 = vpop.f32.mrf.mxu3  ;;  %v10619_v20 = vor.u32 %v13385_v50, %v10616_v25 }
 0x24f   : > { %3642 = vmatpush.bf16.msra.mxu0 %v14393_v18  ;;  %v15666_v31 = vadd.f32 %v1952_v55, %v15483_v1 }
 0x250   : > { %1994 = vmatmul.bf16.gmra.mxu3 %v10619_v20 }
 0x251   : > { %v15654_v47 = vpop.f32.mrf.mxu2 }
 0x253   : > { %v1467_v57 = vpop.f32.mrf.mxu0  ;;  %3643 = vmatpush.bf16.msra.mxu0 %v14405_v24 }
 0x254   : > { %v1604_v56 = vpop.f32.mrf.mxu1 }
 0x255   : > { %v15660_v46 = vadd.f32 %v1604_v56, %v1467_v57  ;;  %v13404_v57 = vld [vmem:[%s19040_s1 + $0x324] sm:$0xf0]  ;;  %v10739_v56 = vor.u32 %v13403_v39, %v10736_v26  ;;  %v13387_v39 = vld [vmem:[%s19040_s1 + $0x2e4] sm:$0xf] }
 0x256   : > { %2104 = vmatmul.bf16.gmra.mxu0 %v2011_v3  ;;  %2507 = vmatmul.bf16.gmra.mxu2 %v10731_v14  ;;  %v1955_v38 = vpop.f32.mrf.mxu3  ;;  %v10734_v14 = vld [vmem:[%s19040_s1 + $0x320] sm:$0xf] }
 0x257   : > { %19085 = vst [vmem:[#allocation23_spill] sm:$0xff] %v15660_v46  ;;  %2418 = vmatmul.bf16.gmra.mxu1 %v10727_v44  ;;  %3644 = vmatpush.bf16.msra.mxu0 %v14417_v30  ;;  %v10735_v25 = vor.u32 %v13404_v57, %v10734_v14  ;;  %v10744_v57 = vld [vmem:[%s19040_s1 + $0x338] sm:$0xf0] }
 0x259   : > { %v15677_v33 = vpop.f32.mrf.mxu2 }
 0x25b   : > { %v1469_v1 = vpop.f32.mrf.mxu0  ;;  %3645 = vmatpush.bf16.msra.mxu0 %v14429_v36 }
 0x25c   : > { %v1606_v3 = vpop.f32.mrf.mxu1 }
 0x25d   : > { %v15680_v55 = vadd.f32 %v1606_v3, %v1469_v1  ;;  %v15699_v1 = vadd.f32 %v1955_v38, %v15513_v34  ;;  %v10624_v34 = vld [vmem:[%s19040_s1 + $0x2e8] sm:$0xf0] }
 0x25e   : > { %v1957_v43 = vpop.f32.mrf.mxu3  ;;  %v10627_v38 = vor.u32 %v13387_v39, %v10624_v34 }
 0x25f   : > { %19086 = vst [vmem:[#allocation24_spill] sm:$0xff] %v15680_v55  ;;  %3646 = vmatpush.bf16.msra.mxu0 %v14441_v42  ;;  %v19088_v55 = vpack.c.bf16 %v15582_v61, %v15573_v2  ;;  %v15707_v46 = vadd.f32 %v1957_v43, %v15529_v59 }
 0x260   : > { %1999 = vmatmul.bf16.gmra.mxu3 %v10627_v38 }
 0x261   : > { %v15695_v44 = vpop.f32.mrf.mxu2 }
 0x263   : > { %v1472_v50 = vpop.f32.mrf.mxu0  ;;  %3647 = vmatpush.bf16.msra.mxu0 %v14465_v52 }
 0x264   : > { %v1609_v20 = vpop.f32.mrf.mxu1 }
 0x265   : > { %v15701_v3 = vadd.f32 %v1609_v20, %v1472_v50  ;;  %v13406_v50 = vld [vmem:[%s19040_s1 + $0x334] sm:$0xf0] }
 0x266   : > { %2109 = vmatmul.bf16.gmra.mxu0 %v19088_v55  ;;  %2512 = vmatmul.bf16.gmra.mxu2 %v10739_v56  ;;  %v1960_v43 = vpop.f32.mrf.mxu3  ;;  %v13405_v55 = vld [vmem:[%s19040_s1 + $0x334] sm:$0xf]  ;;  %v10742_v56 = vld [vmem:[%s19040_s1 + $0x330] sm:$0xf] }
 0x267   : > { %19087 = vst [vmem:[#allocation25_spill] sm:$0xff] %v15701_v3  ;;  %2423 = vmatmul.bf16.gmra.mxu1 %v10735_v25  ;;  %v10747_v20 = vor.u32 %v13405_v55, %v10744_v57  ;;  %v10743_v34 = vor.u32 %v13406_v50, %v10742_v56  ;;  %v13389_v55 = vld [vmem:[%s19040_s1 + $0x2f4] sm:$0xf]  ;;  %v10752_v50 = vld [vmem:[%s19040_s1 + $0x348] sm:$0xf0] }
 0x269   : > { %v15717_v14 = vpop.f32.mrf.mxu2 }
 0x26b   : > { %v1474_v2 = vpop.f32.mrf.mxu0 }
 0x26c   : > { %v1611_v61 = vpop.f32.mrf.mxu1 }
 0x26d   : > { %v15719_v59 = vadd.f32 %v1611_v61, %v1474_v2  ;;  %v15736_v2 = vadd.f32 %v1960_v43, %v15557_v28  ;;  %v10632_v28 = vld [vmem:[%s19040_s1 + $0x2f8] sm:$0xf0] }
 0x26e   : > { %v1962_v26 = vpop.f32.mrf.mxu3  ;;  %v10635_v43 = vor.u32 %v13389_v55, %v10632_v28 }
 0x26f   : > { %19089 = vst [vmem:[#allocation26_spill] sm:$0xff] %v15719_v59  ;;  %v19091_v59 = vpack.c.bf16 %v15625_v22, %v15617_v21  ;;  %v15744_v3 = vadd.f32 %v1962_v26, %v15569_v54 }
 0x270   : > { %2004 = vmatmul.bf16.gmra.mxu3 %v10635_v43 }
 0x271   : > { %v15733_v25 = vpop.f32.mrf.mxu2 }
 0x273   : > { %v1477_v39 = vpop.f32.mrf.mxu0 }
 0x274   : > { %v1614_v38 = vpop.f32.mrf.mxu1 }
 0x275   : > { %v15738_v61 = vadd.f32 %v1614_v38, %v1477_v39  ;;  %v13408_v39 = vld [vmem:[%s19040_s1 + $0x344] sm:$0xf0] }
 0x276   : > { %2114 = vmatmul.bf16.gmra.mxu0 %v19091_v59  ;;  %2517 = vmatmul.bf16.gmra.mxu2 %v10747_v20  ;;  %v1965_v26 = vpop.f32.mrf.mxu3  ;;  %v13407_v59 = vld [vmem:[%s19040_s1 + $0x344] sm:$0xf]  ;;  %v10750_v20 = vld [vmem:[%s19040_s1 + $0x340] sm:$0xf] }
 0x277   : > { %19090 = vst [vmem:[#allocation27_spill] sm:$0xff] %v15738_v61  ;;  %2428 = vmatmul.bf16.gmra.mxu1 %v10743_v34  ;;  %v10755_v38 = vor.u32 %v13407_v59, %v10752_v50  ;;  %v10751_v28 = vor.u32 %v13408_v39, %v10750_v20 }
 0x279   : > { %v15754_v56 = vpop.f32.mrf.mxu2 }
 0x27b   : > { %v1479_v21 = vpop.f32.mrf.mxu0 }
 0x27c   : > { %v1616_v22 = vpop.f32.mrf.mxu1 }
 0x27d   : > { %v15756_v54 = vadd.f32 %v1616_v22, %v1479_v21  ;;  %v15773_v21 = vadd.f32 %v1965_v26, %v15595_v7 }
 0x27e   : > { %v1967_v57 = vpop.f32.mrf.mxu3 }
 0x27f   : > { %19092 = vst [vmem:[#allocation28_spill] sm:$0xff] %v15756_v54  ;;  %v19094_v54 = vpack.c.bf16 %v15666_v31, %v15658_v19  ;;  %v15781_v61 = vadd.f32 %v1967_v57, %v15613_v45  ;;  %v13409_v31 = vld [vmem:[%s19040_s1 + $0x354] sm:$0xf]  ;;  %v10760_v45 = vld [vmem:[%s19040_s1 + $0x358] sm:$0xf0] }
 0x280   : > { %v10758_v19 = vld [vmem:[%s19040_s1 + $0x350] sm:$0xf]  ;;  %v13410_v57 = vld [vmem:[%s19040_s1 + $0x354] sm:$0xf0] }
 0x281   : > { %v15770_v34 = vpop.f32.mrf.mxu2 }
 0x283   : > { %v1482_v55 = vpop.f32.mrf.mxu0 }
 0x284   : > { %v1619_v43 = vpop.f32.mrf.mxu1 }
 0x285   : > { %v15775_v22 = vadd.f32 %v1619_v43, %v1482_v55 }
 0x286   : > { %2119 = vmatmul.bf16.gmra.mxu0 %v19094_v54  ;;  %2522 = vmatmul.bf16.gmra.mxu2 %v10755_v38  ;;  %v1970_v39 = vpop.f32.mrf.mxu3  ;;  %v10763_v38 = vor.u32 %v13409_v31, %v10760_v45  ;;  %v13438_v31 = vld [vmem:[%s19041_s2 + $0xf8] sm:$0xff]  ;;  %v13436_v45 = vld [vmem:[%s19041_s2 + $0xe8] sm:$0xff] }
 0x287   : > { %19093 = vst [vmem:[#allocation29_spill] sm:$0xff] %v15775_v22  ;;  %2433 = vmatmul.bf16.gmra.mxu1 %v10751_v28  ;;  %v10759_v28 = vor.u32 %v13410_v57, %v10758_v19  ;;  %2664 = vmatpush.bf16.msra.mxu3 %v13438_v31  ;;  %v13411_v19 = vld [vmem:[%s19040_s1 + $0x364] sm:$0xf]  ;;  %v10768_v57 = vld [vmem:[%s19040_s1 + $0x368] sm:$0xf0] }
 0x288   : > { %v13435_v31 = vld [vmem:[%s19041_s2 + $0xe0] sm:$0xff] }
 0x289   : > { %v15785_v50 = vpop.f32.mrf.mxu2 }
 0x28b   : > { %v1484_v20 = vpop.f32.mrf.mxu0 }
 0x28c   : > { %v1621_v7 = vpop.f32.mrf.mxu1 }
 0x28d   : > { %v15787_v26 = vadd.f32 %v1621_v7, %v1484_v20  ;;  %v15804_v20 = vadd.f32 %v1970_v39, %v15636_v16 }
 0x28e   : > { %v1972_v59 = vpop.f32.mrf.mxu3 }
 0x28f   : > { %19095 = vst [vmem:[#allocation30_spill] sm:$0xff] %v15787_v26  ;;  %v19097_v26 = vpack.c.bf16 %v15707_v46, %v15699_v1  ;;  %v15812_v22 = vadd.f32 %v1972_v59, %v15654_v47  ;;  %v13437_v46 = vld [vmem:[%s19041_s2 + $0xf0] sm:$0xff] }
 0x290   : > { %2665 = vmatpush.bf16.msra.mxu3 %v13437_v46 }
 0x291   : > { %v15801_v54 = vpop.f32.mrf.mxu2 }
 0x293   : > { %v1487_v55 = vpop.f32.mrf.mxu0 }
 0x294   : > { %v1624_v43 = vpop.f32.mrf.mxu1  ;;  %2666 = vmatpush.bf16.msra.mxu3 %v13436_v45  ;;  %v19100_v45 = vpack.c.bf16 %v15744_v3, %v15736_v2  ;;  %v13433_v3 = vld [vmem:[%s19041_s2 + $0xd0] sm:$0xff] }
 0x295   : > { %v15806_v7 = vadd.f32 %v1624_v43, %v1487_v55  ;;  %v13412_v55 = vld [vmem:[%s19040_s1 + $0x364] sm:$0xf0]  ;;  %v10771_v43 = vor.u32 %v13411_v19, %v10768_v57  ;;  %v13434_v57 = vld [vmem:[%s19041_s2 + $0xd8] sm:$0xff] }
 0x296   : > { %2124 = vmatmul.bf16.gmra.mxu0 %v19097_v26  ;;  %2527 = vmatmul.bf16.gmra.mxu2 %v10763_v38  ;;  %v1975_v59 = vpop.f32.mrf.mxu3  ;;  %v10766_v38 = vld [vmem:[%s19040_s1 + $0x360] sm:$0xf] }
 0x297   : > { %19096 = vst [vmem:[#allocation31_spill] sm:$0xff] %v15806_v7  ;;  %2438 = vmatmul.bf16.gmra.mxu1 %v10759_v28  ;;  %v15847_v16 = vadd.f32 %v1975_v59, %v15677_v33 }
 0x298   : > { %2667 = vmatpush.bf16.msra.mxu3 %v13435_v31  ;;  %v10776_v31 = vld [vmem:[%s19040_s1 + $0x378] sm:$0xf0] }
 0x299   : > { %v15819_v39 = vpop.f32.mrf.mxu2 }
 0x29b   : > { %v1489_v1 = vpop.f32.mrf.mxu0 }
 0x29c   : > { %v1626_v26 = vpop.f32.mrf.mxu1  ;;  %2668 = vmatpush.bf16.msra.mxu3 %v13434_v57  ;;  %v13431_v57 = vld [vmem:[%s19041_s2 + $0xc0] sm:$0xff] }
 0x29d   : > { %v15824_v47 = vadd.f32 %v1626_v26, %v1489_v1  ;;  %v10767_v1 = vor.u32 %v13412_v55, %v10766_v38 }
 0x29e   : > { %v1977_v7 = vpop.f32.mrf.mxu3 }
 0x29f   : > { %19098 = vst [vmem:[#allocation32_spill] sm:$0xff] %v15824_v47  ;;  %v15855_v19 = vadd.f32 %v1977_v7, %v15695_v44  ;;  %v13432_v44 = vld [vmem:[%s19041_s2 + $0xc8] sm:$0xff] }
 0x2a0   : > { %2669 = vmatpush.bf16.msra.mxu3 %v13433_v3 }
 0x2a1   : > { %v15841_v28 = vpop.f32.mrf.mxu2 }
 0x2a3   : > { %v1492_v46 = vpop.f32.mrf.mxu0 }
 0x2a4   : > { %v1629_v26 = vpop.f32.mrf.mxu1  ;;  %2670 = vmatpush.bf16.msra.mxu3 %v13432_v44  ;;  %v19102_v44 = vpack.c.bf16 %v15781_v61, %v15773_v21  ;;  %v10784_v61 = vld [vmem:[%s19040_s1 + $0x388] sm:$0xf0]  ;;  %v10782_v21 = vld [vmem:[%s19040_s1 + $0x380] sm:$0xf] }
 0x2a5   : > { %v15849_v47 = vadd.f32 %v1629_v26, %v1492_v46  ;;  %v10774_v46 = vld [vmem:[%s19040_s1 + $0x370] sm:$0xf] }
 0x2a6   : > { %2129 = vmatmul.bf16.gmra.mxu0 %v19100_v45  ;;  %2532 = vmatmul.bf16.gmra.mxu2 %v10771_v43  ;;  %v1980_v55 = vpop.f32.mrf.mxu3  ;;  %v13413_v43 = vld [vmem:[%s19040_s1 + $0x374] sm:$0xf] }
 0x2a7   : > { %19099 = vst [vmem:[#allocation33_spill] sm:$0xff] %v15849_v47  ;;  %2443 = vmatmul.bf16.gmra.mxu1 %v10767_v1  ;;  %v13414_v1 = vld [vmem:[%s19040_s1 + $0x374] sm:$0xf0]  ;;  %v10779_v45 = vor.u32 %v13413_v43, %v10776_v31  ;;  %v15890_v33 = vadd.f32 %v1980_v55, %v15717_v14 }
 0x2a8   : > { %2671 = vmatpush.bf16.msra.mxu3 %v13431_v57 }
 0x2a9   : > { %v15862_v59 = vpop.f32.mrf.mxu2 }
 0x2ab   : > { %v1494_v2 = vpop.f32.mrf.mxu0 }
 0x2ac   : > { %v1631_v38 = vpop.f32.mrf.mxu1  ;;  %3551 = vmatpush.bf16.msrb.mxu3 %v14367_v4 }
 0x2ad   : > { %v15870_v7 = vadd.f32 %v1631_v38, %v1494_v2  ;;  %v10775_v2 = vor.u32 %v13414_v1, %v10774_v46 }
 0x2ae   : > { %v1982_v47 = vpop.f32.mrf.mxu3 }
 0x2af   : > { %19101 = vst [vmem:[#allocation34_spill] sm:$0xff] %v15870_v7  ;;  %v15899_v43 = vadd.f32 %v1982_v47, %v15733_v25  ;;  %v13415_v25 = vld [vmem:[%s19040_s1 + $0x384] sm:$0xf]  ;;  %v13416_v47 = vld [vmem:[%s19040_s1 + $0x384] sm:$0xf0] }
 0x2b0   : > { %3552 = vmatpush.bf16.msrb.mxu3 %v14378_v11 }
 0x2b1   : > { %v15884_v26 = vpop.f32.mrf.mxu2 }
 0x2b3   : > { %v1497_v3 = vpop.f32.mrf.mxu0 }
 0x2b4   : > { %v1634_v38 = vpop.f32.mrf.mxu1  ;;  %3553 = vmatpush.bf16.msrb.mxu3 %v14390_v17 }
 0x2b5   : > { %v15892_v7 = vadd.f32 %v1634_v38, %v1497_v3  ;;  %v10787_v3 = vor.u32 %v13415_v25, %v10784_v61  ;;  %v10783_v38 = vor.u32 %v13416_v47, %v10782_v21 }
 0x2b6   : > { %2134 = vmatmul.bf16.gmra.mxu0 %v19102_v44  ;;  %2537 = vmatmul.bf16.gmra.mxu2 %v10779_v45  ;;  %v1985_v57 = vpop.f32.mrf.mxu3 }
 0x2b7   : > { %2448 = vmatmul.bf16.gmra.mxu1 %v10775_v2 }
 0x2b8   : > { %3554 = vmatpush.bf16.msrb.mxu3 %v14402_v23 }
 0x2b9   : > { %v15903_v14 = vpop.f32.mrf.mxu2 }
 0x2bb   : > { %v1499_v55 = vpop.f32.mrf.mxu0 }
 0x2bc   : > { %v1636_v46 = vpop.f32.mrf.mxu1  ;;  %3555 = vmatpush.bf16.msrb.mxu3 %v14414_v29 }
 0x2bd   : > { %v15906_v1 = vadd.f32 %v1636_v46, %v1499_v55  ;;  %v15928_v46 = vadd.f32 %v1985_v57, %v15754_v56 }
 0x2be   : > { %v1987_v31 = vpop.f32.mrf.mxu3 }
 0x2bf   : > { %19103 = vst [vmem:[#allocation35_spill] sm:$0xff] %v15906_v1  ;;  %v19104_v1 = vpack.c.bf16 %v15812_v22, %v15804_v20  ;;  %v15935_v23 = vadd.f32 %v1987_v31, %v15770_v34  ;;  %v13417_v34 = vld [vmem:[%s19040_s1 + $0x394] sm:$0xf]  ;;  %v10792_v22 = vld [vmem:[%s19040_s1 + $0x398] sm:$0xf0] }
 0x2c0   : > { %3556 = vmatpush.bf16.msrb.mxu3 %v14426_v35  ;;  %v10790_v31 = vld [vmem:[%s19040_s1 + $0x390] sm:$0xf]  ;;  %v19105_v35 = vpack.c.bf16 %v15855_v19, %v15847_v16  ;;  %v10798_v19 = vld [vmem:[%s19040_s1 + $0x3a0] sm:$0xf] }
 0x2c1   : > { %v15921_v45 = vpop.f32.mrf.mxu2 }
 0x2c3   : > { %v2100_v2 = vpop.f32.mrf.mxu0 }
 0x2c4   : > { %v15925_v44 = vadd.f32 %v2100_v2, %v15309_v49  ;;  %v2414_v55 = vpop.f32.mrf.mxu1  ;;  %3557 = vmatpush.bf16.msrb.mxu3 %v14438_v41 }
 0x2c6   : > { %2139 = vmatmul.bf16.gmra.mxu0 %v19104_v1  ;;  %2542 = vmatmul.bf16.gmra.mxu2 %v10787_v3  ;;  %v1990_v21 = vpop.f32.mrf.mxu3  ;;  %v10795_v3 = vor.u32 %v13417_v34, %v10792_v22 }
 0x2c7   : > { %2453 = vmatmul.bf16.gmra.mxu1 %v10783_v38 }
 0x2c8   : > { %3558 = vmatpush.bf16.msrb.mxu3 %v14453_v48 }
 0x2c9   : > { %v2503_v25 = vpop.f32.mrf.mxu2 }
 0x2ca   : > { %v2504_v20 = vadd.f32 %v2503_v25, %v2414_v55  ;;  %v15961_v25 = vadd.f32 %v1990_v21, %v15785_v50 }
 0x2cb   : > { %v2102_v56 = vpop.f32.mrf.mxu0 }
 0x2cc   : > { %v15941_v57 = vadd.f32 %v2102_v56, %v15333_v9  ;;  %v2416_v61 = vpop.f32.mrf.mxu1  ;;  %v13418_v9 = vld [vmem:[%s19040_s1 + $0x394] sm:$0xf0] }
 0x2cd   : > { %v10791_v38 = vor.u32 %v13418_v9, %v10790_v31 }
 0x2ce   : > { %v1992_v41 = vpop.f32.mrf.mxu3 }
 0x2cf   : > { %v15967_v48 = vadd.f32 %v1992_v41, %v15801_v54  ;;  %v13419_v41 = vld [vmem:[%s19040_s1 + $0x3a4] sm:$0xf]  ;;  %v10800_v54 = vld [vmem:[%s19040_s1 + $0x3a8] sm:$0xf0] }
 0x2d0   : > { %v10803_v31 = vor.u32 %v13419_v41, %v10800_v54  ;;  %v10806_v54 = vld [vmem:[%s19040_s1 + $0x3b0] sm:$0xf] }
 0x2d1   : > { %v2505_v1 = vpop.f32.mrf.mxu2 }
 0x2d2   : > { %v2506_v47 = vadd.f32 %v2505_v1, %v2416_v61  ;;  %v2022_v61 = vpack.c.bf16 %v15967_v48, %v15961_v25  ;;  %v13425_v48 = vld [vmem:[%s19040_s1 + $0x3d4] sm:$0xf] }
 0x2d3   : > { %v2105_v2 = vpop.f32.mrf.mxu0 }
 0x2d4   : > { %v2583_v56 = vpack.c.bf16 %v2506_v47, %v2504_v20  ;;  %v15958_v49 = vadd.f32 %v2105_v2, %v15346_v51  ;;  %v2419_v55 = vpop.f32.mrf.mxu1 }
 0x2d6   : > { %2144 = vmatmul.bf16.gmra.mxu0 %v19105_v35  ;;  %2547 = vmatmul.bf16.gmra.mxu2 %v10795_v3  ;;  %v1995_v35 = vpop.f32.mrf.mxu3 }
 0x2d7   : > { %2458 = vmatmul.bf16.gmra.mxu1 %v10791_v38  ;;  %2672 = vmatmul.bf16.vlgmr.msra.gmra.mxu3 %v2583_v56  ;;  %v15993_v38 = vadd.f32 %v1995_v35, %v15819_v39 }
 0x2d8   : > { %4213 = vmatpush.bf16.msra.mxu3 %v14372_v8 }
 0x2d9   : > { %v2508_v51 = vpop.f32.mrf.mxu2 }
 0x2da   : > { %v2509_v16 = vadd.f32 %v2508_v51, %v2419_v55  ;;  %v19106_v55 = vpack.c.bf16 %v15899_v43, %v15890_v33  ;;  %v10808_v43 = vld [vmem:[%s19040_s1 + $0x3b8] sm:$0xf0] }
 0x2db   : > { %v2107_v34 = vpop.f32.mrf.mxu0 }
 0x2dc   : > { %v15973_v50 = vadd.f32 %v2107_v34, %v15367_v63  ;;  %v2421_v21 = vpop.f32.mrf.mxu1  ;;  %4214 = vmatpush.bf16.msra.mxu3 %v14381_v12  ;;  %v13420_v63 = vld [vmem:[%s19040_s1 + $0x3a4] sm:$0xf0] }
 0x2dd   : > { %v10799_v1 = vor.u32 %v13420_v63, %v10798_v19 }
 0x2de   : > { %v1997_v56 = vpop.f32.mrf.mxu3 }
 0x2df   : > { %v16000_v51 = vadd.f32 %v1997_v56, %v15841_v28  ;;  %v13421_v28 = vld [vmem:[%s19040_s1 + $0x3b4] sm:$0xf]  ;;  %v19107_v56 = vpack.c.bf16 %v15935_v23, %v15928_v46  ;;  %v13423_v23 = vld [vmem:[%s19040_s1 + $0x3c4] sm:$0xf] }
 0x2e0   : > { %4215 = vmatpush.bf16.msra.mxu3 %v14393_v18  ;;  %v10811_v63 = vor.u32 %v13421_v28, %v10808_v43  ;;  %v10814_v28 = vld [vmem:[%s19040_s1 + $0x3c0] sm:$0xf] }
 0x2e1   : > { %v2510_v22 = vpop.f32.mrf.mxu2 }
 0x2e2   : > { %v2511_v20 = vadd.f32 %v2510_v22, %v2421_v21 }
 0x2e3   : > { %v2110_v9 = vpop.f32.mrf.mxu0 }
 0x2e4   : > { %v2584_v47 = vpack.c.bf16 %v2511_v20, %v2509_v16  ;;  %v15990_v3 = vadd.f32 %v2110_v9, %v15380_v13  ;;  %v2424_v2 = vpop.f32.mrf.mxu1  ;;  %4216 = vmatpush.bf16.msra.mxu3 %v14405_v24  ;;  %v2023_v13 = vpack.c.bf16 %v16000_v51, %v15993_v38  ;;  %v10830_v38 = vld [vmem:[%s19040_s1 + $0x3e0] sm:$0xf]  ;;  %v13428_v51 = vld [vmem:[%s19040_s1 + $0x3e4] sm:$0xf0] }
 0x2e6   : > { %2149 = vmatmul.bf16.gmra.mxu0 %v19106_v55  ;;  %2552 = vmatmul.bf16.gmra.mxu2 %v10803_v31  ;;  %v2000_v33 = vpop.f32.mrf.mxu3 }
 0x2e7   : > { %2463 = vmatmul.bf16.gmra.mxu1 %v10799_v1  ;;  %2677 = vmatmul.bf16.gmra.mxu3 %v2584_v47  ;;  %v16026_v47 = vadd.f32 %v2000_v33, %v15862_v59 }
 0x2e8   : > { %4217 = vmatpush.bf16.msra.mxu3 %v14417_v30 }
 0x2e9   : > { %v2513_v39 = vpop.f32.mrf.mxu2 }
 0x2ea   : > { %v2514_v41 = vadd.f32 %v2513_v39, %v2424_v2 }
 0x2eb   : > { %v2112_v34 = vpop.f32.mrf.mxu0 }
 0x2ec   : > { %v16006_v21 = vadd.f32 %v2112_v34, %v15404_v60  ;;  %v2426_v35 = vpop.f32.mrf.mxu1  ;;  %4218 = vmatpush.bf16.msra.mxu3 %v14429_v36  ;;  %v13422_v60 = vld [vmem:[%s19040_s1 + $0x3b4] sm:$0xf0] }
 0x2ed   : > { %v10807_v20 = vor.u32 %v13422_v60, %v10806_v54 }
 0x2ee   : > { %v2002_v2 = vpop.f32.mrf.mxu3 }
 0x2ef   : > { %v16033_v55 = vadd.f32 %v2002_v2, %v15884_v26  ;;  %v10816_v26 = vld [vmem:[%s19040_s1 + $0x3c8] sm:$0xf0] }
 0x2f0   : > { %4219 = vmatpush.bf16.msra.mxu3 %v14441_v42  ;;  %v10819_v54 = vor.u32 %v13423_v23, %v10816_v26 }
 0x2f1   : > { %v2515_v16 = vpop.f32.mrf.mxu2 }
 0x2f2   : > { %v2516_v19 = vadd.f32 %v2515_v16, %v2426_v35 }
 0x2f3   : > { %v2115_v22 = vpop.f32.mrf.mxu0 }
 0x2f4   : > { %v2585_v31 = vpack.c.bf16 %v2516_v19, %v2514_v41  ;;  %v16023_v9 = vadd.f32 %v2115_v22, %v15417_v62  ;;  %v2429_v1 = vpop.f32.mrf.mxu1  ;;  %4220 = vmatpush.bf16.msra.mxu3 %v14465_v52  ;;  %v2024_v62 = vpack.c.bf16 %v16033_v55, %v16026_v47  ;;  %v10838_v47 = vld [vmem:[%s19040_s1 + $0x3f0] sm:$0xf]  ;;  %v13430_v55 = vld [vmem:[%s19040_s1 + $0x3f4] sm:$0xf0] }
 0x2f6   : > { %2154 = vmatmul.bf16.gmra.mxu0 %v19107_v56  ;;  %2557 = vmatmul.bf16.gmra.mxu2 %v10811_v63  ;;  %v2005_v33 = vpop.f32.mrf.mxu3 }
 0x2f7   : > { %2468 = vmatmul.bf16.gmra.mxu1 %v10807_v20  ;;  %2682 = vmatmul.bf16.gmra.mxu3 %v2585_v31  ;;  %v16056_v20 = vadd.f32 %v2005_v33, %v15903_v14 }
 0x2f9   : > { %v2518_v39 = vpop.f32.mrf.mxu2 }
 0x2fa   : > { %v2519_v46 = vadd.f32 %v2518_v39, %v2429_v1 }
 0x2fb   : > { %v2117_v34 = vpop.f32.mrf.mxu0 }
 0x2fc   : > { %v16038_v59 = vadd.f32 %v2117_v34, %v15438_v32  ;;  %v2431_v35 = vpop.f32.mrf.mxu1  ;;  %v13424_v32 = vld [vmem:[%s19040_s1 + $0x3c4] sm:$0xf0]  ;;  %v13426_v34 = vld [vmem:[%s19040_s1 + $0x3d4] sm:$0xf0] }
 0x2fd   : > { %v10815_v16 = vor.u32 %v13424_v32, %v10814_v28 }
 0x2fe   : > { %v2007_v31 = vpop.f32.mrf.mxu3 }
 0x2ff   : > { %v16062_v1 = vadd.f32 %v2007_v31, %v15921_v45  ;;  %v10824_v45 = vld [vmem:[%s19040_s1 + $0x3d8] sm:$0xf0]  ;;  %v10831_v31 = vor.u32 %v13428_v51, %v10830_v38 }
 0x300   : > { %v10827_v33 = vor.u32 %v13425_v48, %v10824_v45 }
 0x301   : > { %v2520_v43 = vpop.f32.mrf.mxu2  ;;  %v2025_v2 = vpack.c.bf16 %v16062_v1, %v16056_v20 }
 0x302   : > { %v2521_v41 = vadd.f32 %v2520_v43, %v2431_v35 }
 0x303   : > { %v2120_v60 = vpop.f32.mrf.mxu0 }
 0x304   : > { %v2586_v19 = vpack.c.bf16 %v2521_v41, %v2519_v46  ;;  %v16053_v63 = vadd.f32 %v2120_v60, %v15451_v58  ;;  %v2434_v22 = vpop.f32.mrf.mxu1 }
 0x306   : > { %2159 = vmatmul.bf16.gmra.mxu0 %v2022_v61  ;;  %2562 = vmatmul.bf16.gmra.mxu2 %v10819_v54  ;;  %v10822_v61 = vld [vmem:[%s19040_s1 + $0x3d0] sm:$0xf] }
 0x307   : > { %2473 = vmatmul.bf16.gmra.mxu1 %v10815_v16  ;;  %2687 = vmatmul.bf16.gmra.mxu3 %v2586_v19  ;;  %v10823_v26 = vor.u32 %v13426_v34, %v10822_v61  ;;  %v13427_v16 = vld [vmem:[%s19040_s1 + $0x3e4] sm:$0xf]  ;;  %v13429_v61 = vld [vmem:[%s19040_s1 + $0x3f4] sm:$0xf] }
 0x309   : > { %v2523_v58 = vpop.f32.mrf.mxu2 }
 0x30a   : > { %v2524_v25 = vadd.f32 %v2523_v58, %v2434_v22 }
 0x30b   : > { %v2122_v56 = vpop.f32.mrf.mxu0 }
 0x30c   : > { %v16067_v39 = vadd.f32 %v2122_v56, %v15475_v0  ;;  %v2436_v14 = vpop.f32.mrf.mxu1 }
 0x311   : > { %v2525_v0 = vpop.f32.mrf.mxu2 }
 0x312   : > { %v2526_v35 = vadd.f32 %v2525_v0, %v2436_v14 }
 0x313   : > { %v2125_v23 = vpop.f32.mrf.mxu0 }
 0x314   : > { %v2587_v46 = vpack.c.bf16 %v2526_v35, %v2524_v25  ;;  %v16082_v28 = vadd.f32 %v2125_v23, %v15491_v5  ;;  %v2439_v32 = vpop.f32.mrf.mxu1  ;;  %v10832_v5 = vld [vmem:[%s19040_s1 + $0x3e8] sm:$0xf0] }
 0x315   : > { %v10835_v22 = vor.u32 %v13427_v16, %v10832_v5  ;;  %v10926_v16 = vld [vmem:[%s19040_s1 + $0x400] sm:$0xf] }
 0x316   : > { %2164 = vmatmul.bf16.gmra.mxu0 %v2023_v13  ;;  %2567 = vmatmul.bf16.gmra.mxu2 %v10827_v33  ;;  %v10839_v33 = vor.u32 %v13430_v55, %v10838_v47 }
 0x317   : > { %2478 = vmatmul.bf16.gmra.mxu1 %v10823_v26  ;;  %2692 = vmatmul.bf16.gmra.mxu3 %v2587_v46 }
 0x319   : > { %v2528_v43 = vpop.f32.mrf.mxu2 }
 0x31a   : > { %v2529_v19 = vadd.f32 %v2528_v43, %v2439_v32 }
 0x31b   : > { %v2127_v41 = vpop.f32.mrf.mxu0 }
 0x31c   : > { %v16088_v54 = vadd.f32 %v2127_v41, %v15518_v37  ;;  %v2441_v60 = vpop.f32.mrf.mxu1 }
 0x321   : > { %v2530_v37 = vpop.f32.mrf.mxu2 }
 0x322   : > { %v2531_v13 = vadd.f32 %v2530_v37, %v2441_v60 }
 0x323   : > { %v2130_v20 = vpop.f32.mrf.mxu0 }
 0x324   : > { %v2588_v1 = vpack.c.bf16 %v2531_v13, %v2529_v19  ;;  %v16103_v58 = vadd.f32 %v2130_v20, %v15537_v15  ;;  %v2444_v56 = vpop.f32.mrf.mxu1  ;;  %v10840_v15 = vld [vmem:[%s19040_s1 + $0x3f8] sm:$0xf0]  ;;  %v10928_v19 = vld [vmem:[%s19040_s1 + $0x408] sm:$0xf0] }
 0x325   : > { %v10843_v0 = vor.u32 %v13429_v61, %v10840_v15  ;;  %v13442_v61 = vld [vmem:[%s19040_s1 + $0x414] sm:$0xf0]  ;;  %v13441_v15 = vld [vmem:[%s19040_s1 + $0x414] sm:$0xf] }
 0x326   : > { %2169 = vmatmul.bf16.gmra.mxu0 %v2024_v62  ;;  %2572 = vmatmul.bf16.gmra.mxu2 %v10835_v22 }
 0x327   : > { %2483 = vmatmul.bf16.gmra.mxu1 %v10831_v31  ;;  %2697 = vmatmul.bf16.gmra.mxu3 %v2588_v1 }
 0x329   : > { %v2533_v14 = vpop.f32.mrf.mxu2 }
 0x32a   : > { %v2534_v34 = vadd.f32 %v2533_v14, %v2444_v56 }
 0x32b   : > { %v2132_v48 = vpop.f32.mrf.mxu0 }
 0x32c   : > { %v16109_v45 = vadd.f32 %v2132_v48, %v15560_v40  ;;  %v2446_v25 = vpop.f32.mrf.mxu1 }
 0x331   : > { %v2535_v40 = vpop.f32.mrf.mxu2 }
 0x332   : > { %v2536_v62 = vadd.f32 %v2535_v40, %v2446_v25  ;;  %v10934_v25 = vld [vmem:[%s19040_s1 + $0x410] sm:$0xf] }
 0x333   : > { %v2135_v35 = vpop.f32.mrf.mxu0  ;;  %v10935_v55 = vor.u32 %v13442_v61, %v10934_v25  ;;  %v19110_v25 = vld [vmem:[#allocation25_spill] sm:$0xff] }
 0x334   : > { %v2589_v23 = vpack.c.bf16 %v2536_v62, %v2534_v34  ;;  %v16124_v26 = vadd.f32 %v2135_v35, %v15575_v6  ;;  %v2449_v46 = vpop.f32.mrf.mxu1  ;;  %v13440_v6 = vld [vmem:[%s19040_s1 + $0x404] sm:$0xf0]  ;;  %v10936_v34 = vld [vmem:[%s19040_s1 + $0x418] sm:$0xf0] }
 0x335   : > { %v10927_v51 = vor.u32 %v13440_v6, %v10926_v16  ;;  %v10939_v62 = vor.u32 %v13441_v15, %v10936_v34  ;;  %v19108_v35 = vld [vmem:[#allocation23_spill] sm:$0xff]  ;;  %v19109_v16 = vld [vmem:[#allocation24_spill] sm:$0xff] }
 0x336   : > { %2174 = vmatmul.bf16.gmra.mxu0 %v2025_v2  ;;  %2577 = vmatmul.bf16.gmra.mxu2 %v10843_v0  ;;  %v13439_v2 = vld [vmem:[%s19040_s1 + $0x404] sm:$0xf] }
 0x337   : > { %2488 = vmatmul.bf16.gmra.mxu1 %v10839_v33  ;;  %2702 = vmatmul.bf16.gmra.mxu3 %v2589_v23  ;;  %v10931_v13 = vor.u32 %v13439_v2, %v10928_v19  ;;  %v10942_v2 = vld [vmem:[%s19040_s1 + $0x420] sm:$0xf]  ;;  %v13444_v19 = vld [vmem:[%s19040_s1 + $0x424] sm:$0xf0] }
 0x339   : > { %v2538_v32 = vpop.f32.mrf.mxu2 }
 0x33a   : > { %v2539_v5 = vadd.f32 %v2538_v32, %v2449_v46 }
 0x33b   : > { %v2137_v43 = vpop.f32.mrf.mxu0 }
 0x33c   : > { %v16127_v41 = vadd.f32 %v2137_v43, %v15598_v27  ;;  %v2451_v60 = vpop.f32.mrf.mxu1 }
 0x341   : > { %v2540_v27 = vpop.f32.mrf.mxu2 }
 0x342   : > { %v2541_v38 = vadd.f32 %v2540_v27, %v2451_v60 }
 0x343   : > { %v2140_v37 = vpop.f32.mrf.mxu0 }
 0x344   : > { %v2590_v22 = vpack.c.bf16 %v2541_v38, %v2539_v5  ;;  %v16142_v20 = vadd.f32 %v2140_v37, %v15619_v10  ;;  %v2454_v31 = vpop.f32.mrf.mxu1  ;;  %v13443_v38 = vld [vmem:[%s19040_s1 + $0x424] sm:$0xf] }
 0x346   : > { %2986 = vmatmul.bf16.vlgmr.msrb.gmra.mxu0 %v10927_v51 }
 0x347   : > { %2707 = vmatmul.bf16.gmra.mxu3 %v2590_v22  ;;  %3075 = vmatmul.bf16.vlgmr.msrb.gmra.mxu1 %v10931_v13  ;;  %v10943_v22 = vor.u32 %v13444_v19, %v10942_v2 }
 0x349   : > { %v2543_v1 = vpop.f32.mrf.mxu2 }
 0x34a   : > { %v2544_v10 = vadd.f32 %v2543_v1, %v2454_v31 }
 0x34b   : > { %v2142_v56 = vpop.f32.mrf.mxu0 }
 0x34c   : > { %v16145_v14 = vadd.f32 %v2142_v56, %v15639_v53  ;;  %v2456_v48 = vpop.f32.mrf.mxu1 }
 0x351   : > { %v2545_v53 = vpop.f32.mrf.mxu2 }
 0x352   : > { %v2546_v47 = vadd.f32 %v2545_v53, %v2456_v48 }
 0x353   : > { %v2145_v40 = vpop.f32.mrf.mxu0 }
 0x354   : > { %v2591_v0 = vpack.c.bf16 %v2546_v47, %v2544_v10  ;;  %v16160_v33 = vadd.f32 %v2145_v40, %v19108_v35  ;;  %v2459_v23 = vpop.f32.mrf.mxu1 }
 0x356   : > { %2991 = vmatmul.bf16.gmra.mxu0 %v10935_v55  ;;  %v19111_v55 = vld [vmem:[#allocation26_spill] sm:$0xff] }
 0x357   : > { %2712 = vmatmul.bf16.gmra.mxu3 %v2591_v0  ;;  %3080 = vmatmul.bf16.gmra.mxu1 %v10939_v62  ;;  %v10950_v62 = vld [vmem:[%s19040_s1 + $0x430] sm:$0xf]  ;;  %v13446_v0 = vld [vmem:[%s19040_s1 + $0x434] sm:$0xf0] }
 0x359   : > { %v2548_v46 = vpop.f32.mrf.mxu2 }
 0x35a   : > { %v2673_v32 = vpop.f32.mrf.mxu3  ;;  %v2549_v27 = vadd.f32 %v2548_v46, %v2459_v23  ;;  %v13445_v23 = vld [vmem:[%s19040_s1 + $0x434] sm:$0xf] }
 0x35b   : > { %v16163_v43 = vadd.f32 %v2673_v32, %v15925_v44  ;;  %v2147_v60 = vpop.f32.mrf.mxu0  ;;  %v10944_v44 = vld [vmem:[%s19040_s1 + $0x428] sm:$0xf0] }
 0x35c   : > { %v16166_v6 = vadd.f32 %v2147_v60, %v19109_v16  ;;  %v2461_v5 = vpop.f32.mrf.mxu1  ;;  %v10947_v56 = vor.u32 %v13443_v38, %v10944_v44  ;;  %v10951_v16 = vor.u32 %v13446_v0, %v10950_v62  ;;  %v19112_v38 = vld [vmem:[#allocation27_spill] sm:$0xff] }
 0x361   : > { %v2550_v51 = vpop.f32.mrf.mxu2 }
 0x362   : > { %v2551_v37 = vadd.f32 %v2550_v51, %v2461_v5  ;;  %v2675_v13 = vpop.f32.mrf.mxu3 }
 0x363   : > { %v16181_v31 = vadd.f32 %v2675_v13, %v15941_v57  ;;  %v2150_v1 = vpop.f32.mrf.mxu0 }
 0x364   : > { %v2592_v48 = vpack.c.bf16 %v2551_v37, %v2549_v27  ;;  %v16184_v61 = vadd.f32 %v2150_v1, %v19110_v25  ;;  %v2464_v10 = vpop.f32.mrf.mxu1  ;;  %v10958_v25 = vld [vmem:[%s19040_s1 + $0x440] sm:$0xf] }
 0x366   : > { %2996 = vmatmul.bf16.gmra.mxu0 %v10943_v22 }
 0x367   : > { %2717 = vmatmul.bf16.gmra.mxu3 %v2592_v48  ;;  %3085 = vmatmul.bf16.gmra.mxu1 %v10947_v56  ;;  %v19113_v56 = vld [vmem:[#allocation28_spill] sm:$0xff] }
 0x369   : > { %v2553_v15 = vpop.f32.mrf.mxu2 }
 0x36a   : > { %v2678_v34 = vpop.f32.mrf.mxu3  ;;  %v2554_v35 = vadd.f32 %v2553_v15, %v2464_v10  ;;  %v13448_v10 = vld [vmem:[%s19040_s1 + $0x444] sm:$0xf0] }
 0x36b   : > { %v16187_v53 = vadd.f32 %v2678_v34, %v15958_v49  ;;  %v2152_v47 = vpop.f32.mrf.mxu0  ;;  %v10952_v49 = vld [vmem:[%s19040_s1 + $0x438] sm:$0xf0]  ;;  %v13447_v34 = vld [vmem:[%s19040_s1 + $0x444] sm:$0xf]  ;;  %v10959_v62 = vor.u32 %v13448_v10, %v10958_v25 }
 0x36c   : > { %v16190_v40 = vadd.f32 %v2152_v47, %v19111_v55  ;;  %v2466_v57 = vpop.f32.mrf.mxu1  ;;  %v10955_v19 = vor.u32 %v13445_v23, %v10952_v49 }
 0x371   : > { %v2555_v46 = vpop.f32.mrf.mxu2 }
 0x372   : > { %v2556_v32 = vadd.f32 %v2555_v46, %v2466_v57  ;;  %v2680_v60 = vpop.f32.mrf.mxu3  ;;  %v19114_v46 = vld [vmem:[#allocation29_spill] sm:$0xff] }
 0x373   : > { %v16205_v5 = vadd.f32 %v2680_v60, %v15973_v50  ;;  %v2155_v2 = vpop.f32.mrf.mxu0 }
 0x374   : > { %v2593_v27 = vpack.c.bf16 %v2556_v32, %v2554_v35  ;;  %v16208_v44 = vadd.f32 %v2155_v2, %v19112_v38  ;;  %v2469_v51 = vpop.f32.mrf.mxu1  ;;  %v19115_v38 = vld [vmem:[#allocation30_spill] sm:$0xff] }
 0x376   : > { %3001 = vmatmul.bf16.gmra.mxu0 %v10951_v16 }
 0x377   : > { %2722 = vmatmul.bf16.gmra.mxu3 %v2593_v27  ;;  %3090 = vmatmul.bf16.gmra.mxu1 %v10955_v19 }
 0x379   : > { %v2558_v37 = vpop.f32.mrf.mxu2 }
 0x37a   : > { %v2683_v13 = vpop.f32.mrf.mxu3  ;;  %v2559_v15 = vadd.f32 %v2558_v37, %v2469_v51  ;;  %v10966_v37 = vld [vmem:[%s19040_s1 + $0x450] sm:$0xf] }
 0x37b   : > { %v16211_v22 = vadd.f32 %v2683_v13, %v15990_v3  ;;  %v2157_v1 = vpop.f32.mrf.mxu0  ;;  %v10960_v3 = vld [vmem:[%s19040_s1 + $0x448] sm:$0xf0]  ;;  %v13450_v13 = vld [vmem:[%s19040_s1 + $0x454] sm:$0xf0] }
 0x37c   : > { %v16214_v48 = vadd.f32 %v2157_v1, %v19113_v56  ;;  %v2471_v50 = vpop.f32.mrf.mxu1  ;;  %v10963_v23 = vor.u32 %v13447_v34, %v10960_v3  ;;  %v13449_v56 = vld [vmem:[%s19040_s1 + $0x454] sm:$0xf]  ;;  %v10967_v34 = vor.u32 %v13450_v13, %v10966_v37  ;;  %v13475_v37 = vld [vmem:[%s19041_s2 + $0x120] sm:$0xff] }
 0x37d   : > { %v10974_v13 = vld [vmem:[%s19040_s1 + $0x460] sm:$0xf] }
 0x381   : > { %v2560_v47 = vpop.f32.mrf.mxu2 }
 0x382   : > { %v2561_v55 = vadd.f32 %v2560_v47, %v2471_v50  ;;  %v2685_v57 = vpop.f32.mrf.mxu3  ;;  %v13478_v50 = vld [vmem:[%s19041_s2 + $0x138] sm:$0xff] }
 0x383   : > { %v16229_v0 = vadd.f32 %v2685_v57, %v16006_v21  ;;  %v2160_v35 = vpop.f32.mrf.mxu0  ;;  %3237 = vmatpush.bf16.msrb.mxu2 %v13478_v50  ;;  %v13474_v50 = vld [vmem:[%s19041_s2 + $0x118] sm:$0xff] }
 0x384   : > { %v2594_v49 = vpack.c.bf16 %v2561_v55, %v2559_v15  ;;  %v16232_v32 = vadd.f32 %v2160_v35, %v19114_v46  ;;  %v2474_v60 = vpop.f32.mrf.mxu1 }
 0x386   : > { %3006 = vmatmul.bf16.gmra.mxu0 %v10959_v62  ;;  %v19116_v62 = vld [vmem:[#allocation31_spill] sm:$0xff] }
 0x387   : > { %2727 = vmatmul.bf16.gmra.mxu3 %v2594_v49  ;;  %3095 = vmatmul.bf16.gmra.mxu1 %v10963_v23  ;;  %v13477_v49 = vld [vmem:[%s19041_s2 + $0x130] sm:$0xff] }
 0x388   : > { %3238 = vmatpush.bf16.msrb.mxu2 %v13477_v49 }
 0x389   : > { %v2563_v16 = vpop.f32.mrf.mxu2 }
 0x38a   : > { %v2688_v2 = vpop.f32.mrf.mxu3  ;;  %v2564_v1 = vadd.f32 %v2563_v16, %v2474_v60 }
 0x38b   : > { %v16235_v19 = vadd.f32 %v2688_v2, %v16023_v9  ;;  %v2162_v27 = vpop.f32.mrf.mxu0  ;;  %v10968_v9 = vld [vmem:[%s19040_s1 + $0x458] sm:$0xf0] }
 0x38c   : > { %v16238_v51 = vadd.f32 %v2162_v27, %v19115_v38  ;;  %v2476_v21 = vpop.f32.mrf.mxu1  ;;  %v10971_v55 = vor.u32 %v13449_v56, %v10968_v9  ;;  %v19117_v27 = vld [vmem:[#allocation32_spill] sm:$0xff]  ;;  %v10976_v9 = vld [vmem:[%s19040_s1 + $0x468] sm:$0xf0] }
 0x38d   : > { %v13451_v56 = vld [vmem:[%s19040_s1 + $0x464] sm:$0xf] }
 0x391   : > { %v2565_v25 = vpop.f32.mrf.mxu2 }
 0x392   : > { %v2566_v10 = vadd.f32 %v2565_v25, %v2476_v21  ;;  %v2690_v15 = vpop.f32.mrf.mxu3 }
 0x393   : > { %v16256_v3 = vadd.f32 %v2690_v15, %v16038_v59  ;;  %v2165_v47 = vpop.f32.mrf.mxu0  ;;  %v13476_v59 = vld [vmem:[%s19041_s2 + $0x128] sm:$0xff] }
 0x394   : > { %v2595_v57 = vpack.c.bf16 %v2566_v10, %v2564_v1  ;;  %v16259_v35 = vadd.f32 %v2165_v47, %v19116_v62  ;;  %v2479_v23 = vpop.f32.mrf.mxu1  ;;  %3239 = vmatpush.bf16.msrb.mxu2 %v13476_v59  ;;  %v13452_v1 = vld [vmem:[%s19040_s1 + $0x464] sm:$0xf0] }
 0x396   : > { %3011 = vmatmul.bf16.gmra.mxu0 %v10967_v34  ;;  %v10975_v34 = vor.u32 %v13452_v1, %v10974_v13 }
 0x397   : > { %2732 = vmatmul.bf16.gmra.mxu3 %v2595_v57  ;;  %3100 = vmatmul.bf16.gmra.mxu1 %v10971_v55  ;;  %v10979_v57 = vor.u32 %v13451_v56, %v10976_v9  ;;  %v10982_v56 = vld [vmem:[%s19040_s1 + $0x470] sm:$0xf]  ;;  %v13454_v9 = vld [vmem:[%s19040_s1 + $0x474] sm:$0xf0] }
 0x398   : > { %3240 = vmatpush.bf16.msrb.mxu2 %v13475_v37  ;;  %v19119_v37 = vld [vmem:[#allocation34_spill] sm:$0xff] }
 0x399   : > { %v2568_v46 = vpop.f32.mrf.mxu2 }
 0x39a   : > { %v2693_v60 = vpop.f32.mrf.mxu3 }
 0x39b   : > { %v16268_v16 = vadd.f32 %v2693_v60, %v16053_v63  ;;  %v2167_v2 = vpop.f32.mrf.mxu0  ;;  %v2569_v63 = vadd.f32 %v2568_v46, %v2479_v23  ;;  %v19118_v23 = vld [vmem:[#allocation33_spill] sm:$0xff] }
 0x39c   : > { %v16271_v38 = vadd.f32 %v2167_v2, %v19117_v27  ;;  %v2481_v21 = vpop.f32.mrf.mxu1  ;;  %3241 = vmatpush.bf16.msrb.mxu2 %v13474_v50  ;;  %v13473_v46 = vld [vmem:[%s19041_s2 + $0x110] sm:$0xff] }
 0x39d   : > { %v13453_v50 = vld [vmem:[%s19040_s1 + $0x474] sm:$0xf] }
 0x3a0   : > { %3242 = vmatpush.bf16.msrb.mxu2 %v13473_v46 }
 0x3a1   : > { %v2570_v25 = vpop.f32.mrf.mxu2 }
 0x3a2   : > { %v2571_v10 = vadd.f32 %v2570_v25, %v2481_v21  ;;  %v2695_v15 = vpop.f32.mrf.mxu3  ;;  %v10984_v25 = vld [vmem:[%s19040_s1 + $0x478] sm:$0xf0] }
 0x3a3   : > { %v16292_v47 = vadd.f32 %v2695_v15, %v16067_v39  ;;  %v2170_v55 = vpop.f32.mrf.mxu0  ;;  %v13472_v39 = vld [vmem:[%s19041_s2 + $0x108] sm:$0xff] }
 0x3a4   : > { %v2596_v62 = vpack.c.bf16 %v2571_v10, %v2569_v63  ;;  %v16295_v49 = vadd.f32 %v2170_v55, %v19118_v23  ;;  %v2484_v59 = vpop.f32.mrf.mxu1  ;;  %3243 = vmatpush.bf16.msrb.mxu2 %v13472_v39  ;;  %v13471_v63 = vld [vmem:[%s19041_s2 + $0x100] sm:$0xff]  ;;  %v10983_v55 = vor.u32 %v13454_v9, %v10982_v56  ;;  %v10987_v23 = vor.u32 %v13453_v50, %v10984_v25  ;;  %v13456_v9 = vld [vmem:[%s19040_s1 + $0x484] sm:$0xf0]  ;;  %v10992_v50 = vld [vmem:[%s19040_s1 + $0x488] sm:$0xf0] }
 0x3a5   : > { %v19121_v56 = vld [vmem:[#allocation16_spill] sm:$0xff] }
 0x3a6   : > { %3016 = vmatmul.bf16.gmra.mxu0 %v10975_v34 }
 0x3a7   : > { %2737 = vmatmul.bf16.gmra.mxu3 %v2596_v62  ;;  %3105 = vmatmul.bf16.gmra.mxu1 %v10979_v57 }
 0x3a8   : > { %3244 = vmatpush.bf16.msrb.mxu2 %v13471_v63 }
 0x3a9   : > { %v2573_v60 = vpop.f32.mrf.mxu2 }
 0x3aa   : > { %v2698_v2 = vpop.f32.mrf.mxu3 }
 0x3ab   : > { %v16304_v27 = vadd.f32 %v2698_v2, %v16082_v28  ;;  %v2172_v21 = vpop.f32.mrf.mxu0  ;;  %v2574_v28 = vadd.f32 %v2573_v60, %v2484_v59 }
 0x3ac   : > { %v16307_v13 = vadd.f32 %v2172_v21, %v19119_v37  ;;  %v2486_v1 = vpop.f32.mrf.mxu1  ;;  %4124 = vmatpush.bf16.msra.mxu2 %v14367_v4  ;;  %v19120_v37 = vld [vmem:[#allocation35_spill] sm:$0xff] }
 0x3b0   : > { %4125 = vmatpush.bf16.msra.mxu2 %v14378_v11 }
 0x3b1   : > { %v2575_v10 = vpop.f32.mrf.mxu2 }
 0x3b2   : > { %v2576_v15 = vadd.f32 %v2575_v10, %v2486_v1  ;;  %v2700_v34 = vpop.f32.mrf.mxu3 }
 0x3b3   : > { %v16326_v57 = vadd.f32 %v2700_v34, %v16088_v54  ;;  %v2175_v62 = vpop.f32.mrf.mxu0 }
 0x3b4   : > { %v2597_v59 = vpack.c.bf16 %v2576_v15, %v2574_v28  ;;  %v16330_v46 = vadd.f32 %v2175_v62, %v15892_v7  ;;  %v2489_v39 = vpop.f32.mrf.mxu1  ;;  %4126 = vmatpush.bf16.msra.mxu2 %v14390_v17  ;;  %v10990_v7 = vld [vmem:[%s19040_s1 + $0x480] sm:$0xf] }
 0x3b5   : > { %v10991_v34 = vor.u32 %v13456_v9, %v10990_v7  ;;  %v19124_v9 = vld [vmem:[#allocation21_spill] sm:$0xff] }
 0x3b6   : > { %3021 = vmatmul.bf16.gmra.mxu0 %v10983_v55 }
 0x3b7   : > { %2742 = vmatmul.bf16.gmra.mxu3 %v2597_v59  ;;  %3110 = vmatmul.bf16.gmra.mxu1 %v10987_v23 }
 0x3b8   : > { %4127 = vmatpush.bf16.msra.mxu2 %v19121_v56 }
 0x3b9   : > { %v2578_v60 = vpop.f32.mrf.mxu2 }
 0x3ba   : > { %v2703_v2 = vpop.f32.mrf.mxu3  ;;  %v2579_v28 = vadd.f32 %v2578_v60, %v2489_v39  ;;  %v19122_v60 = vld [vmem:[#allocation17_spill] sm:$0xff] }
 0x3bb   : > { %v16334_v21 = vadd.f32 %v2703_v2, %v16103_v58  ;;  %v2177_v54 = vpop.f32.mrf.mxu0  ;;  %v13455_v58 = vld [vmem:[%s19040_s1 + $0x484] sm:$0xf]  ;;  %v19123_v2 = vld [vmem:[#allocation19_spill] sm:$0xff] }
 0x3bc   : > { %v16337_v1 = vadd.f32 %v2177_v54, %v19120_v37  ;;  %v2491_v63 = vpop.f32.mrf.mxu1  ;;  %4128 = vmatpush.bf16.msra.mxu2 %v14414_v29  ;;  %v10995_v23 = vor.u32 %v13455_v58, %v10992_v50  ;;  %v13458_v50 = vld [vmem:[%s19040_s1 + $0x494] sm:$0xf0] }
 0x3c0   : > { %4129 = vmatpush.bf16.msra.mxu2 %v19122_v60 }
 0x3c1   : > { %v2580_v25 = vpop.f32.mrf.mxu2 }
 0x3c2   : > { %v2581_v10 = vadd.f32 %v2580_v25, %v2491_v63  ;;  %v2705_v15 = vpop.f32.mrf.mxu3 }
 0x3c3   : > { %v16354_v55 = vadd.f32 %v2705_v15, %v16109_v45  ;;  %v2987_v62 = vpop.f32.mrf.mxu0  ;;  %v11134_v15 = vld [vmem:[%s19040_s1 + $0x500] sm:$0xf] }
 0x3c4   : > { %v2598_v59 = vpack.c.bf16 %v2581_v10, %v2579_v28  ;;  %v3076_v39 = vpop.f32.mrf.mxu1  ;;  %4130 = vmatpush.bf16.msra.mxu2 %v19123_v2  ;;  %v10998_v28 = vld [vmem:[%s19040_s1 + $0x490] sm:$0xf]  ;;  %v11000_v10 = vld [vmem:[%s19040_s1 + $0x498] sm:$0xf0] }
 0x3c5   : > { %v3077_v45 = vadd.f32 %v3076_v39, %v2987_v62 }
 0x3c6   : > { %3026 = vmatmul.bf16.gmra.mxu0 %v10991_v34  ;;  %v13480_v34 = vld [vmem:[%s19040_s1 + $0x504] sm:$0xf0] }
 0x3c7   : > { %2747 = vmatmul.bf16.gmra.mxu3 %v2598_v59  ;;  %3115 = vmatmul.bf16.gmra.mxu1 %v10995_v23  ;;  %v10999_v23 = vor.u32 %v13458_v50, %v10998_v28 }
 0x3c8   : > { %4131 = vmatpush.bf16.msra.mxu2 %v19124_v9 }
 0x3ca   : > { %v2708_v54 = vpop.f32.mrf.mxu3 }
 0x3cb   : > { %v16359_v37 = vadd.f32 %v2708_v54, %v16124_v26  ;;  %v2989_v63 = vpop.f32.mrf.mxu0  ;;  %v13457_v26 = vld [vmem:[%s19040_s1 + $0x494] sm:$0xf] }
 0x3cc   : > { %v3078_v7 = vpop.f32.mrf.mxu1  ;;  %v11003_v54 = vor.u32 %v13457_v26, %v11000_v10  ;;  %v11006_v10 = vld [vmem:[%s19040_s1 + $0x4a0] sm:$0xf] }
 0x3cd   : > { %v3079_v25 = vadd.f32 %v3078_v7, %v2989_v63  ;;  %v11135_v63 = vor.u32 %v13480_v34, %v11134_v15  ;;  %v13460_v15 = vld [vmem:[%s19040_s1 + $0x4a4] sm:$0xf0]  ;;  %v11008_v34 = vld [vmem:[%s19040_s1 + $0x4a8] sm:$0xf0] }
 0x3cf   : > { %v3156_v58 = vpack.c.bf16 %v3079_v25, %v3077_v45 }
 0x3d1   : > { %3245 = vmatmul.bf16.vlgmr.msrb.gmra.mxu2 %v3156_v58 }
 0x3d2   : > { %v2710_v62 = vpop.f32.mrf.mxu3  ;;  %4786 = vmatpush.bf16.msrb.mxu2 %v14372_v8 }
 0x3d3   : > { %v16382_v59 = vadd.f32 %v2710_v62, %v16127_v41  ;;  %v2992_v39 = vpop.f32.mrf.mxu0  ;;  %v11142_v62 = vld [vmem:[%s19040_s1 + $0x510] sm:$0xf] }
 0x3d4   : > { %v3081_v7 = vpop.f32.mrf.mxu1 }
 0x3d5   : > { %v3082_v50 = vadd.f32 %v3081_v7, %v2992_v39 }
 0x3d6   : > { %3031 = vmatmul.bf16.gmra.mxu0 %v10999_v23  ;;  %4787 = vmatpush.bf16.msrb.mxu2 %v14381_v12  ;;  %v13482_v23 = vld [vmem:[%s19040_s1 + $0x514] sm:$0xf0] }
 0x3d7   : > { %3120 = vmatmul.bf16.gmra.mxu1 %v11003_v54  ;;  %3559 = vmatmul.bf16.vlgmr.msrb.gmra.mxu3 %v11135_v63  ;;  %v11007_v54 = vor.u32 %v13460_v15, %v11006_v10 }
 0x3da   : > { %v2713_v45 = vpop.f32.mrf.mxu3  ;;  %4788 = vmatpush.bf16.msrb.mxu2 %v14393_v18 }
 0x3db   : > { %v16387_v25 = vadd.f32 %v2713_v45, %v16142_v20  ;;  %v2994_v58 = vpop.f32.mrf.mxu0  ;;  %v13459_v20 = vld [vmem:[%s19040_s1 + $0x4a4] sm:$0xf] }
 0x3dc   : > { %v3083_v28 = vpop.f32.mrf.mxu1  ;;  %v11011_v45 = vor.u32 %v13459_v20, %v11008_v34  ;;  %v11014_v34 = vld [vmem:[%s19040_s1 + $0x4b0] sm:$0xf] }
 0x3dd   : > { %v3084_v41 = vadd.f32 %v3083_v28, %v2994_v58  ;;  %v11143_v58 = vor.u32 %v13482_v23, %v11142_v62  ;;  %v13462_v62 = vld [vmem:[%s19040_s1 + $0x4b4] sm:$0xf0]  ;;  %v11016_v23 = vld [vmem:[%s19040_s1 + $0x4b8] sm:$0xf0] }
 0x3de   : > { %4789 = vmatpush.bf16.msrb.mxu2 %v14405_v24 }
 0x3df   : > { %v3157_v26 = vpack.c.bf16 %v3084_v41, %v3082_v50 }
 0x3e1   : > { %3250 = vmatmul.bf16.gmra.mxu2 %v3157_v26 }
 0x3e2   : > { %v2715_v39 = vpop.f32.mrf.mxu3  ;;  %4790 = vmatpush.bf16.msrb.mxu2 %v14417_v30 }
 0x3e3   : > { %v16410_v63 = vadd.f32 %v2715_v39, %v16145_v14  ;;  %v2997_v7 = vpop.f32.mrf.mxu0  ;;  %v11150_v39 = vld [vmem:[%s19040_s1 + $0x520] sm:$0xf] }
 0x3e4   : > { %v3086_v28 = vpop.f32.mrf.mxu1 }
 0x3e5   : > { %v3087_v15 = vadd.f32 %v3086_v28, %v2997_v7 }
 0x3e6   : > { %3036 = vmatmul.bf16.gmra.mxu0 %v11007_v54  ;;  %4791 = vmatpush.bf16.msrb.mxu2 %v14429_v36  ;;  %v13484_v54 = vld [vmem:[%s19040_s1 + $0x524] sm:$0xf0] }
 0x3e7   : > { %3125 = vmatmul.bf16.gmra.mxu1 %v11011_v45  ;;  %3564 = vmatmul.bf16.gmra.mxu3 %v11143_v58  ;;  %v11015_v45 = vor.u32 %v13462_v62, %v11014_v34  ;;  %v13464_v34 = vld [vmem:[%s19040_s1 + $0x4c4] sm:$0xf0]  ;;  %v13463_v62 = vld [vmem:[%s19040_s1 + $0x4c4] sm:$0xf] }
 0x3ea   : > { %v2718_v50 = vpop.f32.mrf.mxu3  ;;  %4792 = vmatpush.bf16.msrb.mxu2 %v14441_v42 }
 0x3eb   : > { %v16415_v41 = vadd.f32 %v2718_v50, %v16160_v33  ;;  %v2999_v26 = vpop.f32.mrf.mxu0  ;;  %v13461_v33 = vld [vmem:[%s19040_s1 + $0x4b4] sm:$0xf] }
 0x3ec   : > { %v3088_v10 = vpop.f32.mrf.mxu1  ;;  %v11019_v50 = vor.u32 %v13461_v33, %v11016_v23 }
 0x3ed   : > { %19125 = vst [vmem:[#allocation23_spill] sm:$0xff] %v16415_v41  ;;  %v3089_v14 = vadd.f32 %v3088_v10, %v2999_v26  ;;  %v11151_v26 = vor.u32 %v13484_v54, %v11150_v39 }
 0x3ee   : > { %4793 = vmatpush.bf16.msrb.mxu2 %v14465_v52 }
 0x3ef   : > { %v3158_v20 = vpack.c.bf16 %v3089_v14, %v3087_v15 }
 0x3f1   : > { %3255 = vmatmul.bf16.gmra.mxu2 %v3158_v20 }
 0x3f2   : > { %v2720_v7 = vpop.f32.mrf.mxu3 }
 0x3f3   : > { %v16437_v58 = vadd.f32 %v2720_v7, %v16166_v6  ;;  %v3002_v28 = vpop.f32.mrf.mxu0  ;;  %v11022_v6 = vld [vmem:[%s19040_s1 + $0x4c0] sm:$0xf] }
 0x3f4   : > { %v3091_v10 = vpop.f32.mrf.mxu1  ;;  %v11023_v33 = vor.u32 %v13464_v34, %v11022_v6  ;;  %v13466_v6 = vld [vmem:[%s19040_s1 + $0x4d4] sm:$0xf0]  ;;  %v13465_v34 = vld [vmem:[%s19040_s1 + $0x4d4] sm:$0xf] }
 0x3f5   : > { %v3092_v36 = vadd.f32 %v3091_v10, %v3002_v28 }
 0x3f6   : > { %3041 = vmatmul.bf16.gmra.mxu0 %v11015_v45 }
 0x3f7   : > { %3130 = vmatmul.bf16.gmra.mxu1 %v11019_v50  ;;  %3569 = vmatmul.bf16.gmra.mxu3 %v11151_v26 }
 0x3fa   : > { %v2723_v15 = vpop.f32.mrf.mxu3 }
 0x3fb   : > { %v16440_v14 = vadd.f32 %v2723_v15, %v16184_v61  ;;  %v3004_v52 = vpop.f32.mrf.mxu0  ;;  %v11024_v61 = vld [vmem:[%s19040_s1 + $0x4c8] sm:$0xf0] }
 0x3fc   : > { %v3093_v42 = vpop.f32.mrf.mxu1  ;;  %v11027_v54 = vor.u32 %v13463_v62, %v11024_v61  ;;  %v11166_v62 = vld [vmem:[%s19040_s1 + $0x540] sm:$0xf]  ;;  %v13488_v61 = vld [vmem:[%s19040_s1 + $0x544] sm:$0xf0] }
 0x3fd   : > { %v3094_v20 = vadd.f32 %v3093_v42, %v3004_v52  ;;  %v13486_v42 = vld [vmem:[%s19040_s1 + $0x534] sm:$0xf0] }
 0x3ff   : > { %v3159_v41 = vpack.c.bf16 %v3094_v20, %v3092_v36  ;;  %v11158_v36 = vld [vmem:[%s19040_s1 + $0x530] sm:$0xf] }
 0x400   : > { %v11159_v7 = vor.u32 %v13486_v42, %v11158_v36 }
 0x401   : > { %3260 = vmatmul.bf16.gmra.mxu2 %v3159_v41 }
 0x402   : > { %v2725_v52 = vpop.f32.mrf.mxu3 }
 0x403   : > { %v16461_v23 = vadd.f32 %v2725_v52, %v16190_v40  ;;  %v3007_v39 = vpop.f32.mrf.mxu0  ;;  %v11030_v40 = vld [vmem:[%s19040_s1 + $0x4d0] sm:$0xf] }
 0x404   : > { %v3096_v45 = vpop.f32.mrf.mxu1  ;;  %v11031_v42 = vor.u32 %v13466_v6, %v11030_v40  ;;  %v13468_v40 = vld [vmem:[%s19040_s1 + $0x4e4] sm:$0xf0]  ;;  %v13467_v6 = vld [vmem:[%s19040_s1 + $0x4e4] sm:$0xf] }
 0x405   : > { %v3097_v15 = vadd.f32 %v3096_v45, %v3007_v39 }
 0x406   : > { %3046 = vmatmul.bf16.gmra.mxu0 %v11023_v33 }
 0x407   : > { %3135 = vmatmul.bf16.gmra.mxu1 %v11027_v54  ;;  %3574 = vmatmul.bf16.gmra.mxu3 %v11159_v7  ;;  %v11167_v54 = vor.u32 %v13488_v61, %v11166_v62 }
 0x40a   : > { %v2728_v28 = vpop.f32.mrf.mxu3 }
 0x40b   : > { %v16464_v50 = vadd.f32 %v2728_v28, %v16208_v44  ;;  %v3009_v26 = vpop.f32.mrf.mxu0  ;;  %v11032_v44 = vld [vmem:[%s19040_s1 + $0x4d8] sm:$0xf0] }
 0x40c   : > { %v3098_v10 = vpop.f32.mrf.mxu1  ;;  %v11035_v39 = vor.u32 %v13465_v34, %v11032_v44  ;;  %v11174_v34 = vld [vmem:[%s19040_s1 + $0x550] sm:$0xf]  ;;  %v13490_v44 = vld [vmem:[%s19040_s1 + $0x554] sm:$0xf0] }
 0x40d   : > { %v3099_v41 = vadd.f32 %v3098_v10, %v3009_v26 }
 0x40f   : > { %v3160_v20 = vpack.c.bf16 %v3099_v41, %v3097_v15 }
 0x411   : > { %3265 = vmatmul.bf16.gmra.mxu2 %v3160_v20 }
 0x412   : > { %v2730_v36 = vpop.f32.mrf.mxu3 }
 0x413   : > { %v16485_v52 = vadd.f32 %v2730_v36, %v16214_v48  ;;  %v3012_v33 = vpop.f32.mrf.mxu0  ;;  %v11038_v48 = vld [vmem:[%s19040_s1 + $0x4e0] sm:$0xf] }
 0x414   : > { %v3101_v7 = vpop.f32.mrf.mxu1  ;;  %v11039_v61 = vor.u32 %v13468_v40, %v11038_v48  ;;  %v13470_v48 = vld [vmem:[%s19040_s1 + $0x4f4] sm:$0xf0]  ;;  %v13469_v40 = vld [vmem:[%s19040_s1 + $0x4f4] sm:$0xf] }
 0x415   : > { %v3102_v15 = vadd.f32 %v3101_v7, %v3012_v33 }
 0x416   : > { %3051 = vmatmul.bf16.gmra.mxu0 %v11031_v42 }
 0x417   : > { %3140 = vmatmul.bf16.gmra.mxu1 %v11035_v39  ;;  %3579 = vmatmul.bf16.gmra.mxu3 %v11167_v54  ;;  %v11175_v39 = vor.u32 %v13490_v44, %v11174_v34 }
 0x41a   : > { %v2733_v45 = vpop.f32.mrf.mxu3 }
 0x41b   : > { %v16488_v28 = vadd.f32 %v2733_v45, %v16232_v32  ;;  %v3014_v26 = vpop.f32.mrf.mxu0  ;;  %v11040_v32 = vld [vmem:[%s19040_s1 + $0x4e8] sm:$0xf0] }
 0x41c   : > { %v3103_v10 = vpop.f32.mrf.mxu1  ;;  %v11043_v33 = vor.u32 %v13467_v6, %v11040_v32  ;;  %v11182_v6 = vld [vmem:[%s19040_s1 + $0x560] sm:$0xf]  ;;  %v13492_v32 = vld [vmem:[%s19040_s1 + $0x564] sm:$0xf0] }
 0x41d   : > { %v3104_v41 = vadd.f32 %v3103_v10, %v3014_v26 }
 0x41f   : > { %v3161_v20 = vpack.c.bf16 %v3104_v41, %v3102_v15 }
 0x421   : > { %3270 = vmatmul.bf16.gmra.mxu2 %v3161_v20 }
 0x422   : > { %v2735_v62 = vpop.f32.mrf.mxu3 }
 0x423   : > { %v16509_v36 = vadd.f32 %v2735_v62, %v16238_v51  ;;  %v3017_v42 = vpop.f32.mrf.mxu0  ;;  %v11046_v51 = vld [vmem:[%s19040_s1 + $0x4f0] sm:$0xf] }
 0x424   : > { %v3106_v54 = vpop.f32.mrf.mxu1  ;;  %v11047_v44 = vor.u32 %v13470_v48, %v11046_v51  ;;  %v11136_v51 = vld [vmem:[%s19040_s1 + $0x508] sm:$0xf0]  ;;  %v11190_v48 = vld [vmem:[%s19040_s1 + $0x570] sm:$0xf] }
 0x425   : > { %v3107_v15 = vadd.f32 %v3106_v54, %v3017_v42 }
 0x426   : > { %3056 = vmatmul.bf16.gmra.mxu0 %v11039_v61 }
 0x427   : > { %3145 = vmatmul.bf16.gmra.mxu1 %v11043_v33  ;;  %3584 = vmatmul.bf16.gmra.mxu3 %v11175_v39  ;;  %v11183_v33 = vor.u32 %v13492_v32, %v11182_v6 }
 0x42a   : > { %v2738_v7 = vpop.f32.mrf.mxu3 }
 0x42b   : > { %v16512_v45 = vadd.f32 %v2738_v7, %v16259_v35  ;;  %v3019_v26 = vpop.f32.mrf.mxu0  ;;  %v11048_v35 = vld [vmem:[%s19040_s1 + $0x4f8] sm:$0xf0] }
 0x42c   : > { %v3108_v10 = vpop.f32.mrf.mxu1  ;;  %v11051_v42 = vor.u32 %v13469_v40, %v11048_v35 }
 0x42d   : > { %v3109_v41 = vadd.f32 %v3108_v10, %v3019_v26 }
 0x42f   : > { %v3162_v20 = vpack.c.bf16 %v3109_v41, %v3107_v15 }
 0x431   : > { %3275 = vmatmul.bf16.gmra.mxu2 %v3162_v20 }
 0x432   : > { %v2740_v34 = vpop.f32.mrf.mxu3 }
 0x433   : > { %v16533_v62 = vadd.f32 %v2740_v34, %v16271_v38  ;;  %v3022_v61 = vpop.f32.mrf.mxu0  ;;  %v13479_v38 = vld [vmem:[%s19040_s1 + $0x504] sm:$0xf] }
 0x434   : > { %v3111_v39 = vpop.f32.mrf.mxu1  ;;  %v11139_v35 = vor.u32 %v13479_v38, %v11136_v51  ;;  %v13518_v51 = vld [vmem:[%s19041_s2 + $0x178] sm:$0xff] }
 0x435   : > { %v3112_v15 = vadd.f32 %v3111_v39, %v3022_v61  ;;  %3810 = vmatpush.bf16.msra.mxu1 %v13518_v51 }
 0x436   : > { %3061 = vmatmul.bf16.gmra.mxu0 %v11047_v44 }
 0x437   : > { %3150 = vmatmul.bf16.gmra.mxu1 %v11051_v42  ;;  %3589 = vmatmul.bf16.gmra.mxu3 %v11183_v33 }
 0x43a   : > { %v2743_v54 = vpop.f32.mrf.mxu3 }
 0x43b   : > { %v16536_v7 = vadd.f32 %v2743_v54, %v16295_v49  ;;  %v3024_v26 = vpop.f32.mrf.mxu0  ;;  %v13494_v49 = vld [vmem:[%s19040_s1 + $0x574] sm:$0xf0] }
 0x43c   : > { %v3113_v10 = vpop.f32.mrf.mxu1  ;;  %v11191_v34 = vor.u32 %v13494_v49, %v11190_v48 }
 0x43d   : > { %v3114_v41 = vadd.f32 %v3113_v10, %v3024_v26 }
 0x43f   : > { %v3163_v20 = vpack.c.bf16 %v3114_v41, %v3112_v15  ;;  %v13481_v15 = vld [vmem:[%s19040_s1 + $0x514] sm:$0xf]  ;;  %v11198_v41 = vld [vmem:[%s19040_s1 + $0x580] sm:$0xf] }
 0x441   : > { %3280 = vmatmul.bf16.gmra.mxu2 %v3163_v20 }
 0x442   : > { %v2745_v40 = vpop.f32.mrf.mxu3 }
 0x443   : > { %v16551_v6 = vadd.f32 %v2745_v40, %v16307_v13  ;;  %v3027_v32 = vpop.f32.mrf.mxu0  ;;  %v11144_v13 = vld [vmem:[%s19040_s1 + $0x518] sm:$0xf0] }
 0x444   : > { %v3116_v44 = vpop.f32.mrf.mxu1  ;;  %v11147_v38 = vor.u32 %v13481_v15, %v11144_v13  ;;  %v13483_v15 = vld [vmem:[%s19040_s1 + $0x524] sm:$0xf]  ;;  %v11206_v13 = vld [vmem:[%s19040_s1 + $0x590] sm:$0xf] }
 0x445   : > { %v3117_v54 = vadd.f32 %v3116_v44, %v3027_v32 }
 0x446   : > { %3648 = vmatmul.bf16.vlgmr.msra.gmra.mxu0 %v11139_v35 }
 0x447   : > { %3594 = vmatmul.bf16.gmra.mxu3 %v11191_v34 }
 0x44a   : > { %v2748_v61 = vpop.f32.mrf.mxu3 }
 0x44b   : > { %v16554_v42 = vadd.f32 %v2748_v61, %v16330_v46  ;;  %v3029_v33 = vpop.f32.mrf.mxu0  ;;  %v13496_v46 = vld [vmem:[%s19040_s1 + $0x584] sm:$0xf0] }
 0x44c   : > { %v3118_v39 = vpop.f32.mrf.mxu1  ;;  %v11199_v40 = vor.u32 %v13496_v46, %v11198_v41  ;;  %v13498_v41 = vld [vmem:[%s19040_s1 + $0x594] sm:$0xf0] }
 0x44d   : > { %v3119_v26 = vadd.f32 %v3118_v39, %v3029_v33 }
 0x44f   : > { %v3164_v10 = vpack.c.bf16 %v3119_v26, %v3117_v54 }
 0x451   : > { %3285 = vmatmul.bf16.gmra.mxu2 %v3164_v10 }
 0x452   : > { %v2750_v20 = vpop.f32.mrf.mxu3 }
 0x453   : > { %v16572_v48 = vadd.f32 %v2750_v20, %v16337_v1  ;;  %v3032_v49 = vpop.f32.mrf.mxu0 }
 0x454   : > { %v3121_v35 = vpop.f32.mrf.mxu1  ;;  %v3246_v32 = vpop.f32.mrf.mxu2 }
 0x455   : > { %v16575_v34 = vadd.f32 %v3246_v32, %v16163_v43  ;;  %v3122_v54 = vadd.f32 %v3121_v35, %v3032_v49  ;;  %v11152_v43 = vld [vmem:[%s19040_s1 + $0x528] sm:$0xf0] }
 0x456   : > { %3653 = vmatmul.bf16.gmra.mxu0 %v11147_v38  ;;  %v11155_v46 = vor.u32 %v13483_v15, %v11152_v43  ;;  %v11207_v38 = vor.u32 %v13498_v41, %v11206_v13  ;;  %v13485_v15 = vld [vmem:[%s19040_s1 + $0x534] sm:$0xf]  ;;  %v11214_v43 = vld [vmem:[%s19040_s1 + $0x5a0] sm:$0xf]  ;;  %v13500_v13 = vld [vmem:[%s19040_s1 + $0x5a4] sm:$0xf0] }
 0x457   : > { %3599 = vmatmul.bf16.gmra.mxu3 %v11199_v40 }
 0x45a   : > { %v16577_v44 = vpop.f32.mrf.mxu3 }
 0x45b   : > { %v3034_v61 = vpop.f32.mrf.mxu0 }
 0x45c   : > { %v3123_v33 = vpop.f32.mrf.mxu1  ;;  %v3248_v39 = vpop.f32.mrf.mxu2 }
 0x45d   : > { %v3124_v26 = vadd.f32 %v3123_v33, %v3034_v61  ;;  %v16580_v1 = vadd.f32 %v3248_v39, %v16181_v31 }
 0x45f   : > { %v3165_v10 = vpack.c.bf16 %v3124_v26, %v3122_v54 }
 0x461   : > { %3290 = vmatmul.bf16.gmra.mxu2 %v3165_v10 }
 0x462   : > { %v16594_v31 = vpop.f32.mrf.mxu3 }
 0x463   : > { %v3037_v20 = vpop.f32.mrf.mxu0 }
 0x464   : > { %v3126_v51 = vpop.f32.mrf.mxu1  ;;  %v3251_v49 = vpop.f32.mrf.mxu2 }
 0x465   : > { %v16597_v40 = vadd.f32 %v3251_v49, %v16187_v53  ;;  %v3127_v39 = vadd.f32 %v3126_v51, %v3037_v20  ;;  %v11160_v53 = vld [vmem:[%s19040_s1 + $0x538] sm:$0xf0] }
 0x466   : > { %3658 = vmatmul.bf16.gmra.mxu0 %v11155_v46  ;;  %v11163_v41 = vor.u32 %v13485_v15, %v11160_v53  ;;  %v13517_v46 = vld [vmem:[%s19041_s2 + $0x170] sm:$0xff] }
 0x467   : > { %3604 = vmatmul.bf16.gmra.mxu3 %v11207_v38  ;;  %v11215_v38 = vor.u32 %v13500_v13, %v11214_v43  ;;  %3811 = vmatpush.bf16.msra.mxu1 %v13517_v46  ;;  %v13487_v43 = vld [vmem:[%s19040_s1 + $0x544] sm:$0xf]  ;;  %v11222_v13 = vld [vmem:[%s19040_s1 + $0x5b0] sm:$0xf] }
 0x46a   : > { %v16599_v35 = vpop.f32.mrf.mxu3 }
 0x46b   : > { %v3039_v32 = vpop.f32.mrf.mxu0 }
 0x46c   : > { %v3128_v61 = vpop.f32.mrf.mxu1  ;;  %v3253_v33 = vpop.f32.mrf.mxu2 }
 0x46d   : > { %v3129_v54 = vadd.f32 %v3128_v61, %v3039_v32  ;;  %v16602_v26 = vadd.f32 %v3253_v33, %v16205_v5 }
 0x46f   : > { %19126 = vst [vmem:[#allocation24_spill] sm:$0xff] %v16602_v26  ;;  %v3166_v10 = vpack.c.bf16 %v3129_v54, %v3127_v39 }
 0x471   : > { %3295 = vmatmul.bf16.gmra.mxu2 %v3166_v10 }
 0x472   : > { %v16616_v5 = vpop.f32.mrf.mxu3 }
 0x473   : > { %v3042_v20 = vpop.f32.mrf.mxu0 }
 0x474   : > { %v3131_v51 = vpop.f32.mrf.mxu1  ;;  %v3256_v49 = vpop.f32.mrf.mxu2 }
 0x475   : > { %v16622_v32 = vadd.f32 %v3256_v49, %v16211_v22  ;;  %v3132_v10 = vadd.f32 %v3131_v51, %v3042_v20  ;;  %v11168_v22 = vld [vmem:[%s19040_s1 + $0x548] sm:$0xf0] }
 0x476   : > { %3663 = vmatmul.bf16.gmra.mxu0 %v11163_v41  ;;  %v13502_v41 = vld [vmem:[%s19040_s1 + $0x5b4] sm:$0xf0]  ;;  %v11171_v46 = vor.u32 %v13487_v43, %v11168_v22  ;;  %v13489_v22 = vld [vmem:[%s19040_s1 + $0x554] sm:$0xf] }
 0x477   : > { %19127 = vst [vmem:[#allocation25_spill] sm:$0xff] %v16622_v32  ;;  %3609 = vmatmul.bf16.gmra.mxu3 %v11215_v38  ;;  %v11223_v38 = vor.u32 %v13502_v41, %v11222_v13  ;;  %v11230_v13 = vld [vmem:[%s19040_s1 + $0x5c0] sm:$0xf]  ;;  %v13504_v41 = vld [vmem:[%s19040_s1 + $0x5c4] sm:$0xf0] }
 0x47a   : > { %v16624_v61 = vpop.f32.mrf.mxu3 }
 0x47b   : > { %v3044_v33 = vpop.f32.mrf.mxu0 }
 0x47c   : > { %v3133_v39 = vpop.f32.mrf.mxu1  ;;  %v3258_v54 = vpop.f32.mrf.mxu2 }
 0x47d   : > { %v3134_v15 = vadd.f32 %v3133_v39, %v3044_v33  ;;  %v16627_v53 = vadd.f32 %v3258_v54, %v16229_v0 }
 0x47f   : > { %19128 = vst [vmem:[#allocation26_spill] sm:$0xff] %v16627_v53  ;;  %v3167_v26 = vpack.c.bf16 %v3134_v15, %v3132_v10 }
 0x481   : > { %3300 = vmatmul.bf16.gmra.mxu2 %v3167_v26 }
 0x482   : > { %v16641_v0 = vpop.f32.mrf.mxu3 }
 0x483   : > { %v3047_v20 = vpop.f32.mrf.mxu0 }
 0x484   : > { %v3136_v51 = vpop.f32.mrf.mxu1  ;;  %v3261_v49 = vpop.f32.mrf.mxu2 }
 0x485   : > { %v16644_v33 = vadd.f32 %v3261_v49, %v16235_v19  ;;  %v3137_v53 = vadd.f32 %v3136_v51, %v3047_v20  ;;  %v11176_v19 = vld [vmem:[%s19040_s1 + $0x558] sm:$0xf0]  ;;  %v11231_v20 = vor.u32 %v13504_v41, %v11230_v13 }
 0x486   : > { %3668 = vmatmul.bf16.gmra.mxu0 %v11171_v46 }
 0x487   : > { %3614 = vmatmul.bf16.gmra.mxu3 %v11223_v38 }
 0x48a   : > { %v16646_v39 = vpop.f32.mrf.mxu3 }
 0x48b   : > { %v3049_v54 = vpop.f32.mrf.mxu0 }
 0x48c   : > { %v3138_v10 = vpop.f32.mrf.mxu1  ;;  %v3263_v15 = vpop.f32.mrf.mxu2 }
 0x48d   : > { %v3139_v32 = vadd.f32 %v3138_v10, %v3049_v54  ;;  %v16649_v26 = vadd.f32 %v3263_v15, %v16256_v3 }
 0x48f   : > { %19129 = vst [vmem:[#allocation27_spill] sm:$0xff] %v16649_v26  ;;  %v3168_v43 = vpack.c.bf16 %v3139_v32, %v3137_v53  ;;  %v11179_v32 = vor.u32 %v13489_v22, %v11176_v19  ;;  %v13516_v53 = vld [vmem:[%s19041_s2 + $0x168] sm:$0xff]  ;;  %v13515_v22 = vld [vmem:[%s19041_s2 + $0x160] sm:$0xff] }
 0x490   : > { %3812 = vmatpush.bf16.msra.mxu1 %v13516_v53  ;;  %v11238_v53 = vld [vmem:[%s19040_s1 + $0x5d0] sm:$0xf] }
 0x491   : > { %3305 = vmatmul.bf16.gmra.mxu2 %v3168_v43 }
 0x492   : > { %v16663_v3 = vpop.f32.mrf.mxu3 }
 0x493   : > { %v3052_v46 = vpop.f32.mrf.mxu0 }
 0x494   : > { %v3141_v38 = vpop.f32.mrf.mxu1  ;;  %v3266_v51 = vpop.f32.mrf.mxu2  ;;  %3813 = vmatpush.bf16.msra.mxu1 %v13515_v22 }
 0x495   : > { %v16669_v49 = vadd.f32 %v3266_v51, %v16268_v16  ;;  %v3142_v19 = vadd.f32 %v3141_v38, %v3052_v46  ;;  %v13491_v16 = vld [vmem:[%s19040_s1 + $0x564] sm:$0xf]  ;;  %v13506_v46 = vld [vmem:[%s19040_s1 + $0x5d4] sm:$0xf0] }
 0x496   : > { %3673 = vmatmul.bf16.gmra.mxu0 %v11179_v32  ;;  %v11184_v32 = vld [vmem:[%s19040_s1 + $0x568] sm:$0xf0]  ;;  %v11239_v51 = vor.u32 %v13506_v46, %v11238_v53  ;;  %v13511_v46 = vld [vmem:[%s19041_s2 + $0x140] sm:$0xff] }
 0x497   : > { %3619 = vmatmul.bf16.gmra.mxu3 %v11231_v20  ;;  %v11187_v20 = vor.u32 %v13491_v16, %v11184_v32 }
 0x49a   : > { %v16671_v54 = vpop.f32.mrf.mxu3 }
 0x49b   : > { %v3054_v10 = vpop.f32.mrf.mxu0 }
 0x49c   : > { %v3143_v15 = vpop.f32.mrf.mxu1  ;;  %v3268_v43 = vpop.f32.mrf.mxu2 }
 0x49d   : > { %v3144_v26 = vadd.f32 %v3143_v15, %v3054_v10  ;;  %v16677_v13 = vadd.f32 %v3268_v43, %v16292_v47  ;;  %v13514_v47 = vld [vmem:[%s19041_s2 + $0x158] sm:$0xff]  ;;  %v13513_v43 = vld [vmem:[%s19041_s2 + $0x150] sm:$0xff] }
 0x49e   : > { %3814 = vmatpush.bf16.msra.mxu1 %v13514_v47 }
 0x49f   : > { %v3169_v41 = vpack.c.bf16 %v3144_v26, %v3142_v19  ;;  %v13512_v19 = vld [vmem:[%s19041_s2 + $0x148] sm:$0xff] }
 0x4a1   : > { %3310 = vmatmul.bf16.gmra.mxu2 %v3169_v41 }
 0x4a2   : > { %v16694_v26 = vpop.f32.mrf.mxu3  ;;  %3815 = vmatpush.bf16.msra.mxu1 %v13513_v43  ;;  %v11192_v43 = vld [vmem:[%s19040_s1 + $0x578] sm:$0xf0] }
 0x4a3   : > { %v3057_v38 = vpop.f32.mrf.mxu0 }
 0x4a4   : > { %v3146_v10 = vpop.f32.mrf.mxu1  ;;  %v3271_v15 = vpop.f32.mrf.mxu2 }
 0x4a5   : > { %v16700_v22 = vadd.f32 %v3271_v15, %v16304_v27  ;;  %v3147_v47 = vadd.f32 %v3146_v10, %v3057_v38  ;;  %v13493_v15 = vld [vmem:[%s19040_s1 + $0x574] sm:$0xf]  ;;  %v11246_v38 = vld [vmem:[%s19040_s1 + $0x5e0] sm:$0xf] }
 0x4a6   : > { %3678 = vmatmul.bf16.gmra.mxu0 %v11187_v20  ;;  %3816 = vmatpush.bf16.msra.mxu1 %v13512_v19  ;;  %v11195_v19 = vor.u32 %v13493_v15, %v11192_v43 }
 0x4a7   : > { %19130 = vst [vmem:[#allocation28_spill] sm:$0xff] %v16700_v22  ;;  %3624 = vmatmul.bf16.gmra.mxu3 %v11239_v51 }
 0x4aa   : > { %v16705_v41 = vpop.f32.mrf.mxu3  ;;  %3817 = vmatpush.bf16.msra.mxu1 %v13511_v46 }
 0x4ab   : > { %v3059_v16 = vpop.f32.mrf.mxu0 }
 0x4ac   : > { %v3148_v32 = vpop.f32.mrf.mxu1  ;;  %v3273_v53 = vpop.f32.mrf.mxu2 }
 0x4ad   : > { %v3149_v27 = vadd.f32 %v3148_v32, %v3059_v16  ;;  %v16711_v20 = vadd.f32 %v3273_v53, %v16326_v57  ;;  %v13508_v57 = vld [vmem:[%s19040_s1 + $0x5e4] sm:$0xf0] }
 0x4ae   : > { %4697 = vmatpush.bf16.msrb.mxu1 %v14367_v4  ;;  %v11247_v32 = vor.u32 %v13508_v57, %v11246_v38 }
 0x4af   : > { %19131 = vst [vmem:[#allocation29_spill] sm:$0xff] %v16711_v20  ;;  %v3170_v51 = vpack.c.bf16 %v3149_v27, %v3147_v47 }
 0x4b1   : > { %3315 = vmatmul.bf16.gmra.mxu2 %v3170_v51 }
 0x4b2   : > { %v16726_v10 = vpop.f32.mrf.mxu3  ;;  %4698 = vmatpush.bf16.msrb.mxu1 %v14378_v11 }
 0x4b3   : > { %v3062_v16 = vpop.f32.mrf.mxu0 }
 0x4b4   : > { %v3151_v53 = vpop.f32.mrf.mxu1  ;;  %v3276_v46 = vpop.f32.mrf.mxu2 }
 0x4b5   : > { %v16730_v47 = vadd.f32 %v3276_v46, %v16334_v21  ;;  %v3152_v43 = vadd.f32 %v3151_v53, %v3062_v16  ;;  %v13495_v21 = vld [vmem:[%s19040_s1 + $0x584] sm:$0xf] }
 0x4b6   : > { %3683 = vmatmul.bf16.gmra.mxu0 %v11195_v19  ;;  %4699 = vmatpush.bf16.msrb.mxu1 %v14390_v17  ;;  %v11200_v19 = vld [vmem:[%s19040_s1 + $0x588] sm:$0xf0] }
 0x4b7   : > { %3629 = vmatmul.bf16.gmra.mxu3 %v11247_v32  ;;  %v11254_v32 = vld [vmem:[%s19040_s1 + $0x5f0] sm:$0xf]  ;;  %v11203_v16 = vor.u32 %v13495_v21, %v11200_v19 }
 0x4ba   : > { %v16733_v27 = vpop.f32.mrf.mxu3  ;;  %4700 = vmatpush.bf16.msrb.mxu1 %v19121_v56 }
 0x4bb   : > { %v3064_v20 = vpop.f32.mrf.mxu0 }
 0x4bc   : > { %v3153_v51 = vpop.f32.mrf.mxu1  ;;  %v3278_v15 = vpop.f32.mrf.mxu2 }
 0x4bd   : > { %v3154_v38 = vadd.f32 %v3153_v51, %v3064_v20  ;;  %v16737_v57 = vadd.f32 %v3278_v15, %v16354_v55  ;;  %v13510_v55 = vld [vmem:[%s19040_s1 + $0x5f4] sm:$0xf0] }
 0x4be   : > { %4701 = vmatpush.bf16.msrb.mxu1 %v14414_v29  ;;  %v11255_v46 = vor.u32 %v13510_v55, %v11254_v32 }
 0x4bf   : > { %v3171_v22 = vpack.c.bf16 %v3154_v38, %v3152_v43  ;;  %v13520_v38 = vld [vmem:[%s19040_s1 + $0x604] sm:$0xf0] }
 0x4c1   : > { %3320 = vmatmul.bf16.gmra.mxu2 %v3171_v22  ;;  %v11342_v22 = vld [vmem:[%s19040_s1 + $0x600] sm:$0xf] }
 0x4c2   : > { %v16752_v20 = vpop.f32.mrf.mxu3  ;;  %4702 = vmatpush.bf16.msrb.mxu1 %v19122_v60 }
 0x4c3   : > { %v3649_v53 = vpop.f32.mrf.mxu0 }
 0x4c4   : > { %v3281_v51 = vpop.f32.mrf.mxu2 }
 0x4c5   : > { %v16756_v15 = vadd.f32 %v3281_v51, %v16359_v37  ;;  %v3650_v37 = vadd.f32 %v3649_v53, %v16577_v44  ;;  %v13497_v51 = vld [vmem:[%s19040_s1 + $0x594] sm:$0xf]  ;;  %v13519_v44 = vld [vmem:[%s19040_s1 + $0x604] sm:$0xf] }
 0x4c6   : > { %3688 = vmatmul.bf16.gmra.mxu0 %v11203_v16  ;;  %4703 = vmatpush.bf16.msrb.mxu1 %v19123_v2  ;;  %v11343_v16 = vor.u32 %v13520_v38, %v11342_v22 }
 0x4c7   : > { %19132 = vst [vmem:[#allocation30_spill] sm:$0xff] %v16756_v15  ;;  %3634 = vmatmul.bf16.gmra.mxu3 %v11255_v46  ;;  %v11208_v15 = vld [vmem:[%s19040_s1 + $0x598] sm:$0xf0] }
 0x4c8   : > { %v11211_v53 = vor.u32 %v13497_v51, %v11208_v15  ;;  %v13522_v15 = vld [vmem:[%s19040_s1 + $0x614] sm:$0xf0] }
 0x4ca   : > { %v16759_v43 = vpop.f32.mrf.mxu3  ;;  %4704 = vmatpush.bf16.msrb.mxu1 %v19124_v9 }
 0x4cb   : > { %v3651_v21 = vpop.f32.mrf.mxu0 }
 0x4cc   : > { %v3283_v19 = vpop.f32.mrf.mxu2  ;;  %v3652_v32 = vadd.f32 %v3651_v21, %v16594_v31 }
 0x4cd   : > { %v16771_v55 = vadd.f32 %v3283_v19, %v16382_v59  ;;  %v11344_v59 = vld [vmem:[%s19040_s1 + $0x608] sm:$0xf0] }
 0x4ce   : > { %v3729_v46 = vpack.c.bf16 %v3652_v32, %v3650_v37  ;;  %v11347_v38 = vor.u32 %v13519_v44, %v11344_v59  ;;  %v13499_v44 = vld [vmem:[%s19040_s1 + $0x5a4] sm:$0xf]  ;;  %v11216_v59 = vld [vmem:[%s19040_s1 + $0x5a8] sm:$0xf0] }
 0x4d0   : > { %3818 = vmatmul.bf16.vlgmr.msra.gmra.mxu1 %v3729_v46 }
 0x4d1   : > { %4132 = vmatmul.bf16.vlgmr.msra.gmra.mxu2 %v11343_v16  ;;  %5359 = vmatpush.bf16.msra.mxu1 %v14372_v8  ;;  %v11350_v8 = vld [vmem:[%s19040_s1 + $0x610] sm:$0xf] }
 0x4d2   : > { %v16786_v31 = vpop.f32.mrf.mxu3 }
 0x4d3   : > { %v3654_v22 = vpop.f32.mrf.mxu0 }
 0x4d4   : > { %v3286_v21 = vpop.f32.mrf.mxu2 }
 0x4d5   : > { %v16789_v37 = vadd.f32 %v3286_v21, %v16387_v25  ;;  %5360 = vmatpush.bf16.msra.mxu1 %v14381_v12  ;;  %v3655_v25 = vadd.f32 %v3654_v22, %v16599_v35  ;;  %v13521_v35 = vld [vmem:[%s19040_s1 + $0x614] sm:$0xf]  ;;  %v19133_v21 = vld [vmem:[#allocation23_spill] sm:$0xff] }
 0x4d6   : > { %3693 = vmatmul.bf16.gmra.mxu0 %v11211_v53 }
 0x4d7   : > { %4221 = vmatmul.bf16.vlgmr.msra.gmra.mxu3 %v11347_v38 }
 0x4d9   : > { %5361 = vmatpush.bf16.msra.mxu1 %v14393_v18  ;;  %v11351_v18 = vor.u32 %v13522_v15, %v11350_v8  ;;  %v19134_v15 = vld [vmem:[#allocation18_spill] sm:$0xff] }
 0x4da   : > { %v16793_v19 = vpop.f32.mrf.mxu3 }
 0x4db   : > { %v3656_v32 = vpop.f32.mrf.mxu0 }
 0x4dc   : > { %v3288_v16 = vpop.f32.mrf.mxu2  ;;  %v3657_v12 = vadd.f32 %v3656_v32, %v16616_v5  ;;  %v11219_v5 = vor.u32 %v13499_v44, %v11216_v59  ;;  %v19135_v32 = vld [vmem:[#allocation20_spill] sm:$0xff] }
 0x4dd   : > { %v16804_v46 = vadd.f32 %v3288_v16, %v16410_v63  ;;  %5362 = vmatpush.bf16.msra.mxu1 %v14405_v24  ;;  %v11352_v63 = vld [vmem:[%s19040_s1 + $0x618] sm:$0xf0]  ;;  %v13524_v16 = vld [vmem:[%s19040_s1 + $0x624] sm:$0xf0] }
 0x4de   : > { %v3730_v51 = vpack.c.bf16 %v3657_v12, %v3655_v25  ;;  %v11355_v22 = vor.u32 %v13521_v35, %v11352_v63  ;;  %v19136_v63 = vld [vmem:[#allocation22_spill] sm:$0xff] }
 0x4e0   : > { %3823 = vmatmul.bf16.gmra.mxu1 %v3730_v51 }
 0x4e1   : > { %4137 = vmatmul.bf16.gmra.mxu2 %v11351_v18  ;;  %5363 = vmatpush.bf16.msra.mxu1 %v14417_v30  ;;  %v11358_v30 = vld [vmem:[%s19040_s1 + $0x620] sm:$0xf] }
 0x4e2   : > { %v16820_v24 = vpop.f32.mrf.mxu3  ;;  %v11359_v35 = vor.u32 %v13524_v16, %v11358_v30 }
 0x4e3   : > { %v3659_v53 = vpop.f32.mrf.mxu0 }
 0x4e4   : > { %v3291_v38 = vpop.f32.mrf.mxu2  ;;  %v3660_v18 = vadd.f32 %v3659_v53, %v16624_v61  ;;  %v13523_v61 = vld [vmem:[%s19040_s1 + $0x624] sm:$0xf] }
 0x4e5   : > { %v16823_v8 = vadd.f32 %v3291_v38, %v19133_v21  ;;  %5364 = vmatpush.bf16.msra.mxu1 %v19134_v15  ;;  %v11224_v38 = vld [vmem:[%s19040_s1 + $0x5b8] sm:$0xf0] }
 0x4e6   : > { %3698 = vmatmul.bf16.gmra.mxu0 %v11219_v5 }
 0x4e7   : > { %4226 = vmatmul.bf16.gmra.mxu3 %v11355_v22  ;;  %v13501_v22 = vld [vmem:[%s19040_s1 + $0x5b4] sm:$0xf] }
 0x4e8   : > { %v11227_v53 = vor.u32 %v13501_v22, %v11224_v38  ;;  %v13503_v38 = vld [vmem:[%s19040_s1 + $0x5c4] sm:$0xf] }
 0x4e9   : > { %5365 = vmatpush.bf16.msra.mxu1 %v19135_v32 }
 0x4ea   : > { %v16827_v25 = vpop.f32.mrf.mxu3 }
 0x4eb   : > { %v3661_v12 = vpop.f32.mrf.mxu0 }
 0x4ec   : > { %v3293_v51 = vpop.f32.mrf.mxu2  ;;  %v3662_v44 = vadd.f32 %v3661_v12, %v16641_v0  ;;  %v11366_v12 = vld [vmem:[%s19040_s1 + $0x630] sm:$0xf] }
 0x4ed   : > { %v16838_v59 = vadd.f32 %v3293_v51, %v16437_v58  ;;  %5366 = vmatpush.bf16.msra.mxu1 %v19136_v63  ;;  %v11360_v58 = vld [vmem:[%s19040_s1 + $0x628] sm:$0xf0] }
 0x4ee   : > { %v3731_v5 = vpack.c.bf16 %v3662_v44, %v3660_v18  ;;  %v11363_v15 = vor.u32 %v13523_v61, %v11360_v58  ;;  %v13526_v18 = vld [vmem:[%s19040_s1 + $0x634] sm:$0xf0]  ;;  %v11232_v61 = vld [vmem:[%s19040_s1 + $0x5c8] sm:$0xf0] }
 0x4ef   : > { %v11235_v58 = vor.u32 %v13503_v38, %v11232_v61  ;;  %v13505_v61 = vld [vmem:[%s19040_s1 + $0x5d4] sm:$0xf] }
 0x4f0   : > { %3828 = vmatmul.bf16.gmra.mxu1 %v3731_v5  ;;  %v11367_v5 = vor.u32 %v13526_v18, %v11366_v12  ;;  %v11374_v18 = vld [vmem:[%s19040_s1 + $0x640] sm:$0xf] }
 0x4f1   : > { %4142 = vmatmul.bf16.gmra.mxu2 %v11359_v35 }
 0x4f2   : > { %v16853_v0 = vpop.f32.mrf.mxu3 }
 0x4f3   : > { %v3664_v21 = vpop.f32.mrf.mxu0 }
 0x4f4   : > { %v3296_v32 = vpop.f32.mrf.mxu2  ;;  %v3665_v44 = vadd.f32 %v3664_v21, %v16646_v39  ;;  %v13525_v39 = vld [vmem:[%s19040_s1 + $0x634] sm:$0xf] }
 0x4f5   : > { %v16856_v30 = vadd.f32 %v3296_v32, %v16440_v14 }
 0x4f6   : > { %3703 = vmatmul.bf16.gmra.mxu0 %v11227_v53 }
 0x4f7   : > { %4231 = vmatmul.bf16.gmra.mxu3 %v11363_v15 }
 0x4fa   : > { %v16858_v16 = vpop.f32.mrf.mxu3 }
 0x4fb   : > { %v3666_v51 = vpop.f32.mrf.mxu0 }
 0x4fc   : > { %v3298_v35 = vpop.f32.mrf.mxu2  ;;  %v3667_v63 = vadd.f32 %v3666_v51, %v16663_v3  ;;  %v13528_v51 = vld [vmem:[%s19040_s1 + $0x644] sm:$0xf0] }
 0x4fd   : > { %v16869_v14 = vadd.f32 %v3298_v35, %v16461_v23  ;;  %v11368_v23 = vld [vmem:[%s19040_s1 + $0x638] sm:$0xf0] }
 0x4fe   : > { %v3732_v22 = vpack.c.bf16 %v3667_v63, %v3665_v44  ;;  %v11371_v21 = vor.u32 %v13525_v39, %v11368_v23  ;;  %v11240_v39 = vld [vmem:[%s19040_s1 + $0x5d8] sm:$0xf0] }
 0x4ff   : > { %v11243_v23 = vor.u32 %v13505_v61, %v11240_v39  ;;  %v13507_v39 = vld [vmem:[%s19040_s1 + $0x5e4] sm:$0xf] }
 0x500   : > { %3833 = vmatmul.bf16.gmra.mxu1 %v3732_v22  ;;  %v11375_v22 = vor.u32 %v13528_v51, %v11374_v18  ;;  %v11382_v51 = vld [vmem:[%s19040_s1 + $0x650] sm:$0xf] }
 0x501   : > { %4147 = vmatmul.bf16.gmra.mxu2 %v11367_v5 }
 0x502   : > { %v16883_v3 = vpop.f32.mrf.mxu3 }
 0x503   : > { %v3669_v53 = vpop.f32.mrf.mxu0 }
 0x504   : > { %v3301_v15 = vpop.f32.mrf.mxu2  ;;  %v3670_v35 = vadd.f32 %v3669_v53, %v16671_v54  ;;  %v13527_v54 = vld [vmem:[%s19040_s1 + $0x644] sm:$0xf] }
 0x505   : > { %v16886_v32 = vadd.f32 %v3301_v15, %v16464_v50 }
 0x506   : > { %3708 = vmatmul.bf16.gmra.mxu0 %v11235_v58 }
 0x507   : > { %4236 = vmatmul.bf16.gmra.mxu3 %v11371_v21 }
 0x50a   : > { %v16888_v12 = vpop.f32.mrf.mxu3 }
 0x50b   : > { %v3671_v44 = vpop.f32.mrf.mxu0 }
 0x50c   : > { %v3303_v63 = vpop.f32.mrf.mxu2  ;;  %v3672_v5 = vadd.f32 %v3671_v44, %v16694_v26  ;;  %v13530_v44 = vld [vmem:[%s19040_s1 + $0x654] sm:$0xf0] }
 0x50d   : > { %v16899_v50 = vadd.f32 %v3303_v63, %v16485_v52  ;;  %v11376_v52 = vld [vmem:[%s19040_s1 + $0x648] sm:$0xf0] }
 0x50e   : > { %v3733_v38 = vpack.c.bf16 %v3672_v5, %v3670_v35  ;;  %v11379_v53 = vor.u32 %v13527_v54, %v11376_v52  ;;  %v11248_v54 = vld [vmem:[%s19040_s1 + $0x5e8] sm:$0xf0] }
 0x50f   : > { %v11251_v52 = vor.u32 %v13507_v39, %v11248_v54 }
 0x510   : > { %3838 = vmatmul.bf16.gmra.mxu1 %v3733_v38  ;;  %v11383_v38 = vor.u32 %v13530_v44, %v11382_v51  ;;  %v13558_v51 = vld [vmem:[%s19041_s2 + $0x1b8] sm:$0xff] }
 0x511   : > { %4152 = vmatmul.bf16.gmra.mxu2 %v11375_v22  ;;  %4383 = vmatpush.bf16.msrb.mxu0 %v13558_v51 }
 0x512   : > { %v16913_v26 = vpop.f32.mrf.mxu3 }
 0x513   : > { %v3674_v58 = vpop.f32.mrf.mxu0 }
 0x514   : > { %v3306_v21 = vpop.f32.mrf.mxu2  ;;  %v3675_v63 = vadd.f32 %v3674_v58, %v16705_v41  ;;  %v13529_v41 = vld [vmem:[%s19040_s1 + $0x654] sm:$0xf] }
 0x515   : > { %v16916_v15 = vadd.f32 %v3306_v21, %v16488_v28 }
 0x516   : > { %3713 = vmatmul.bf16.gmra.mxu0 %v11243_v23 }
 0x517   : > { %4241 = vmatmul.bf16.gmra.mxu3 %v11379_v53 }
 0x51a   : > { %v16918_v18 = vpop.f32.mrf.mxu3 }
 0x51b   : > { %v3676_v35 = vpop.f32.mrf.mxu0 }
 0x51c   : > { %v3308_v5 = vpop.f32.mrf.mxu2  ;;  %v3677_v22 = vadd.f32 %v3676_v35, %v16726_v10  ;;  %v11390_v35 = vld [vmem:[%s19040_s1 + $0x660] sm:$0xf] }
 0x51d   : > { %v16929_v28 = vadd.f32 %v3308_v5, %v16509_v36  ;;  %v11384_v36 = vld [vmem:[%s19040_s1 + $0x658] sm:$0xf0] }
 0x51e   : > { %v3734_v61 = vpack.c.bf16 %v3677_v22, %v3675_v63  ;;  %v11387_v58 = vor.u32 %v13529_v41, %v11384_v36  ;;  %v13532_v63 = vld [vmem:[%s19040_s1 + $0x664] sm:$0xf0] }
 0x51f   : > { %v11391_v54 = vor.u32 %v13532_v63, %v11390_v35  ;;  %v13556_v36 = vld [vmem:[%s19041_s2 + $0x1a8] sm:$0xff] }
 0x520   : > { %3843 = vmatmul.bf16.gmra.mxu1 %v3734_v61 }
 0x521   : > { %4157 = vmatmul.bf16.gmra.mxu2 %v11383_v38 }
 0x522   : > { %v16943_v10 = vpop.f32.mrf.mxu3 }
 0x523   : > { %v3679_v23 = vpop.f32.mrf.mxu0 }
 0x524   : > { %v3311_v53 = vpop.f32.mrf.mxu2  ;;  %v3680_v22 = vadd.f32 %v3679_v23, %v16733_v27  ;;  %v11256_v27 = vld [vmem:[%s19040_s1 + $0x5f8] sm:$0xf0] }
 0x525   : > { %v16946_v21 = vadd.f32 %v3311_v53, %v16512_v45  ;;  %v13557_v45 = vld [vmem:[%s19041_s2 + $0x1b0] sm:$0xff]  ;;  %v13555_v53 = vld [vmem:[%s19041_s2 + $0x1a0] sm:$0xff] }
 0x526   : > { %3718 = vmatmul.bf16.gmra.mxu0 %v11251_v52  ;;  %v13509_v52 = vld [vmem:[%s19040_s1 + $0x5f4] sm:$0xf] }
 0x527   : > { %4246 = vmatmul.bf16.gmra.mxu3 %v11387_v58  ;;  %4384 = vmatpush.bf16.msrb.mxu0 %v13557_v45  ;;  %v11259_v58 = vor.u32 %v13509_v52, %v11256_v27 }
 0x52a   : > { %v16951_v44 = vpop.f32.mrf.mxu3 }
 0x52b   : > { %v3681_v5 = vpop.f32.mrf.mxu0  ;;  %4385 = vmatpush.bf16.msrb.mxu0 %v13556_v36 }
 0x52c   : > { %v3313_v38 = vpop.f32.mrf.mxu2  ;;  %v3682_v61 = vadd.f32 %v3681_v5, %v16752_v20  ;;  %v11392_v20 = vld [vmem:[%s19040_s1 + $0x668] sm:$0xf0]  ;;  %v13554_v5 = vld [vmem:[%s19041_s2 + $0x198] sm:$0xff] }
 0x52d   : > { %v16965_v39 = vadd.f32 %v3313_v38, %v16533_v62  ;;  %v13531_v62 = vld [vmem:[%s19040_s1 + $0x664] sm:$0xf]  ;;  %v11398_v38 = vld [vmem:[%s19040_s1 + $0x670] sm:$0xf] }
 0x52e   : > { %v3735_v41 = vpack.c.bf16 %v3682_v61, %v3680_v22  ;;  %v11395_v35 = vor.u32 %v13531_v62, %v11392_v20  ;;  %v13534_v61 = vld [vmem:[%s19040_s1 + $0x674] sm:$0xf0] }
 0x52f   : > { %4386 = vmatpush.bf16.msrb.mxu0 %v13555_v53  ;;  %v11399_v62 = vor.u32 %v13534_v61, %v11398_v38  ;;  %v13533_v53 = vld [vmem:[%s19040_s1 + $0x674] sm:$0xf]  ;;  %v11406_v61 = vld [vmem:[%s19040_s1 + $0x680] sm:$0xf] }
 0x530   : > { %3848 = vmatmul.bf16.gmra.mxu1 %v3735_v41 }
 0x531   : > { %4162 = vmatmul.bf16.gmra.mxu2 %v11391_v54 }
 0x532   : > { %v16982_v23 = vpop.f32.mrf.mxu3 }
 0x533   : > { %v3684_v51 = vpop.f32.mrf.mxu0  ;;  %4387 = vmatpush.bf16.msrb.mxu0 %v13554_v5 }
 0x534   : > { %v3316_v63 = vpop.f32.mrf.mxu2  ;;  %v3685_v41 = vadd.f32 %v3684_v51, %v16759_v43  ;;  %v11400_v43 = vld [vmem:[%s19040_s1 + $0x678] sm:$0xf0] }
 0x535   : > { %v16988_v45 = vadd.f32 %v3316_v63, %v16536_v7  ;;  %v13553_v7 = vld [vmem:[%s19041_s2 + $0x190] sm:$0xff] }
 0x536   : > { %3723 = vmatmul.bf16.gmra.mxu0 %v11259_v58  ;;  %v13552_v58 = vld [vmem:[%s19041_s2 + $0x188] sm:$0xff] }
 0x537   : > { %4251 = vmatmul.bf16.gmra.mxu3 %v11395_v35  ;;  %4388 = vmatpush.bf16.msrb.mxu0 %v13553_v7  ;;  %v11403_v35 = vor.u32 %v13533_v53, %v11400_v43  ;;  %v13536_v7 = vld [vmem:[%s19040_s1 + $0x684] sm:$0xf0] }
 0x53a   : > { %v16993_v22 = vpop.f32.mrf.mxu3 }
 0x53b   : > { %v3686_v54 = vpop.f32.mrf.mxu0  ;;  %4389 = vmatpush.bf16.msrb.mxu0 %v13552_v58  ;;  %v13535_v58 = vld [vmem:[%s19040_s1 + $0x684] sm:$0xf] }
 0x53c   : > { %v3318_v36 = vpop.f32.mrf.mxu2  ;;  %v3687_v52 = vadd.f32 %v3686_v54, %v16786_v31 }
 0x53d   : > { %v17007_v27 = vadd.f32 %v3318_v36, %v16551_v6  ;;  %v13551_v6 = vld [vmem:[%s19041_s2 + $0x180] sm:$0xff] }
 0x53e   : > { %v3736_v20 = vpack.c.bf16 %v3687_v52, %v3685_v41  ;;  %v11407_v52 = vor.u32 %v13536_v7, %v11406_v61 }
 0x53f   : > { %4390 = vmatpush.bf16.msrb.mxu0 %v13551_v6 }
 0x540   : > { %3853 = vmatmul.bf16.gmra.mxu1 %v3736_v20 }
 0x541   : > { %4167 = vmatmul.bf16.gmra.mxu2 %v11399_v62 }
 0x542   : > { %v17018_v31 = vpop.f32.mrf.mxu3 }
 0x543   : > { %v3689_v51 = vpop.f32.mrf.mxu0  ;;  %5270 = vmatpush.bf16.msra.mxu0 %v14367_v4 }
 0x544   : > { %v3321_v63 = vpop.f32.mrf.mxu2  ;;  %v3690_v41 = vadd.f32 %v3689_v51, %v16793_v19  ;;  %v11408_v19 = vld [vmem:[%s19040_s1 + $0x688] sm:$0xf0]  ;;  %v11414_v51 = vld [vmem:[%s19040_s1 + $0x690] sm:$0xf] }
 0x545   : > { %v17024_v5 = vadd.f32 %v3321_v63, %v16554_v42 }
 0x547   : > { %4256 = vmatmul.bf16.gmra.mxu3 %v11403_v35  ;;  %5271 = vmatpush.bf16.msra.mxu0 %v14378_v11 }
 0x54a   : > { %v17028_v38 = vpop.f32.mrf.mxu3 }
 0x54b   : > { %v3691_v54 = vpop.f32.mrf.mxu0  ;;  %5272 = vmatpush.bf16.msra.mxu0 %v14390_v17  ;;  %v11411_v17 = vor.u32 %v13535_v58, %v11408_v19  ;;  %v19137_v58 = vld [vmem:[#allocation24_spill] sm:$0xff] }
 0x54c   : > { %v3323_v42 = vpop.f32.mrf.mxu2  ;;  %v3692_v36 = vadd.f32 %v3691_v54, %v16820_v24 }
 0x54d   : > { %v17039_v4 = vadd.f32 %v3323_v42, %v16572_v48  ;;  %v3819_v11 = vpop.f32.mrf.mxu1 }
 0x54e   : > { %v3737_v62 = vpack.c.bf16 %v3692_v36, %v3690_v41  ;;  %v17043_v20 = vadd.f32 %v3819_v11, %v16575_v34  ;;  %v13537_v41 = vld [vmem:[%s19040_s1 + $0x694] sm:$0xf] }
 0x54f   : > { %5273 = vmatpush.bf16.msra.mxu0 %v19121_v56  ;;  %v13538_v56 = vld [vmem:[%s19040_s1 + $0x694] sm:$0xf0] }
 0x550   : > { %3858 = vmatmul.bf16.gmra.mxu1 %v3737_v62  ;;  %v11415_v7 = vor.u32 %v13538_v56, %v11414_v51 }
 0x551   : > { %4172 = vmatmul.bf16.gmra.mxu2 %v11407_v52 }
 0x552   : > { %v17052_v48 = vpop.f32.mrf.mxu3 }
 0x553   : > { %v3694_v24 = vpop.f32.mrf.mxu0  ;;  %5274 = vmatpush.bf16.msra.mxu0 %v14414_v29 }
 0x554   : > { %v4133_v53 = vpop.f32.mrf.mxu2  ;;  %v3695_v63 = vadd.f32 %v3694_v24, %v16827_v25  ;;  %v11416_v25 = vld [vmem:[%s19040_s1 + $0x698] sm:$0xf0] }
 0x555   : > { %v3821_v43 = vpop.f32.mrf.mxu1  ;;  %v11419_v11 = vor.u32 %v13537_v41, %v11416_v25 }
 0x556   : > { %v17056_v34 = vadd.f32 %v3821_v43, %v16580_v1 }
 0x557   : > { %4261 = vmatmul.bf16.gmra.mxu3 %v11411_v17  ;;  %5275 = vmatpush.bf16.msra.mxu0 %v19122_v60  ;;  %v11422_v17 = vld [vmem:[%s19040_s1 + $0x6a0] sm:$0xf] }
 0x55a   : > { %v4222_v6 = vpop.f32.mrf.mxu3 }
 0x55b   : > { %v3696_v35 = vpop.f32.mrf.mxu0  ;;  %5276 = vmatpush.bf16.msra.mxu0 %v19123_v2  ;;  %v4223_v42 = vadd.f32 %v4222_v6, %v4133_v53 }
 0x55c   : > { %v3697_v29 = vadd.f32 %v3696_v35, %v16853_v0  ;;  %v4135_v61 = vpop.f32.mrf.mxu2 }
 0x55d   : > { %v3824_v1 = vpop.f32.mrf.mxu1 }
 0x55e   : > { %v3738_v60 = vpack.c.bf16 %v3697_v29, %v3695_v63  ;;  %v17069_v54 = vadd.f32 %v3824_v1, %v16597_v40  ;;  %v19138_v29 = vld [vmem:[#allocation25_spill] sm:$0xff]  ;;  %v13539_v1 = vld [vmem:[%s19040_s1 + $0x6a4] sm:$0xf] }
 0x55f   : > { %5277 = vmatpush.bf16.msra.mxu0 %v19124_v9  ;;  %v13540_v9 = vld [vmem:[%s19040_s1 + $0x6a4] sm:$0xf0] }
 0x560   : > { %3863 = vmatmul.bf16.gmra.mxu1 %v3738_v60  ;;  %v11423_v35 = vor.u32 %v13540_v9, %v11422_v17 }
 0x561   : > { %4177 = vmatmul.bf16.gmra.mxu2 %v11415_v7  ;;  %v11424_v7 = vld [vmem:[%s19040_s1 + $0x6a8] sm:$0xf0] }
 0x562   : > { %v4224_v0 = vpop.f32.mrf.mxu3  ;;  %v11427_v25 = vor.u32 %v13539_v1, %v11424_v7 }
 0x563   : > { %v4225_v36 = vadd.f32 %v4224_v0, %v4135_v61  ;;  %v3699_v2 = vpop.f32.mrf.mxu0 }
 0x564   : > { %v4138_v52 = vpop.f32.mrf.mxu2  ;;  %v3700_v43 = vadd.f32 %v3699_v2, %v16858_v16  ;;  %v19139_v2 = vld [vmem:[#allocation26_spill] sm:$0xff] }
 0x565   : > { %v4302_v40 = vpack.c.bf16 %v4225_v36, %v4223_v42  ;;  %v3826_v62 = vpop.f32.mrf.mxu1 }
 0x566   : > { %v17079_v19 = vadd.f32 %v3826_v62, %v19137_v58  ;;  %v11430_v62 = vld [vmem:[%s19040_s1 + $0x6b0] sm:$0xf] }
 0x567   : > { %4266 = vmatmul.bf16.gmra.mxu3 %v11419_v11  ;;  %4391 = vmatmul.bf16.vlgmr.msrb.gmra.mxu0 %v4302_v40 }
 0x56a   : > { %v4227_v24 = vpop.f32.mrf.mxu3 }
 0x56b   : > { %v3701_v53 = vpop.f32.mrf.mxu0  ;;  %v4228_v60 = vadd.f32 %v4227_v24, %v4138_v52  ;;  %v13542_v52 = vld [vmem:[%s19040_s1 + $0x6b4] sm:$0xf0] }
 0x56c   : > { %v3702_v6 = vadd.f32 %v3701_v53, %v16883_v3  ;;  %v4140_v51 = vpop.f32.mrf.mxu2 }
 0x56d   : > { %v3829_v56 = vpop.f32.mrf.mxu1 }
 0x56e   : > { %v3739_v63 = vpack.c.bf16 %v3702_v6, %v3700_v43  ;;  %v17090_v61 = vadd.f32 %v3829_v56, %v19138_v29  ;;  %v11431_v43 = vor.u32 %v13542_v52, %v11430_v62  ;;  %v13541_v56 = vld [vmem:[%s19040_s1 + $0x6b4] sm:$0xf] }
 0x570   : > { %3868 = vmatmul.bf16.gmra.mxu1 %v3739_v63 }
 0x571   : > { %4182 = vmatmul.bf16.gmra.mxu2 %v11423_v35  ;;  %v11432_v35 = vld [vmem:[%s19040_s1 + $0x6b8] sm:$0xf0] }
 0x572   : > { %v4229_v16 = vpop.f32.mrf.mxu3  ;;  %v11435_v1 = vor.u32 %v13541_v56, %v11432_v35 }
 0x573   : > { %v4230_v3 = vadd.f32 %v4229_v16, %v4140_v51  ;;  %v3704_v41 = vpop.f32.mrf.mxu0 }
 0x574   : > { %v4143_v42 = vpop.f32.mrf.mxu2  ;;  %v3705_v24 = vadd.f32 %v3704_v41, %v16888_v12 }
 0x575   : > { %v4303_v0 = vpack.c.bf16 %v4230_v3, %v4228_v60  ;;  %v3831_v36 = vpop.f32.mrf.mxu1 }
 0x576   : > { %v17099_v11 = vadd.f32 %v3831_v36, %v19139_v2 }
 0x577   : > { %4271 = vmatmul.bf16.gmra.mxu3 %v11427_v25  ;;  %4396 = vmatmul.bf16.gmra.mxu0 %v4303_v0  ;;  %v11438_v25 = vld [vmem:[%s19040_s1 + $0x6c0] sm:$0xf] }
 0x57a   : > { %v4232_v40 = vpop.f32.mrf.mxu3 }
 0x57b   : > { %v3706_v58 = vpop.f32.mrf.mxu0  ;;  %v4233_v63 = vadd.f32 %v4232_v40, %v4143_v42  ;;  %v13544_v42 = vld [vmem:[%s19040_s1 + $0x6c4] sm:$0xf0] }
 0x57c   : > { %v3707_v17 = vadd.f32 %v3706_v58, %v16913_v26  ;;  %v4145_v9 = vpop.f32.mrf.mxu2  ;;  %v11439_v52 = vor.u32 %v13544_v42, %v11438_v25  ;;  %v19141_v25 = vld [vmem:[#allocation28_spill] sm:$0xff] }
 0x57d   : > { %v3834_v53 = vpop.f32.mrf.mxu1 }
 0x57e   : > { %v3740_v6 = vpack.c.bf16 %v3707_v17, %v3705_v24  ;;  %v17110_v51 = vadd.f32 %v3834_v53, %v16644_v33  ;;  %v19140_v33 = vld [vmem:[#allocation27_spill] sm:$0xff]  ;;  %v13543_v17 = vld [vmem:[%s19040_s1 + $0x6c4] sm:$0xf] }
 0x580   : > { %3873 = vmatmul.bf16.gmra.mxu1 %v3740_v6 }
 0x581   : > { %4187 = vmatmul.bf16.gmra.mxu2 %v11431_v43 }
 0x582   : > { %v4234_v12 = vpop.f32.mrf.mxu3 }
 0x583   : > { %v4235_v26 = vadd.f32 %v4234_v12, %v4145_v9  ;;  %v3709_v29 = vpop.f32.mrf.mxu0  ;;  %v11440_v9 = vld [vmem:[%s19040_s1 + $0x6c8] sm:$0xf0] }
 0x584   : > { %v4148_v7 = vpop.f32.mrf.mxu2  ;;  %v3710_v36 = vadd.f32 %v3709_v29, %v16918_v18  ;;  %v11443_v6 = vor.u32 %v13543_v17, %v11440_v9  ;;  %v13546_v29 = vld [vmem:[%s19040_s1 + $0x6d4] sm:$0xf0]  ;;  %v19142_v9 = vld [vmem:[#allocation29_spill] sm:$0xff] }
 0x585   : > { %v4304_v60 = vpack.c.bf16 %v4235_v26, %v4233_v63  ;;  %v3836_v16 = vpop.f32.mrf.mxu1  ;;  %v11446_v26 = vld [vmem:[%s19040_s1 + $0x6d0] sm:$0xf] }
 0x586   : > { %v17119_v3 = vadd.f32 %v3836_v16, %v19140_v33 }
 0x587   : > { %4276 = vmatmul.bf16.gmra.mxu3 %v11435_v1  ;;  %4401 = vmatmul.bf16.gmra.mxu0 %v4304_v60 }
 0x58a   : > { %v4237_v41 = vpop.f32.mrf.mxu3 }
 0x58b   : > { %v3711_v0 = vpop.f32.mrf.mxu0  ;;  %v4238_v53 = vadd.f32 %v4237_v41, %v4148_v7 }
 0x58c   : > { %v3712_v2 = vadd.f32 %v3711_v0, %v16943_v10  ;;  %v4150_v40 = vpop.f32.mrf.mxu2  ;;  %v13545_v0 = vld [vmem:[%s19040_s1 + $0x6d4] sm:$0xf] }
 0x58d   : > { %v3839_v62 = vpop.f32.mrf.mxu1 }
 0x58e   : > { %v3741_v58 = vpack.c.bf16 %v3712_v2, %v3710_v36  ;;  %v17130_v24 = vadd.f32 %v3839_v62, %v16669_v49  ;;  %v11448_v36 = vld [vmem:[%s19040_s1 + $0x6d8] sm:$0xf0] }
 0x58f   : > { %v11451_v62 = vor.u32 %v13545_v0, %v11448_v36 }
 0x590   : > { %3878 = vmatmul.bf16.gmra.mxu1 %v3741_v58 }
 0x591   : > { %4192 = vmatmul.bf16.gmra.mxu2 %v11439_v52 }
 0x592   : > { %v4239_v18 = vpop.f32.mrf.mxu3 }
 0x593   : > { %v4240_v10 = vadd.f32 %v4239_v18, %v4150_v40  ;;  %v3714_v43 = vpop.f32.mrf.mxu0 }
 0x594   : > { %v4153_v56 = vpop.f32.mrf.mxu2  ;;  %v3715_v7 = vadd.f32 %v3714_v43, %v16951_v44  ;;  %v13548_v43 = vld [vmem:[%s19040_s1 + $0x6e4] sm:$0xf0] }
 0x595   : > { %v4305_v35 = vpack.c.bf16 %v4240_v10, %v4238_v53  ;;  %v3841_v63 = vpop.f32.mrf.mxu1  ;;  %v11454_v10 = vld [vmem:[%s19040_s1 + $0x6e0] sm:$0xf] }
 0x596   : > { %v17139_v49 = vadd.f32 %v3841_v63, %v16677_v13  ;;  %v11447_v13 = vor.u32 %v13546_v29, %v11446_v26  ;;  %v11455_v26 = vor.u32 %v13548_v43, %v11454_v10  ;;  %v13549_v10 = vld [vmem:[%s19040_s1 + $0x6f4] sm:$0xf]  ;;  %v11464_v43 = vld [vmem:[%s19040_s1 + $0x6f8] sm:$0xf0] }
 0x597   : > { %4281 = vmatmul.bf16.gmra.mxu3 %v11443_v6  ;;  %4406 = vmatmul.bf16.gmra.mxu0 %v4305_v35 }
 0x59a   : > { %v4242_v12 = vpop.f32.mrf.mxu3 }
 0x59b   : > { %v3716_v1 = vpop.f32.mrf.mxu0  ;;  %v4243_v2 = vadd.f32 %v4242_v12, %v4153_v56 }
 0x59c   : > { %v3717_v60 = vadd.f32 %v3716_v1, %v16982_v23  ;;  %v4155_v16 = vpop.f32.mrf.mxu2 }
 0x59d   : > { %v3844_v33 = vpop.f32.mrf.mxu1 }
 0x59e   : > { %v3742_v41 = vpack.c.bf16 %v3717_v60, %v3715_v7  ;;  %v17150_v42 = vadd.f32 %v3844_v33, %v19141_v25  ;;  %v13547_v7 = vld [vmem:[%s19040_s1 + $0x6e4] sm:$0xf]  ;;  %v11456_v60 = vld [vmem:[%s19040_s1 + $0x6e8] sm:$0xf0] }
 0x5a0   : > { %3883 = vmatmul.bf16.gmra.mxu1 %v3742_v41 }
 0x5a1   : > { %4197 = vmatmul.bf16.gmra.mxu2 %v11447_v13  ;;  %v11459_v13 = vor.u32 %v13547_v7, %v11456_v60  ;;  %v13560_v7 = vld [vmem:[%s19040_s1 + $0x704] sm:$0xf0] }
 0x5a2   : > { %v4244_v44 = vpop.f32.mrf.mxu3 }
 0x5a3   : > { %v4245_v23 = vadd.f32 %v4244_v44, %v4155_v16  ;;  %v3719_v40 = vpop.f32.mrf.mxu0  ;;  %v13550_v44 = vld [vmem:[%s19040_s1 + $0x6f4] sm:$0xf0] }
 0x5a4   : > { %v4158_v52 = vpop.f32.mrf.mxu2  ;;  %v3720_v56 = vadd.f32 %v3719_v40, %v16993_v22 }
 0x5a5   : > { %v4306_v58 = vpack.c.bf16 %v4245_v23, %v4243_v2  ;;  %v3846_v17 = vpop.f32.mrf.mxu1  ;;  %v11462_v2 = vld [vmem:[%s19040_s1 + $0x6f0] sm:$0xf] }
 0x5a6   : > { %v17159_v53 = vadd.f32 %v3846_v17, %v19142_v9  ;;  %v19143_v9 = vld [vmem:[#allocation30_spill] sm:$0xff] }
 0x5a7   : > { %4286 = vmatmul.bf16.gmra.mxu3 %v11451_v62  ;;  %4411 = vmatmul.bf16.gmra.mxu0 %v4306_v58 }
 0x5aa   : > { %v4247_v18 = vpop.f32.mrf.mxu3 }
 0x5ab   : > { %v3721_v6 = vpop.f32.mrf.mxu0  ;;  %v4248_v16 = vadd.f32 %v4247_v18, %v4158_v52 }
 0x5ac   : > { %v3722_v35 = vadd.f32 %v3721_v6, %v17018_v31  ;;  %v4160_v63 = vpop.f32.mrf.mxu2 }
 0x5ad   : > { %v3849_v12 = vpop.f32.mrf.mxu1 }
 0x5ae   : > { %v3743_v29 = vpack.c.bf16 %v3722_v35, %v3720_v56  ;;  %v17170_v1 = vadd.f32 %v3849_v12, %v16730_v47  ;;  %v11467_v56 = vor.u32 %v13549_v10, %v11464_v43 }
 0x5b0   : > { %3888 = vmatmul.bf16.gmra.mxu1 %v3743_v29  ;;  %v11550_v29 = vld [vmem:[%s19040_s1 + $0x700] sm:$0xf] }
 0x5b1   : > { %4202 = vmatmul.bf16.gmra.mxu2 %v11455_v26 }
 0x5b2   : > { %v4249_v22 = vpop.f32.mrf.mxu3 }
 0x5b3   : > { %v4250_v31 = vadd.f32 %v4249_v22, %v4160_v63  ;;  %v3724_v33 = vpop.f32.mrf.mxu0 }
 0x5b4   : > { %v4163_v41 = vpop.f32.mrf.mxu2  ;;  %v3725_v40 = vadd.f32 %v3724_v33, %v17028_v38 }
 0x5b5   : > { %v4307_v25 = vpack.c.bf16 %v4250_v31, %v4248_v16  ;;  %v3851_v0 = vpop.f32.mrf.mxu1  ;;  %v13559_v16 = vld [vmem:[%s19040_s1 + $0x704] sm:$0xf]  ;;  %v11551_v31 = vor.u32 %v13560_v7, %v11550_v29 }
 0x5b6   : > { %v17179_v47 = vadd.f32 %v3851_v0, %v16737_v57  ;;  %v11463_v57 = vor.u32 %v13550_v44, %v11462_v2 }
 0x5b7   : > { %4291 = vmatmul.bf16.gmra.mxu3 %v11459_v13  ;;  %4416 = vmatmul.bf16.gmra.mxu0 %v4307_v25 }
 0x5ba   : > { %v4252_v36 = vpop.f32.mrf.mxu3 }
 0x5bb   : > { %v3726_v23 = vpop.f32.mrf.mxu0  ;;  %v4253_v6 = vadd.f32 %v4252_v36, %v4163_v41 }
 0x5bc   : > { %v3727_v62 = vadd.f32 %v3726_v23, %v17052_v48  ;;  %v4165_v52 = vpop.f32.mrf.mxu2 }
 0x5bd   : > { %v3854_v58 = vpop.f32.mrf.mxu1 }
 0x5be   : > { %v3744_v17 = vpack.c.bf16 %v3727_v62, %v3725_v40  ;;  %v17190_v18 = vadd.f32 %v3854_v58, %v19143_v9  ;;  %v11558_v62 = vld [vmem:[%s19040_s1 + $0x710] sm:$0xf]  ;;  %v13561_v58 = vld [vmem:[%s19040_s1 + $0x714] sm:$0xf] }
 0x5c0   : > { %3893 = vmatmul.bf16.gmra.mxu1 %v3744_v17 }
 0x5c1   : > { %4207 = vmatmul.bf16.gmra.mxu2 %v11463_v57  ;;  %v11560_v57 = vld [vmem:[%s19040_s1 + $0x718] sm:$0xf0] }
 0x5c2   : > { %v4254_v38 = vpop.f32.mrf.mxu3  ;;  %v11563_v10 = vor.u32 %v13561_v58, %v11560_v57  ;;  %v13566_v57 = vld [vmem:[%s19040_s1 + $0x734] sm:$0xf0] }
 0x5c3   : > { %v4255_v48 = vadd.f32 %v4254_v38, %v4165_v52 }
 0x5c4   : > { %v4168_v35 = vpop.f32.mrf.mxu2 }
 0x5c5   : > { %v4308_v63 = vpack.c.bf16 %v4255_v48, %v4253_v6  ;;  %v3856_v12 = vpop.f32.mrf.mxu1 }
 0x5c6   : > { %v17199_v26 = vadd.f32 %v3856_v12, %v16771_v55  ;;  %v11552_v55 = vld [vmem:[%s19040_s1 + $0x708] sm:$0xf0] }
 0x5c7   : > { %4296 = vmatmul.bf16.gmra.mxu3 %v11467_v56  ;;  %4421 = vmatmul.bf16.gmra.mxu0 %v4308_v63  ;;  %v11555_v13 = vor.u32 %v13559_v16, %v11552_v55  ;;  %v13563_v55 = vld [vmem:[%s19040_s1 + $0x724] sm:$0xf] }
 0x5ca   : > { %v4257_v60 = vpop.f32.mrf.mxu3 }
 0x5cb   : > { %v4258_v25 = vadd.f32 %v4257_v60, %v4168_v35  ;;  %v13564_v60 = vld [vmem:[%s19040_s1 + $0x724] sm:$0xf0] }
 0x5cc   : > { %v4170_v22 = vpop.f32.mrf.mxu2 }
 0x5cd   : > { %v3859_v33 = vpop.f32.mrf.mxu1 }
 0x5ce   : > { %v17214_v41 = vadd.f32 %v3859_v33, %v16789_v37  ;;  %v13562_v37 = vld [vmem:[%s19040_s1 + $0x714] sm:$0xf0] }
 0x5cf   : > { %v11559_v17 = vor.u32 %v13562_v37, %v11558_v62 }
 0x5d0   : > { %4705 = vmatmul.bf16.vlgmr.msrb.gmra.mxu1 %v11551_v31 }
 0x5d1   : > { %4794 = vmatmul.bf16.vlgmr.msrb.gmra.mxu2 %v11555_v13 }
 0x5d2   : > { %v4259_v0 = vpop.f32.mrf.mxu3 }
 0x5d3   : > { %v4260_v36 = vadd.f32 %v4259_v0, %v4170_v22 }
 0x5d4   : > { %v4173_v2 = vpop.f32.mrf.mxu2 }
 0x5d5   : > { %v4309_v44 = vpack.c.bf16 %v4260_v36, %v4258_v25  ;;  %v3861_v23 = vpop.f32.mrf.mxu1 }
 0x5d6   : > { %v17217_v40 = vadd.f32 %v3861_v23, %v16804_v46 }
 0x5d7   : > { %4426 = vmatmul.bf16.gmra.mxu0 %v4309_v44 }
 0x5da   : > { %v4262_v52 = vpop.f32.mrf.mxu3 }
 0x5db   : > { %v4263_v6 = vadd.f32 %v4262_v52, %v4173_v2 }
 0x5dc   : > { %v4175_v46 = vpop.f32.mrf.mxu2 }
 0x5dd   : > { %v3864_v9 = vpop.f32.mrf.mxu1 }
 0x5de   : > { %v17232_v43 = vadd.f32 %v3864_v9, %v16823_v8  ;;  %v11566_v8 = vld [vmem:[%s19040_s1 + $0x720] sm:$0xf] }
 0x5df   : > { %v11567_v31 = vor.u32 %v13564_v60, %v11566_v8 }
 0x5e0   : > { %4710 = vmatmul.bf16.gmra.mxu1 %v11559_v17  ;;  %v13565_v17 = vld [vmem:[%s19040_s1 + $0x734] sm:$0xf] }
 0x5e1   : > { %4799 = vmatmul.bf16.gmra.mxu2 %v11563_v10 }
 0x5e2   : > { %v4264_v38 = vpop.f32.mrf.mxu3 }
 0x5e3   : > { %v4265_v48 = vadd.f32 %v4264_v38, %v4175_v46 }
 0x5e4   : > { %v4178_v56 = vpop.f32.mrf.mxu2  ;;  %v4392_v35 = vpop.f32.mrf.mxu0 }
 0x5e5   : > { %v4310_v63 = vpack.c.bf16 %v4265_v48, %v4263_v6  ;;  %v17235_v12 = vadd.f32 %v4392_v35, %v17043_v20  ;;  %v3866_v29 = vpop.f32.mrf.mxu1  ;;  %v11568_v20 = vld [vmem:[%s19040_s1 + $0x728] sm:$0xf0] }
 0x5e6   : > { %v17238_v7 = vadd.f32 %v3866_v29, %v16838_v59  ;;  %v11571_v25 = vor.u32 %v13563_v55, %v11568_v20 }
 0x5e7   : > { %4431 = vmatmul.bf16.gmra.mxu0 %v4310_v63 }
 0x5ea   : > { %v4267_v16 = vpop.f32.mrf.mxu3 }
 0x5eb   : > { %v4268_v36 = vadd.f32 %v4267_v16, %v4178_v56 }
 0x5ec   : > { %v4180_v59 = vpop.f32.mrf.mxu2  ;;  %v4394_v22 = vpop.f32.mrf.mxu0 }
 0x5ed   : > { %v17253_v33 = vadd.f32 %v4394_v22, %v17056_v34  ;;  %v3869_v13 = vpop.f32.mrf.mxu1 }
 0x5ee   : > { %v17256_v0 = vadd.f32 %v3869_v13, %v16856_v30  ;;  %v11574_v30 = vld [vmem:[%s19040_s1 + $0x730] sm:$0xf] }
 0x5ef   : > { %v11575_v10 = vor.u32 %v13566_v57, %v11574_v30 }
 0x5f0   : > { %4715 = vmatmul.bf16.gmra.mxu1 %v11567_v31  ;;  %v13567_v31 = vld [vmem:[%s19040_s1 + $0x744] sm:$0xf] }
 0x5f1   : > { %4804 = vmatmul.bf16.gmra.mxu2 %v11571_v25 }
 0x5f2   : > { %v4269_v2 = vpop.f32.mrf.mxu3 }
 0x5f3   : > { %v4270_v44 = vadd.f32 %v4269_v2, %v4180_v59  ;;  %v13568_v59 = vld [vmem:[%s19040_s1 + $0x744] sm:$0xf0] }
 0x5f4   : > { %v4183_v23 = vpop.f32.mrf.mxu2  ;;  %v4397_v62 = vpop.f32.mrf.mxu0 }
 0x5f5   : > { %v4311_v37 = vpack.c.bf16 %v4270_v44, %v4268_v36  ;;  %v17259_v52 = vadd.f32 %v4397_v62, %v17069_v54  ;;  %v3871_v58 = vpop.f32.mrf.mxu1  ;;  %v11576_v54 = vld [vmem:[%s19040_s1 + $0x738] sm:$0xf0] }
 0x5f6   : > { %v17262_v34 = vadd.f32 %v3871_v58, %v16869_v14  ;;  %v11579_v48 = vor.u32 %v13565_v17, %v11576_v54 }
 0x5f7   : > { %4436 = vmatmul.bf16.gmra.mxu0 %v4311_v37 }
 0x5fa   : > { %v4272_v46 = vpop.f32.mrf.mxu3 }
 0x5fb   : > { %v4273_v35 = vadd.f32 %v4272_v46, %v4183_v23 }
 0x5fc   : > { %v4185_v14 = vpop.f32.mrf.mxu2  ;;  %v4399_v9 = vpop.f32.mrf.mxu0 }
 0x5fd   : > { %v17277_v6 = vadd.f32 %v4399_v9, %v17079_v19  ;;  %v3874_v38 = vpop.f32.mrf.mxu1 }
 0x5fe   : > { %v17280_v56 = vadd.f32 %v3874_v38, %v16886_v32  ;;  %v11582_v32 = vld [vmem:[%s19040_s1 + $0x740] sm:$0xf] }
 0x5ff   : > { %v11583_v25 = vor.u32 %v13568_v59, %v11582_v32 }
 0x600   : > { %4720 = vmatmul.bf16.gmra.mxu1 %v11575_v10  ;;  %v13569_v10 = vld [vmem:[%s19040_s1 + $0x754] sm:$0xf] }
 0x601   : > { %4809 = vmatmul.bf16.gmra.mxu2 %v11579_v48 }
 0x602   : > { %v4274_v63 = vpop.f32.mrf.mxu3 }
 0x603   : > { %v4275_v29 = vadd.f32 %v4274_v63, %v4185_v14  ;;  %v13570_v14 = vld [vmem:[%s19040_s1 + $0x754] sm:$0xf0] }
 0x604   : > { %v4188_v8 = vpop.f32.mrf.mxu2  ;;  %v4402_v60 = vpop.f32.mrf.mxu0 }
 0x605   : > { %v4312_v16 = vpack.c.bf16 %v4275_v29, %v4273_v35  ;;  %v17283_v55 = vadd.f32 %v4402_v60, %v17090_v61  ;;  %v3876_v20 = vpop.f32.mrf.mxu1  ;;  %v11584_v61 = vld [vmem:[%s19040_s1 + $0x748] sm:$0xf0]  ;;  %v13598_v60 = vld [vmem:[%s19041_s2 + $0x1f8] sm:$0xff] }
 0x606   : > { %v17286_v19 = vadd.f32 %v3876_v20, %v16899_v50  ;;  %v11587_v44 = vor.u32 %v13567_v31, %v11584_v61  ;;  %4956 = vmatpush.bf16.msrb.mxu3 %v13598_v60  ;;  %v13592_v60 = vld [vmem:[%s19041_s2 + $0x1c8] sm:$0xff] }
 0x607   : > { %4441 = vmatmul.bf16.gmra.mxu0 %v4312_v16 }
 0x60a   : > { %v4277_v22 = vpop.f32.mrf.mxu3 }
 0x60b   : > { %v4278_v62 = vadd.f32 %v4277_v22, %v4188_v8 }
 0x60c   : > { %v4190_v50 = vpop.f32.mrf.mxu2  ;;  %v4404_v13 = vpop.f32.mrf.mxu0 }
 0x60d   : > { %v17301_v36 = vadd.f32 %v4404_v13, %v17099_v11  ;;  %v3879_v2 = vpop.f32.mrf.mxu1  ;;  %v13596_v13 = vld [vmem:[%s19041_s2 + $0x1e8] sm:$0xff] }
 0x60e   : > { %v17304_v23 = vadd.f32 %v3879_v2, %v16916_v15  ;;  %v11590_v15 = vld [vmem:[%s19040_s1 + $0x750] sm:$0xf]  ;;  %v13572_v2 = vld [vmem:[%s19040_s1 + $0x764] sm:$0xf0] }
 0x60f   : > { %v11591_v48 = vor.u32 %v13570_v14, %v11590_v15  ;;  %v13594_v15 = vld [vmem:[%s19041_s2 + $0x1d8] sm:$0xff] }
 0x610   : > { %4725 = vmatmul.bf16.gmra.mxu1 %v11583_v25  ;;  %v11598_v25 = vld [vmem:[%s19040_s1 + $0x760] sm:$0xf] }
 0x611   : > { %4814 = vmatmul.bf16.gmra.mxu2 %v11587_v44  ;;  %v11600_v44 = vld [vmem:[%s19040_s1 + $0x768] sm:$0xf0] }
 0x612   : > { %v4279_v37 = vpop.f32.mrf.mxu3 }
 0x613   : > { %v4280_v58 = vadd.f32 %v4279_v37, %v4190_v50 }
 0x614   : > { %v4193_v30 = vpop.f32.mrf.mxu2  ;;  %v4407_v57 = vpop.f32.mrf.mxu0 }
 0x615   : > { %v4313_v46 = vpack.c.bf16 %v4280_v58, %v4278_v62  ;;  %v17307_v17 = vadd.f32 %v4407_v57, %v17110_v51  ;;  %v3881_v54 = vpop.f32.mrf.mxu1  ;;  %v11592_v51 = vld [vmem:[%s19040_s1 + $0x758] sm:$0xf0]  ;;  %v11599_v58 = vor.u32 %v13572_v2, %v11598_v25 }
 0x616   : > { %v17310_v11 = vadd.f32 %v3881_v54, %v16929_v28  ;;  %v11595_v29 = vor.u32 %v13569_v10, %v11592_v51 }
 0x617   : > { %4446 = vmatmul.bf16.gmra.mxu0 %v4313_v46 }
 0x618   : > { %19144 = vst [vmem:[#allocation31_spill] sm:$0xff] %v17310_v11 }
 0x61a   : > { %v4282_v9 = vpop.f32.mrf.mxu3 }
 0x61b   : > { %v4283_v16 = vadd.f32 %v4282_v9, %v4193_v30  ;;  %v13595_v30 = vld [vmem:[%s19041_s2 + $0x1e0] sm:$0xff] }
 0x61c   : > { %v4195_v28 = vpop.f32.mrf.mxu2  ;;  %v4409_v38 = vpop.f32.mrf.mxu0 }
 0x61d   : > { %v17325_v35 = vadd.f32 %v4409_v38, %v17119_v3  ;;  %v3884_v63 = vpop.f32.mrf.mxu1  ;;  %v13597_v3 = vld [vmem:[%s19041_s2 + $0x1f0] sm:$0xff] }
 0x61e   : > { %v17328_v8 = vadd.f32 %v3884_v63, %v16946_v21  ;;  %4957 = vmatpush.bf16.msrb.mxu3 %v13597_v3  ;;  %v13593_v38 = vld [vmem:[%s19041_s2 + $0x1d0] sm:$0xff] }
 0x620   : > { %4730 = vmatmul.bf16.gmra.mxu1 %v11591_v48 }
 0x621   : > { %4819 = vmatmul.bf16.gmra.mxu2 %v11595_v29 }
 0x622   : > { %v4284_v20 = vpop.f32.mrf.mxu3  ;;  %4958 = vmatpush.bf16.msrb.mxu3 %v13596_v13 }
 0x623   : > { %v4285_v32 = vadd.f32 %v4284_v20, %v4195_v28  ;;  %v13574_v20 = vld [vmem:[%s19040_s1 + $0x774] sm:$0xf0] }
 0x624   : > { %v4198_v59 = vpop.f32.mrf.mxu2  ;;  %v4412_v22 = vpop.f32.mrf.mxu0 }
 0x625   : > { %v4314_v31 = vpack.c.bf16 %v4285_v32, %v4283_v16  ;;  %v17337_v21 = vadd.f32 %v4412_v22, %v17130_v24  ;;  %v3886_v61 = vpop.f32.mrf.mxu1  ;;  %v11606_v16 = vld [vmem:[%s19040_s1 + $0x770] sm:$0xf]  ;;  %v11608_v32 = vld [vmem:[%s19040_s1 + $0x778] sm:$0xf0] }
 0x626   : > { %v17340_v50 = vadd.f32 %v3886_v61, %v16965_v39  ;;  %v13571_v39 = vld [vmem:[%s19040_s1 + $0x764] sm:$0xf]  ;;  %4959 = vmatpush.bf16.msrb.mxu3 %v13595_v30  ;;  %v11607_v3 = vor.u32 %v13574_v20, %v11606_v16 }
 0x627   : > { %4451 = vmatmul.bf16.gmra.mxu0 %v4314_v31  ;;  %v11603_v46 = vor.u32 %v13571_v39, %v11600_v44  ;;  %v13591_v31 = vld [vmem:[%s19041_s2 + $0x1c0] sm:$0xff] }
 0x628   : > { %19145 = vst [vmem:[#allocation32_spill] sm:$0xff] %v17340_v50 }
 0x62a   : > { %v4287_v24 = vpop.f32.mrf.mxu3  ;;  %4960 = vmatpush.bf16.msrb.mxu3 %v13594_v15  ;;  %v13576_v15 = vld [vmem:[%s19040_s1 + $0x784] sm:$0xf0] }
 0x62b   : > { %v4288_v14 = vadd.f32 %v4287_v24, %v4198_v59 }
 0x62c   : > { %v4200_v62 = vpop.f32.mrf.mxu2  ;;  %v17357_v37 = vpop.f32.mrf.mxu0 }
 0x62d   : > { %v3889_v57 = vpop.f32.mrf.mxu1 }
 0x62e   : > { %v17363_v54 = vadd.f32 %v3889_v57, %v16988_v45  ;;  %4961 = vmatpush.bf16.msrb.mxu3 %v13593_v38 }
 0x630   : > { %4735 = vmatmul.bf16.gmra.mxu1 %v11599_v58 }
 0x631   : > { %4824 = vmatmul.bf16.gmra.mxu2 %v11603_v46 }
 0x632   : > { %v4289_v9 = vpop.f32.mrf.mxu3  ;;  %4962 = vmatpush.bf16.msrb.mxu3 %v13592_v60 }
 0x633   : > { %v4290_v10 = vadd.f32 %v4289_v9, %v4200_v62  ;;  %v13575_v9 = vld [vmem:[%s19040_s1 + $0x784] sm:$0xf] }
 0x634   : > { %v4203_v51 = vpop.f32.mrf.mxu2  ;;  %v4417_v28 = vpop.f32.mrf.mxu0 }
 0x635   : > { %v4315_v48 = vpack.c.bf16 %v4290_v10, %v4288_v14  ;;  %v17372_v45 = vadd.f32 %v4417_v28, %v17150_v42  ;;  %v3891_v63 = vpop.f32.mrf.mxu1 }
 0x636   : > { %v17375_v29 = vadd.f32 %v3891_v63, %v17007_v27  ;;  %v13573_v27 = vld [vmem:[%s19040_s1 + $0x774] sm:$0xf]  ;;  %4963 = vmatpush.bf16.msrb.mxu3 %v13591_v31 }
 0x637   : > { %4456 = vmatmul.bf16.gmra.mxu0 %v4315_v48  ;;  %v11611_v13 = vor.u32 %v13573_v27, %v11608_v32  ;;  %v13577_v31 = vld [vmem:[%s19040_s1 + $0x794] sm:$0xf] }
 0x638   : > { %19146 = vst [vmem:[#allocation33_spill] sm:$0xff] %v17375_v29 }
 0x63a   : > { %v4292_v42 = vpop.f32.mrf.mxu3 }
 0x63b   : > { %v4293_v2 = vadd.f32 %v4292_v42, %v4203_v51 }
 0x63c   : > { %v4205_v59 = vpop.f32.mrf.mxu2  ;;  %v17392_v22 = vpop.f32.mrf.mxu0 }
 0x63d   : > { %v3894_v61 = vpop.f32.mrf.mxu1 }
 0x63e   : > { %v17398_v25 = vadd.f32 %v3894_v61, %v17024_v5  ;;  %v11614_v5 = vld [vmem:[%s19040_s1 + $0x780] sm:$0xf]  ;;  %v11624_v61 = vld [vmem:[%s19040_s1 + $0x798] sm:$0xf0] }
 0x63f   : > { %v11615_v51 = vor.u32 %v13576_v15, %v11614_v5 }
 0x640   : > { %4740 = vmatmul.bf16.gmra.mxu1 %v11607_v3  ;;  %v13578_v3 = vld [vmem:[%s19040_s1 + $0x794] sm:$0xf0] }
 0x641   : > { %4829 = vmatmul.bf16.gmra.mxu2 %v11611_v13 }
 0x642   : > { %v4294_v24 = vpop.f32.mrf.mxu3 }
 0x643   : > { %v4295_v39 = vadd.f32 %v4294_v24, %v4205_v59  ;;  %v11622_v59 = vld [vmem:[%s19040_s1 + $0x790] sm:$0xf] }
 0x644   : > { %v4208_v44 = vpop.f32.mrf.mxu2  ;;  %v4422_v62 = vpop.f32.mrf.mxu0 }
 0x645   : > { %v4316_v58 = vpack.c.bf16 %v4295_v39, %v4293_v2  ;;  %v17401_v30 = vadd.f32 %v4422_v62, %v17170_v1  ;;  %v3896_v57 = vpop.f32.mrf.mxu1  ;;  %v11616_v1 = vld [vmem:[%s19040_s1 + $0x788] sm:$0xf0]  ;;  %v11623_v2 = vor.u32 %v13578_v3, %v11622_v59  ;;  %v11627_v62 = vor.u32 %v13577_v31, %v11624_v61  ;;  %v11638_v31 = vld [vmem:[%s19040_s1 + $0x7b0] sm:$0xf]  ;;  %v13582_v61 = vld [vmem:[%s19040_s1 + $0x7b4] sm:$0xf0] }
 0x646   : > { %v17404_v46 = vadd.f32 %v3896_v57, %v17039_v4  ;;  %v11619_v38 = vor.u32 %v13575_v9, %v11616_v1  ;;  %v11630_v9 = vld [vmem:[%s19040_s1 + $0x7a0] sm:$0xf]  ;;  %v13580_v1 = vld [vmem:[%s19040_s1 + $0x7a4] sm:$0xf0] }
 0x647   : > { %4461 = vmatmul.bf16.gmra.mxu0 %v4316_v58 }
 0x648   : > { %19147 = vst [vmem:[#allocation34_spill] sm:$0xff] %v17404_v46 }
 0x64a   : > { %v4297_v14 = vpop.f32.mrf.mxu3 }
 0x64b   : > { %v4298_v48 = vadd.f32 %v4297_v14, %v4208_v44 }
 0x64c   : > { %v4210_v4 = vpop.f32.mrf.mxu2  ;;  %v17418_v10 = vpop.f32.mrf.mxu0 }
 0x64d   : > { %v4706_v28 = vpop.f32.mrf.mxu1 }
 0x650   : > { %4745 = vmatmul.bf16.gmra.mxu1 %v11615_v51  ;;  %v11632_v51 = vld [vmem:[%s19040_s1 + $0x7a8] sm:$0xf0] }
 0x651   : > { %4834 = vmatmul.bf16.gmra.mxu2 %v11619_v38  ;;  %v11631_v38 = vor.u32 %v13580_v1, %v11630_v9 }
 0x652   : > { %v4299_v63 = vpop.f32.mrf.mxu3 }
 0x653   : > { %v4300_v60 = vadd.f32 %v4299_v63, %v4210_v4  ;;  %v13579_v4 = vld [vmem:[%s19040_s1 + $0x7a4] sm:$0xf] }
 0x654   : > { %v4427_v16 = vpop.f32.mrf.mxu0  ;;  %v4795_v20 = vpop.f32.mrf.mxu2 }
 0x655   : > { %v4317_v42 = vpack.c.bf16 %v4300_v60, %v4298_v48  ;;  %v17421_v27 = vadd.f32 %v4427_v16, %v17190_v18  ;;  %v4708_v32 = vpop.f32.mrf.mxu1  ;;  %v4796_v24 = vadd.f32 %v4795_v20, %v4706_v28  ;;  %v11635_v16 = vor.u32 %v13579_v4, %v11632_v51  ;;  %v11646_v51 = vld [vmem:[%s19040_s1 + $0x7c0] sm:$0xf] }
 0x657   : > { %4466 = vmatmul.bf16.gmra.mxu0 %v4317_v42 }
 0x65c   : > { %v17435_v18 = vpop.f32.mrf.mxu0  ;;  %v4797_v13 = vpop.f32.mrf.mxu2 }
 0x65d   : > { %v4798_v39 = vadd.f32 %v4797_v13, %v4708_v32  ;;  %v4711_v44 = vpop.f32.mrf.mxu1  ;;  %v13581_v13 = vld [vmem:[%s19040_s1 + $0x7b4] sm:$0xf] }
 0x65f   : > { %v4875_v58 = vpack.c.bf16 %v4798_v39, %v4796_v24  ;;  %v11639_v39 = vor.u32 %v13582_v61, %v11638_v31 }
 0x660   : > { %4750 = vmatmul.bf16.gmra.mxu1 %v11623_v2  ;;  %v11640_v2 = vld [vmem:[%s19040_s1 + $0x7b8] sm:$0xf0] }
 0x661   : > { %4839 = vmatmul.bf16.gmra.mxu2 %v11627_v62  ;;  %4964 = vmatmul.bf16.vlgmr.msrb.gmra.mxu3 %v4875_v58 }
 0x664   : > { %v4432_v57 = vpop.f32.mrf.mxu0  ;;  %v4800_v5 = vpop.f32.mrf.mxu2 }
 0x665   : > { %v17438_v15 = vadd.f32 %v4432_v57, %v17214_v41  ;;  %v4713_v14 = vpop.f32.mrf.mxu1  ;;  %v4801_v48 = vadd.f32 %v4800_v5, %v4711_v44  ;;  %v11643_v57 = vor.u32 %v13581_v13, %v11640_v2 }
 0x66c   : > { %v17452_v28 = vpop.f32.mrf.mxu0  ;;  %v4802_v41 = vpop.f32.mrf.mxu2 }
 0x66d   : > { %v4803_v63 = vadd.f32 %v4802_v41, %v4713_v14  ;;  %v4716_v60 = vpop.f32.mrf.mxu1  ;;  %v13584_v41 = vld [vmem:[%s19040_s1 + $0x7c4] sm:$0xf0] }
 0x66f   : > { %v4876_v20 = vpack.c.bf16 %v4803_v63, %v4801_v48  ;;  %v11648_v48 = vld [vmem:[%s19040_s1 + $0x7c8] sm:$0xf0] }
 0x670   : > { %4755 = vmatmul.bf16.gmra.mxu1 %v11631_v38  ;;  %v13583_v38 = vld [vmem:[%s19040_s1 + $0x7c4] sm:$0xf] }
 0x671   : > { %4844 = vmatmul.bf16.gmra.mxu2 %v11635_v16  ;;  %4969 = vmatmul.bf16.gmra.mxu3 %v4876_v20 }
 0x674   : > { %v4437_v42 = vpop.f32.mrf.mxu0  ;;  %v4805_v32 = vpop.f32.mrf.mxu2 }
 0x675   : > { %v17455_v59 = vadd.f32 %v4437_v42, %v17232_v43  ;;  %v4718_v3 = vpop.f32.mrf.mxu1  ;;  %v4806_v44 = vadd.f32 %v4805_v32, %v4716_v60  ;;  %v11647_v60 = vor.u32 %v13584_v41, %v11646_v51  ;;  %v11651_v32 = vor.u32 %v13583_v38, %v11648_v48 }
 0x67c   : > { %v17469_v24 = vpop.f32.mrf.mxu0  ;;  %v4807_v43 = vpop.f32.mrf.mxu2 }
 0x67d   : > { %v4808_v62 = vadd.f32 %v4807_v43, %v4718_v3  ;;  %v4721_v58 = vpop.f32.mrf.mxu1  ;;  %v11654_v43 = vld [vmem:[%s19040_s1 + $0x7d0] sm:$0xf] }
 0x67f   : > { %v4877_v5 = vpack.c.bf16 %v4808_v62, %v4806_v44  ;;  %v13585_v44 = vld [vmem:[%s19040_s1 + $0x7d4] sm:$0xf]  ;;  %v11656_v62 = vld [vmem:[%s19040_s1 + $0x7d8] sm:$0xf0] }
 0x680   : > { %4760 = vmatmul.bf16.gmra.mxu1 %v11639_v39  ;;  %v13586_v39 = vld [vmem:[%s19040_s1 + $0x7d4] sm:$0xf0] }
 0x681   : > { %4849 = vmatmul.bf16.gmra.mxu2 %v11643_v57  ;;  %4974 = vmatmul.bf16.gmra.mxu3 %v4877_v5  ;;  %v11655_v57 = vor.u32 %v13586_v39, %v11654_v43 }
 0x684   : > { %v4442_v14 = vpop.f32.mrf.mxu0  ;;  %v4810_v9 = vpop.f32.mrf.mxu2 }
 0x685   : > { %v17472_v1 = vadd.f32 %v4442_v14, %v17256_v0  ;;  %v4723_v4 = vpop.f32.mrf.mxu1  ;;  %v4811_v16 = vadd.f32 %v4810_v9, %v4721_v58 }
 0x68c   : > { %v17486_v63 = vpop.f32.mrf.mxu0  ;;  %v4812_v0 = vpop.f32.mrf.mxu2 }
 0x68d   : > { %v4813_v20 = vadd.f32 %v4812_v0, %v4723_v4  ;;  %v4726_v42 = vpop.f32.mrf.mxu1  ;;  %v11659_v4 = vor.u32 %v13585_v44, %v11656_v62 }
 0x68f   : > { %v4878_v3 = vpack.c.bf16 %v4813_v20, %v4811_v16  ;;  %v13600_v16 = vld [vmem:[%s19040_s1 + $0x804] sm:$0xf0] }
 0x690   : > { %4765 = vmatmul.bf16.gmra.mxu1 %v11647_v60  ;;  %v11758_v60 = vld [vmem:[%s19040_s1 + $0x800] sm:$0xf] }
 0x691   : > { %4854 = vmatmul.bf16.gmra.mxu2 %v11651_v32  ;;  %4979 = vmatmul.bf16.gmra.mxu3 %v4878_v3  ;;  %v11759_v20 = vor.u32 %v13600_v16, %v11758_v60  ;;  %v13587_v32 = vld [vmem:[%s19040_s1 + $0x7e4] sm:$0xf]  ;;  %v11664_v3 = vld [vmem:[%s19040_s1 + $0x7e8] sm:$0xf0]  ;;  %v11672_v60 = vld [vmem:[%s19040_s1 + $0x7f8] sm:$0xf0] }
 0x692   : > { %v11667_v62 = vor.u32 %v13587_v32, %v11664_v3 }
 0x693   : > { %5278 = vmatmul.bf16.vlgmr.msra.gmra.mxu0 %v11759_v20 }
 0x694   : > { %v4447_v31 = vpop.f32.mrf.mxu0  ;;  %v4815_v61 = vpop.f32.mrf.mxu2 }
 0x695   : > { %v17489_v13 = vadd.f32 %v4447_v31, %v17280_v56  ;;  %v4728_v2 = vpop.f32.mrf.mxu1  ;;  %v4816_v5 = vadd.f32 %v4815_v61, %v4726_v42  ;;  %v11662_v42 = vld [vmem:[%s19040_s1 + $0x7e0] sm:$0xf] }
 0x69c   : > { %v17503_v58 = vpop.f32.mrf.mxu0  ;;  %v4817_v56 = vpop.f32.mrf.mxu2 }
 0x69d   : > { %19148 = vst [vmem:[#allocation35_spill] sm:$0xff] %v17503_v58  ;;  %v4818_v14 = vadd.f32 %v4817_v56, %v4728_v2  ;;  %v4731_v9 = vpop.f32.mrf.mxu1 }
 0x69f   : > { %v4879_v51 = vpack.c.bf16 %v4818_v14, %v4816_v5 }
 0x6a0   : > { %4770 = vmatmul.bf16.gmra.mxu1 %v11655_v57 }
 0x6a1   : > { %4859 = vmatmul.bf16.gmra.mxu2 %v11659_v4  ;;  %4984 = vmatmul.bf16.gmra.mxu3 %v4879_v51  ;;  %v11766_v51 = vld [vmem:[%s19040_s1 + $0x810] sm:$0xf] }
 0x6a4   : > { %v4452_v41 = vpop.f32.mrf.mxu0  ;;  %v4820_v38 = vpop.f32.mrf.mxu2 }
 0x6a5   : > { %v17506_v48 = vadd.f32 %v4452_v41, %v17304_v23  ;;  %v4733_v0 = vpop.f32.mrf.mxu1  ;;  %v13588_v23 = vld [vmem:[%s19040_s1 + $0x7e4] sm:$0xf0]  ;;  %v4821_v43 = vadd.f32 %v4820_v38, %v4731_v9  ;;  %v13602_v9 = vld [vmem:[%s19040_s1 + $0x814] sm:$0xf0]  ;;  %v11670_v38 = vld [vmem:[%s19040_s1 + $0x7f0] sm:$0xf] }
 0x6a6   : > { %v11663_v2 = vor.u32 %v13588_v23, %v11662_v42  ;;  %v11767_v41 = vor.u32 %v13602_v9, %v11766_v51 }
 0x6a8   : > { %5283 = vmatmul.bf16.gmra.mxu0 %v11767_v41 }
 0x6ac   : > { %v17526_v31 = vpop.f32.mrf.mxu0  ;;  %v4822_v61 = vpop.f32.mrf.mxu2 }
 0x6ad   : > { %19149 = vst [vmem:[#allocation16_spill] sm:$0xff] %v17526_v31  ;;  %v4823_v39 = vadd.f32 %v4822_v61, %v4733_v0  ;;  %v4736_v44 = vpop.f32.mrf.mxu1  ;;  %v13589_v0 = vld [vmem:[%s19040_s1 + $0x7f4] sm:$0xf] }
 0x6ae   : > { %v11675_v61 = vor.u32 %v13589_v0, %v11672_v60 }
 0x6af   : > { %v4880_v56 = vpack.c.bf16 %v4823_v39, %v4821_v43 }
 0x6b0   : > { %4775 = vmatmul.bf16.gmra.mxu1 %v11663_v2 }
 0x6b1   : > { %4864 = vmatmul.bf16.gmra.mxu2 %v11667_v62  ;;  %4989 = vmatmul.bf16.gmra.mxu3 %v4880_v56 }
 0x6b4   : > { %v4457_v57 = vpop.f32.mrf.mxu0  ;;  %v4825_v5 = vpop.f32.mrf.mxu2 }
 0x6b5   : > { %v17529_v14 = vadd.f32 %v4457_v57, %v17328_v8  ;;  %v4738_v4 = vpop.f32.mrf.mxu1  ;;  %v13590_v8 = vld [vmem:[%s19040_s1 + $0x7f4] sm:$0xf0]  ;;  %v4826_v23 = vadd.f32 %v4825_v5, %v4736_v44  ;;  %v11774_v57 = vld [vmem:[%s19040_s1 + $0x820] sm:$0xf]  ;;  %v13604_v44 = vld [vmem:[%s19040_s1 + $0x824] sm:$0xf0] }
 0x6b6   : > { %v11671_v42 = vor.u32 %v13590_v8, %v11670_v38  ;;  %v11775_v5 = vor.u32 %v13604_v44, %v11774_v57 }
 0x6b7   : > { %19150 = vst [vmem:[#allocation17_spill] sm:$0xff] %v17529_v14 }
 0x6b8   : > { %5288 = vmatmul.bf16.gmra.mxu0 %v11775_v5 }
 0x6bc   : > { %v17549_v16 = vpop.f32.mrf.mxu0  ;;  %v4827_v20 = vpop.f32.mrf.mxu2 }
 0x6bd   : > { %19151 = vst [vmem:[#allocation19_spill] sm:$0xff] %v17549_v16  ;;  %v4828_v32 = vadd.f32 %v4827_v20, %v4738_v4  ;;  %v4741_v3 = vpop.f32.mrf.mxu1  ;;  %v13599_v4 = vld [vmem:[%s19040_s1 + $0x804] sm:$0xf] }
 0x6bf   : > { %v4881_v2 = vpack.c.bf16 %v4828_v32, %v4826_v23 }
 0x6c0   : > { %4780 = vmatmul.bf16.gmra.mxu1 %v11671_v42 }
 0x6c1   : > { %4869 = vmatmul.bf16.gmra.mxu2 %v11675_v61  ;;  %4994 = vmatmul.bf16.gmra.mxu3 %v4881_v2  ;;  %v11782_v61 = vld [vmem:[%s19040_s1 + $0x830] sm:$0xf]  ;;  %v13606_v2 = vld [vmem:[%s19040_s1 + $0x834] sm:$0xf0] }
 0x6c4   : > { %v4462_v43 = vpop.f32.mrf.mxu0  ;;  %v4830_v39 = vpop.f32.mrf.mxu2 }
 0x6c5   : > { %v17552_v62 = vadd.f32 %v4462_v43, %v17363_v54  ;;  %v4743_v56 = vpop.f32.mrf.mxu1  ;;  %v11760_v54 = vld [vmem:[%s19040_s1 + $0x808] sm:$0xf0]  ;;  %v4831_v38 = vadd.f32 %v4830_v39, %v4741_v3  ;;  %v11783_v3 = vor.u32 %v13606_v2, %v11782_v61  ;;  %v13601_v43 = vld [vmem:[%s19040_s1 + $0x814] sm:$0xf] }
 0x6c6   : > { %v11763_v41 = vor.u32 %v13599_v4, %v11760_v54  ;;  %v13638_v54 = vld [vmem:[%s19041_s2 + $0x238] sm:$0xff] }
 0x6c7   : > { %19152 = vst [vmem:[#allocation21_spill] sm:$0xff] %v17552_v62  ;;  %5529 = vmatpush.bf16.msra.mxu2 %v13638_v54 }
 0x6c8   : > { %5293 = vmatmul.bf16.gmra.mxu0 %v11783_v3 }
 0x6cc   : > { %v17566_v51 = vpop.f32.mrf.mxu0  ;;  %v4832_v9 = vpop.f32.mrf.mxu2 }
 0x6cd   : > { %19153 = vst [vmem:[#allocation23_spill] sm:$0xff] %v17566_v51  ;;  %v4833_v8 = vadd.f32 %v4832_v9, %v4743_v56  ;;  %v4746_v0 = vpop.f32.mrf.mxu1 }
 0x6cf   : > { %v4882_v60 = vpack.c.bf16 %v4833_v8, %v4831_v38 }
 0x6d0   : > { %5367 = vmatmul.bf16.vlgmr.msra.gmra.mxu1 %v11763_v41 }
 0x6d1   : > { %4999 = vmatmul.bf16.gmra.mxu3 %v4882_v60  ;;  %v13608_v60 = vld [vmem:[%s19040_s1 + $0x844] sm:$0xf0] }
 0x6d4   : > { %v4467_v20 = vpop.f32.mrf.mxu0  ;;  %v4835_v42 = vpop.f32.mrf.mxu2 }
 0x6d5   : > { %v17569_v23 = vadd.f32 %v4467_v20, %v17398_v25  ;;  %v4748_v32 = vpop.f32.mrf.mxu1  ;;  %v11768_v25 = vld [vmem:[%s19040_s1 + $0x818] sm:$0xf0]  ;;  %v4836_v57 = vadd.f32 %v4835_v42, %v4746_v0  ;;  %v11790_v0 = vld [vmem:[%s19040_s1 + $0x840] sm:$0xf]  ;;  %v13603_v42 = vld [vmem:[%s19040_s1 + $0x824] sm:$0xf] }
 0x6d6   : > { %v11771_v56 = vor.u32 %v13601_v43, %v11768_v25  ;;  %v11791_v20 = vor.u32 %v13608_v60, %v11790_v0 }
 0x6d7   : > { %19154 = vst [vmem:[#allocation18_spill] sm:$0xff] %v17569_v23 }
 0x6d8   : > { %5298 = vmatmul.bf16.gmra.mxu0 %v11791_v20 }
 0x6dc   : > { %v4837_v39 = vpop.f32.mrf.mxu2 }
 0x6dd   : > { %v4838_v44 = vadd.f32 %v4837_v39, %v4748_v32  ;;  %v4751_v5 = vpop.f32.mrf.mxu1 }
 0x6df   : > { %v4883_v4 = vpack.c.bf16 %v4838_v44, %v4836_v57 }
 0x6e0   : > { %5372 = vmatmul.bf16.gmra.mxu1 %v11771_v56 }
 0x6e1   : > { %5004 = vmatmul.bf16.gmra.mxu3 %v4883_v4 }
 0x6e4   : > { %v4840_v9 = vpop.f32.mrf.mxu2  ;;  %v4965_v41 = vpop.f32.mrf.mxu3 }
 0x6e5   : > { %v17587_v38 = vadd.f32 %v4965_v41, %v17235_v12  ;;  %v4753_v8 = vpop.f32.mrf.mxu1  ;;  %v11776_v12 = vld [vmem:[%s19040_s1 + $0x828] sm:$0xf0]  ;;  %v4841_v3 = vadd.f32 %v4840_v9, %v4751_v5  ;;  %v11798_v41 = vld [vmem:[%s19040_s1 + $0x850] sm:$0xf]  ;;  %v13610_v5 = vld [vmem:[%s19040_s1 + $0x854] sm:$0xf0] }
 0x6e6   : > { %v11779_v2 = vor.u32 %v13603_v42, %v11776_v12  ;;  %v13605_v9 = vld [vmem:[%s19040_s1 + $0x834] sm:$0xf] }
 0x6ec   : > { %v4842_v32 = vpop.f32.mrf.mxu2  ;;  %v4967_v61 = vpop.f32.mrf.mxu3 }
 0x6ed   : > { %v4843_v43 = vadd.f32 %v4842_v32, %v4753_v8  ;;  %v17602_v25 = vadd.f32 %v4967_v61, %v17253_v33  ;;  %v4756_v39 = vpop.f32.mrf.mxu1  ;;  %v11799_v33 = vor.u32 %v13610_v5, %v11798_v41 }
 0x6ef   : > { %v4884_v56 = vpack.c.bf16 %v4843_v43, %v4841_v3  ;;  %5303 = vmatmul.bf16.gmra.mxu0 %v11799_v33 }
 0x6f0   : > { %5377 = vmatmul.bf16.gmra.mxu1 %v11779_v2  ;;  %v13637_v2 = vld [vmem:[%s19041_s2 + $0x230] sm:$0xff] }
 0x6f1   : > { %5009 = vmatmul.bf16.gmra.mxu3 %v4884_v56  ;;  %5530 = vmatpush.bf16.msra.mxu2 %v13637_v2 }
 0x6f4   : > { %v4845_v57 = vpop.f32.mrf.mxu2  ;;  %v4970_v44 = vpop.f32.mrf.mxu3 }
 0x6f5   : > { %v17605_v4 = vadd.f32 %v4970_v44, %v17259_v52  ;;  %v4758_v54 = vpop.f32.mrf.mxu1  ;;  %v11784_v52 = vld [vmem:[%s19040_s1 + $0x838] sm:$0xf0]  ;;  %v4846_v20 = vadd.f32 %v4845_v57, %v4756_v39  ;;  %v13612_v39 = vld [vmem:[%s19040_s1 + $0x864] sm:$0xf0] }
 0x6f6   : > { %v11787_v60 = vor.u32 %v13605_v9, %v11784_v52 }
 0x6fc   : > { %v4847_v8 = vpop.f32.mrf.mxu2  ;;  %v4972_v0 = vpop.f32.mrf.mxu3 }
 0x6fd   : > { %v4848_v42 = vadd.f32 %v4847_v8, %v4758_v54  ;;  %v17620_v12 = vadd.f32 %v4972_v0, %v17277_v6  ;;  %v4761_v32 = vpop.f32.mrf.mxu1  ;;  %v11806_v6 = vld [vmem:[%s19040_s1 + $0x860] sm:$0xf]  ;;  %v13607_v54 = vld [vmem:[%s19040_s1 + $0x844] sm:$0xf] }
 0x6fe   : > { %v11807_v57 = vor.u32 %v13612_v39, %v11806_v6 }
 0x6ff   : > { %v4885_v61 = vpack.c.bf16 %v4848_v42, %v4846_v20 }
 0x700   : > { %5382 = vmatmul.bf16.gmra.mxu1 %v11787_v60  ;;  %5308 = vmatmul.bf16.gmra.mxu0 %v11807_v57  ;;  %v17658_v57 = vpop.f32.mrf.mxu0 }
 0x701   : > { %5014 = vmatmul.bf16.gmra.mxu3 %v4885_v61  ;;  %19155 = vst [vmem:[#allocation20_spill] sm:$0xff] %v17658_v57 }
 0x704   : > { %v4850_v3 = vpop.f32.mrf.mxu2  ;;  %v4975_v43 = vpop.f32.mrf.mxu3 }
 0x705   : > { %v17626_v56 = vadd.f32 %v4975_v43, %v17283_v55  ;;  %v4763_v44 = vpop.f32.mrf.mxu1  ;;  %v11792_v55 = vld [vmem:[%s19040_s1 + $0x848] sm:$0xf0]  ;;  %v4851_v9 = vadd.f32 %v4850_v3, %v4761_v32  ;;  %v11814_v43 = vld [vmem:[%s19040_s1 + $0x870] sm:$0xf]  ;;  %v13614_v32 = vld [vmem:[%s19040_s1 + $0x874] sm:$0xf0] }
 0x706   : > { %v11795_v33 = vor.u32 %v13607_v54, %v11792_v55  ;;  %v13609_v3 = vld [vmem:[%s19040_s1 + $0x854] sm:$0xf] }
 0x70c   : > { %v4852_v41 = vpop.f32.mrf.mxu2  ;;  %v4977_v5 = vpop.f32.mrf.mxu3 }
 0x70d   : > { %v4853_v52 = vadd.f32 %v4852_v41, %v4763_v44  ;;  %v17641_v8 = vadd.f32 %v4977_v5, %v17301_v36  ;;  %v4766_v0 = vpop.f32.mrf.mxu1  ;;  %v11815_v36 = vor.u32 %v13614_v32, %v11814_v43 }
 0x70f   : > { %v4886_v60 = vpack.c.bf16 %v4853_v52, %v4851_v9  ;;  %v13636_v9 = vld [vmem:[%s19041_s2 + $0x228] sm:$0xff] }
 0x710   : > { %5387 = vmatmul.bf16.gmra.mxu1 %v11795_v33  ;;  %5313 = vmatmul.bf16.gmra.mxu0 %v11815_v36  ;;  %v11808_v36 = vld [vmem:[%s19040_s1 + $0x868] sm:$0xf0] }
 0x711   : > { %5019 = vmatmul.bf16.gmra.mxu3 %v4886_v60  ;;  %5531 = vmatpush.bf16.msra.mxu2 %v13636_v9  ;;  %v13633_v9 = vld [vmem:[%s19041_s2 + $0x210] sm:$0xff] }
 0x714   : > { %v4855_v20 = vpop.f32.mrf.mxu2  ;;  %v4980_v42 = vpop.f32.mrf.mxu3 }
 0x715   : > { %v17644_v61 = vadd.f32 %v4980_v42, %v17307_v17  ;;  %v4768_v2 = vpop.f32.mrf.mxu1  ;;  %v11800_v17 = vld [vmem:[%s19040_s1 + $0x858] sm:$0xf0]  ;;  %v4856_v54 = vadd.f32 %v4855_v20, %v4766_v0  ;;  %v17669_v0 = vpop.f32.mrf.mxu0  ;;  %v11822_v20 = vld [vmem:[%s19040_s1 + $0x880] sm:$0xf] }
 0x716   : > { %v11803_v39 = vor.u32 %v13609_v3, %v11800_v17  ;;  %v13634_v3 = vld [vmem:[%s19041_s2 + $0x218] sm:$0xff] }
 0x71c   : > { %v4857_v44 = vpop.f32.mrf.mxu2  ;;  %v4982_v6 = vpop.f32.mrf.mxu3 }
 0x71d   : > { %v4858_v55 = vadd.f32 %v4857_v44, %v4768_v2  ;;  %v17661_v41 = vadd.f32 %v4982_v6, %v17325_v35  ;;  %v4771_v5 = vpop.f32.mrf.mxu1  ;;  %v13635_v35 = vld [vmem:[%s19041_s2 + $0x220] sm:$0xff]  ;;  %v13616_v2 = vld [vmem:[%s19040_s1 + $0x884] sm:$0xf0] }
 0x71e   : > { %5532 = vmatpush.bf16.msra.mxu2 %v13635_v35  ;;  %v11823_v32 = vor.u32 %v13616_v2, %v11822_v20  ;;  %v13632_v35 = vld [vmem:[%s19041_s2 + $0x208] sm:$0xff] }
 0x71f   : > { %v4887_v33 = vpack.c.bf16 %v4858_v55, %v4856_v54 }
 0x720   : > { %5392 = vmatmul.bf16.gmra.mxu1 %v11803_v39  ;;  %5318 = vmatmul.bf16.gmra.mxu0 %v11823_v32  ;;  %v11830_v32 = vld [vmem:[%s19040_s1 + $0x890] sm:$0xf] }
 0x721   : > { %5024 = vmatmul.bf16.gmra.mxu3 %v4887_v33  ;;  %v5281_v33 = vpop.f32.mrf.mxu0 }
 0x722   : > { %5533 = vmatpush.bf16.msra.mxu2 %v13634_v3  ;;  %v13613_v3 = vld [vmem:[%s19040_s1 + $0x874] sm:$0xf] }
 0x724   : > { %v4860_v52 = vpop.f32.mrf.mxu2  ;;  %v4985_v60 = vpop.f32.mrf.mxu3 }
 0x725   : > { %v17667_v42 = vadd.f32 %v4985_v60, %v17337_v21  ;;  %v4773_v43 = vpop.f32.mrf.mxu1  ;;  %v13611_v21 = vld [vmem:[%s19040_s1 + $0x864] sm:$0xf]  ;;  %v4861_v39 = vadd.f32 %v4860_v52, %v4771_v5 }
 0x726   : > { %v11811_v6 = vor.u32 %v13611_v21, %v11808_v36  ;;  %5534 = vmatpush.bf16.msra.mxu2 %v13633_v9  ;;  %v13618_v21 = vld [vmem:[%s19040_s1 + $0x894] sm:$0xf0] }
 0x727   : > { %v11831_v36 = vor.u32 %v13618_v21, %v11830_v32 }
 0x729   : > { %v5284_v52 = vpop.f32.mrf.mxu0 }
 0x72a   : > { %5535 = vmatpush.bf16.msra.mxu2 %v13632_v35 }
 0x72c   : > { %v4862_v17 = vpop.f32.mrf.mxu2  ;;  %v17689_v44 = vpop.f32.mrf.mxu3 }
 0x72d   : > { %v4863_v54 = vadd.f32 %v4862_v17, %v4773_v43  ;;  %v4776_v55 = vpop.f32.mrf.mxu1  ;;  %v13631_v43 = vld [vmem:[%s19041_s2 + $0x200] sm:$0xff]  ;;  %v11816_v17 = vld [vmem:[%s19040_s1 + $0x878] sm:$0xf0] }
 0x72e   : > { %5536 = vmatpush.bf16.msra.mxu2 %v13631_v43 }
 0x72f   : > { %v4888_v60 = vpack.c.bf16 %v4863_v54, %v4861_v39  ;;  %v11819_v54 = vor.u32 %v13613_v3, %v11816_v17  ;;  %v13620_v3 = vld [vmem:[%s19040_s1 + $0x8a4] sm:$0xf0] }
 0x730   : > { %5397 = vmatmul.bf16.gmra.mxu1 %v11811_v6  ;;  %5323 = vmatmul.bf16.gmra.mxu0 %v11831_v36  ;;  %v11838_v36 = vld [vmem:[%s19040_s1 + $0x8a0] sm:$0xf] }
 0x731   : > { %5029 = vmatmul.bf16.gmra.mxu3 %v4888_v60  ;;  %v5286_v57 = vpop.f32.mrf.mxu0 }
 0x734   : > { %v4865_v20 = vpop.f32.mrf.mxu2  ;;  %v17697_v2 = vpop.f32.mrf.mxu3 }
 0x735   : > { %v4778_v5 = vpop.f32.mrf.mxu1  ;;  %v4866_v9 = vadd.f32 %v4865_v20, %v4776_v55  ;;  %v11839_v55 = vor.u32 %v13620_v3, %v11838_v36  ;;  %v13615_v20 = vld [vmem:[%s19040_s1 + $0x884] sm:$0xf] }
 0x739   : > { %v5289_v23 = vpop.f32.mrf.mxu0 }
 0x73c   : > { %v4867_v6 = vpop.f32.mrf.mxu2  ;;  %v17714_v39 = vpop.f32.mrf.mxu3 }
 0x73d   : > { %v4868_v60 = vadd.f32 %v4867_v6, %v4778_v5  ;;  %v4781_v35 = vpop.f32.mrf.mxu1 }
 0x73f   : > { %v4889_v46 = vpack.c.bf16 %v4868_v60, %v4866_v9 }
 0x740   : > { %5402 = vmatmul.bf16.gmra.mxu1 %v11819_v54  ;;  %5328 = vmatmul.bf16.gmra.mxu0 %v11839_v55  ;;  %v11846_v55 = vld [vmem:[%s19040_s1 + $0x8b0] sm:$0xf] }
 0x741   : > { %5034 = vmatmul.bf16.gmra.mxu3 %v4889_v46  ;;  %v11824_v46 = vld [vmem:[%s19040_s1 + $0x888] sm:$0xf0]  ;;  %v5291_v51 = vpop.f32.mrf.mxu0 }
 0x742   : > { %v11827_v6 = vor.u32 %v13615_v20, %v11824_v46 }
 0x744   : > { %v4870_v43 = vpop.f32.mrf.mxu2  ;;  %v17716_v32 = vpop.f32.mrf.mxu3 }
 0x745   : > { %v4783_v21 = vpop.f32.mrf.mxu1  ;;  %v4871_v54 = vadd.f32 %v4870_v43, %v4781_v35  ;;  %v13622_v35 = vld [vmem:[%s19040_s1 + $0x8b4] sm:$0xf0] }
 0x746   : > { %v11847_v43 = vor.u32 %v13622_v35, %v11846_v55  ;;  %v13624_v55 = vld [vmem:[%s19040_s1 + $0x8c4] sm:$0xf0] }
 0x749   : > { %v5294_v50 = vpop.f32.mrf.mxu0 }
 0x74c   : > { %v4872_v5 = vpop.f32.mrf.mxu2  ;;  %v17730_v17 = vpop.f32.mrf.mxu3 }
 0x74d   : > { %v4873_v9 = vadd.f32 %v4872_v5, %v4783_v21  ;;  %v5368_v60 = vpop.f32.mrf.mxu1 }
 0x74e   : > { %v5369_v62 = vadd.f32 %v5368_v60, %v17669_v0  ;;  %v11832_v0 = vld [vmem:[%s19040_s1 + $0x898] sm:$0xf0] }
 0x74f   : > { %v4890_v29 = vpack.c.bf16 %v4873_v9, %v4871_v54 }
 0x750   : > { %5407 = vmatmul.bf16.gmra.mxu1 %v11827_v6  ;;  %5333 = vmatmul.bf16.gmra.mxu0 %v11847_v43 }
 0x751   : > { %5039 = vmatmul.bf16.gmra.mxu3 %v4890_v29  ;;  %v13617_v29 = vld [vmem:[%s19040_s1 + $0x894] sm:$0xf]  ;;  %v5296_v5 = vpop.f32.mrf.mxu0 }
 0x752   : > { %v11835_v20 = vor.u32 %v13617_v29, %v11832_v0 }
 0x754   : > { %v17732_v36 = vpop.f32.mrf.mxu3 }
 0x755   : > { %v5370_v3 = vpop.f32.mrf.mxu1 }
 0x756   : > { %v5371_v16 = vadd.f32 %v5370_v3, %v5281_v33  ;;  %v11854_v3 = vld [vmem:[%s19040_s1 + $0x8c0] sm:$0xf] }
 0x757   : > { %v11855_v35 = vor.u32 %v13624_v55, %v11854_v3  ;;  %v11862_v3 = vld [vmem:[%s19040_s1 + $0x8d0] sm:$0xf]  ;;  %v13626_v55 = vld [vmem:[%s19040_s1 + $0x8d4] sm:$0xf0] }
 0x758   : > { %v5448_v21 = vpack.c.bf16 %v5371_v16, %v5369_v62 }
 0x759   : > { %v5299_v60 = vpop.f32.mrf.mxu0 }
 0x75a   : > { %5537 = vmatmul.bf16.vlgmr.msra.gmra.mxu2 %v5448_v21  ;;  %v13619_v21 = vld [vmem:[%s19040_s1 + $0x8a4] sm:$0xf] }
 0x75c   : > { %v17747_v33 = vpop.f32.mrf.mxu3 }
 0x75d   : > { %v5373_v46 = vpop.f32.mrf.mxu1 }
 0x75e   : > { %v5374_v62 = vadd.f32 %v5373_v46, %v5284_v52 }
 0x760   : > { %5412 = vmatmul.bf16.gmra.mxu1 %v11835_v20  ;;  %5338 = vmatmul.bf16.gmra.mxu0 %v11855_v35  ;;  %v11863_v35 = vor.u32 %v13626_v55, %v11862_v3  ;;  %v11870_v55 = vld [vmem:[%s19040_s1 + $0x8e0] sm:$0xf] }
 0x761   : > { %v5301_v0 = vpop.f32.mrf.mxu0 }
 0x764   : > { %v5005_v6 = vpop.f32.mrf.mxu3 }
 0x765   : > { %v17750_v54 = vadd.f32 %v5005_v6, %v17438_v15  ;;  %v5375_v16 = vpop.f32.mrf.mxu1  ;;  %v11840_v15 = vld [vmem:[%s19040_s1 + $0x8a8] sm:$0xf0] }
 0x766   : > { %v5376_v9 = vadd.f32 %v5375_v16, %v5286_v57  ;;  %v11843_v52 = vor.u32 %v13619_v21, %v11840_v15  ;;  %v13621_v21 = vld [vmem:[%s19040_s1 + $0x8b4] sm:$0xf] }
 0x768   : > { %v5449_v43 = vpack.c.bf16 %v5376_v9, %v5374_v62 }
 0x76a   : > { %5542 = vmatmul.bf16.gmra.mxu2 %v5449_v43 }
 0x76c   : > { %v17764_v57 = vpop.f32.mrf.mxu3  ;;  %v5304_v9 = vpop.f32.mrf.mxu0 }
 0x76d   : > { %v5378_v29 = vpop.f32.mrf.mxu1 }
 0x76e   : > { %v5379_v16 = vadd.f32 %v5378_v29, %v5289_v23 }
 0x770   : > { %5417 = vmatmul.bf16.gmra.mxu1 %v11843_v52  ;;  %5343 = vmatmul.bf16.gmra.mxu0 %v11863_v35  ;;  %v13628_v35 = vld [vmem:[%s19040_s1 + $0x8e4] sm:$0xf0] }
 0x774   : > { %v5010_v20 = vpop.f32.mrf.mxu3  ;;  %v5306_v52 = vpop.f32.mrf.mxu0 }
 0x775   : > { %v17767_v46 = vadd.f32 %v5010_v20, %v17455_v59  ;;  %v5380_v6 = vpop.f32.mrf.mxu1  ;;  %v11848_v59 = vld [vmem:[%s19040_s1 + $0x8b8] sm:$0xf0] }
 0x776   : > { %v5381_v62 = vadd.f32 %v5380_v6, %v5291_v51  ;;  %v11851_v23 = vor.u32 %v13621_v21, %v11848_v59  ;;  %v13623_v59 = vld [vmem:[%s19040_s1 + $0x8c4] sm:$0xf] }
 0x778   : > { %v5450_v43 = vpack.c.bf16 %v5381_v62, %v5379_v16 }
 0x77a   : > { %5547 = vmatmul.bf16.gmra.mxu2 %v5450_v43  ;;  %v11871_v43 = vor.u32 %v13628_v35, %v11870_v55  ;;  %v11878_v35 = vld [vmem:[%s19040_s1 + $0x8f0] sm:$0xf] }
 0x77c   : > { %v17781_v51 = vpop.f32.mrf.mxu3 }
 0x77d   : > { %v5383_v15 = vpop.f32.mrf.mxu1  ;;  %v5309_v3 = vpop.f32.mrf.mxu0 }
 0x77e   : > { %v5384_v16 = vadd.f32 %v5383_v15, %v5294_v50  ;;  %v11856_v50 = vld [vmem:[%s19040_s1 + $0x8c8] sm:$0xf0] }
 0x780   : > { %5422 = vmatmul.bf16.gmra.mxu1 %v11851_v23  ;;  %5348 = vmatmul.bf16.gmra.mxu0 %v11871_v43  ;;  %v13630_v43 = vld [vmem:[%s19040_s1 + $0x8f4] sm:$0xf0] }
 0x784   : > { %v5015_v29 = vpop.f32.mrf.mxu3 }
 0x785   : > { %v17784_v20 = vadd.f32 %v5015_v29, %v17472_v1  ;;  %v5385_v6 = vpop.f32.mrf.mxu1  ;;  %v5311_v15 = vpop.f32.mrf.mxu0 }
 0x786   : > { %v5386_v62 = vadd.f32 %v5385_v6, %v5296_v5  ;;  %v11859_v5 = vor.u32 %v13623_v59, %v11856_v50  ;;  %v13625_v50 = vld [vmem:[%s19040_s1 + $0x8d4] sm:$0xf] }
 0x788   : > { %v5451_v21 = vpack.c.bf16 %v5386_v62, %v5384_v16 }
 0x78a   : > { %5552 = vmatmul.bf16.gmra.mxu2 %v5451_v21  ;;  %v11879_v21 = vor.u32 %v13630_v43, %v11878_v35 }
 0x78c   : > { %v17798_v1 = vpop.f32.mrf.mxu3 }
 0x78d   : > { %v5388_v23 = vpop.f32.mrf.mxu1 }
 0x78e   : > { %v5389_v62 = vadd.f32 %v5388_v23, %v5299_v60  ;;  %v5314_v60 = vpop.f32.mrf.mxu0 }
 0x790   : > { %5427 = vmatmul.bf16.gmra.mxu1 %v11859_v5  ;;  %5353 = vmatmul.bf16.gmra.mxu0 %v11879_v21  ;;  %v13627_v21 = vld [vmem:[%s19040_s1 + $0x8e4] sm:$0xf] }
 0x794   : > { %v5020_v29 = vpop.f32.mrf.mxu3 }
 0x795   : > { %v17801_v6 = vadd.f32 %v5020_v29, %v17489_v13  ;;  %v5390_v16 = vpop.f32.mrf.mxu1  ;;  %v11864_v13 = vld [vmem:[%s19040_s1 + $0x8d8] sm:$0xf0] }
 0x796   : > { %v5391_v55 = vadd.f32 %v5390_v16, %v5301_v0  ;;  %v11867_v5 = vor.u32 %v13625_v50, %v11864_v13  ;;  %v5316_v16 = vpop.f32.mrf.mxu0 }
 0x798   : > { %v5452_v59 = vpack.c.bf16 %v5391_v55, %v5389_v62 }
 0x79a   : > { %5557 = vmatmul.bf16.gmra.mxu2 %v5452_v59  ;;  %v11872_v59 = vld [vmem:[%s19040_s1 + $0x8e8] sm:$0xf0] }
 0x79b   : > { %v11875_v50 = vor.u32 %v13627_v21, %v11872_v59 }
 0x79c   : > { %v17815_v0 = vpop.f32.mrf.mxu3 }
 0x79d   : > { %19156 = vst [vmem:[#allocation22_spill] sm:$0xff] %v17815_v0  ;;  %v5393_v23 = vpop.f32.mrf.mxu1 }
 0x79e   : > { %v5394_v35 = vadd.f32 %v5393_v23, %v5304_v9  ;;  %v11880_v23 = vld [vmem:[%s19040_s1 + $0x8f8] sm:$0xf0] }
 0x7a0   : > { %5432 = vmatmul.bf16.gmra.mxu1 %v11867_v5  ;;  %v5319_v5 = vpop.f32.mrf.mxu0 }
 0x7a4   : > { %v5025_v29 = vpop.f32.mrf.mxu3 }
 0x7a5   : > { %v17818_v62 = vadd.f32 %v5025_v29, %v17506_v48  ;;  %v5395_v55 = vpop.f32.mrf.mxu1 }
 0x7a6   : > { %v5396_v43 = vadd.f32 %v5395_v55, %v5306_v52  ;;  %v13629_v52 = vld [vmem:[%s19040_s1 + $0x8f4] sm:$0xf] }
 0x7a7   : > { %19157 = vst [vmem:[#allocation24_spill] sm:$0xff] %v17818_v62  ;;  %v11883_v55 = vor.u32 %v13629_v52, %v11880_v23  ;;  %v17836_v52 = vld [vmem:[%s19042_s3] ss:$0 sm:$0xff] }
 0x7a8   : > { %v5453_v14 = vpack.c.bf16 %v5396_v43, %v5394_v35  ;;  %v5321_v9 = vpop.f32.mrf.mxu0 }
 0x7aa   : > { %5562 = vmatmul.bf16.gmra.mxu2 %v5453_v14 }
 0x7ad   : > { %v5398_v13 = vpop.f32.mrf.mxu1 }
 0x7ae   : > { %v5399_v48 = vadd.f32 %v5398_v13, %v5309_v3 }
 0x7b0   : > { %5437 = vmatmul.bf16.gmra.mxu1 %v11875_v50  ;;  %v5324_v35 = vpop.f32.mrf.mxu0 }
 0x7b5   : > { %v5400_v31 = vpop.f32.mrf.mxu1 }
 0x7b6   : > { %v5401_v29 = vadd.f32 %v5400_v31, %v5311_v15 }
 0x7b8   : > { %v5454_v11 = vpack.c.bf16 %v5401_v29, %v5399_v48  ;;  %v5326_v31 = vpop.f32.mrf.mxu0 }
 0x7ba   : > { %5567 = vmatmul.bf16.gmra.mxu2 %v5454_v11 }
 0x7bd   : > { %v5403_v14 = vpop.f32.mrf.mxu1 }
 0x7be   : > { %v5404_v21 = vadd.f32 %v5403_v14, %v5314_v60 }
 0x7c0   : > { %5442 = vmatmul.bf16.gmra.mxu1 %v11883_v55  ;;  %v5329_v29 = vpop.f32.mrf.mxu0 }
 0x7c5   : > { %v5405_v43 = vpop.f32.mrf.mxu1 }
 0x7c6   : > { %v5406_v59 = vadd.f32 %v5405_v43, %v5316_v16 }
 0x7c8   : > { %v5455_v3 = vpack.c.bf16 %v5406_v59, %v5404_v21  ;;  %v5331_v60 = vpop.f32.mrf.mxu0 }
 0x7ca   : > { %5572 = vmatmul.bf16.gmra.mxu2 %v5455_v3 }
 0x7cd   : > { %v5408_v15 = vpop.f32.mrf.mxu1 }
 0x7ce   : > { %v5409_v13 = vadd.f32 %v5408_v15, %v5319_v5 }
 0x7d5   : > { %v5410_v50 = vpop.f32.mrf.mxu1 }
 0x7d6   : > { %v5411_v48 = vadd.f32 %v5410_v50, %v5321_v9 }
 0x7d8   : > { %v5456_v62 = vpack.c.bf16 %v5411_v48, %v5409_v13 }
 0x7da   : > { %5577 = vmatmul.bf16.gmra.mxu2 %v5456_v62 }
 0x7dd   : > { %v5413_v0 = vpop.f32.mrf.mxu1  ;;  %v5538_v58 = vpop.f32.mrf.mxu2 }
 0x7de   : > { %v5618_v11 = vadd.f32 %v5538_v58, %v17587_v38  ;;  %v5414_v14 = vadd.f32 %v5413_v0, %v5324_v35  ;;  %v5334_v38 = vpop.f32.mrf.mxu0 }
 0x7e0   : > { %v5654_v16 = vadd.f32 %v17836_v52, %v5618_v11 }
 0x7e2   : > { %v5718_v43 = vmul.f32 0.2, %v5654_v16  ;;  %vm5686_vm1 = vcmp.ge.f32.partialorder %v5654_v16, 0.0 }
 0x7e4   : > { %v5750_v59 = vsel %vm5686_vm1, %v5654_v16, %v5718_v43 }
 0x7e5   : > { %v5415_v23 = vpop.f32.mrf.mxu1  ;;  %v5540_v55 = vpop.f32.mrf.mxu2 }
 0x7e6   : > { %v5416_v5 = vadd.f32 %v5415_v23, %v5326_v31  ;;  %v5619_v9 = vadd.f32 %v5540_v55, %v17602_v25  ;;  %v5336_v25 = vpop.f32.mrf.mxu0 }
 0x7e8   : > { %v5457_v62 = vpack.c.bf16 %v5416_v5, %v5414_v14  ;;  %v5655_v21 = vadd.f32 %v17836_v52, %v5619_v9 }
 0x7ea   : > { %vm5687_vm2 = vcmp.ge.f32.partialorder %v5655_v21, 0.0  ;;  %v5719_v58 = vmul.f32 0.2, %v5655_v21  ;;  %5582 = vmatmul.bf16.gmra.mxu2 %v5457_v62 }
 0x7ec   : > { %v5751_v3 = vsel %vm5687_vm2, %v5655_v21, %v5719_v58 }
 0x7ed   : > { %v17841_v15 = vpack.c.bf16 %v5751_v3, %v5750_v59  ;;  %v5418_v50 = vpop.f32.mrf.mxu1  ;;  %v5543_v13 = vpop.f32.mrf.mxu2 }
 0x7ee   : > { %v5620_v0 = vadd.f32 %v5543_v13, %v17605_v4  ;;  %v5419_v11 = vadd.f32 %v5418_v50, %v5329_v29  ;;  %v5339_v29 = vpop.f32.mrf.mxu0 }
 0x7f0   : > { %v5656_v35 = vadd.f32 %v17836_v52, %v5620_v0 }
 0x7f2   : > { %v5720_v14 = vmul.f32 0.2, %v5656_v35  ;;  %vm5688_vm3 = vcmp.ge.f32.partialorder %v5656_v35, 0.0 }
 0x7f4   : > { %v5752_v43 = vsel %vm5688_vm3, %v5656_v35, %v5720_v14 }
 0x7f5   : > { %v5420_v31 = vpop.f32.mrf.mxu1  ;;  %v5545_v48 = vpop.f32.mrf.mxu2 }
 0x7f6   : > { %v5421_v23 = vadd.f32 %v5420_v31, %v5331_v60  ;;  %v5621_v55 = vadd.f32 %v5545_v48, %v17620_v12 }
 0x7f8   : > { %v5458_v5 = vpack.c.bf16 %v5421_v23, %v5419_v11  ;;  %v5657_v16 = vadd.f32 %v17836_v52, %v5621_v55  ;;  %v5341_v11 = vpop.f32.mrf.mxu0 }
 0x7fa   : > { %vm5689_vm4 = vcmp.ge.f32.partialorder %v5657_v16, 0.0  ;;  %v5721_v9 = vmul.f32 0.2, %v5657_v16  ;;  %5587 = vmatmul.bf16.gmra.mxu2 %v5458_v5 }
 0x7fc   : > { %v5753_v62 = vsel %vm5689_vm4, %v5657_v16, %v5721_v9 }
 0x7fd   : > { %v17847_v4 = vpack.c.bf16 %v5753_v62, %v5752_v43  ;;  %v5423_v21 = vpop.f32.mrf.mxu1  ;;  %v5548_v58 = vpop.f32.mrf.mxu2 }
 0x7fe   : > { %v5622_v59 = vadd.f32 %v5548_v58, %v17626_v56  ;;  %v5424_v50 = vadd.f32 %v5423_v21, %v5334_v38 }
 0x800   : > { %v5658_v60 = vadd.f32 %v17836_v52, %v5622_v59 }
 0x802   : > { %v5722_v31 = vmul.f32 0.2, %v5658_v60  ;;  %vm5690_vm5 = vcmp.ge.f32.partialorder %v5658_v60, 0.0 }
 0x804   : > { %v5754_v55 = vsel %vm5690_vm5, %v5658_v60, %v5722_v31 }
 0x805   : > { %v5425_v12 = vpop.f32.mrf.mxu1  ;;  %v5550_v3 = vpop.f32.mrf.mxu2 }
 0x806   : > { %v5426_v13 = vadd.f32 %v5425_v12, %v5336_v25  ;;  %v5623_v0 = vadd.f32 %v5550_v3, %v17641_v8  ;;  %v5344_v25 = vpop.f32.mrf.mxu0 }
 0x808   : > { %v5459_v48 = vpack.c.bf16 %v5426_v13, %v5424_v50  ;;  %v5659_v35 = vadd.f32 %v17836_v52, %v5623_v0 }
 0x80a   : > { %vm5691_vm6 = vcmp.ge.f32.partialorder %v5659_v35, 0.0  ;;  %v5723_v23 = vmul.f32 0.2, %v5659_v35  ;;  %5592 = vmatmul.bf16.gmra.mxu2 %v5459_v48 }
 0x80c   : > { %v5755_v56 = vsel %vm5691_vm6, %v5659_v35, %v5723_v23  ;;  %v13654_v35 = vld [vmem:[#allocation3 + $0x38] sm:$0xff] }
 0x80d   : > { %v17853_v14 = vpack.c.bf16 %v5755_v56, %v5754_v55  ;;  %v5428_v5 = vpop.f32.mrf.mxu1  ;;  %v5553_v16 = vpop.f32.mrf.mxu2  ;;  %6177 = vmatpush.bf16.msrb.mxu1 %v13654_v35 }
 0x80e   : > { %v5624_v38 = vadd.f32 %v5553_v16, %v17644_v61  ;;  %v5429_v62 = vadd.f32 %v5428_v5, %v5339_v29  ;;  %v5346_v61 = vpop.f32.mrf.mxu0  ;;  %v13653_v5 = vld [vmem:[#allocation3 + $0x30] sm:$0xff] }
 0x810   : > { %v5660_v8 = vadd.f32 %v17836_v52, %v5624_v38 }
 0x811   : > { %6178 = vmatpush.bf16.msrb.mxu1 %v13653_v5  ;;  %v13648_v5 = vld [vmem:[#allocation3 + $0x8] sm:$0xff] }
 0x812   : > { %v5724_v59 = vmul.f32 0.2, %v5660_v8  ;;  %vm5692_vm7 = vcmp.ge.f32.partialorder %v5660_v8, 0.0 }
 0x814   : > { %v5756_v50 = vsel %vm5692_vm7, %v5660_v8, %v5724_v59 }
 0x815   : > { %v5430_v9 = vpop.f32.mrf.mxu1  ;;  %v5555_v43 = vpop.f32.mrf.mxu2 }
 0x816   : > { %v5431_v21 = vadd.f32 %v5430_v9, %v5341_v11  ;;  %v5625_v58 = vadd.f32 %v5555_v43, %v17661_v41  ;;  %v4481_v41 = vadd.f32 %v17357_v37, %v17139_v49  ;;  %v5349_v9 = vpop.f32.mrf.mxu0 }
 0x818   : > { %v5460_v12 = vpack.c.bf16 %v5431_v21, %v5429_v62  ;;  %v5661_v60 = vadd.f32 %v17836_v52, %v5625_v58  ;;  %v5054_v11 = vadd.f32 %v17689_v44, %v4481_v41  ;;  %v13652_v21 = vld [vmem:[#allocation3 + $0x28] sm:$0xff]  ;;  %v13649_v41 = vld [vmem:[#allocation3 + $0x10] sm:$0xff] }
 0x819   : > { %6179 = vmatpush.bf16.msrb.mxu1 %v13652_v21  ;;  %v4485_v21 = vadd.f32 %v17418_v10, %v17179_v47 }
 0x81a   : > { %vm5693_vm8 = vcmp.ge.f32.partialorder %v5661_v60, 0.0  ;;  %v5725_v3 = vmul.f32 0.2, %v5661_v60  ;;  %5597 = vmatmul.bf16.gmra.mxu2 %v5460_v12  ;;  %v13651_v12 = vld [vmem:[#allocation3 + $0x20] sm:$0xff] }
 0x81c   : > { %v5757_v13 = vsel %vm5693_vm8, %v5661_v60, %v5725_v3  ;;  %v5055_v60 = vadd.f32 %v17697_v2, %v17372_v45 }
 0x81d   : > { %v17859_v0 = vpack.c.bf16 %v5757_v13, %v5756_v50  ;;  %v5433_v31 = vpop.f32.mrf.mxu1  ;;  %v5558_v48 = vpop.f32.mrf.mxu2  ;;  %6180 = vmatpush.bf16.msrb.mxu1 %v13651_v12  ;;  %v13650_v13 = vld [vmem:[#allocation3 + $0x18] sm:$0xff] }
 0x81e   : > { %v5626_v29 = vadd.f32 %v5558_v48, %v17667_v42  ;;  %v5434_v16 = vadd.f32 %v5433_v31, %v5344_v25  ;;  %v5351_v50 = vpop.f32.mrf.mxu0 }
 0x820   : > { %v5662_v23 = vadd.f32 %v17836_v52, %v5626_v29 }
 0x821   : > { %6181 = vmatpush.bf16.msrb.mxu1 %v13650_v13 }
 0x822   : > { %v5726_v43 = vmul.f32 0.2, %v5662_v23  ;;  %vm5694_vm9 = vcmp.ge.f32.partialorder %v5662_v23, 0.0 }
 0x824   : > { %v5758_v37 = vsel %vm5694_vm9, %v5662_v23, %v5726_v43  ;;  %v13647_v43 = vld [vmem:[#allocation3] sm:$0xff] }
 0x825   : > { %v5435_v55 = vpop.f32.mrf.mxu1  ;;  %v5560_v56 = vpop.f32.mrf.mxu2  ;;  %6182 = vmatpush.bf16.msrb.mxu1 %v13649_v41 }
 0x826   : > { %v5436_v38 = vadd.f32 %v5435_v55, %v5346_v61  ;;  %v5627_v8 = vadd.f32 %v5560_v56, %v5054_v11  ;;  %v4483_v61 = vadd.f32 %v17392_v22, %v17159_v53  ;;  %v5354_v22 = vpop.f32.mrf.mxu0 }
 0x828   : > { %v5461_v62 = vpack.c.bf16 %v5436_v38, %v5434_v16  ;;  %v5663_v42 = vadd.f32 %v17836_v52, %v5627_v8  ;;  %v5056_v31 = vadd.f32 %v17714_v39, %v4483_v61 }
 0x829   : > { %6183 = vmatpush.bf16.msrb.mxu1 %v13648_v5 }
 0x82a   : > { %vm5695_vm10 = vcmp.ge.f32.partialorder %v5663_v42, 0.0  ;;  %v5727_v49 = vmul.f32 0.2, %v5663_v42  ;;  %5602 = vmatmul.bf16.gmra.mxu2 %v5461_v62  ;;  %v5057_v62 = vadd.f32 %v17716_v32, %v17401_v30 }
 0x82c   : > { %v5759_v44 = vsel %vm5695_vm10, %v5663_v42, %v5727_v49  ;;  %v5058_v49 = vadd.f32 %v17730_v17, %v4485_v21 }
 0x82d   : > { %v17867_v58 = vpack.c.bf16 %v5759_v44, %v5758_v37  ;;  %v5438_v59 = vpop.f32.mrf.mxu1  ;;  %v5563_v25 = vpop.f32.mrf.mxu2  ;;  %6184 = vmatpush.bf16.msrb.mxu1 %v13647_v43 }
 0x82e   : > { %v5628_v3 = vadd.f32 %v5563_v25, %v5055_v60  ;;  %v5439_v11 = vadd.f32 %v5438_v59, %v5349_v9  ;;  %v5356_v44 = vpop.f32.mrf.mxu0 }
 0x830   : > { %v5664_v48 = vadd.f32 %v17836_v52, %v5628_v3 }
 0x832   : > { %v5728_v45 = vmul.f32 0.2, %v5664_v48  ;;  %vm5696_vm11 = vcmp.ge.f32.partialorder %v5664_v48, 0.0 }
 0x834   : > { %v5760_v39 = vsel %vm5696_vm11, %v5664_v48, %v5728_v45 }
 0x835   : > { %v5440_v29 = vpop.f32.mrf.mxu1  ;;  %v5565_v35 = vpop.f32.mrf.mxu2 }
 0x836   : > { %v5441_v23 = vadd.f32 %v5440_v29, %v5351_v50  ;;  %v5629_v55 = vadd.f32 %v5565_v35, %v5056_v31  ;;  %v5059_v31 = vadd.f32 %v17732_v36, %v17421_v27  ;;  %v4487_v29 = vadd.f32 %v17435_v18, %v17199_v26 }
 0x837   : > { %v4489_v26 = vadd.f32 %v17452_v28, %v17217_v40 }
 0x838   : > { %v5462_v2 = vpack.c.bf16 %v5441_v23, %v5439_v11  ;;  %v5665_v56 = vadd.f32 %v17836_v52, %v5629_v55  ;;  %v5060_v35 = vadd.f32 %v17747_v33, %v4487_v29 }
 0x839   : > { %v5062_v18 = vadd.f32 %v17764_v57, %v4489_v26 }
 0x83a   : > { %vm5697_vm12 = vcmp.ge.f32.partialorder %v5665_v56, 0.0  ;;  %v5729_v53 = vmul.f32 0.2, %v5665_v56  ;;  %5607 = vmatmul.bf16.gmra.mxu2 %v5462_v2 }
 0x83c   : > { %v5761_v16 = vsel %vm5697_vm12, %v5665_v56, %v5729_v53 }
 0x83d   : > { %v17876_v38 = vpack.c.bf16 %v5761_v16, %v5760_v39  ;;  %v5443_v8 = vpop.f32.mrf.mxu1  ;;  %v5568_v9 = vpop.f32.mrf.mxu2 }
 0x83e   : > { %v5630_v42 = vadd.f32 %v5568_v9, %v5057_v62  ;;  %v5444_v12 = vadd.f32 %v5443_v8, %v5354_v22  ;;  %v4491_v62 = vadd.f32 %v17469_v24, %v17238_v7 }
 0x840   : > { %v5666_v37 = vadd.f32 %v17836_v52, %v5630_v42  ;;  %v5064_v42 = vadd.f32 %v17781_v51, %v4491_v62 }
 0x842   : > { %v5730_v50 = vmul.f32 0.2, %v5666_v37  ;;  %vm5698_vm13 = vcmp.ge.f32.partialorder %v5666_v37, 0.0 }
 0x844   : > { %v5762_v32 = vsel %vm5698_vm13, %v5666_v37, %v5730_v50 }
 0x845   : > { %v5445_v59 = vpop.f32.mrf.mxu1  ;;  %v5570_v25 = vpop.f32.mrf.mxu2 }
 0x846   : > { %v5446_v60 = vadd.f32 %v5445_v59, %v5356_v44  ;;  %v5631_v3 = vadd.f32 %v5570_v25, %v5058_v49 }
 0x848   : > { %v5463_v13 = vpack.c.bf16 %v5446_v60, %v5444_v12  ;;  %v5667_v61 = vadd.f32 %v17836_v52, %v5631_v3  ;;  %v4493_v60 = vadd.f32 %v17486_v63, %v17262_v34  ;;  %v19158_v34 = vld [vmem:[#allocation35_spill] sm:$0xff] }
 0x849   : > { %v4495_v63 = vadd.f32 %v19158_v34, %v17286_v19 }
 0x84a   : > { %vm5699_vm14 = vcmp.ge.f32.partialorder %v5667_v61, 0.0  ;;  %v5731_v30 = vmul.f32 0.2, %v5667_v61  ;;  %5612 = vmatmul.bf16.gmra.mxu2 %v5463_v13  ;;  %v5066_v3 = vadd.f32 %v17798_v1, %v4493_v60  ;;  %v19159_v1 = vld [vmem:[#allocation22_spill] sm:$0xff] }
 0x84c   : > { %v5763_v47 = vsel %vm5699_vm14, %v5667_v61, %v5731_v30 }
 0x84d   : > { %v17885_v10 = vpack.c.bf16 %v5763_v47, %v5762_v32  ;;  %v5573_v17 = vpop.f32.mrf.mxu2 }
 0x84e   : > { %v5632_v48 = vadd.f32 %v5573_v17, %v5059_v31 }
 0x850   : > { %v5668_v41 = vadd.f32 %v17836_v52, %v5632_v48 }
 0x852   : > { %v5732_v55 = vmul.f32 0.2, %v5668_v41  ;;  %vm5700_vm15 = vcmp.ge.f32.partialorder %v5668_v41, 0.0 }
 0x854   : > { %v5764_v56 = vsel %vm5700_vm15, %v5668_v41, %v5732_v55  ;;  %v5027_v55 = vpop.f32.mrf.mxu3 }
 0x855   : > { %v5575_v11 = vpop.f32.mrf.mxu2 }
 0x856   : > { %v5633_v23 = vadd.f32 %v5575_v11, %v5060_v35  ;;  %v5068_v35 = vadd.f32 %v19159_v1, %v4495_v63  ;;  %v11934_v11 = vld [vmem:[%s19043_s4] sm:$0xf]  ;;  %v13672_v1 = vld [vmem:[%s19043_s4 + $0x84] sm:$0xf0] }
 0x857   : > { %v12078_v63 = vld [vmem:[%s19043_s4 + $0x80] sm:$0xf] }
 0x858   : > { %v5669_v45 = vadd.f32 %v17836_v52, %v5633_v23  ;;  %v13640_v23 = vld [vmem:[%s19043_s4 + $0x4] sm:$0xf0] }
 0x85a   : > { %vm5701_vm0 = vcmp.ge.f32.partialorder %v5669_v45, 0.0  ;;  %v5733_v2 = vmul.f32 0.2, %v5669_v45 }
 0x85c   : > { %v5765_v5 = vsel %vm5701_vm0, %v5669_v45, %v5733_v2  ;;  %v11935_v2 = vor.u32 %v13640_v23, %v11934_v11  ;;  %v12079_v11 = vor.u32 %v13672_v1, %v12078_v63 }
 0x85d   : > { %v17894_v53 = vpack.c.bf16 %v5765_v5, %v5764_v56  ;;  %v5578_v27 = vpop.f32.mrf.mxu2 }
 0x85e   : > { %v5634_v36 = vadd.f32 %v5578_v27, %v17750_v54 }
 0x85f   : > { %5846 = vmatpush.bf16.msra.mxu3 %v17894_v53  ;;  %6255 = vmatpush.bf16.msrb.mxu2 %v17894_v53 }
 0x860   : > { %6468 = vmatpush.bf16.msra.mxu1 %v17894_v53  ;;  %v5670_v33 = vadd.f32 %v17836_v52, %v5634_v36 }
 0x862   : > { %v5734_v39 = vmul.f32 0.2, %v5670_v33  ;;  %vm5702_vm1 = vcmp.ge.f32.partialorder %v5670_v33, 0.0 }
 0x863   : > { %5847 = vmatpush.bf16.msra.mxu3 %v17885_v10  ;;  %6256 = vmatpush.bf16.msrb.mxu2 %v17885_v10 }
 0x864   : > { %6469 = vmatpush.bf16.msra.mxu1 %v17885_v10  ;;  %v5766_v28 = vsel %vm5702_vm1, %v5670_v33, %v5734_v39  ;;  %v19160_v33 = vld [vmem:[#allocation24_spill] sm:$0xff]  ;;  %v19161_v39 = vld [vmem:[#allocation31_spill] sm:$0xff] }
 0x865   : > { %v5580_v54 = vpop.f32.mrf.mxu2 }
 0x866   : > { %v5635_v22 = vadd.f32 %v5580_v54, %v5062_v18 }
 0x867   : > { %5848 = vmatpush.bf16.msra.mxu3 %v17876_v38  ;;  %6257 = vmatpush.bf16.msrb.mxu2 %v17876_v38 }
 0x868   : > { %v5671_v16 = vadd.f32 %v17836_v52, %v5635_v22  ;;  %6470 = vmatpush.bf16.msra.mxu1 %v17876_v38  ;;  %v5030_v22 = vpop.f32.mrf.mxu3 }
 0x86a   : > { %vm5703_vm2 = vcmp.ge.f32.partialorder %v5671_v16, 0.0  ;;  %v5735_v40 = vmul.f32 0.2, %v5671_v16 }
 0x86b   : > { %5849 = vmatpush.bf16.msra.mxu3 %v17867_v58  ;;  %6258 = vmatpush.bf16.msrb.mxu2 %v17867_v58 }
 0x86c   : > { %v5767_v57 = vsel %vm5703_vm2, %v5671_v16, %v5735_v40  ;;  %6471 = vmatpush.bf16.msra.mxu1 %v17867_v58  ;;  %v19162_v16 = vld [vmem:[#allocation16_spill] sm:$0xff] }
 0x86d   : > { %v17914_v8 = vpack.c.bf16 %v5767_v57, %v5766_v28  ;;  %v5583_v9 = vpop.f32.mrf.mxu2  ;;  %v4497_v40 = vadd.f32 %v19162_v16, %v19161_v39  ;;  %v11958_v39 = vld [vmem:[%s19043_s4 + $0x30] sm:$0xf]  ;;  %v13646_v16 = vld [vmem:[%s19043_s4 + $0x34] sm:$0xf0] }
 0x86e   : > { %v5636_v43 = vadd.f32 %v5583_v9, %v17767_v46  ;;  %v11942_v9 = vld [vmem:[%s19043_s4 + $0x10] sm:$0xf] }
 0x86f   : > { %5850 = vmatpush.bf16.msra.mxu3 %v17859_v0  ;;  %6259 = vmatpush.bf16.msrb.mxu2 %v17859_v0  ;;  %v5070_v28 = vadd.f32 %v5027_v55, %v4497_v40 }
 0x870   : > { %6472 = vmatpush.bf16.msra.mxu1 %v17859_v0  ;;  %v5672_v21 = vadd.f32 %v17836_v52, %v5636_v43  ;;  %v13642_v43 = vld [vmem:[%s19043_s4 + $0x14] sm:$0xf0] }
 0x872   : > { %v5736_v37 = vmul.f32 0.2, %v5672_v21  ;;  %vm5704_vm3 = vcmp.ge.f32.partialorder %v5672_v21, 0.0 }
 0x873   : > { %5851 = vmatpush.bf16.msra.mxu3 %v17853_v14  ;;  %6260 = vmatpush.bf16.msrb.mxu2 %v17853_v14 }
 0x874   : > { %6473 = vmatpush.bf16.msra.mxu1 %v17853_v14  ;;  %v5768_v24 = vsel %vm5704_vm3, %v5672_v21, %v5736_v37  ;;  %v5032_v37 = vpop.f32.mrf.mxu3 }
 0x875   : > { %v5585_v46 = vpop.f32.mrf.mxu2 }
 0x876   : > { %v5637_v49 = vadd.f32 %v5585_v46, %v5064_v42  ;;  %v11943_v42 = vor.u32 %v13642_v43, %v11942_v9  ;;  %v12086_v43 = vld [vmem:[%s19043_s4 + $0x90] sm:$0xf] }
 0x877   : > { %5852 = vmatpush.bf16.msra.mxu3 %v17847_v4  ;;  %6261 = vmatpush.bf16.msrb.mxu2 %v17847_v4 }
 0x878   : > { %v5673_v44 = vadd.f32 %v17836_v52, %v5637_v49  ;;  %6474 = vmatpush.bf16.msra.mxu1 %v17847_v4 }
 0x87a   : > { %vm5705_vm4 = vcmp.ge.f32.partialorder %v5673_v44, 0.0  ;;  %v5737_v7 = vmul.f32 0.2, %v5673_v44 }
 0x87b   : > { %5853 = vmatpush.bf16.msra.mxu3 %v17841_v15  ;;  %6262 = vmatpush.bf16.msrb.mxu2 %v17841_v15 }
 0x87c   : > { %v5769_v51 = vsel %vm5705_vm4, %v5673_v44, %v5737_v7  ;;  %6475 = vmatpush.bf16.msra.mxu1 %v17841_v15 }
 0x87d   : > { %v17934_v59 = vpack.c.bf16 %v5769_v51, %v5768_v24  ;;  %v5588_v25 = vpop.f32.mrf.mxu2 }
 0x87e   : > { %v5638_v12 = vadd.f32 %v5588_v25, %v17784_v20  ;;  %5854 = vmatmul.bf16.vlgmr.msra.gmra.mxu3 %v11935_v2  ;;  %6263 = vmatmul.bf16.vlgmr.msrb.gmra.mxu2 %v12079_v11 }
 0x880   : > { %v5674_v50 = vadd.f32 %v17836_v52, %v5638_v12  ;;  %v19163_v12 = vld [vmem:[#allocation17_spill] sm:$0xff] }
 0x881   : > { %v5071_v60 = vadd.f32 %v5030_v22, %v19163_v12 }
 0x882   : > { %v5738_v30 = vmul.f32 0.2, %v5674_v50  ;;  %vm5706_vm5 = vcmp.ge.f32.partialorder %v5674_v50, 0.0 }
 0x884   : > { %v5770_v17 = vsel %vm5706_vm5, %v5674_v50, %v5738_v30  ;;  %v19164_v50 = vld [vmem:[#allocation32_spill] sm:$0xff]  ;;  %v5035_v30 = vpop.f32.mrf.mxu3 }
 0x885   : > { %v5590_v13 = vpop.f32.mrf.mxu2 }
 0x886   : > { %v5639_v61 = vadd.f32 %v5590_v13, %v5066_v3  ;;  %v19165_v13 = vld [vmem:[#allocation19_spill] sm:$0xff] }
 0x888   : > { %v5675_v32 = vadd.f32 %v17836_v52, %v5639_v61  ;;  %v4499_v61 = vadd.f32 %v19165_v13, %v19164_v50  ;;  %v19170_v50 = vld [vmem:[#allocation34_spill] sm:$0xff]  ;;  %v19171_v13 = vld [vmem:[#allocation20_spill] sm:$0xff] }
 0x88a   : > { %vm5707_vm6 = vcmp.ge.f32.partialorder %v5675_v32, 0.0  ;;  %v5739_v47 = vmul.f32 0.2, %v5675_v32 }
 0x88c   : > { %v5771_v31 = vsel %vm5707_vm6, %v5675_v32, %v5739_v47  ;;  %v5072_v32 = vadd.f32 %v5032_v37, %v4499_v61  ;;  %v5037_v2 = vpop.f32.mrf.mxu3  ;;  %v4503_v61 = vadd.f32 %v19171_v13, %v19170_v50 }
 0x88d   : > { %v17942_v48 = vpack.c.bf16 %v5771_v31, %v5770_v17  ;;  %v5593_v20 = vpop.f32.mrf.mxu2  ;;  %v11950_v17 = vld [vmem:[%s19043_s4 + $0x20] sm:$0xf]  ;;  %v13644_v31 = vld [vmem:[%s19043_s4 + $0x24] sm:$0xf0] }
 0x88e   : > { %v5640_v29 = vadd.f32 %v5593_v20, %v17801_v6  ;;  %5859 = vmatmul.bf16.gmra.mxu3 %v11943_v42 }
 0x890   : > { %v5676_v41 = vadd.f32 %v17836_v52, %v5640_v29  ;;  %v11951_v29 = vor.u32 %v13644_v31, %v11950_v17  ;;  %v12094_v31 = vld [vmem:[%s19043_s4 + $0xa0] sm:$0xf] }
 0x892   : > { %v5740_v6 = vmul.f32 0.2, %v5676_v41  ;;  %vm5708_vm7 = vcmp.ge.f32.partialorder %v5676_v41, 0.0 }
 0x894   : > { %v5772_v27 = vsel %vm5708_vm7, %v5676_v41, %v5740_v6  ;;  %v5040_v9 = vpop.f32.mrf.mxu3 }
 0x895   : > { %v5595_v45 = vpop.f32.mrf.mxu2 }
 0x896   : > { %v5641_v56 = vadd.f32 %v5595_v45, %v5068_v35 }
 0x898   : > { %v5677_v19 = vadd.f32 %v17836_v52, %v5641_v56 }
 0x89a   : > { %vm5709_vm8 = vcmp.ge.f32.partialorder %v5677_v19, 0.0  ;;  %v5741_v5 = vmul.f32 0.2, %v5677_v19 }
 0x89c   : > { %v5773_v36 = vsel %vm5709_vm8, %v5677_v19, %v5741_v5  ;;  %v19166_v19 = vld [vmem:[#allocation21_spill] sm:$0xff] }
 0x89d   : > { %v17956_v26 = vpack.c.bf16 %v5773_v36, %v5772_v27  ;;  %v5598_v18 = vpop.f32.mrf.mxu2  ;;  %v5073_v5 = vadd.f32 %v5035_v30, %v19166_v19  ;;  %v19167_v36 = vld [vmem:[#allocation33_spill] sm:$0xff] }
 0x89e   : > { %v5642_v54 = vadd.f32 %v5598_v18, %v19160_v33  ;;  %5864 = vmatmul.bf16.gmra.mxu3 %v11951_v29  ;;  %v19168_v18 = vld [vmem:[#allocation23_spill] sm:$0xff]  ;;  %v12152_v19 = vld [vmem:[%s19043_s4 + $0xc8] sm:$0xf0] }
 0x89f   : > { %v4501_v33 = vadd.f32 %v19168_v18, %v19167_v36  ;;  %v13717_v18 = vld [vmem:[#allocation3 + $0x130] sm:$0xff] }
 0x8a0   : > { %v5678_v57 = vadd.f32 %v17836_v52, %v5642_v54 }
 0x8a1   : > { %v5074_v54 = vadd.f32 %v5037_v2, %v4501_v33  ;;  %v11936_v2 = vld [vmem:[%s19043_s4 + $0x8] sm:$0xf0] }
 0x8a2   : > { %v5742_v46 = vmul.f32 0.2, %v5678_v57  ;;  %vm5710_vm9 = vcmp.ge.f32.partialorder %v5678_v57, 0.0  ;;  %v13716_v33 = vld [vmem:[#allocation3 + $0x128] sm:$0xff] }
 0x8a4   : > { %v5774_v7 = vsel %vm5710_vm9, %v5678_v57, %v5742_v46  ;;  %vm7744_vm9 = vcmask 523264  }
 0x8a5   : > { %v5600_v62 = vpop.f32.mrf.mxu2 }
 0x8a6   : > { %v5643_v21 = vadd.f32 %v5600_v62, %v5070_v28  ;;  %v11959_v28 = vor.u32 %v13646_v16, %v11958_v39  ;;  %v13674_v62 = vld [vmem:[%s19043_s4 + $0x94] sm:$0xf0]  ;;  %v11944_v39 = vld [vmem:[%s19043_s4 + $0x18] sm:$0xf0] }
 0x8a7   : > { %v12087_v46 = vor.u32 %v13674_v62, %v12086_v43  ;;  %v13714_v16 = vld [vmem:[#allocation3 + $0x118] sm:$0xff]  ;;  %v13643_v43 = vld [vmem:[%s19043_s4 + $0x24] sm:$0xf]  ;;  %v11952_v62 = vld [vmem:[%s19043_s4 + $0x28] sm:$0xf0] }
 0x8a8   : > { %v5679_v49 = vadd.f32 %v17836_v52, %v5643_v21 }
 0x8a9   : > { %6268 = vmatmul.bf16.gmra.mxu2 %v12087_v46  ;;  %v11960_v46 = vld [vmem:[%s19043_s4 + $0x38] sm:$0xf0] }
 0x8aa   : > { %vm5711_vm10 = vcmp.ge.f32.partialorder %v5679_v49, 0.0  ;;  %v5743_v44 = vmul.f32 0.2, %v5679_v49 }
 0x8ac   : > { %v5775_v24 = vsel %vm5711_vm10, %v5679_v49, %v5743_v44 }
 0x8ad   : > { %v17969_v51 = vpack.c.bf16 %v5775_v24, %v5774_v7  ;;  %v5603_v25 = vpop.f32.mrf.mxu2 }
 0x8ae   : > { %v5644_v3 = vadd.f32 %v5603_v25, %v5071_v60  ;;  %5869 = vmatmul.bf16.gmra.mxu3 %v11959_v28  ;;  %v19169_v25 = vld [vmem:[#allocation18_spill] sm:$0xff] }
 0x8af   : > { %v5075_v12 = vadd.f32 %v5040_v9, %v19169_v25  ;;  %v13713_v28 = vld [vmem:[#allocation3 + $0x110] sm:$0xff]  ;;  %v13711_v9 = vld [vmem:[#allocation3 + $0x100] sm:$0xff] }
 0x8b0   : > { %v5680_v47 = vadd.f32 %v17836_v52, %v5644_v3  ;;  %v5042_v3 = vpop.f32.mrf.mxu3 }
 0x8b1   : > { %v5076_v30 = vadd.f32 %v5042_v3, %v4503_v61  ;;  %v13658_v3 = vld [vmem:[%s19043_s4 + $0x54] sm:$0xf0] }
 0x8b2   : > { %v5744_v35 = vmul.f32 0.2, %v5680_v47  ;;  %vm5712_vm11 = vcmp.ge.f32.partialorder %v5680_v47, 0.0 }
 0x8b4   : > { %v5776_v55 = vsel %vm5712_vm11, %v5680_v47, %v5744_v35 }
 0x8b5   : > { %v5605_v20 = vpop.f32.mrf.mxu2 }
 0x8b6   : > { %v5645_v34 = vadd.f32 %v5605_v20, %v5072_v32  ;;  %v13676_v20 = vld [vmem:[%s19043_s4 + $0xa4] sm:$0xf0] }
 0x8b7   : > { %v12095_v63 = vor.u32 %v13676_v20, %v12094_v31  ;;  %v11998_v20 = vld [vmem:[%s19043_s4 + $0x70] sm:$0xf] }
 0x8b8   : > { %v5681_v41 = vadd.f32 %v17836_v52, %v5645_v34 }
 0x8b9   : > { %6273 = vmatmul.bf16.gmra.mxu2 %v12095_v63 }
 0x8ba   : > { %vm5713_vm12 = vcmp.ge.f32.partialorder %v5681_v41, 0.0  ;;  %v5745_v23 = vmul.f32 0.2, %v5681_v41 }
 0x8bc   : > { %v5777_v45 = vsel %vm5713_vm12, %v5681_v41, %v5745_v23  ;;  %v13678_v23 = vld [vmem:[%s19043_s4 + $0xb4] sm:$0xf0]  ;;  %vm8715_vm12 = vcmask 130048  }
 0x8bd   : > { %v17988_v56 = vpack.c.bf16 %v5777_v45, %v5776_v55  ;;  %v5608_v6 = vpop.f32.mrf.mxu2  ;;  %v13639_v45 = vld [vmem:[%s19043_s4 + $0x4] sm:$0xf] }
 0x8be   : > { %v5646_v27 = vadd.f32 %v5608_v6, %v5073_v5  ;;  %v13687_v6 = vld [vmem:[%s19043_s4 + $0xc4] sm:$0xf]  ;;  %v13718_v5 = vld [vmem:[#allocation3 + $0x138] sm:$0xff] }
 0x8bf   : > { %v12155_v36 = vor.u32 %v13687_v6, %v12152_v19  ;;  %v11984_v6 = vld [vmem:[%s19043_s4 + $0x58] sm:$0xf0]  ;;  %v13700_v19 = vld [vmem:[#allocation3 + $0xe8] sm:$0xff] }
 0x8c0   : > { %v5682_v22 = vadd.f32 %v17836_v52, %v5646_v27  ;;  %v11939_v27 = vor.u32 %v13639_v45, %v11936_v2  ;;  %v13701_v45 = vld [vmem:[#allocation3 + $0xf0] sm:$0xff] }
 0x8c1   : > { %v13657_v2 = vld [vmem:[%s19043_s4 + $0x54] sm:$0xf] }
 0x8c2   : > { %v5746_v42 = vmul.f32 0.2, %v5682_v22  ;;  %vm5714_vm13 = vcmp.ge.f32.partialorder %v5682_v22, 0.0 }
 0x8c4   : > { %v5778_v37 = vsel %vm5714_vm13, %v5682_v22, %v5746_v42  ;;  %v13641_v22 = vld [vmem:[%s19043_s4 + $0x14] sm:$0xf]  ;;  %v11955_v42 = vor.u32 %v13643_v43, %v11952_v62  ;;  %vm9674_vm13 = vcmask 7168  }
 0x8c5   : > { %v5610_v40 = vpop.f32.mrf.mxu2 }
 0x8c6   : > { %v5647_v57 = vadd.f32 %v5610_v40, %v5074_v54  ;;  %v13715_v54 = vld [vmem:[#allocation3 + $0x120] sm:$0xff]  ;;  %v11947_v40 = vor.u32 %v13641_v22, %v11944_v39  ;;  %v13670_v22 = vld [vmem:[#allocation3 + $0x78] sm:$0xff] }
 0x8c7   : > { %6100 = vmatpush.bf16.msrb.mxu0 %v13670_v22  ;;  %v13698_v39 = vld [vmem:[#allocation3 + $0xd8] sm:$0xff] }
 0x8c8   : > { %v5683_v21 = vadd.f32 %v17836_v52, %v5647_v57  ;;  %v13712_v57 = vld [vmem:[#allocation3 + $0x108] sm:$0xff] }
 0x8ca   : > { %vm5715_vm14 = vcmp.ge.f32.partialorder %v5683_v21, 0.0  ;;  %v5747_v49 = vmul.f32 0.2, %v5683_v21 }
 0x8cc   : > { %v5779_v44 = vsel %vm5715_vm14, %v5683_v21, %v5747_v49  ;;  %v13645_v21 = vld [vmem:[%s19043_s4 + $0x34] sm:$0xf] }
 0x8cd   : > { %v18007_v7 = vpack.c.bf16 %v5779_v44, %v5778_v37  ;;  %v5613_v24 = vpop.f32.mrf.mxu2  ;;  %v11963_v49 = vor.u32 %v13645_v21, %v11960_v46  ;;  %v11974_v44 = vld [vmem:[%s19043_s4 + $0x40] sm:$0xf] }
 0x8ce   : > { %v5648_v60 = vadd.f32 %v5613_v24, %v5075_v12  ;;  %v13656_v24 = vld [vmem:[%s19043_s4 + $0x44] sm:$0xf0] }
 0x8cf   : > { %v11975_v25 = vor.u32 %v13656_v24, %v11974_v44  ;;  %v13661_v44 = vld [vmem:[%s19043_s4 + $0x74] sm:$0xf]  ;;  %v12000_v24 = vld [vmem:[%s19043_s4 + $0x78] sm:$0xf0] }
 0x8d0   : > { %v5684_v32 = vadd.f32 %v17836_v52, %v5648_v60  ;;  %v11982_v60 = vld [vmem:[%s19043_s4 + $0x50] sm:$0xf] }
 0x8d1   : > { %v11983_v13 = vor.u32 %v13658_v3, %v11982_v60  ;;  %v12003_v3 = vor.u32 %v13661_v44, %v12000_v24  ;;  %v13684_v44 = vld [vmem:[#allocation3 + $0xa8] sm:$0xff] }
 0x8d2   : > { %v5748_v29 = vmul.f32 0.2, %v5684_v32  ;;  %vm5716_vm15 = vcmp.ge.f32.partialorder %v5684_v32, 0.0  ;;  %v13732_v24 = vld [vmem:[#allocation3 + $0x168] sm:$0xff] }
 0x8d4   : > { %v5780_v35 = vsel %vm5716_vm15, %v5684_v32, %v5748_v29  ;;  %v13660_v32 = vld [vmem:[%s19043_s4 + $0x64] sm:$0xf0]  ;;  %v13662_v29 = vld [vmem:[%s19043_s4 + $0x74] sm:$0xf0] }
 0x8d5   : > { %v5615_v47 = vpop.f32.mrf.mxu2 }
 0x8d6   : > { %v5649_v17 = vadd.f32 %v5615_v47, %v5076_v30  ;;  %v11990_v30 = vld [vmem:[%s19043_s4 + $0x60] sm:$0xf] }
 0x8d7   : > { %v11991_v47 = vor.u32 %v13660_v32, %v11990_v30  ;;  %v13689_v30 = vld [vmem:[%s19043_s4 + $0xd4] sm:$0xf]  ;;  %v12160_v32 = vld [vmem:[%s19043_s4 + $0xd8] sm:$0xf0] }
 0x8d8   : > { %v5685_v34 = vadd.f32 %v17836_v52, %v5649_v17  ;;  %v12102_v52 = vld [vmem:[%s19043_s4 + $0xb0] sm:$0xf] }
 0x8d9   : > { %v12103_v55 = vor.u32 %v13678_v23, %v12102_v52  ;;  %v13702_v23 = vld [vmem:[#allocation3 + $0xf8] sm:$0xff] }
 0x8da   : > { %vm5717_vm0 = vcmp.ge.f32.partialorder %v5685_v34, 0.0  ;;  %v5749_v1 = vmul.f32 0.2, %v5685_v34 }
 0x8db   : > { %6278 = vmatmul.bf16.gmra.mxu2 %v12103_v55 }
 0x8dc   : > { %v5781_v41 = vsel %vm5717_vm0, %v5685_v34, %v5749_v1  ;;  %v11999_v34 = vor.u32 %v13662_v29, %v11998_v20  ;;  %v13655_v1 = vld [vmem:[%s19043_s4 + $0x44] sm:$0xf] }
 0x8dd   : > { %v18020_v11 = vpack.c.bf16 %v5781_v41, %v5780_v35  ;;  %v11976_v35 = vld [vmem:[%s19043_s4 + $0x48] sm:$0xf0] }
 0x8de   : > { %v11979_v52 = vor.u32 %v13655_v1, %v11976_v35  ;;  %v13668_v35 = vld [vmem:[#allocation3 + $0x68] sm:$0xff] }
 0x8df   : > { %5875 = vmatpush.bf16.msrb.mxu3 %v18020_v11  ;;  %6497 = vmatpush.bf16.msra.mxu2 %v18020_v11 }
 0x8e3   : > { %5876 = vmatpush.bf16.msrb.mxu3 %v18007_v7  ;;  %6498 = vmatpush.bf16.msra.mxu2 %v18007_v7 }
 0x8e7   : > { %5877 = vmatpush.bf16.msrb.mxu3 %v17988_v56  ;;  %6499 = vmatpush.bf16.msra.mxu2 %v17988_v56 }
 0x8eb   : > { %5878 = vmatpush.bf16.msrb.mxu3 %v17969_v51  ;;  %6500 = vmatpush.bf16.msra.mxu2 %v17969_v51 }
 0x8ef   : > { %5879 = vmatpush.bf16.msrb.mxu3 %v17956_v26  ;;  %6501 = vmatpush.bf16.msra.mxu2 %v17956_v26 }
 0x8f3   : > { %5880 = vmatpush.bf16.msrb.mxu3 %v17942_v48  ;;  %6502 = vmatpush.bf16.msra.mxu2 %v17942_v48 }
 0x8f7   : > { %5881 = vmatpush.bf16.msrb.mxu3 %v17934_v59  ;;  %6503 = vmatpush.bf16.msra.mxu2 %v17934_v59 }
 0x8fb   : > { %5882 = vmatpush.bf16.msrb.mxu3 %v17914_v8  ;;  %6504 = vmatpush.bf16.msra.mxu2 %v17914_v8 }
 0x8fe   : > { %5883 = vmatmul.bf16.vlgmr.msrb.gmra.mxu3 %v11939_v27  ;;  %6505 = vmatmul.bf16.vlgmr.msra.gmra.mxu2 %v12155_v36 }
 0x8ff   : > { %5973 = vmatpush.bf16.msra.mxu3 %v17894_v53  ;;  %6808 = vmatpush.bf16.msrb.mxu2 %v13718_v5 }
 0x901   : > { %v5855_v37 = vpop.f32.mrf.mxu3 }
 0x903   : > { %5974 = vmatpush.bf16.msra.mxu3 %v17885_v10  ;;  %6809 = vmatpush.bf16.msrb.mxu2 %v13717_v18  ;;  %v11987_v18 = vor.u32 %v13657_v2, %v11984_v6  ;;  %v13691_v2 = vld [vmem:[%s19043_s4 + $0xe4] sm:$0xf] }
 0x907   : > { %5975 = vmatpush.bf16.msra.mxu3 %v17876_v38  ;;  %6810 = vmatpush.bf16.msrb.mxu2 %v13716_v33 }
 0x909   : > { %v5857_v12 = vpop.f32.mrf.mxu3 }
 0x90b   : > { %5976 = vmatpush.bf16.msra.mxu3 %v17867_v58  ;;  %6811 = vmatpush.bf16.msrb.mxu2 %v13715_v54  ;;  %v13699_v54 = vld [vmem:[#allocation3 + $0xe0] sm:$0xff] }
 0x90e   : > { %5888 = vmatmul.bf16.gmra.mxu3 %v11947_v40  ;;  %v13697_v40 = vld [vmem:[#allocation3 + $0xd0] sm:$0xff] }
 0x90f   : > { %5977 = vmatpush.bf16.msra.mxu3 %v17859_v0  ;;  %6812 = vmatpush.bf16.msrb.mxu2 %v13714_v16 }
 0x911   : > { %v5860_v50 = vpop.f32.mrf.mxu3 }
 0x913   : > { %5978 = vmatpush.bf16.msra.mxu3 %v17853_v14  ;;  %6813 = vmatpush.bf16.msrb.mxu2 %v13713_v28  ;;  %v13659_v28 = vld [vmem:[%s19043_s4 + $0x64] sm:$0xf] }
 0x917   : > { %5979 = vmatpush.bf16.msra.mxu3 %v17847_v4  ;;  %6814 = vmatpush.bf16.msrb.mxu2 %v13712_v57  ;;  %v11992_v57 = vld [vmem:[%s19043_s4 + $0x68] sm:$0xf0] }
 0x918   : > { %v11995_v21 = vor.u32 %v13659_v28, %v11992_v57  ;;  %v13685_v57 = vld [vmem:[#allocation3 + $0xb0] sm:$0xff] }
 0x919   : > { %v5862_v61 = vpop.f32.mrf.mxu3 }
 0x91b   : > { %5980 = vmatpush.bf16.msra.mxu3 %v17841_v15  ;;  %6815 = vmatpush.bf16.msrb.mxu2 %v13711_v9  ;;  %v13696_v9 = vld [vmem:[#allocation3 + $0xc8] sm:$0xff] }
 0x91e   : > { %5893 = vmatmul.bf16.gmra.mxu3 %v11955_v42 }
 0x91f   : > { %6002 = vmatpush.bf16.msrb.mxu3 %v18020_v11  ;;  %7107 = vmatpush.bf16.msra.mxu2 %v17894_v53 }
 0x921   : > { %v5865_v17 = vpop.f32.mrf.mxu3 }
 0x923   : > { %6003 = vmatpush.bf16.msrb.mxu3 %v18007_v7  ;;  %7108 = vmatpush.bf16.msra.mxu2 %v17885_v10 }
 0x927   : > { %6004 = vmatpush.bf16.msrb.mxu3 %v17988_v56  ;;  %7109 = vmatpush.bf16.msra.mxu2 %v17876_v38 }
 0x929   : > { %v5867_v31 = vpop.f32.mrf.mxu3 }
 0x92b   : > { %6005 = vmatpush.bf16.msrb.mxu3 %v17969_v51  ;;  %7110 = vmatpush.bf16.msra.mxu2 %v17867_v58 }
 0x92e   : > { %5898 = vmatmul.bf16.gmra.mxu3 %v11963_v49  ;;  %v13695_v49 = vld [vmem:[#allocation3 + $0xc0] sm:$0xff] }
 0x92f   : > { %6006 = vmatpush.bf16.msrb.mxu3 %v17956_v26  ;;  %7111 = vmatpush.bf16.msra.mxu2 %v17859_v0 }
 0x931   : > { %v18130_v63 = vpop.f32.mrf.mxu3 }
 0x933   : > { %6007 = vmatpush.bf16.msrb.mxu3 %v17942_v48  ;;  %7112 = vmatpush.bf16.msra.mxu2 %v17853_v14 }
 0x937   : > { %6008 = vmatpush.bf16.msrb.mxu3 %v17934_v59  ;;  %7113 = vmatpush.bf16.msra.mxu2 %v17847_v4 }
 0x939   : > { %v18138_v41 = vpop.f32.mrf.mxu3 }
 0x93b   : > { %6009 = vmatpush.bf16.msrb.mxu3 %v17914_v8  ;;  %7114 = vmatpush.bf16.msra.mxu2 %v17841_v15 }
 0x93e   : > { %5981 = vmatmul.bf16.vlgmr.msra.gmra.mxu3 %v11975_v25 }
 0x93f   : > { %6284 = vmatpush.bf16.msra.mxu3 %v18020_v11 }
 0x943   : > { %6285 = vmatpush.bf16.msra.mxu3 %v18007_v7 }
 0x947   : > { %6286 = vmatpush.bf16.msra.mxu3 %v17988_v56 }
 0x94b   : > { %6287 = vmatpush.bf16.msra.mxu3 %v17969_v51 }
 0x94e   : > { %5986 = vmatmul.bf16.gmra.mxu3 %v11983_v13  ;;  %v13669_v13 = vld [vmem:[#allocation3 + $0x70] sm:$0xff] }
 0x94f   : > { %6288 = vmatpush.bf16.msra.mxu3 %v17956_v26  ;;  %6101 = vmatpush.bf16.msrb.mxu0 %v13669_v13  ;;  %v13682_v13 = vld [vmem:[#allocation3 + $0x98] sm:$0xff] }
 0x953   : > { %6289 = vmatpush.bf16.msra.mxu3 %v17942_v48  ;;  %6102 = vmatpush.bf16.msrb.mxu0 %v13668_v35 }
 0x957   : > { %6290 = vmatpush.bf16.msra.mxu3 %v17934_v59 }
 0x95b   : > { %6291 = vmatpush.bf16.msra.mxu3 %v17914_v8 }
 0x95e   : > { %5991 = vmatmul.bf16.gmra.mxu3 %v11991_v47  ;;  %v13671_v47 = vld [vmem:[%s19043_s4 + $0x84] sm:$0xf] }
 0x96e   : > { %5996 = vmatmul.bf16.gmra.mxu3 %v11999_v34 }
 0x97e   : > { %6010 = vmatmul.bf16.vlgmr.msrb.gmra.mxu3 %v11979_v52 }
 0x97f   : > { %6595 = vmatpush.bf16.msrb.mxu3 %v13702_v23  ;;  %v13667_v23 = vld [vmem:[#allocation3 + $0x60] sm:$0xff] }
 0x980   : > { %6103 = vmatpush.bf16.msrb.mxu0 %v13667_v23 }
 0x981   : > { %v5884_v55 = vpop.f32.mrf.mxu3 }
 0x982   : > { %v5885_v27 = vadd.f32 %v5884_v55, %v5855_v37 }
 0x983   : > { %6596 = vmatpush.bf16.msrb.mxu3 %v13701_v45  ;;  %v13666_v45 = vld [vmem:[#allocation3 + $0x58] sm:$0xff] }
 0x984   : > { %6104 = vmatpush.bf16.msrb.mxu0 %v13666_v45  ;;  %v18246_v45 = vpop.f32.mrf.mxu2 }
 0x987   : > { %6597 = vmatpush.bf16.msrb.mxu3 %v13700_v19  ;;  %v13673_v19 = vld [vmem:[%s19043_s4 + $0x94] sm:$0xf] }
 0x989   : > { %v5886_v5 = vpop.f32.mrf.mxu3 }
 0x98a   : > { %v5887_v36 = vadd.f32 %v5886_v5, %v5857_v12  ;;  %v12088_v5 = vld [vmem:[%s19043_s4 + $0x98] sm:$0xf0] }
 0x98b   : > { %6598 = vmatpush.bf16.msrb.mxu3 %v13699_v54  ;;  %v12091_v54 = vor.u32 %v13673_v19, %v12088_v5  ;;  %v12174_v19 = vld [vmem:[%s19043_s4 + $0xf0] sm:$0xf]  ;;  %v13694_v5 = vld [vmem:[%s19043_s4 + $0xf4] sm:$0xf0] }
 0x98c   : > { %v5904_v33 = vpack.c.bf16 %v5887_v36, %v5885_v27  ;;  %v12150_v27 = vld [vmem:[%s19043_s4 + $0xc0] sm:$0xf]  ;;  %v13688_v36 = vld [vmem:[%s19043_s4 + $0xc4] sm:$0xf0] }
 0x98d   : > { %v12151_v22 = vor.u32 %v13688_v36, %v12150_v27  ;;  %v12175_v36 = vor.u32 %v13694_v5, %v12174_v19 }
 0x98e   : > { %6015 = vmatmul.bf16.gmra.mxu3 %v11987_v18  ;;  %6185 = vmatmul.bf16.vlgmr.msrb.gmra.mxu1 %v5904_v33  ;;  %v13664_v33 = vld [vmem:[#allocation3 + $0x48] sm:$0xff] }
 0x98f   : > { %6710 = vmatpush.bf16.msrb.mxu1 %v18020_v11  ;;  %6599 = vmatpush.bf16.msrb.mxu3 %v13698_v39  ;;  %v13663_v39 = vld [vmem:[#allocation3 + $0x40] sm:$0xff] }
 0x991   : > { %v5889_v16 = vpop.f32.mrf.mxu3 }
 0x992   : > { %v5890_v62 = vadd.f32 %v5889_v16, %v5860_v50  ;;  %v13686_v16 = vld [vmem:[#allocation3 + $0xb8] sm:$0xff] }
 0x993   : > { %6711 = vmatpush.bf16.msrb.mxu1 %v18007_v7  ;;  %6600 = vmatpush.bf16.msrb.mxu3 %v13697_v40  ;;  %v13734_v40 = vld [vmem:[#allocation3 + $0x178] sm:$0xff] }
 0x997   : > { %6712 = vmatpush.bf16.msrb.mxu1 %v17988_v56  ;;  %6601 = vmatpush.bf16.msrb.mxu3 %v13696_v9  ;;  %v13733_v9 = vld [vmem:[#allocation3 + $0x170] sm:$0xff] }
 0x999   : > { %v5891_v43 = vpop.f32.mrf.mxu3 }
 0x99a   : > { %v5892_v42 = vadd.f32 %v5891_v43, %v5862_v61  ;;  %v13693_v43 = vld [vmem:[%s19043_s4 + $0xf4] sm:$0xf] }
 0x99b   : > { %6713 = vmatpush.bf16.msrb.mxu1 %v17969_v51  ;;  %6602 = vmatpush.bf16.msrb.mxu3 %v13695_v49  ;;  %v12158_v49 = vld [vmem:[%s19043_s4 + $0xd0] sm:$0xf] }
 0x99c   : > { %v5905_v46 = vpack.c.bf16 %v5892_v42, %v5890_v62  ;;  %v12176_v62 = vld [vmem:[%s19043_s4 + $0xf8] sm:$0xf0] }
 0x99d   : > { %v12179_v42 = vor.u32 %v13693_v43, %v12176_v62 }
 0x99e   : > { %6020 = vmatmul.bf16.gmra.mxu3 %v11995_v21  ;;  %6190 = vmatmul.bf16.gmra.mxu1 %v5905_v46  ;;  %v13675_v21 = vld [vmem:[%s19043_s4 + $0xa4] sm:$0xf]  ;;  %v12096_v46 = vld [vmem:[%s19043_s4 + $0xa8] sm:$0xf0] }
 0x99f   : > { %6714 = vmatpush.bf16.msrb.mxu1 %v17956_v26 }
 0x9a1   : > { %v5894_v37 = vpop.f32.mrf.mxu3 }
 0x9a2   : > { %v5895_v12 = vadd.f32 %v5894_v37, %v5865_v17  ;;  %v12080_v17 = vld [vmem:[%s19043_s4 + $0x88] sm:$0xf0]  ;;  %v13690_v37 = vld [vmem:[%s19043_s4 + $0xd4] sm:$0xf0] }
 0x9a3   : > { %6715 = vmatpush.bf16.msrb.mxu1 %v17942_v48  ;;  %v12083_v1 = vor.u32 %v13671_v47, %v12080_v17  ;;  %v13729_v47 = vld [vmem:[#allocation3 + $0x150] sm:$0xff] }
 0x9a4   : > { %v13677_v17 = vld [vmem:[%s19043_s4 + $0xb4] sm:$0xf] }
 0x9a7   : > { %6716 = vmatpush.bf16.msrb.mxu1 %v17934_v59 }
 0x9a9   : > { %v5896_v25 = vpop.f32.mrf.mxu3 }
 0x9aa   : > { %v5897_v60 = vadd.f32 %v5896_v25, %v5867_v31  ;;  %v12163_v31 = vor.u32 %v13689_v30, %v12160_v32  ;;  %v13681_v32 = vld [vmem:[#allocation3 + $0x90] sm:$0xff] }
 0x9ab   : > { %6717 = vmatpush.bf16.msrb.mxu1 %v17914_v8 }
 0x9ac   : > { %v5906_v50 = vpack.c.bf16 %v5897_v60, %v5895_v12  ;;  %6510 = vmatmul.bf16.gmra.mxu2 %v12163_v31  ;;  %v12099_v12 = vor.u32 %v13675_v21, %v12096_v46  ;;  %v12159_v60 = vor.u32 %v13690_v37, %v12158_v49  ;;  %v12104_v31 = vld [vmem:[%s19043_s4 + $0xb8] sm:$0xf0] }
 0x9ae   : > { %6025 = vmatmul.bf16.gmra.mxu3 %v12003_v3  ;;  %6195 = vmatmul.bf16.gmra.mxu1 %v5906_v50  ;;  %v13683_v3 = vld [vmem:[#allocation3 + $0xa0] sm:$0xff] }
 0x9af   : > { %v13731_v50 = vld [vmem:[#allocation3 + $0x160] sm:$0xff] }
 0x9b1   : > { %v5899_v61 = vpop.f32.mrf.mxu3 }
 0x9b2   : > { %v5900_v29 = vadd.f32 %v5899_v61, %v18130_v63  ;;  %v12168_v63 = vld [vmem:[%s19043_s4 + $0xe8] sm:$0xf0]  ;;  %v13730_v61 = vld [vmem:[#allocation3 + $0x158] sm:$0xff] }
 0x9b3   : > { %v12171_v6 = vor.u32 %v13691_v2, %v12168_v63  ;;  %v13679_v2 = vld [vmem:[#allocation3 + $0x80] sm:$0xff] }
 0x9b4   : > { %v13727_v63 = vld [vmem:[#allocation3 + $0x140] sm:$0xff] }
 0x9b9   : > { %v5901_v20 = vpop.f32.mrf.mxu3 }
 0x9ba   : > { %v5902_v34 = vadd.f32 %v5901_v20, %v18138_v41  ;;  %v13665_v41 = vld [vmem:[#allocation3 + $0x50] sm:$0xff]  ;;  %v12166_v20 = vld [vmem:[%s19043_s4 + $0xe0] sm:$0xf] }
 0x9bb   : > { %6105 = vmatpush.bf16.msrb.mxu0 %v13665_v41 }
 0x9bc   : > { %v5907_v52 = vpack.c.bf16 %v5902_v34, %v5900_v29  ;;  %6515 = vmatmul.bf16.gmra.mxu2 %v12171_v6  ;;  %v13692_v29 = vld [vmem:[%s19043_s4 + $0xe4] sm:$0xf0]  ;;  %v18248_v6 = vpop.f32.mrf.mxu2 }
 0x9bd   : > { %v13680_v34 = vld [vmem:[#allocation3 + $0x88] sm:$0xff]  ;;  %v12167_v23 = vor.u32 %v13692_v29, %v12166_v20 }
 0x9be   : > { %6200 = vmatmul.bf16.gmra.mxu1 %v5907_v52  ;;  %6292 = vmatmul.bf16.vlgmr.msra.gmra.mxu3 %v12083_v1  ;;  %v13728_v1 = vld [vmem:[#allocation3 + $0x148] sm:$0xff]  ;;  %v12107_v52 = vor.u32 %v13677_v17, %v12104_v31 }
 0x9bf   : > { %6894 = vmatpush.bf16.msra.mxu3 %v17894_v53  ;;  %6106 = vmatpush.bf16.msrb.mxu0 %v13664_v33 }
 0x9c1   : > { %v18181_v55 = vpop.f32.mrf.mxu3 }
 0x9c3   : > { %6895 = vmatpush.bf16.msra.mxu3 %v17885_v10  ;;  %6107 = vmatpush.bf16.msrb.mxu0 %v13663_v39  ;;  %v12224_v39 = vld [vmem:[%s19043_s4 + $0x108] sm:$0xf0] }
 0x9c4   : > { %v18256_v33 = vpop.f32.mrf.mxu2 }
 0x9c7   : > { %6896 = vmatpush.bf16.msra.mxu3 %v17876_v38  ;;  %6382 = vmatpush.bf16.msra.mxu0 %v13686_v16 }
 0x9c9   : > { %v18203_v18 = vpop.f32.mrf.mxu3 }
 0x9cb   : > { %6897 = vmatpush.bf16.msra.mxu3 %v17867_v58  ;;  %6383 = vmatpush.bf16.msra.mxu0 %v13685_v57 }
 0x9cc   : > { %6520 = vmatmul.bf16.gmra.mxu2 %v12179_v42 }
 0x9ce   : > { %6297 = vmatmul.bf16.gmra.mxu3 %v12091_v54  ;;  %6476 = vmatmul.bf16.vlgmr.msra.gmra.mxu1 %v12151_v22  ;;  %v13703_v22 = vld [vmem:[%s19043_s4 + $0x104] sm:$0xf] }
 0x9cf   : > { %6898 = vmatpush.bf16.msra.mxu3 %v17859_v0  ;;  %7021 = vmatpush.bf16.msra.mxu1 %v13734_v40  ;;  %v18264_v40 = vpop.f32.mrf.mxu2  ;;  %v12227_v43 = vor.u32 %v13703_v22, %v12224_v39 }
 0x9d0   : > { %6384 = vmatpush.bf16.msra.mxu0 %v13684_v44 }
 0x9d1   : > { %v18207_v28 = vpop.f32.mrf.mxu3 }
 0x9d3   : > { %6899 = vmatpush.bf16.msra.mxu3 %v17853_v14  ;;  %7022 = vmatpush.bf16.msra.mxu1 %v13733_v9 }
 0x9d4   : > { %6385 = vmatpush.bf16.msra.mxu0 %v13683_v3 }
 0x9d7   : > { %6900 = vmatpush.bf16.msra.mxu3 %v17847_v4  ;;  %7023 = vmatpush.bf16.msra.mxu1 %v13732_v24 }
 0x9d8   : > { %6386 = vmatpush.bf16.msra.mxu0 %v13682_v13 }
 0x9d9   : > { %v18229_v25 = vpop.f32.mrf.mxu3 }
 0x9db   : > { %6901 = vmatpush.bf16.msra.mxu3 %v17841_v15  ;;  %7024 = vmatpush.bf16.msra.mxu1 %v13731_v50 }
 0x9dc   : > { %6387 = vmatpush.bf16.msra.mxu0 %v13681_v32 }
 0x9de   : > { %6302 = vmatmul.bf16.gmra.mxu3 %v12099_v12  ;;  %6481 = vmatmul.bf16.gmra.mxu1 %v12159_v60 }
 0x9df   : > { %7025 = vmatpush.bf16.msra.mxu1 %v13730_v61 }
 0x9e0   : > { %6388 = vmatpush.bf16.msra.mxu0 %v13680_v34 }
 0x9e1   : > { %v18232_v30 = vpop.f32.mrf.mxu3 }
 0x9e3   : > { %7026 = vmatpush.bf16.msra.mxu1 %v13729_v47 }
 0x9e4   : > { %6389 = vmatpush.bf16.msra.mxu0 %v13679_v2 }
 0x9e7   : > { %7027 = vmatpush.bf16.msra.mxu1 %v13728_v1 }
 0x9e9   : > { %v5994_v35 = vpop.f32.mrf.mxu3 }
 0x9eb   : > { %7028 = vmatpush.bf16.msra.mxu1 %v13727_v63 }
 0x9ee   : > { %6307 = vmatmul.bf16.gmra.mxu3 %v12107_v52  ;;  %6486 = vmatmul.bf16.gmra.mxu1 %v12167_v23 }
 0x9f1   : > { %v5997_v41 = vpop.f32.mrf.mxu3 }
 0x9f9   : > { %v5999_v27 = vpop.f32.mrf.mxu3 }
 0x9fe   : > { %6491 = vmatmul.bf16.gmra.mxu1 %v12175_v36 }
 0xa01   : > { %v6011_v54 = vpop.f32.mrf.mxu3 }
 0xa02   : > { %v6012_v57 = vadd.f32 %v6011_v54, %v18181_v55  ;;  %v18276_v55 = vpop.f32.mrf.mxu2 }
 0xa09   : > { %v6013_v16 = vpop.f32.mrf.mxu3 }
 0xa0a   : > { %v6014_v9 = vadd.f32 %v6013_v16, %v18203_v18  ;;  %v18286_v12 = vpop.f32.mrf.mxu2 }
 0xa0b   : > { %v18268_v62 = vpop.f32.mrf.mxu1 }
 0xa0c   : > { %v6031_v42 = vpack.c.bf16 %v6014_v9, %v6012_v57 }
 0xa0e   : > { %6108 = vmatmul.bf16.vlgmr.msrb.gmra.mxu0 %v6031_v42  ;;  %6718 = vmatmul.bf16.vlgmr.msrb.gmra.mxu1 %v12227_v43 }
 0xa0f   : > { %6681 = vmatpush.bf16.msrb.mxu0 %v17894_v53  ;;  %7320 = vmatpush.bf16.msrb.mxu1 %v17894_v53 }
 0xa11   : > { %v6016_v21 = vpop.f32.mrf.mxu3 }
 0xa12   : > { %v6017_v49 = vadd.f32 %v6016_v21, %v18207_v28 }
 0xa13   : > { %6682 = vmatpush.bf16.msrb.mxu0 %v17885_v10  ;;  %7321 = vmatpush.bf16.msrb.mxu1 %v17885_v10  ;;  %v18274_v46 = vpop.f32.mrf.mxu1 }
 0xa17   : > { %6683 = vmatpush.bf16.msrb.mxu0 %v17876_v38  ;;  %7322 = vmatpush.bf16.msrb.mxu1 %v17876_v38 }
 0xa19   : > { %v6018_v18 = vpop.f32.mrf.mxu3 }
 0xa1a   : > { %v6019_v37 = vadd.f32 %v6018_v18, %v18229_v25  ;;  %v18296_v25 = vpop.f32.mrf.mxu2 }
 0xa1b   : > { %6684 = vmatpush.bf16.msrb.mxu0 %v17867_v58  ;;  %7323 = vmatpush.bf16.msrb.mxu1 %v17867_v58  ;;  %v18284_v44 = vpop.f32.mrf.mxu1 }
 0xa1c   : > { %v6032_v24 = vpack.c.bf16 %v6019_v37, %v6017_v49 }
 0xa1e   : > { %6113 = vmatmul.bf16.gmra.mxu0 %v6032_v24 }
 0xa1f   : > { %6685 = vmatpush.bf16.msrb.mxu0 %v17859_v0  ;;  %7324 = vmatpush.bf16.msrb.mxu1 %v17859_v0 }
 0xa21   : > { %v6021_v60 = vpop.f32.mrf.mxu3 }
 0xa22   : > { %v6022_v50 = vadd.f32 %v6021_v60, %v18232_v30  ;;  %v18303_v17 = vpop.f32.mrf.mxu2 }
 0xa23   : > { %6686 = vmatpush.bf16.msrb.mxu0 %v17853_v14  ;;  %7325 = vmatpush.bf16.msrb.mxu1 %v17853_v14  ;;  %v18292_v28 = vpop.f32.mrf.mxu1 }
 0xa27   : > { %6687 = vmatpush.bf16.msrb.mxu0 %v17847_v4  ;;  %7326 = vmatpush.bf16.msrb.mxu1 %v17847_v4 }
 0xa29   : > { %v6023_v3 = vpop.f32.mrf.mxu3 }
 0xa2a   : > { %v6024_v13 = vadd.f32 %v6023_v3, %v5994_v35  ;;  %v6506_v30 = vpop.f32.mrf.mxu2 }
 0xa2b   : > { %6688 = vmatpush.bf16.msrb.mxu0 %v17841_v15  ;;  %7327 = vmatpush.bf16.msrb.mxu1 %v17841_v15  ;;  %v18301_v61 = vpop.f32.mrf.mxu1 }
 0xa2c   : > { %v6033_v32 = vpack.c.bf16 %v6024_v13, %v6022_v50 }
 0xa2e   : > { %6118 = vmatmul.bf16.gmra.mxu0 %v6033_v32 }
 0xa31   : > { %v6026_v47 = vpop.f32.mrf.mxu3 }
 0xa32   : > { %v6027_v29 = vadd.f32 %v6026_v47, %v5997_v41  ;;  %v6508_v2 = vpop.f32.mrf.mxu2 }
 0xa33   : > { %v18305_v31 = vpop.f32.mrf.mxu1 }
 0xa39   : > { %v6028_v20 = vpop.f32.mrf.mxu3 }
 0xa3a   : > { %v6029_v34 = vadd.f32 %v6028_v20, %v5999_v27  ;;  %v6511_v41 = vpop.f32.mrf.mxu2 }
 0xa3b   : > { %v18307_v1 = vpop.f32.mrf.mxu1 }
 0xa3c   : > { %v6034_v35 = vpack.c.bf16 %v6029_v34, %v6027_v29 }
 0xa3e   : > { %6123 = vmatmul.bf16.gmra.mxu0 %v6034_v35 }
 0xa41   : > { %v6293_v52 = vpop.f32.mrf.mxu3 }
 0xa42   : > { %v6294_v19 = vadd.f32 %v6293_v52, %v18246_v45 }
 0xa43   : > { %v18309_v23 = vpop.f32.mrf.mxu1 }
 0xa49   : > { %v6295_v63 = vpop.f32.mrf.mxu3 }
 0xa4a   : > { %v6296_v5 = vadd.f32 %v6295_v63, %v18248_v6  ;;  %v6513_v6 = vpop.f32.mrf.mxu2 }
 0xa4b   : > { %v6477_v36 = vpop.f32.mrf.mxu1 }
 0xa4c   : > { %v6313_v54 = vpack.c.bf16 %v6296_v5, %v6294_v19  ;;  %v6507_v22 = vadd.f32 %v6506_v30, %v6477_v36 }
 0xa4e   : > { %6390 = vmatmul.bf16.vlgmr.msra.gmra.mxu0 %v6313_v54 }
 0xa4f   : > { %6923 = vmatpush.bf16.msra.mxu0 %v18020_v11 }
 0xa51   : > { %v6298_v27 = vpop.f32.mrf.mxu3 }
 0xa52   : > { %v6299_v9 = vadd.f32 %v6298_v27, %v18256_v33  ;;  %v6516_v24 = vpop.f32.mrf.mxu2 }
 0xa53   : > { %6924 = vmatpush.bf16.msra.mxu0 %v18007_v7  ;;  %v6479_v39 = vpop.f32.mrf.mxu1 }
 0xa54   : > { %v6509_v16 = vadd.f32 %v6508_v2, %v6479_v39 }
 0xa56   : > { %v6526_v57 = vpack.c.bf16 %v6509_v16, %v6507_v22  ;;  %v13707_v16 = vld [vmem:[%s19043_s4 + $0x124] sm:$0xf] }
 0xa57   : > { %6925 = vmatpush.bf16.msra.mxu0 %v17988_v56 }
 0xa58   : > { %6603 = vmatmul.bf16.vlgmr.msrb.gmra.mxu3 %v6526_v57  ;;  %v12240_v57 = vld [vmem:[%s19043_s4 + $0x128] sm:$0xf0] }
 0xa59   : > { %7136 = vmatpush.bf16.msrb.mxu3 %v18020_v11  ;;  %v6300_v45 = vpop.f32.mrf.mxu3 }
 0xa5a   : > { %v6301_v43 = vadd.f32 %v6300_v45, %v18264_v40  ;;  %v6518_v47 = vpop.f32.mrf.mxu2 }
 0xa5b   : > { %6926 = vmatpush.bf16.msra.mxu0 %v17969_v51  ;;  %v6482_v42 = vpop.f32.mrf.mxu1 }
 0xa5c   : > { %v6314_v21 = vpack.c.bf16 %v6301_v43, %v6299_v9  ;;  %v6512_v49 = vadd.f32 %v6511_v41, %v6482_v42  ;;  %v13750_v42 = vld [vmem:[#allocation3 + $0x1b8] sm:$0xff] }
 0xa5d   : > { %7137 = vmatpush.bf16.msrb.mxu3 %v18007_v7 }
 0xa5e   : > { %6395 = vmatmul.bf16.gmra.mxu0 %v6314_v21  ;;  %v12294_v21 = vld [vmem:[%s19043_s4 + $0x140] sm:$0xf] }
 0xa5f   : > { %6927 = vmatpush.bf16.msra.mxu0 %v17956_v26 }
 0xa61   : > { %7138 = vmatpush.bf16.msrb.mxu3 %v17988_v56  ;;  %v6303_v18 = vpop.f32.mrf.mxu3 }
 0xa62   : > { %v6304_v3 = vadd.f32 %v6303_v18, %v18276_v55  ;;  %v13705_v55 = vld [vmem:[%s19043_s4 + $0x114] sm:$0xf]  ;;  %v6521_v2 = vpop.f32.mrf.mxu2  ;;  %v13720_v18 = vld [vmem:[%s19043_s4 + $0x144] sm:$0xf0] }
 0xa63   : > { %6928 = vmatpush.bf16.msra.mxu0 %v17942_v48  ;;  %v6484_v37 = vpop.f32.mrf.mxu1 }
 0xa64   : > { %v6514_v33 = vadd.f32 %v6513_v6, %v6484_v37  ;;  %v12243_v6 = vor.u32 %v13707_v16, %v12240_v57  ;;  %v12295_v37 = vor.u32 %v13720_v18, %v12294_v21  ;;  %v13761_v16 = vld [vmem:[#allocation3 + $0x1d0] sm:$0xff]  ;;  %v12310_v57 = vld [vmem:[%s19043_s4 + $0x160] sm:$0xf]  ;;  %v13710_v21 = vld [vmem:[%s19043_s4 + $0x134] sm:$0xf0] }
 0xa65   : > { %7139 = vmatpush.bf16.msrb.mxu3 %v17969_v51 }
 0xa66   : > { %v6527_v40 = vpack.c.bf16 %v6514_v33, %v6512_v49  ;;  %v13709_v33 = vld [vmem:[%s19043_s4 + $0x134] sm:$0xf] }
 0xa67   : > { %6929 = vmatpush.bf16.msra.mxu0 %v17934_v59 }
 0xa68   : > { %6608 = vmatmul.bf16.gmra.mxu3 %v6527_v40  ;;  %v12248_v40 = vld [vmem:[%s19043_s4 + $0x138] sm:$0xf0] }
 0xa69   : > { %7140 = vmatpush.bf16.msrb.mxu3 %v17956_v26  ;;  %v6305_v60 = vpop.f32.mrf.mxu3 }
 0xa6a   : > { %v6306_v50 = vadd.f32 %v6305_v60, %v18286_v12  ;;  %v12232_v12 = vld [vmem:[%s19043_s4 + $0x118] sm:$0xf0]  ;;  %v6523_v41 = vpop.f32.mrf.mxu2  ;;  %v12251_v60 = vor.u32 %v13709_v33, %v12248_v40  ;;  %v13726_v33 = vld [vmem:[%s19043_s4 + $0x174] sm:$0xf0] }
 0xa6b   : > { %6930 = vmatpush.bf16.msra.mxu0 %v17914_v8  ;;  %v6487_v13 = vpop.f32.mrf.mxu1  ;;  %v12235_v52 = vor.u32 %v13705_v55, %v12232_v12  ;;  %v12302_v55 = vld [vmem:[%s19043_s4 + $0x150] sm:$0xf]  ;;  %v13722_v12 = vld [vmem:[%s19043_s4 + $0x154] sm:$0xf0] }
 0xa6c   : > { %v6315_v32 = vpack.c.bf16 %v6306_v50, %v6304_v3  ;;  %v6517_v29 = vadd.f32 %v6516_v24, %v6487_v13  ;;  %v13749_v24 = vld [vmem:[#allocation3 + $0x1b0] sm:$0xff]  ;;  %v13706_v50 = vld [vmem:[%s19043_s4 + $0x114] sm:$0xf0]  ;;  %v13748_v13 = vld [vmem:[#allocation3 + $0x1a8] sm:$0xff] }
 0xa6d   : > { %7141 = vmatpush.bf16.msrb.mxu3 %v17942_v48  ;;  %6723 = vmatmul.bf16.gmra.mxu1 %v12235_v52  ;;  %v12230_v3 = vld [vmem:[%s19043_s4 + $0x110] sm:$0xf] }
 0xa6e   : > { %6400 = vmatmul.bf16.gmra.mxu0 %v6315_v32  ;;  %v12231_v32 = vor.u32 %v13706_v50, %v12230_v3  ;;  %v13719_v3 = vld [vmem:[%s19043_s4 + $0x144] sm:$0xf]  ;;  %v12296_v50 = vld [vmem:[%s19043_s4 + $0x148] sm:$0xf0] }
 0xa71   : > { %7142 = vmatpush.bf16.msrb.mxu3 %v17934_v59  ;;  %v6308_v20 = vpop.f32.mrf.mxu3 }
 0xa72   : > { %v6309_v19 = vadd.f32 %v6308_v20, %v18296_v25  ;;  %v12222_v25 = vld [vmem:[%s19043_s4 + $0x100] sm:$0xf] }
 0xa73   : > { %v6489_v34 = vpop.f32.mrf.mxu1 }
 0xa74   : > { %v6519_v30 = vadd.f32 %v6518_v47, %v6489_v34  ;;  %v13766_v47 = vld [vmem:[#allocation3 + $0x1f8] sm:$0xff]  ;;  %v13765_v34 = vld [vmem:[#allocation3 + $0x1f0] sm:$0xff] }
 0xa75   : > { %7143 = vmatpush.bf16.msrb.mxu3 %v17914_v8 }
 0xa76   : > { %v6528_v35 = vpack.c.bf16 %v6519_v30, %v6517_v29  ;;  %v13747_v29 = vld [vmem:[#allocation3 + $0x1a0] sm:$0xff]  ;;  %v13746_v30 = vld [vmem:[#allocation3 + $0x198] sm:$0xff] }
 0xa78   : > { %6613 = vmatmul.bf16.gmra.mxu3 %v6528_v35  ;;  %v13764_v35 = vld [vmem:[#allocation3 + $0x1e8] sm:$0xff] }
 0xa79   : > { %v6310_v63 = vpop.f32.mrf.mxu3 }
 0xa7a   : > { %v6311_v5 = vadd.f32 %v6310_v63, %v18303_v17  ;;  %v13704_v17 = vld [vmem:[%s19043_s4 + $0x104] sm:$0xf0]  ;;  %v13745_v63 = vld [vmem:[#allocation3 + $0x190] sm:$0xff] }
 0xa7b   : > { %v6492_v36 = vpop.f32.mrf.mxu1  ;;  %v12223_v9 = vor.u32 %v13704_v17, %v12222_v25 }
 0xa7c   : > { %v6316_v54 = vpack.c.bf16 %v6311_v5, %v6309_v19  ;;  %v6522_v27 = vadd.f32 %v6521_v2, %v6492_v36  ;;  %v12303_v2 = vor.u32 %v13722_v12, %v12302_v55  ;;  %v13763_v19 = vld [vmem:[#allocation3 + $0x1e0] sm:$0xff]  ;;  %v13708_v36 = vld [vmem:[%s19043_s4 + $0x124] sm:$0xf0] }
 0xa7d   : > { %6728 = vmatmul.bf16.gmra.mxu1 %v12243_v6  ;;  %v12238_v5 = vld [vmem:[%s19043_s4 + $0x120] sm:$0xf]  ;;  %v13760_v6 = vld [vmem:[#allocation3 + $0x1c8] sm:$0xff] }
 0xa7e   : > { %6405 = vmatmul.bf16.gmra.mxu0 %v6316_v54  ;;  %v13744_v54 = vld [vmem:[#allocation3 + $0x188] sm:$0xff] }
 0xa83   : > { %v6494_v22 = vpop.f32.mrf.mxu1 }
 0xa84   : > { %v6524_v39 = vadd.f32 %v6523_v41, %v6494_v22  ;;  %v12239_v41 = vor.u32 %v13708_v36, %v12238_v5 }
 0xa86   : > { %v6529_v45 = vpack.c.bf16 %v6524_v39, %v6522_v27  ;;  %v13762_v27 = vld [vmem:[#allocation3 + $0x1d8] sm:$0xff]  ;;  %v13743_v39 = vld [vmem:[#allocation3 + $0x180] sm:$0xff] }
 0xa88   : > { %6618 = vmatmul.bf16.gmra.mxu3 %v6529_v45  ;;  %v13724_v45 = vld [vmem:[%s19043_s4 + $0x164] sm:$0xf0] }
 0xa89   : > { %v12311_v17 = vor.u32 %v13724_v45, %v12310_v57 }
 0xa8b   : > { %v18353_v43 = vpop.f32.mrf.mxu0 }
 0xa8d   : > { %6733 = vmatmul.bf16.gmra.mxu1 %v12251_v60 }
 0xa8e   : > { %6689 = vmatmul.bf16.vlgmr.msrb.gmra.mxu0 %v12223_v9  ;;  %v13759_v9 = vld [vmem:[#allocation3 + $0x1c0] sm:$0xff] }
 0xa8f   : > { %7234 = vmatpush.bf16.msrb.mxu0 %v13750_v42  ;;  %v12246_v42 = vld [vmem:[%s19043_s4 + $0x130] sm:$0xf] }
 0xa90   : > { %v12247_v18 = vor.u32 %v13710_v21, %v12246_v42 }
 0xa93   : > { %v18361_v49 = vpop.f32.mrf.mxu0  ;;  %7235 = vmatpush.bf16.msrb.mxu0 %v13749_v24  ;;  %v12318_v24 = vld [vmem:[%s19043_s4 + $0x170] sm:$0xf] }
 0xa94   : > { %v12319_v60 = vor.u32 %v13726_v33, %v12318_v24 }
 0xa97   : > { %7236 = vmatpush.bf16.msrb.mxu0 %v13748_v13  ;;  %v6187_v13 = vadd.f32 %v18268_v62, %v18353_v43  ;;  %v13721_v62 = vld [vmem:[%s19043_s4 + $0x154] sm:$0xf] }
 0xa98   : > { %6902 = vmatmul.bf16.vlgmr.msra.gmra.mxu3 %v12295_v37 }
 0xa99   : > { %7447 = vmatpush.bf16.msra.mxu3 %v13766_v47 }
 0xa9b   : > { %v18375_v20 = vpop.f32.mrf.mxu0  ;;  %7237 = vmatpush.bf16.msrb.mxu0 %v13747_v29 }
 0xa9c   : > { %v6192_v43 = vadd.f32 %v18284_v44, %v18375_v20 }
 0xa9d   : > { %7448 = vmatpush.bf16.msra.mxu3 %v13765_v34  ;;  %v13735_v34 = vld [vmem:[%s19043_s4 + $0x184] sm:$0xf] }
 0xa9e   : > { %6694 = vmatmul.bf16.gmra.mxu0 %v12231_v32  ;;  %v12299_v32 = vor.u32 %v13719_v3, %v12296_v50 }
 0xa9f   : > { %7238 = vmatpush.bf16.msrb.mxu0 %v13746_v30  ;;  %v12368_v30 = vld [vmem:[%s19043_s4 + $0x188] sm:$0xf0] }
 0xaa0   : > { %v12371_v12 = vor.u32 %v13735_v34, %v12368_v30 }
 0xaa1   : > { %7449 = vmatpush.bf16.msra.mxu3 %v13764_v35 }
 0xaa3   : > { %v18383_v52 = vpop.f32.mrf.mxu0  ;;  %7239 = vmatpush.bf16.msrb.mxu0 %v13745_v63 }
 0xaa5   : > { %7450 = vmatpush.bf16.msra.mxu3 %v13763_v19 }
 0xaa7   : > { %7240 = vmatpush.bf16.msrb.mxu0 %v13744_v54 }
 0xaa8   : > { %6907 = vmatmul.bf16.gmra.mxu3 %v12303_v2 }
 0xaa9   : > { %7451 = vmatpush.bf16.msra.mxu3 %v13762_v27 }
 0xaab   : > { %v18391_v22 = vpop.f32.mrf.mxu0  ;;  %7241 = vmatpush.bf16.msrb.mxu0 %v13743_v39 }
 0xaad   : > { %7452 = vmatpush.bf16.msra.mxu3 %v13761_v16 }
 0xaae   : > { %6699 = vmatmul.bf16.gmra.mxu0 %v12239_v41 }
 0xab1   : > { %7453 = vmatpush.bf16.msra.mxu3 %v13760_v6 }
 0xab3   : > { %v18399_v25 = vpop.f32.mrf.mxu0 }
 0xab5   : > { %7454 = vmatpush.bf16.msra.mxu3 %v13759_v9 }
 0xab8   : > { %6912 = vmatmul.bf16.gmra.mxu3 %v12311_v17  ;;  %v6719_v17 = vpop.f32.mrf.mxu1 }
 0xabb   : > { %v6124_v37 = vpop.f32.mrf.mxu0 }
 0xabe   : > { %6704 = vmatmul.bf16.gmra.mxu0 %v12247_v18 }
 0xac0   : > { %v6721_v21 = vpop.f32.mrf.mxu1 }
 0xac3   : > { %v18413_v40 = vpop.f32.mrf.mxu0 }
 0xac8   : > { %6917 = vmatmul.bf16.gmra.mxu3 %v12319_v60 }
 0xacb   : > { %v6391_v47 = vpop.f32.mrf.mxu0 }
 0xacc   : > { %v6411_v29 = vadd.f32 %v6391_v47, %v6187_v13 }
 0xace   : > { %6931 = vmatmul.bf16.vlgmr.msra.gmra.mxu0 %v12299_v32 }
 0xacf   : > { %7533 = vmatpush.bf16.msra.mxu0 %v17894_v53  ;;  %v12304_v53 = vld [vmem:[%s19043_s4 + $0x158] sm:$0xf0] }
 0xad3   : > { %7534 = vmatpush.bf16.msra.mxu0 %v17885_v10  ;;  %v18431_v55 = vpop.f32.mrf.mxu0  ;;  %v12307_v10 = vor.u32 %v13721_v62, %v12304_v53 }
 0xad7   : > { %7535 = vmatpush.bf16.msra.mxu0 %v17876_v38 }
 0xad8   : > { %7144 = vmatmul.bf16.vlgmr.msrb.gmra.mxu3 %v12371_v12 }
 0xad9   : > { %13945 = vmatpush.bf16.msrb.mxu3 %v18020_v11 }
 0xadb   : > { %7536 = vmatpush.bf16.msra.mxu0 %v17867_v58  ;;  %v6396_v35 = vpop.f32.mrf.mxu0  ;;  %v6604_v2 = vpop.f32.mrf.mxu3  ;;  %v13723_v58 = vld [vmem:[%s19043_s4 + $0x164] sm:$0xf] }
 0xadc   : > { %v6413_v38 = vadd.f32 %v6396_v35, %v6192_v43  ;;  %v18444_v63 = vadd.f32 %v6604_v2, %v6411_v29 }
 0xadd   : > { %13946 = vmatpush.bf16.msrb.mxu3 %v18007_v7 }
 0xade   : > { %6936 = vmatmul.bf16.gmra.mxu0 %v12307_v10 }
 0xadf   : > { %7537 = vmatpush.bf16.msra.mxu0 %v17859_v0  ;;  %v12312_v0 = vld [vmem:[%s19043_s4 + $0x168] sm:$0xf0] }
 0xae0   : > { %v12315_v20 = vor.u32 %v13723_v58, %v12312_v0 }
 0xae1   : > { %13947 = vmatpush.bf16.msrb.mxu3 %v17988_v56 }
 0xae3   : > { %7538 = vmatpush.bf16.msra.mxu0 %v17853_v14  ;;  %v18450_v19 = vpop.f32.mrf.mxu0  ;;  %v18452_v44 = vpop.f32.mrf.mxu3  ;;  %v6197_v14 = vadd.f32 %v18301_v61, %v18391_v22  ;;  %v12320_v61 = vld [vmem:[%s19043_s4 + $0x178] sm:$0xf0]  ;;  %v6202_v22 = vadd.f32 %v18307_v1, %v6124_v37 }
 0xae5   : > { %13948 = vmatpush.bf16.msrb.mxu3 %v17969_v51 }
 0xae7   : > { %7539 = vmatpush.bf16.msra.mxu0 %v17847_v4 }
 0xae9   : > { %13949 = vmatpush.bf16.msrb.mxu3 %v17956_v26 }
 0xaea   : > { %v6724_v60 = vpop.f32.mrf.mxu1 }
 0xaeb   : > { %7540 = vmatpush.bf16.msra.mxu0 %v17841_v15  ;;  %v6401_v5 = vpop.f32.mrf.mxu0  ;;  %v6609_v36 = vpop.f32.mrf.mxu3  ;;  %v13725_v15 = vld [vmem:[%s19043_s4 + $0x174] sm:$0xf] }
 0xaec   : > { %v6415_v54 = vadd.f32 %v6401_v5, %v6197_v14  ;;  %v18466_v4 = vadd.f32 %v6609_v36, %v6413_v38  ;;  %v12323_v39 = vor.u32 %v13725_v15, %v12320_v61  ;;  %v13737_v61 = vld [vmem:[%s19043_s4 + $0x194] sm:$0xf] }
 0xaed   : > { %13950 = vmatpush.bf16.msrb.mxu3 %v17942_v48 }
 0xaee   : > { %6941 = vmatmul.bf16.gmra.mxu0 %v12315_v20 }
 0xaf1   : > { %13951 = vmatpush.bf16.msrb.mxu3 %v17934_v59 }
 0xaf2   : > { %v6726_v32 = vpop.f32.mrf.mxu1 }
 0xaf3   : > { %v18470_v41 = vpop.f32.mrf.mxu0  ;;  %v18472_v27 = vpop.f32.mrf.mxu3 }
 0xaf5   : > { %13952 = vmatpush.bf16.msrb.mxu3 %v17914_v8 }
 0xafa   : > { %v6729_v30 = vpop.f32.mrf.mxu1 }
 0xafb   : > { %v6406_v16 = vpop.f32.mrf.mxu0  ;;  %v6614_v57 = vpop.f32.mrf.mxu3 }
 0xafc   : > { %v6417_v45 = vadd.f32 %v6406_v16, %v6202_v22  ;;  %v18482_v6 = vadd.f32 %v6614_v57, %v6415_v54 }
 0xafe   : > { %6946 = vmatmul.bf16.gmra.mxu0 %v12323_v39  ;;  %v12376_v39 = vld [vmem:[%s19043_s4 + $0x198] sm:$0xf0] }
 0xaff   : > { %v12379_v16 = vor.u32 %v13737_v61, %v12376_v39 }
 0xb01   : > { %7149 = vmatmul.bf16.gmra.mxu3 %v12379_v16 }
 0xb02   : > { %v6731_v53 = vpop.f32.mrf.mxu1 }
 0xb03   : > { %v18484_v9 = vpop.f32.mrf.mxu0  ;;  %v18486_v42 = vpop.f32.mrf.mxu3 }
 0xb0a   : > { %v6734_v58 = vpop.f32.mrf.mxu1 }
 0xb0b   : > { %v6619_v18 = vpop.f32.mrf.mxu3  ;;  %v6690_v24 = vpop.f32.mrf.mxu0 }
 0xb0c   : > { %v18488_v33 = vadd.f32 %v6619_v18, %v6417_v45  ;;  %v6720_v1 = vadd.f32 %v6719_v17, %v6690_v24  ;;  %v12366_v45 = vld [vmem:[%s19043_s4 + $0x180] sm:$0xf]  ;;  %v13736_v17 = vld [vmem:[%s19043_s4 + $0x184] sm:$0xf0] }
 0xb12   : > { %v6736_v5 = vpop.f32.mrf.mxu1 }
 0xb13   : > { %v6692_v3 = vpop.f32.mrf.mxu0  ;;  %v18497_v2 = vpop.f32.mrf.mxu3 }
 0xb14   : > { %v6722_v37 = vadd.f32 %v6721_v21, %v6692_v3  ;;  %v12367_v3 = vor.u32 %v13736_v17, %v12366_v45  ;;  %v12440_v45 = vld [vmem:[%s19043_s4 + $0x1c8] sm:$0xf0]  ;;  %v12438_v17 = vld [vmem:[%s19043_s4 + $0x1c0] sm:$0xf] }
 0xb16   : > { %v6739_v50 = vpack.c.bf16 %v6722_v37, %v6720_v1  ;;  %v13739_v37 = vld [vmem:[%s19043_s4 + $0x1a4] sm:$0xf] }
 0xb18   : > { %6816 = vmatmul.bf16.vlgmr.msrb.gmra.mxu2 %v6739_v50  ;;  %v12384_v50 = vld [vmem:[%s19043_s4 + $0x1a8] sm:$0xf0] }
 0xb19   : > { %7349 = vmatpush.bf16.msrb.mxu2 %v18020_v11 }
 0xb1b   : > { %v6695_v13 = vpop.f32.mrf.mxu0  ;;  %v6903_v14 = vpop.f32.mrf.mxu3 }
 0xb1c   : > { %v6725_v29 = vadd.f32 %v6724_v60, %v6695_v13  ;;  %v12387_v13 = vor.u32 %v13739_v37, %v12384_v50  ;;  %v12448_v37 = vld [vmem:[%s19043_s4 + $0x1d8] sm:$0xf0]  ;;  %v12446_v50 = vld [vmem:[%s19043_s4 + $0x1d0] sm:$0xf] }
 0xb1d   : > { %7350 = vmatpush.bf16.msrb.mxu2 %v18007_v7 }
 0xb1e   : > { %7154 = vmatmul.bf16.gmra.mxu3 %v12387_v13  ;;  %v13754_v13 = vld [vmem:[%s19043_s4 + $0x1d4] sm:$0xf0] }
 0xb21   : > { %7351 = vmatpush.bf16.msrb.mxu2 %v17988_v56 }
 0xb23   : > { %v6697_v47 = vpop.f32.mrf.mxu0  ;;  %v6905_v22 = vpop.f32.mrf.mxu3 }
 0xb24   : > { %v6727_v34 = vadd.f32 %v6726_v32, %v6697_v47 }
 0xb25   : > { %7352 = vmatpush.bf16.msrb.mxu2 %v17969_v51 }
 0xb26   : > { %v6740_v12 = vpack.c.bf16 %v6727_v34, %v6725_v29  ;;  %v12374_v29 = vld [vmem:[%s19043_s4 + $0x190] sm:$0xf]  ;;  %v13738_v34 = vld [vmem:[%s19043_s4 + $0x194] sm:$0xf0] }
 0xb28   : > { %6821 = vmatmul.bf16.gmra.mxu2 %v6740_v12 }
 0xb29   : > { %7353 = vmatpush.bf16.msrb.mxu2 %v17956_v26 }
 0xb2b   : > { %v6700_v62 = vpop.f32.mrf.mxu0  ;;  %v6908_v21 = vpop.f32.mrf.mxu3 }
 0xb2c   : > { %v6730_v10 = vadd.f32 %v6729_v30, %v6700_v62 }
 0xb2d   : > { %7354 = vmatpush.bf16.msrb.mxu2 %v17942_v48 }
 0xb31   : > { %7355 = vmatpush.bf16.msrb.mxu2 %v17934_v59 }
 0xb33   : > { %v6702_v43 = vpop.f32.mrf.mxu0  ;;  %v6910_v47 = vpop.f32.mrf.mxu3 }
 0xb34   : > { %v6732_v35 = vadd.f32 %v6731_v53, %v6702_v43  ;;  %v12375_v53 = vor.u32 %v13738_v34, %v12374_v29 }
 0xb35   : > { %7356 = vmatpush.bf16.msrb.mxu2 %v17914_v8 }
 0xb36   : > { %v6741_v38 = vpack.c.bf16 %v6732_v35, %v6730_v10 }
 0xb38   : > { %6826 = vmatmul.bf16.gmra.mxu2 %v6741_v38  ;;  %v12382_v38 = vld [vmem:[%s19043_s4 + $0x1a0] sm:$0xf] }
 0xb3b   : > { %v6705_v0 = vpop.f32.mrf.mxu0 }
 0xb3c   : > { %v6735_v36 = vadd.f32 %v6734_v58, %v6705_v0  ;;  %v13740_v58 = vld [vmem:[%s19043_s4 + $0x1a4] sm:$0xf0] }
 0xb43   : > { %v6707_v20 = vpop.f32.mrf.mxu0 }
 0xb44   : > { %v6737_v54 = vadd.f32 %v6736_v5, %v6707_v20  ;;  %v12383_v5 = vor.u32 %v13740_v58, %v12382_v38  ;;  %v13758_v38 = vld [vmem:[%s19043_s4 + $0x1f4] sm:$0xf0] }
 0xb46   : > { %v6742_v15 = vpack.c.bf16 %v6737_v54, %v6735_v36  ;;  %v13742_v54 = vld [vmem:[%s19043_s4 + $0x1b4] sm:$0xf0] }
 0xb48   : > { %6831 = vmatmul.bf16.gmra.mxu2 %v6742_v15 }
 0xb4b   : > { %v6932_v57 = vpop.f32.mrf.mxu0 }
 0xb4c   : > { %v6933_v24 = vadd.f32 %v6932_v57, %v6903_v14 }
 0xb53   : > { %v6934_v18 = vpop.f32.mrf.mxu0 }
 0xb54   : > { %v6935_v60 = vadd.f32 %v6934_v18, %v6905_v22 }
 0xb56   : > { %v6952_v1 = vpack.c.bf16 %v6935_v60, %v6933_v24 }
 0xb58   : > { %7029 = vmatmul.bf16.vlgmr.msra.gmra.mxu1 %v6952_v1  ;;  %7115 = vmatmul.bf16.vlgmr.msra.gmra.mxu2 %v12367_v3  ;;  %v13753_v1 = vld [vmem:[%s19043_s4 + $0x1d4] sm:$0xf] }
 0xb59   : > { %7562 = vmatpush.bf16.msra.mxu1 %v18020_v11  ;;  %v6913_v11 = vpop.f32.mrf.mxu3 }
 0xb5b   : > { %v6937_v32 = vpop.f32.mrf.mxu0 }
 0xb5c   : > { %v6938_v12 = vadd.f32 %v6937_v32, %v6908_v21  ;;  %v13752_v21 = vld [vmem:[%s19043_s4 + $0x1c4] sm:$0xf0] }
 0xb5d   : > { %7563 = vmatpush.bf16.msra.mxu1 %v18007_v7  ;;  %v12392_v7 = vld [vmem:[%s19043_s4 + $0x1b8] sm:$0xf0]  ;;  %v12439_v24 = vor.u32 %v13752_v21, %v12438_v17 }
 0xb61   : > { %7564 = vmatpush.bf16.msra.mxu1 %v17988_v56  ;;  %v13741_v56 = vld [vmem:[%s19043_s4 + $0x1b4] sm:$0xf] }
 0xb62   : > { %v12395_v10 = vor.u32 %v13741_v56, %v12392_v7 }
 0xb63   : > { %v6939_v30 = vpop.f32.mrf.mxu0 }
 0xb64   : > { %v6940_v62 = vadd.f32 %v6939_v30, %v6910_v47  ;;  %7159 = vmatmul.bf16.gmra.mxu3 %v12395_v10  ;;  %v12451_v47 = vor.u32 %v13753_v1, %v12448_v37  ;;  %v13755_v30 = vld [vmem:[%s19043_s4 + $0x1e4] sm:$0xf]  ;;  %v13757_v10 = vld [vmem:[%s19043_s4 + $0x1f4] sm:$0xf] }
 0xb65   : > { %7565 = vmatpush.bf16.msra.mxu1 %v17969_v51  ;;  %v6915_v51 = vpop.f32.mrf.mxu3 }
 0xb66   : > { %v6953_v43 = vpack.c.bf16 %v6940_v62, %v6938_v12  ;;  %v12456_v12 = vld [vmem:[%s19043_s4 + $0x1e8] sm:$0xf0]  ;;  %v12454_v62 = vld [vmem:[%s19043_s4 + $0x1e0] sm:$0xf] }
 0xb68   : > { %7034 = vmatmul.bf16.gmra.mxu1 %v6953_v43  ;;  %7120 = vmatmul.bf16.gmra.mxu2 %v12375_v53  ;;  %v13756_v53 = vld [vmem:[%s19043_s4 + $0x1e4] sm:$0xf0]  ;;  %v12459_v43 = vor.u32 %v13755_v30, %v12456_v12 }
 0xb69   : > { %7566 = vmatpush.bf16.msra.mxu1 %v17956_v26 }
 0xb6b   : > { %v6942_v35 = vpop.f32.mrf.mxu0 }
 0xb6c   : > { %v6943_v14 = vadd.f32 %v6942_v35, %v6913_v11  ;;  %v12464_v35 = vld [vmem:[%s19043_s4 + $0x1f8] sm:$0xf0] }
 0xb6d   : > { %7567 = vmatpush.bf16.msra.mxu1 %v17942_v48  ;;  %v6918_v48 = vpop.f32.mrf.mxu3 }
 0xb71   : > { %7568 = vmatpush.bf16.msra.mxu1 %v17934_v59  ;;  %v12390_v59 = vld [vmem:[%s19043_s4 + $0x1b0] sm:$0xf] }
 0xb72   : > { %v12391_v16 = vor.u32 %v13742_v54, %v12390_v59 }
 0xb73   : > { %v6944_v0 = vpop.f32.mrf.mxu0 }
 0xb74   : > { %v6945_v20 = vadd.f32 %v6944_v0, %v6915_v51  ;;  %v12462_v51 = vld [vmem:[%s19043_s4 + $0x1f0] sm:$0xf]  ;;  %v12467_v0 = vor.u32 %v13757_v10, %v12464_v35 }
 0xb75   : > { %7569 = vmatpush.bf16.msra.mxu1 %v17914_v8  ;;  %v6920_v15 = vpop.f32.mrf.mxu3  ;;  %v13751_v8 = vld [vmem:[%s19043_s4 + $0x1c4] sm:$0xf] }
 0xb76   : > { %v6954_v26 = vpack.c.bf16 %v6945_v20, %v6943_v14  ;;  %v12443_v18 = vor.u32 %v13751_v8, %v12440_v45 }
 0xb78   : > { %7039 = vmatmul.bf16.gmra.mxu1 %v6954_v26  ;;  %7125 = vmatmul.bf16.gmra.mxu2 %v12383_v5 }
 0xb7b   : > { %v6947_v36 = vpop.f32.mrf.mxu0 }
 0xb7c   : > { %v6948_v22 = vadd.f32 %v6947_v36, %v6918_v48 }
 0xb7d   : > { %v7145_v20 = vpop.f32.mrf.mxu3 }
 0xb83   : > { %v6949_v61 = vpop.f32.mrf.mxu0 }
 0xb84   : > { %v6950_v39 = vadd.f32 %v6949_v61, %v6920_v15 }
 0xb85   : > { %v7147_v36 = vpop.f32.mrf.mxu3 }
 0xb86   : > { %v6955_v57 = vpack.c.bf16 %v6950_v39, %v6948_v22 }
 0xb88   : > { %7044 = vmatmul.bf16.gmra.mxu1 %v6955_v57  ;;  %7130 = vmatmul.bf16.gmra.mxu2 %v12391_v16 }
 0xb8d   : > { %v7150_v61 = vpop.f32.mrf.mxu3 }
 0xb95   : > { %v7152_v17 = vpop.f32.mrf.mxu3 }
 0xb98   : > { %7357 = vmatmul.bf16.vlgmr.msrb.gmra.mxu2 %v12443_v18  ;;  %7328 = vmatmul.bf16.vlgmr.msrb.gmra.mxu1 %v12439_v24 }
 0xb9b   : > { %v6817_v60 = vpop.f32.mrf.mxu2 }
 0xb9c   : > { %v6837_v3 = vadd.f32 %v6817_v60, %v18444_v63  ;;  %v12447_v63 = vor.u32 %v13754_v13, %v12446_v50 }
 0xba1   : > { %v7155_v24 = vpop.f32.mrf.mxu3 }
 0xba3   : > { %v18575_v32 = vpop.f32.mrf.mxu2 }
 0xba8   : > { %7362 = vmatmul.bf16.gmra.mxu2 %v12451_v47  ;;  %7333 = vmatmul.bf16.gmra.mxu1 %v12447_v63 }
 0xba9   : > { %v7157_v63 = vpop.f32.mrf.mxu3 }
 0xbab   : > { %v6822_v29 = vpop.f32.mrf.mxu2 }
 0xbac   : > { %v6839_v34 = vadd.f32 %v6822_v29, %v18466_v4  ;;  %v12455_v4 = vor.u32 %v13756_v53, %v12454_v62 }
 0xbb3   : > { %v18590_v11 = vpop.f32.mrf.mxu2 }
 0xbb8   : > { %7367 = vmatmul.bf16.gmra.mxu2 %v12459_v43  ;;  %7338 = vmatmul.bf16.gmra.mxu1 %v12455_v4  ;;  %v13767_v43 = vld [vmem:[%s19043_s4 + $0x204] sm:$0xf] }
 0xbbb   : > { %v6827_v56 = vpop.f32.mrf.mxu2 }
 0xbbc   : > { %v6841_v7 = vadd.f32 %v6827_v56, %v18482_v6  ;;  %v12463_v6 = vor.u32 %v13758_v38, %v12462_v51  ;;  %v12512_v56 = vld [vmem:[%s19043_s4 + $0x208] sm:$0xf0] }
 0xbc3   : > { %v18605_v58 = vpop.f32.mrf.mxu2 }
 0xbc8   : > { %7372 = vmatmul.bf16.gmra.mxu2 %v12467_v0  ;;  %7343 = vmatmul.bf16.gmra.mxu1 %v12463_v6 }
 0xbcb   : > { %v6832_v14 = vpop.f32.mrf.mxu2 }
 0xbcc   : > { %v6843_v5 = vadd.f32 %v6832_v14, %v18488_v33 }
 0xbd3   : > { %v18608_v26 = vpop.f32.mrf.mxu2 }
 0xbd5   : > { %v7030_v48 = vpop.f32.mrf.mxu1 }
 0xbd6   : > { %v18610_v59 = vadd.f32 %v7030_v48, %v6837_v3  ;;  %v12520_v48 = vld [vmem:[%s19043_s4 + $0x218] sm:$0xf0] }
 0xbdb   : > { %v7116_v54 = vpop.f32.mrf.mxu2 }
 0xbdc   : > { %v7146_v39 = vadd.f32 %v7145_v20, %v7116_v54 }
 0xbdd   : > { %v18612_v15 = vpop.f32.mrf.mxu1 }
 0xbe3   : > { %v7118_v22 = vpop.f32.mrf.mxu2 }
 0xbe4   : > { %v7148_v16 = vadd.f32 %v7147_v36, %v7118_v22  ;;  %v12510_v22 = vld [vmem:[%s19043_s4 + $0x200] sm:$0xf] }
 0xbe5   : > { %v7035_v57 = vpop.f32.mrf.mxu1 }
 0xbe6   : > { %v7165_v8 = vpack.c.bf16 %v7148_v16, %v7146_v39  ;;  %v18614_v45 = vadd.f32 %v7035_v57, %v6839_v34  ;;  %v13768_v39 = vld [vmem:[%s19043_s4 + $0x204] sm:$0xf0] }
 0xbe7   : > { %v7160_v4 = vpop.f32.mrf.mxu3 }
 0xbe8   : > { %7242 = vmatmul.bf16.vlgmr.msrb.gmra.mxu0 %v7165_v8 }
 0xbeb   : > { %v7121_v33 = vpop.f32.mrf.mxu2 }
 0xbec   : > { %v7151_v60 = vadd.f32 %v7150_v61, %v7121_v33 }
 0xbed   : > { %v18616_v21 = vpop.f32.mrf.mxu1 }
 0xbef   : > { %v7162_v51 = vpop.f32.mrf.mxu3 }
 0xbf3   : > { %v7123_v18 = vpop.f32.mrf.mxu2 }
 0xbf4   : > { %v7153_v3 = vadd.f32 %v7152_v17, %v7123_v18  ;;  %v12511_v17 = vor.u32 %v13768_v39, %v12510_v22 }
 0xbf5   : > { %v7040_v1 = vpop.f32.mrf.mxu1 }
 0xbf6   : > { %v7166_v37 = vpack.c.bf16 %v7153_v3, %v7151_v60  ;;  %v18618_v50 = vadd.f32 %v7040_v1, %v6841_v7  ;;  %v12515_v7 = vor.u32 %v13767_v43, %v12512_v56  ;;  %v12528_v60 = vld [vmem:[%s19043_s4 + $0x228] sm:$0xf0] }
 0xbf8   : > { %7247 = vmatmul.bf16.gmra.mxu0 %v7166_v37  ;;  %7570 = vmatmul.bf16.vlgmr.msra.gmra.mxu1 %v12515_v7  ;;  %v12526_v7 = vld [vmem:[%s19043_s4 + $0x220] sm:$0xf] }
 0xbfb   : > { %v7126_v13 = vpop.f32.mrf.mxu2 }
 0xbfc   : > { %v7156_v34 = vadd.f32 %v7155_v24, %v7126_v13  ;;  %v13771_v24 = vld [vmem:[%s19043_s4 + $0x224] sm:$0xf]  ;;  %v12518_v13 = vld [vmem:[%s19043_s4 + $0x210] sm:$0xf] }
 0xbfd   : > { %v18620_v47 = vpop.f32.mrf.mxu1  ;;  %v12531_v3 = vor.u32 %v13771_v24, %v12528_v60 }
 0xc03   : > { %v7128_v29 = vpop.f32.mrf.mxu2 }
 0xc04   : > { %v7158_v30 = vadd.f32 %v7157_v63, %v7128_v29  ;;  %v13770_v63 = vld [vmem:[%s19043_s4 + $0x214] sm:$0xf0] }
 0xc05   : > { %v7045_v12 = vpop.f32.mrf.mxu1 }
 0xc06   : > { %v7167_v62 = vpack.c.bf16 %v7158_v30, %v7156_v34  ;;  %v18622_v53 = vadd.f32 %v7045_v12, %v6843_v5  ;;  %v13769_v5 = vld [vmem:[%s19043_s4 + $0x214] sm:$0xf]  ;;  %v12519_v12 = vor.u32 %v13770_v63, %v12518_v13  ;;  %v13780_v63 = vld [vmem:[#allocation3 + $0x228] sm:$0xff] }
 0xc07   : > { %v12523_v36 = vor.u32 %v13769_v5, %v12520_v48  ;;  %v12534_v48 = vld [vmem:[%s19043_s4 + $0x230] sm:$0xf] }
 0xc08   : > { %7252 = vmatmul.bf16.gmra.mxu0 %v7167_v62  ;;  %v13781_v13 = vld [vmem:[#allocation3 + $0x230] sm:$0xff] }
 0xc09   : > { %7575 = vmatmul.bf16.gmra.mxu1 %v12523_v36  ;;  %v13774_v36 = vld [vmem:[%s19043_s4 + $0x234] sm:$0xf0] }
 0xc0b   : > { %v7131_v10 = vpop.f32.mrf.mxu2 }
 0xc0c   : > { %v7161_v0 = vadd.f32 %v7160_v4, %v7131_v10  ;;  %v13772_v10 = vld [vmem:[%s19043_s4 + $0x224] sm:$0xf0] }
 0xc0d   : > { %v18630_v35 = vpop.f32.mrf.mxu1 }
 0xc13   : > { %v7133_v38 = vpop.f32.mrf.mxu2 }
 0xc14   : > { %v7163_v6 = vadd.f32 %v7162_v51, %v7133_v38 }
 0xc15   : > { %v7329_v14 = vpop.f32.mrf.mxu1 }
 0xc16   : > { %v7168_v20 = vpack.c.bf16 %v7163_v6, %v7161_v0  ;;  %v12527_v6 = vor.u32 %v13772_v10, %v12526_v7 }
 0xc18   : > { %7257 = vmatmul.bf16.gmra.mxu0 %v7168_v20 }
 0xc19   : > { %7580 = vmatmul.bf16.gmra.mxu1 %v12531_v3  ;;  %v13782_v3 = vld [vmem:[#allocation3 + $0x238] sm:$0xff] }
 0xc1a   : > { %7660 = vmatpush.bf16.msra.mxu2 %v13782_v3 }
 0xc1b   : > { %v7358_v54 = vpop.f32.mrf.mxu2 }
 0xc1c   : > { %v7359_v57 = vadd.f32 %v7358_v54, %v7329_v14 }
 0xc1d   : > { %v7331_v61 = vpop.f32.mrf.mxu1 }
 0xc1e   : > { %7661 = vmatpush.bf16.msra.mxu2 %v13781_v13 }
 0xc22   : > { %7662 = vmatpush.bf16.msra.mxu2 %v13780_v63 }
 0xc23   : > { %v7360_v16 = vpop.f32.mrf.mxu2 }
 0xc24   : > { %v7361_v8 = vadd.f32 %v7360_v16, %v7331_v61  ;;  %v12535_v16 = vor.u32 %v13774_v36, %v12534_v48 }
 0xc25   : > { %v7334_v33 = vpop.f32.mrf.mxu1 }
 0xc26   : > { %v7378_v18 = vpack.c.bf16 %v7361_v8, %v7359_v57  ;;  %v13773_v8 = vld [vmem:[%s19043_s4 + $0x234] sm:$0xf] }
 0xc28   : > { %7455 = vmatmul.bf16.vlgmr.msra.gmra.mxu3 %v7378_v18  ;;  %7541 = vmatmul.bf16.vlgmr.msra.gmra.mxu0 %v12511_v17  ;;  %v12536_v17 = vld [vmem:[%s19043_s4 + $0x238] sm:$0xf0] }
 0xc2b   : > { %v7363_v1 = vpop.f32.mrf.mxu2 }
 0xc2c   : > { %v7364_v34 = vadd.f32 %v7363_v1, %v7334_v33  ;;  %v12539_v33 = vor.u32 %v13773_v8, %v12536_v17 }
 0xc2d   : > { %v7336_v37 = vpop.f32.mrf.mxu1 }
 0xc33   : > { %v7365_v29 = vpop.f32.mrf.mxu2 }
 0xc34   : > { %v7366_v30 = vadd.f32 %v7365_v29, %v7336_v37 }
 0xc35   : > { %v7339_v62 = vpop.f32.mrf.mxu1 }
 0xc36   : > { %v7379_v43 = vpack.c.bf16 %v7366_v30, %v7364_v34  ;;  %v13779_v34 = vld [vmem:[#allocation3 + $0x220] sm:$0xff]  ;;  %v13778_v30 = vld [vmem:[#allocation3 + $0x218] sm:$0xff] }
 0xc37   : > { %7663 = vmatpush.bf16.msra.mxu2 %v13779_v34 }
 0xc38   : > { %7460 = vmatmul.bf16.gmra.mxu3 %v7379_v43  ;;  %7546 = vmatmul.bf16.gmra.mxu0 %v12519_v12  ;;  %v13776_v43 = vld [vmem:[#allocation3 + $0x208] sm:$0xff] }
 0xc3b   : > { %v7368_v4 = vpop.f32.mrf.mxu2  ;;  %7664 = vmatpush.bf16.msra.mxu2 %v13778_v30 }
 0xc3c   : > { %v7369_v38 = vadd.f32 %v7368_v4, %v7339_v62  ;;  %v13777_v62 = vld [vmem:[#allocation3 + $0x210] sm:$0xff] }
 0xc3d   : > { %v7341_v56 = vpop.f32.mrf.mxu1 }
 0xc3f   : > { %7665 = vmatpush.bf16.msra.mxu2 %v13777_v62 }
 0xc43   : > { %v7370_v51 = vpop.f32.mrf.mxu2  ;;  %7666 = vmatpush.bf16.msra.mxu2 %v13776_v43 }
 0xc44   : > { %v7371_v0 = vadd.f32 %v7370_v51, %v7341_v56 }
 0xc45   : > { %v7344_v20 = vpop.f32.mrf.mxu1 }
 0xc46   : > { %v7380_v14 = vpack.c.bf16 %v7371_v0, %v7369_v38 }
 0xc48   : > { %7465 = vmatmul.bf16.gmra.mxu3 %v7380_v14  ;;  %7551 = vmatmul.bf16.gmra.mxu0 %v12527_v6 }
 0xc4b   : > { %v7373_v5 = vpop.f32.mrf.mxu2 }
 0xc4c   : > { %v7374_v22 = vadd.f32 %v7373_v5, %v7344_v20 }
 0xc4d   : > { %v7346_v54 = vpop.f32.mrf.mxu1 }
 0xc53   : > { %v7375_v61 = vpop.f32.mrf.mxu2 }
 0xc54   : > { %v7376_v39 = vadd.f32 %v7375_v61, %v7346_v54 }
 0xc56   : > { %v7381_v57 = vpack.c.bf16 %v7376_v39, %v7374_v22 }
 0xc58   : > { %7470 = vmatmul.bf16.gmra.mxu3 %v7381_v57  ;;  %7556 = vmatmul.bf16.gmra.mxu0 %v12535_v16 }
 0xc65   : > { %v7243_v18 = vpop.f32.mrf.mxu0 }
 0xc66   : > { %v7263_v24 = vadd.f32 %v7243_v18, %v18610_v59 }
 0xc68   : > { %7585 = vmatmul.bf16.vlgmr.msrb.gmra.mxu3 %v12539_v33 }
 0xc6d   : > { %v18675_v60 = vpop.f32.mrf.mxu0 }
 0xc75   : > { %v7248_v1 = vpop.f32.mrf.mxu0  ;;  %v7571_v10 = vpop.f32.mrf.mxu1 }
 0xc76   : > { %v7265_v37 = vadd.f32 %v7248_v1, %v18614_v45  ;;  %v13775_v45 = vld [vmem:[#allocation3 + $0x200] sm:$0xff] }
 0xc77   : > { %7667 = vmatpush.bf16.msra.mxu2 %v13775_v45 }
 0xc7d   : > { %v18678_v29 = vpop.f32.mrf.mxu0  ;;  %v7573_v38 = vpop.f32.mrf.mxu1 }
 0xc85   : > { %v7253_v12 = vpop.f32.mrf.mxu0 }
 0xc86   : > { %v7267_v59 = vadd.f32 %v7253_v12, %v18618_v50  ;;  %v7576_v50 = vpop.f32.mrf.mxu1 }
 0xc8d   : > { %v18681_v4 = vpop.f32.mrf.mxu0 }
 0xc8e   : > { %v7578_v22 = vpop.f32.mrf.mxu1 }
 0xc95   : > { %v7258_v56 = vpop.f32.mrf.mxu0 }
 0xc96   : > { %v7269_v7 = vadd.f32 %v7258_v56, %v18622_v53  ;;  %v7581_v33 = vpop.f32.mrf.mxu1 }
 0xc9d   : > { %v7260_v51 = vpop.f32.mrf.mxu0 }
 0xca5   : > { %v7542_v0 = vpop.f32.mrf.mxu0 }
 0xca6   : > { %v7572_v14 = vadd.f32 %v7571_v10, %v7542_v0 }
 0xcab   : > { %v7456_v6 = vpop.f32.mrf.mxu3 }
 0xcac   : > { %v7476_v20 = vadd.f32 %v7456_v6, %v7263_v24  ;;  %v7583_v24 = vpop.f32.mrf.mxu1 }
 0xcad   : > { %v7544_v5 = vpop.f32.mrf.mxu0 }
 0xcae   : > { %v7574_v48 = vadd.f32 %v7573_v38, %v7544_v5 }
 0xcb0   : > { %v7591_v36 = vpack.c.bf16 %v7574_v48, %v7572_v14 }
 0xcb2   : > { %7668 = vmatmul.bf16.vlgmr.msra.gmra.mxu2 %v7591_v36 }
 0xcb3   : > { %v7458_v54 = vpop.f32.mrf.mxu3 }
 0xcb5   : > { %v7547_v61 = vpop.f32.mrf.mxu0 }
 0xcb6   : > { %v7577_v16 = vadd.f32 %v7576_v50, %v7547_v61 }
 0xcbb   : > { %v7461_v39 = vpop.f32.mrf.mxu3 }
 0xcbc   : > { %v7478_v57 = vadd.f32 %v7461_v39, %v7265_v37  ;;  %v6204_v37 = vadd.f32 %v18309_v23, %v18413_v40  ;;  %v14025_v39 = vld [vmem:[%s19045_s6] ss:$0 sm:$0xff] }
 0xcbd   : > { %v7549_v8 = vpop.f32.mrf.mxu0 }
 0xcbe   : > { %v7579_v53 = vadd.f32 %v7578_v22, %v7549_v8  ;;  %v6418_v43 = vadd.f32 %v18484_v9, %v6204_v37 }
 0xcc0   : > { %v7592_v17 = vpack.c.bf16 %v7579_v53, %v7577_v16  ;;  %v6631_v56 = vadd.f32 %v18497_v2, %v6418_v43  ;;  %v6189_v2 = vadd.f32 %v18274_v46, %v18361_v49  ;;  %v6194_v49 = vadd.f32 %v18292_v28, %v18383_v52 }
 0xcc2   : > { %7673 = vmatmul.bf16.gmra.mxu2 %v7592_v17  ;;  %v6844_v38 = vadd.f32 %v18608_v26, %v6631_v56 }
 0xcc3   : > { %v7463_v18 = vpop.f32.mrf.mxu3 }
 0xcc5   : > { %v7552_v3 = vpop.f32.mrf.mxu0 }
 0xcc6   : > { %v7582_v13 = vadd.f32 %v7581_v33, %v7552_v3 }
 0xccb   : > { %v7466_v1 = vpop.f32.mrf.mxu3 }
 0xccc   : > { %v18684_v63 = vadd.f32 %v7466_v1, %v7267_v59  ;;  %v7057_v59 = vadd.f32 %v18630_v35, %v6844_v38 }
 0xccd   : > { %v7554_v34 = vpop.f32.mrf.mxu0 }
 0xcce   : > { %v7584_v30 = vadd.f32 %v7583_v24, %v7554_v34  ;;  %v7270_v0 = vadd.f32 %v7260_v51, %v7057_v59 }
 0xcd0   : > { %v7593_v12 = vpack.c.bf16 %v7584_v30, %v7582_v13 }
 0xcd2   : > { %7678 = vmatmul.bf16.gmra.mxu2 %v7593_v12  ;;  %v6199_v12 = vadd.f32 %v18305_v31, %v18399_v25 }
 0xcd3   : > { %v18686_v62 = vpop.f32.mrf.mxu3 }
 0xcd4   : > { %v6416_v43 = vadd.f32 %v18470_v41, %v6199_v12  ;;  %v13827_v12 = vld [vmem:[#allocation6 + $0x138] sm:$0xff] }
 0xcd5   : > { %v7557_v5 = vpop.f32.mrf.mxu0 }
 0xcdb   : > { %v7471_v45 = vpop.f32.mrf.mxu3 }
 0xcdc   : > { %v18692_v10 = vadd.f32 %v7471_v45, %v7269_v7  ;;  %v6412_v7 = vadd.f32 %v18431_v55, %v6189_v2 }
 0xcdd   : > { %v7559_v48 = vpop.f32.mrf.mxu0 }
 0xcde   : > { %v6625_v26 = vadd.f32 %v18452_v44, %v6412_v7 }
 0xce0   : > { %v6838_v51 = vadd.f32 %v18575_v32, %v6625_v26  ;;  %v6414_v32 = vadd.f32 %v18450_v19, %v6194_v49  ;;  %v13833_v49 = vld [vmem:[#allocation6 + $0x160] sm:$0xff] }
 0xce2   : > { %v7051_v22 = vadd.f32 %v18612_v15, %v6838_v51  ;;  %v13800_v51 = vld [vmem:[#allocation6 + $0x78] sm:$0xff] }
 0xce3   : > { %v7473_v6 = vpop.f32.mrf.mxu3 }
 0xce4   : > { %v18696_v14 = vadd.f32 %v7473_v6, %v7270_v0  ;;  %v7264_v16 = vadd.f32 %v18675_v60, %v7051_v22  ;;  %v13799_v22 = vld [vmem:[#allocation6 + $0x70] sm:$0xff] }
 0xce6   : > { %v7477_v8 = vadd.f32 %v7458_v54, %v7264_v16  ;;  %v13792_v16 = vld [vmem:[%s19046_s7 + $0x8] sm:$0xff] }
 0xceb   : > { %v7586_v50 = vpop.f32.mrf.mxu3 }
 0xcec   : > { %v7587_v23 = vadd.f32 %v7586_v50, %v7557_v5 }
 0xcf3   : > { %v7588_v36 = vpop.f32.mrf.mxu3 }
 0xcf4   : > { %v7589_v40 = vadd.f32 %v7588_v36, %v7559_v48 }
 0xcf6   : > { %v7594_v9 = vpack.c.bf16 %v7589_v40, %v7587_v23 }
 0xcf8   : > { %7683 = vmatmul.bf16.gmra.mxu2 %v7594_v9 }
 0xd35   : > { %v7669_v35 = vpop.f32.mrf.mxu2 }
 0xd36   : > { %v7689_v61 = vadd.f32 %v7669_v35, %v7476_v20  ;;  %v6627_v20 = vadd.f32 %v18472_v27, %v6414_v32  ;;  %v13796_v32 = vld [vmem:[#allocation6 + $0x58] sm:$0xff] }
 0xd38   : > { %v7701_v53 = vadd.f32 %v14025_v39, %v7689_v61  ;;  %v6840_v54 = vadd.f32 %v18590_v11, %v6627_v20  ;;  %v6629_v11 = vadd.f32 %v18486_v42, %v6416_v43  ;;  %v13836_v61 = vld [vmem:[#allocation6 + $0x178] sm:$0xff]  ;;  %v13807_v20 = vld [vmem:[#allocation6 + $0xa8] sm:$0xff]  ;;  %v13824_v43 = vld [vmem:[#allocation6 + $0x120] sm:$0xff] }
 0xd3a   : > { %v7717_v55 = vmul.f32 0.2, %v7701_v53  ;;  %vm7709_vm1 = vcmp.ge.f32.partialorder %v7701_v53, 0.0  ;;  %v7053_v24 = vadd.f32 %v18616_v21, %v6840_v54  ;;  %v13794_v54 = vld [vmem:[#allocation6 + $0x48] sm:$0xff] }
 0xd3c   : > { %v7725_v33 = vsel %vm7709_vm1, %v7701_v53, %v7717_v55  ;;  %v7266_v28 = vadd.f32 %v18678_v29, %v7053_v24  ;;  %v13798_v53 = vld [vmem:[#allocation6 + $0x68] sm:$0xff]  ;;  %v13809_v55 = vld [vmem:[#allocation6 + $0xb8] sm:$0xff] }
 0xd3d   : > { %v7671_v17 = vpop.f32.mrf.mxu2  ;;  %8037 = vmatpush.bf16.msrb.mxu2 %v13809_v55  ;;  %v13830_v24 = vld [vmem:[#allocation6 + $0x148] sm:$0xff] }
 0xd3e   : > { %v7690_v46 = vadd.f32 %v7671_v17, %v7477_v8  ;;  %v7479_v52 = vadd.f32 %v7463_v18, %v7266_v28  ;;  %v6842_v18 = vadd.f32 %v18605_v58, %v6629_v11  ;;  %v13819_v8 = vld [vmem:[%s19046_s7 + $0x20] sm:$0xff]  ;;  %v13834_v17 = vld [vmem:[#allocation6 + $0x168] sm:$0xff]  ;;  %v13791_v11 = vld [vmem:[#allocation6 + $0x38] sm:$0xff] }
 0xd3f   : > { %v13793_v28 = vld [vmem:[#allocation6 + $0x40] sm:$0xff]  ;;  %7932 = vmatpush.bf16.msrb.mxu0 %v13791_v11  ;;  %v13852_v55 = vld [vmem:[#allocation6 + $0x1e8] sm:$0xff] }
 0xd40   : > { %v7702_v44 = vadd.f32 %v14025_v39, %v7690_v46  ;;  %v7055_v38 = vadd.f32 %v18620_v47, %v6842_v18  ;;  %v13797_v46 = vld [vmem:[#allocation6 + $0x60] sm:$0xff]  ;;  %v13822_v18 = vld [vmem:[#allocation6 + $0x110] sm:$0xff] }
 0xd42   : > { %vm7710_vm2 = vcmp.ge.f32.partialorder %v7702_v44, 0.0  ;;  %v7718_v15 = vmul.f32 0.2, %v7702_v44  ;;  %v7268_v25 = vadd.f32 %v18681_v4, %v7055_v38  ;;  %v13787_v38 = vld [vmem:[#allocation6 + $0x18] sm:$0xff] }
 0xd44   : > { %v7726_v3 = vsel %vm7710_vm2, %v7702_v44, %v7718_v15  ;;  %v7481_v59 = vadd.f32 %v18686_v62, %v7268_v25  ;;  %v13808_v44 = vld [vmem:[#allocation6 + $0xb0] sm:$0xff]  ;;  %v13832_v15 = vld [vmem:[#allocation6 + $0x158] sm:$0xff] }
 0xd45   : > { %v18712_v1 = vpack.c.bf16 %v7726_v3, %v7725_v33  ;;  %v7674_v60 = vpop.f32.mrf.mxu2  ;;  %8038 = vmatpush.bf16.msrb.mxu2 %v13808_v44  ;;  %v13795_v33 = vld [vmem:[#allocation6 + $0x50] sm:$0xff] }
 0xd46   : > { %v7691_v13 = vadd.f32 %v7674_v60, %v7478_v57  ;;  %v13831_v3 = vld [vmem:[#allocation6 + $0x150] sm:$0xff]  ;;  %v13806_v60 = vld [vmem:[#allocation6 + $0xa0] sm:$0xff] }
 0xd47   : > { %v13786_v25 = vld [vmem:[#allocation6 + $0x10] sm:$0xff] }
 0xd48   : > { %v7703_v34 = vadd.f32 %v14025_v39, %v7691_v13  ;;  %v13805_v13 = vld [vmem:[#allocation6 + $0x98] sm:$0xff] }
 0xd49   : > { %8039 = vmatpush.bf16.msrb.mxu2 %v13807_v20 }
 0xd4a   : > { %v7719_v27 = vmul.f32 0.2, %v7703_v34  ;;  %vm7711_vm3 = vcmp.ge.f32.partialorder %v7703_v34, 0.0 }
 0xd4c   : > { %v7727_v21 = vsel %vm7711_vm3, %v7703_v34, %v7719_v27  ;;  %v13804_v34 = vld [vmem:[#allocation6 + $0x90] sm:$0xff] }
 0xd4d   : > { %v7676_v30 = vpop.f32.mrf.mxu2  ;;  %8040 = vmatpush.bf16.msrb.mxu2 %v13806_v60  ;;  %v13826_v27 = vld [vmem:[#allocation6 + $0x130] sm:$0xff]  ;;  %v13842_v60 = vld [vmem:[#allocation6 + $0x1a0] sm:$0xff] }
 0xd4e   : > { %v7692_v19 = vadd.f32 %v7676_v30, %v7479_v52  ;;  %v13829_v52 = vld [vmem:[#allocation6 + $0x140] sm:$0xff]  ;;  %v13803_v30 = vld [vmem:[#allocation6 + $0x88] sm:$0xff] }
 0xd50   : > { %v7704_v37 = vadd.f32 %v14025_v39, %v7692_v19  ;;  %v13802_v19 = vld [vmem:[#allocation6 + $0x80] sm:$0xff] }
 0xd51   : > { %8041 = vmatpush.bf16.msrb.mxu2 %v13805_v13 }
 0xd52   : > { %vm7712_vm4 = vcmp.ge.f32.partialorder %v7704_v37, 0.0  ;;  %v7720_v45 = vmul.f32 0.2, %v7704_v37 }
 0xd54   : > { %v7728_v57 = vsel %vm7712_vm4, %v7704_v37, %v7720_v45  ;;  %v13825_v37 = vld [vmem:[#allocation6 + $0x128] sm:$0xff]  ;;  %v13823_v45 = vld [vmem:[#allocation6 + $0x118] sm:$0xff] }
 0xd55   : > { %v18721_v56 = vpack.c.bf16 %v7728_v57, %v7727_v21  ;;  %v7679_v29 = vpop.f32.mrf.mxu2  ;;  %8042 = vmatpush.bf16.msrb.mxu2 %v13804_v34  ;;  %v13790_v21 = vld [vmem:[#allocation6 + $0x30] sm:$0xff]  ;;  %v13789_v57 = vld [vmem:[#allocation6 + $0x28] sm:$0xff] }
 0xd56   : > { %v7693_v31 = vadd.f32 %v7679_v29, %v18684_v63  ;;  %7933 = vmatpush.bf16.msrb.mxu0 %v13790_v21  ;;  %v13788_v29 = vld [vmem:[#allocation6 + $0x20] sm:$0xff]  ;;  %v13849_v34 = vld [vmem:[#allocation6 + $0x1d0] sm:$0xff] }
 0xd58   : > { %v7705_v41 = vadd.f32 %v14025_v39, %v7693_v31  ;;  %v13821_v31 = vld [vmem:[#allocation6 + $0x108] sm:$0xff] }
 0xd59   : > { %8043 = vmatpush.bf16.msrb.mxu2 %v13803_v30 }
 0xd5a   : > { %v7721_v5 = vmul.f32 0.2, %v7705_v41  ;;  %vm7713_vm5 = vcmp.ge.f32.partialorder %v7705_v41, 0.0  ;;  %7934 = vmatpush.bf16.msrb.mxu0 %v13789_v57  ;;  %v13838_v57 = vld [vmem:[#allocation6 + $0x180] sm:$0xff] }
 0xd5c   : > { %v7729_v48 = vsel %vm7713_vm5, %v7705_v41, %v7721_v5  ;;  %v13785_v41 = vld [vmem:[#allocation6 + $0x8] sm:$0xff] }
 0xd5d   : > { %v7681_v0 = vpop.f32.mrf.mxu2  ;;  %8044 = vmatpush.bf16.msrb.mxu2 %v13802_v19 }
 0xd5e   : > { %v7694_v6 = vadd.f32 %v7681_v0, %v7481_v59  ;;  %7935 = vmatpush.bf16.msrb.mxu0 %v13788_v29  ;;  %v13820_v59 = vld [vmem:[#allocation6 + $0x100] sm:$0xff] }
 0xd5f   : > { %v13784_v0 = vld [vmem:[#allocation6] sm:$0xff] }
 0xd60   : > { %v7706_v42 = vadd.f32 %v14025_v39, %v7694_v6 }
 0xd61   : > { %8251 = vmatpush.bf16.msra.mxu2 %v13827_v12  ;;  %v13840_v12 = vld [vmem:[#allocation6 + $0x190] sm:$0xff] }
 0xd62   : > { %vm7714_vm6 = vcmp.ge.f32.partialorder %v7706_v42, 0.0  ;;  %v7722_v50 = vmul.f32 0.2, %v7706_v42  ;;  %7936 = vmatpush.bf16.msrb.mxu0 %v13787_v38 }
 0xd64   : > { %v7730_v36 = vsel %vm7714_vm6, %v7706_v42, %v7722_v50 }
 0xd65   : > { %v18728_v23 = vpack.c.bf16 %v7730_v36, %v7729_v48  ;;  %8252 = vmatpush.bf16.msra.mxu2 %v13826_v27  ;;  %v13848_v27 = vld [vmem:[#allocation6 + $0x1c8] sm:$0xff] }
 0xd66   : > { %7937 = vmatpush.bf16.msrb.mxu0 %v13786_v25 }
 0xd69   : > { %8253 = vmatpush.bf16.msra.mxu2 %v13825_v37 }
 0xd6a   : > { %7938 = vmatpush.bf16.msrb.mxu0 %v13785_v41  ;;  %v13855_v41 = vld [vmem:[%s19046_s7 + $0x40] sm:$0xff] }
 0xd6d   : > { %8254 = vmatpush.bf16.msra.mxu2 %v13824_v43  ;;  %v13839_v43 = vld [vmem:[#allocation6 + $0x188] sm:$0xff] }
 0xd6e   : > { %7939 = vmatpush.bf16.msrb.mxu0 %v13784_v0 }
 0xd71   : > { %8255 = vmatpush.bf16.msra.mxu2 %v13823_v45  ;;  %v13847_v45 = vld [vmem:[#allocation6 + $0x1c0] sm:$0xff] }
 0xd75   : > { %8256 = vmatpush.bf16.msra.mxu2 %v13822_v18 }
 0xd79   : > { %8257 = vmatpush.bf16.msra.mxu2 %v13821_v31 }
 0xd7b   : > { %v7684_v58 = vpop.f32.mrf.mxu2 }
 0xd7c   : > { %v7695_v47 = vadd.f32 %v7684_v58, %v18692_v10  ;;  %v13783_v10 = vld [vmem:[%s19046_s7] sm:$0xff] }
 0xd7d   : > { %8258 = vmatpush.bf16.msra.mxu2 %v13820_v59 }
 0xd7e   : > { %v7707_v63 = vadd.f32 %v14025_v39, %v7695_v47 }
 0xd80   : > { %v7723_v62 = vmul.f32 0.2, %v7707_v63  ;;  %vm7715_vm7 = vcmp.ge.f32.partialorder %v7707_v63, 0.0 }
 0xd82   : > { %v7731_v7 = vsel %vm7715_vm7, %v7707_v63, %v7723_v62 }
 0xd83   : > { %v7686_v40 = vpop.f32.mrf.mxu2 }
 0xd84   : > { %v7696_v4 = vadd.f32 %v7686_v40, %v18696_v14  ;;  %v13801_v14 = vld [vmem:[%s19046_s7 + $0x10] sm:$0xff] }
 0xd86   : > { %v7708_v9 = vadd.f32 %v14025_v39, %v7696_v4  ;;  %v13835_v39 = vld [vmem:[#allocation6 + $0x170] sm:$0xff] }
 0xd88   : > { %vm7716_vm8 = vcmp.ge.f32.partialorder %v7708_v9, 0.0  ;;  %v7724_v2 = vmul.f32 0.2, %v7708_v9 }
 0xd8a   : > { %v7732_v26 = vsel %vm7716_vm8, %v7708_v9, %v7724_v2  ;;  %v13846_v9 = vld [vmem:[%s19046_s7 + $0x38] sm:$0xff] }
 0xd8b   : > { %v18732_v35 = vpack.c.bf16 %v7732_v26, %v7731_v7  ;;  %v13810_v2 = vld [vmem:[%s19046_s7 + $0x18] sm:$0xff]  ;;  %v13828_v26 = vld [vmem:[%s19046_s7 + $0x28] sm:$0xff] }
 0xd8c   : > { %v13818_v7 = vld [vmem:[#allocation6 + $0xf8] sm:$0xff] }
 0xd8d   : > { %7752 = vmatpush.bf16.msra.mxu3 %v18732_v35  ;;  %7961 = vmatpush.bf16.msrb.mxu1 %v18732_v35 }
 0xd8e   : > { %8144 = vmatpush.bf16.msra.mxu0 %v13818_v7 }
 0xd91   : > { %7753 = vmatpush.bf16.msra.mxu3 %v18728_v23  ;;  %7962 = vmatpush.bf16.msrb.mxu1 %v18728_v23 }
 0xd95   : > { %7754 = vmatpush.bf16.msra.mxu3 %v18721_v56  ;;  %7963 = vmatpush.bf16.msrb.mxu1 %v18721_v56 }
 0xd99   : > { %7755 = vmatpush.bf16.msra.mxu3 %v18712_v1  ;;  %7964 = vmatpush.bf16.msrb.mxu1 %v18712_v1 }
 0xd9c   : > { %12576 = vmatmul.msk.bf16.vlgmr.msra.gmra.mxu3 %vm7744_vm9, %v13783_v10  ;;  %12654 = vmatmul.msk.bf16.vlgmr.msrb.gmra.mxu1 %vm7744_vm9, %v13801_v14  ;;  %v13837_v10 = vld [vmem:[%s19046_s7 + $0x30] sm:$0xff]  ;;  %v13816_v14 = vld [vmem:[#allocation6 + $0xe8] sm:$0xff] }
 0xd9d   : > { %7794 = vmatpush.bf16.msrb.mxu3 %v18732_v35  ;;  %8175 = vmatpush.bf16.msra.mxu1 %v18732_v35 }
 0xda1   : > { %7795 = vmatpush.bf16.msrb.mxu3 %v18728_v23  ;;  %8176 = vmatpush.bf16.msra.mxu1 %v18728_v23 }
 0xda5   : > { %7796 = vmatpush.bf16.msrb.mxu3 %v18721_v56  ;;  %8177 = vmatpush.bf16.msra.mxu1 %v18721_v56 }
 0xda9   : > { %7797 = vmatpush.bf16.msrb.mxu3 %v18712_v1  ;;  %8178 = vmatpush.bf16.msra.mxu1 %v18712_v1 }
 0xdac   : > { %12583 = vmatmul.msk.bf16.vlgmr.msrb.gmra.mxu3 %vm7744_vm9, %v13792_v16  ;;  %12732 = vmatmul.msk.bf16.vlgmr.msra.gmra.mxu1 %vm7744_vm9, %v13819_v8  ;;  %v13854_v16 = vld [vmem:[#allocation6 + $0x1f8] sm:$0xff] }
 0xdad   : > { %7870 = vmatpush.bf16.msra.mxu3 %v13800_v51  ;;  %8358 = vmatpush.bf16.msrb.mxu1 %v13836_v61  ;;  %v13813_v61 = vld [vmem:[#allocation6 + $0xd0] sm:$0xff]  ;;  %v13845_v8 = vld [vmem:[#allocation6 + $0x1b8] sm:$0xff] }
 0xdb1   : > { %7871 = vmatpush.bf16.msra.mxu3 %v13799_v22  ;;  %8359 = vmatpush.bf16.msrb.mxu1 %v13835_v39  ;;  %v13811_v39 = vld [vmem:[#allocation6 + $0xc0] sm:$0xff] }
 0xdb5   : > { %7872 = vmatpush.bf16.msra.mxu3 %v13798_v53  ;;  %8360 = vmatpush.bf16.msrb.mxu1 %v13834_v17  ;;  %v13853_v53 = vld [vmem:[#allocation6 + $0x1f0] sm:$0xff] }
 0xdb9   : > { %7873 = vmatpush.bf16.msra.mxu3 %v13797_v46  ;;  %8361 = vmatpush.bf16.msrb.mxu1 %v13833_v49  ;;  %v13844_v49 = vld [vmem:[#allocation6 + $0x1b0] sm:$0xff] }
 0xdbd   : > { %7874 = vmatpush.bf16.msra.mxu3 %v13796_v32  ;;  %8362 = vmatpush.bf16.msrb.mxu1 %v13832_v15  ;;  %v13843_v32 = vld [vmem:[#allocation6 + $0x1a8] sm:$0xff]  ;;  %v13851_v15 = vld [vmem:[#allocation6 + $0x1e0] sm:$0xff] }
 0xdc1   : > { %7875 = vmatpush.bf16.msra.mxu3 %v13795_v33  ;;  %8363 = vmatpush.bf16.msrb.mxu1 %v13831_v3 }
 0xdc5   : > { %7876 = vmatpush.bf16.msra.mxu3 %v13794_v54  ;;  %8364 = vmatpush.bf16.msrb.mxu1 %v13830_v24  ;;  %v13850_v54 = vld [vmem:[#allocation6 + $0x1d8] sm:$0xff] }
 0xdc9   : > { %7877 = vmatpush.bf16.msra.mxu3 %v13793_v28  ;;  %8365 = vmatpush.bf16.msrb.mxu1 %v13829_v52  ;;  %v13841_v52 = vld [vmem:[#allocation6 + $0x198] sm:$0xff] }
 0xdcd   : > { %8068 = vmatpush.bf16.msrb.mxu3 %v18732_v35  ;;  %8603 = vmatpush.bf16.msra.mxu1 %v18732_v35 }
 0xdd1   : > { %8069 = vmatpush.bf16.msrb.mxu3 %v18728_v23  ;;  %8604 = vmatpush.bf16.msra.mxu1 %v18728_v23 }
 0xdd5   : > { %8070 = vmatpush.bf16.msrb.mxu3 %v18721_v56  ;;  %8605 = vmatpush.bf16.msra.mxu1 %v18721_v56 }
 0xdd9   : > { %8071 = vmatpush.bf16.msrb.mxu3 %v18712_v1  ;;  %8606 = vmatpush.bf16.msra.mxu1 %v18712_v1 }
 0xe19   : > { %v7966_v6 = vpop.f32.mrf.mxu1 }
 0xe1f   : > { %v7757_v5 = vpop.f32.mrf.mxu3 }
 0xe21   : > { %v7968_v42 = vpop.f32.mrf.mxu1 }
 0xe22   : > { %v7971_v50 = vpack.c.bf16 %v7968_v42, %v7966_v6  ;;  %v13862_v42 = vld [vmem:[#allocation6 + $0x230] sm:$0xff] }
 0xe24   : > { %8045 = vmatmul.bf16.vlgmr.msrb.gmra.mxu2 %v7971_v50  ;;  %v13861_v50 = vld [vmem:[#allocation6 + $0x228] sm:$0xff] }
 0xe25   : > { %8496 = vmatpush.bf16.msrb.mxu2 %v18732_v35 }
 0xe27   : > { %v7759_v48 = vpop.f32.mrf.mxu3 }
 0xe28   : > { %v7762_v36 = vpack.c.bf16 %v7759_v48, %v7757_v5  ;;  %v13863_v5 = vld [vmem:[#allocation6 + $0x238] sm:$0xff]  ;;  %v13860_v48 = vld [vmem:[#allocation6 + $0x220] sm:$0xff] }
 0xe29   : > { %8497 = vmatpush.bf16.msrb.mxu2 %v18728_v23  ;;  %v8180_v58 = vpop.f32.mrf.mxu1 }
 0xe2a   : > { %7940 = vmatmul.bf16.vlgmr.msrb.gmra.mxu0 %v7762_v36  ;;  %v13859_v36 = vld [vmem:[#allocation6 + $0x218] sm:$0xff] }
 0xe2d   : > { %8498 = vmatpush.bf16.msrb.mxu2 %v18721_v56 }
 0xe2f   : > { %v7799_v47 = vpop.f32.mrf.mxu3 }
 0xe31   : > { %8499 = vmatpush.bf16.msrb.mxu2 %v18712_v1  ;;  %v8182_v63 = vpop.f32.mrf.mxu1 }
 0xe32   : > { %v8185_v40 = vpack.c.bf16 %v8182_v63, %v8180_v58  ;;  %v13858_v58 = vld [vmem:[#allocation6 + $0x210] sm:$0xff] }
 0xe34   : > { %8259 = vmatmul.bf16.vlgmr.msra.gmra.mxu2 %v8185_v40  ;;  %v13856_v40 = vld [vmem:[#allocation6 + $0x200] sm:$0xff] }
 0xe35   : > { %8679 = vmatpush.bf16.msra.mxu2 %v13863_v5  ;;  %v13891_v5 = vld [vmem:[%s19049_s10 + $0x18] sm:$0xff] }
 0xe37   : > { %v7801_v4 = vpop.f32.mrf.mxu3 }
 0xe38   : > { %v7804_v62 = vpack.c.bf16 %v7801_v4, %v7799_v47  ;;  %v13857_v47 = vld [vmem:[#allocation6 + $0x208] sm:$0xff] }
 0xe39   : > { %8680 = vmatpush.bf16.msra.mxu2 %v13862_v42  ;;  %v13904_v42 = vld [vmem:[#allocation8 + $0x118] sm:$0xff] }
 0xe3a   : > { %7878 = vmatmul.bf16.vlgmr.msra.gmra.mxu3 %v7804_v62  ;;  %v13890_v62 = vld [vmem:[#allocation8 + $0xb8] sm:$0xff] }
 0xe3b   : > { %8282 = vmatpush.bf16.msra.mxu3 %v18732_v35 }
 0xe3d   : > { %8681 = vmatpush.bf16.msra.mxu2 %v13861_v50  ;;  %v13903_v50 = vld [vmem:[#allocation8 + $0x110] sm:$0xff] }
 0xe3f   : > { %8283 = vmatpush.bf16.msra.mxu3 %v18728_v23 }
 0xe41   : > { %8682 = vmatpush.bf16.msra.mxu2 %v13860_v48  ;;  %v13902_v48 = vld [vmem:[#allocation8 + $0x108] sm:$0xff] }
 0xe43   : > { %8284 = vmatpush.bf16.msra.mxu3 %v18721_v56 }
 0xe44   : > { %12849 = vmatmul.msk.bf16.vlgmr.msrb.gmra.mxu2 %vm7744_vm9, %v13846_v9  ;;  %v13889_v9 = vld [vmem:[#allocation8 + $0xb0] sm:$0xff] }
 0xe45   : > { %8683 = vmatpush.bf16.msra.mxu2 %v13859_v36  ;;  %v13901_v36 = vld [vmem:[#allocation8 + $0x100] sm:$0xff] }
 0xe47   : > { %8285 = vmatpush.bf16.msra.mxu3 %v18712_v1 }
 0xe49   : > { %8684 = vmatpush.bf16.msra.mxu2 %v13858_v58  ;;  %v13881_v58 = vld [vmem:[#allocation8 + $0x78] sm:$0xff] }
 0xe4a   : > { %12693 = vmatmul.msk.bf16.vlgmr.msrb.gmra.mxu3 %vm7744_vm9, %v13810_v2 }
 0xe4b   : > { %8389 = vmatpush.bf16.msrb.mxu3 %v18732_v35  ;;  %v13817_v35 = vld [vmem:[#allocation6 + $0xf0] sm:$0xff] }
 0xe4c   : > { %8145 = vmatpush.bf16.msra.mxu0 %v13817_v35  ;;  %v13888_v35 = vld [vmem:[#allocation8 + $0xa8] sm:$0xff] }
 0xe4d   : > { %8685 = vmatpush.bf16.msra.mxu2 %v13857_v47  ;;  %v13880_v47 = vld [vmem:[#allocation8 + $0x70] sm:$0xff] }
 0xe4f   : > { %8390 = vmatpush.bf16.msrb.mxu3 %v18728_v23  ;;  %v13815_v23 = vld [vmem:[#allocation6 + $0xe0] sm:$0xff] }
 0xe50   : > { %8146 = vmatpush.bf16.msra.mxu0 %v13816_v14 }
 0xe51   : > { %8686 = vmatpush.bf16.msra.mxu2 %v13856_v40  ;;  %v13878_v40 = vld [vmem:[#allocation8 + $0x60] sm:$0xff] }
 0xe53   : > { %8391 = vmatpush.bf16.msrb.mxu3 %v18721_v56  ;;  %v13814_v56 = vld [vmem:[#allocation6 + $0xd8] sm:$0xff] }
 0xe54   : > { %8147 = vmatpush.bf16.msra.mxu0 %v13815_v23 }
 0xe55   : > { %9008 = vmatpush.bf16.msrb.mxu2 %v13890_v62  ;;  %v13876_v62 = vld [vmem:[#allocation8 + $0x50] sm:$0xff] }
 0xe57   : > { %8392 = vmatpush.bf16.msrb.mxu3 %v18712_v1  ;;  %v13812_v1 = vld [vmem:[#allocation6 + $0xc8] sm:$0xff] }
 0xe58   : > { %8148 = vmatpush.bf16.msra.mxu0 %v13814_v56 }
 0xe59   : > { %9009 = vmatpush.bf16.msrb.mxu2 %v13889_v9  ;;  %v13875_v9 = vld [vmem:[#allocation8 + $0x48] sm:$0xff] }
 0xe5a   : > { %12771 = vmatmul.msk.bf16.vlgmr.msra.gmra.mxu3 %vm7744_vm9, %v13828_v26 }
 0xe5b   : > { %8572 = vmatpush.bf16.msra.mxu3 %v13854_v16  ;;  %v13886_v16 = vld [vmem:[#allocation8 + $0x98] sm:$0xff] }
 0xe5c   : > { %8149 = vmatpush.bf16.msra.mxu0 %v13813_v61 }
 0xe5d   : > { %9010 = vmatpush.bf16.msrb.mxu2 %v13888_v35  ;;  %v13896_v35 = vld [vmem:[#allocation8 + $0xe0] sm:$0xff] }
 0xe5f   : > { %8573 = vmatpush.bf16.msra.mxu3 %v13853_v53  ;;  %v13884_v53 = vld [vmem:[#allocation8 + $0x88] sm:$0xff] }
 0xe60   : > { %8150 = vmatpush.bf16.msra.mxu0 %v13812_v1 }
 0xe63   : > { %8574 = vmatpush.bf16.msra.mxu3 %v13852_v55 }
 0xe64   : > { %8151 = vmatpush.bf16.msra.mxu0 %v13811_v39  ;;  %v13887_v39 = vld [vmem:[#allocation8 + $0xa0] sm:$0xff] }
 0xe65   : > { %9011 = vmatpush.bf16.msrb.mxu2 %v13887_v39 }
 0xe67   : > { %8575 = vmatpush.bf16.msra.mxu3 %v13851_v15 }
 0xe68   : > { %8465 = vmatpush.bf16.msrb.mxu0 %v13845_v8  ;;  %v13885_v8 = vld [vmem:[#allocation8 + $0x90] sm:$0xff] }
 0xe69   : > { %9012 = vmatpush.bf16.msrb.mxu2 %v13886_v16  ;;  %v13917_v16 = vld [vmem:[#allocation8 + $0x178] sm:$0xff] }
 0xe6a   : > { %12810 = vmatmul.msk.bf16.vlgmr.msrb.gmra.mxu3 %vm7744_vm9, %v13837_v10 }
 0xe6b   : > { %8576 = vmatpush.bf16.msra.mxu3 %v13850_v54 }
 0xe6c   : > { %8466 = vmatpush.bf16.msrb.mxu0 %v13844_v49 }
 0xe6d   : > { %9013 = vmatpush.bf16.msrb.mxu2 %v13885_v8 }
 0xe6f   : > { %8577 = vmatpush.bf16.msra.mxu3 %v13849_v34 }
 0xe70   : > { %8467 = vmatpush.bf16.msrb.mxu0 %v13843_v32 }
 0xe71   : > { %9014 = vmatpush.bf16.msrb.mxu2 %v13884_v53 }
 0xe73   : > { %8578 = vmatpush.bf16.msra.mxu3 %v13848_v27  ;;  %v13872_v27 = vld [vmem:[#allocation8 + $0x38] sm:$0xff] }
 0xe74   : > { %8468 = vmatpush.bf16.msrb.mxu0 %v13842_v60 }
 0xe77   : > { %8579 = vmatpush.bf16.msra.mxu3 %v13847_v45  ;;  %v13873_v45 = vld [vmem:[%s19049_s10 + $0x8] sm:$0xff] }
 0xe78   : > { %8469 = vmatpush.bf16.msrb.mxu0 %v13841_v52 }
 0xe7b   : > { %8841 = vmatpush.bf16.msrb.mxu3 %v13881_v58 }
 0xe7c   : > { %8470 = vmatpush.bf16.msrb.mxu0 %v13840_v12 }
 0xe7f   : > { %8842 = vmatpush.bf16.msrb.mxu3 %v13880_v47 }
 0xe80   : > { %8471 = vmatpush.bf16.msrb.mxu0 %v13839_v43  ;;  %v13864_v43 = vld [vmem:[%s19049_s10] sm:$0xff] }
 0xe84   : > { %8472 = vmatpush.bf16.msrb.mxu0 %v13838_v57  ;;  %v13869_v57 = vld [vmem:[#allocation8 + $0x20] sm:$0xff] }
 0xea7   : > { %v8046_v51 = vpop.f32.mrf.mxu2  ;;  %v7941_v46 = vpop.f32.mrf.mxu0 }
 0xeaf   : > { %v8048_v22 = vpop.f32.mrf.mxu2  ;;  %v7943_v13 = vpop.f32.mrf.mxu0 }
 0xeb7   : > { %v18802_v17 = vpop.f32.mrf.mxu2 }
 0xebd   : > { %v7879_v44 = vpop.f32.mrf.mxu3 }
 0xebe   : > { %v7942_v20 = vadd.f32 %v7941_v46, %v7879_v44 }
 0xebf   : > { %v18804_v3 = vpop.f32.mrf.mxu2 }
 0xec0   : > { %v8051_v33 = vadd.f32 %v8046_v51, %v7942_v20 }
 0xec5   : > { %v7881_v24 = vpop.f32.mrf.mxu3 }
 0xec6   : > { %v7944_v28 = vadd.f32 %v7943_v13, %v7881_v24 }
 0xec7   : > { %v8501_v19 = vpop.f32.mrf.mxu2 }
 0xec8   : > { %v8052_v30 = vadd.f32 %v8048_v22, %v7944_v28 }
 0xecd   : > { %v8073_v37 = vpop.f32.mrf.mxu3 }
 0xecf   : > { %v8503_v11 = vpop.f32.mrf.mxu2 }
 0xed0   : > { %v8506_v21 = vpack.c.bf16 %v8503_v11, %v8501_v19  ;;  %v13871_v11 = vld [vmem:[#allocation8 + $0x30] sm:$0xff] }
 0xed2   : > { %8580 = vmatmul.bf16.vlgmr.msra.gmra.mxu3 %v8506_v21  ;;  %v13870_v21 = vld [vmem:[#allocation8 + $0x28] sm:$0xff] }
 0xed5   : > { %v8075_v29 = vpop.f32.mrf.mxu3 }
 0xed6   : > { %v8078_v18 = vpack.c.bf16 %v8075_v29, %v8073_v37  ;;  %v13868_v29 = vld [vmem:[#allocation8 + $0x18] sm:$0xff] }
 0xed8   : > { %8152 = vmatmul.bf16.vlgmr.msra.gmra.mxu0 %v8078_v18  ;;  %v13882_v18 = vld [vmem:[%s19049_s10 + $0x10] sm:$0xff] }
 0xedd   : > { %v8287_v38 = vpop.f32.mrf.mxu3 }
 0xee5   : > { %v8289_v31 = vpop.f32.mrf.mxu3 }
 0xee6   : > { %v8292_v25 = vpack.c.bf16 %v8289_v31, %v8287_v38  ;;  %v13908_v38 = vld [vmem:[#allocation8 + $0x138] sm:$0xff]  ;;  %v13867_v31 = vld [vmem:[#allocation8 + $0x10] sm:$0xff] }
 0xee8   : > { %8366 = vmatmul.bf16.vlgmr.msrb.gmra.mxu1 %v8292_v25  ;;  %v13907_v25 = vld [vmem:[#allocation8 + $0x130] sm:$0xff] }
 0xeed   : > { %v8394_v59 = vpop.f32.mrf.mxu3 }
 0xef5   : > { %v8396_v0 = vpop.f32.mrf.mxu3 }
 0xef6   : > { %v8399_v6 = vpack.c.bf16 %v8396_v0, %v8394_v59  ;;  %v13866_v59 = vld [vmem:[#allocation8 + $0x8] sm:$0xff]  ;;  %v13865_v0 = vld [vmem:[#allocation8] sm:$0xff] }
 0xef8   : > { %8473 = vmatmul.bf16.vlgmr.msrb.gmra.mxu0 %v8399_v6  ;;  %12888 = vmatmul.msk.bf16.vlgmr.msra.gmra.mxu1 %vm7744_vm9, %v13855_v41  ;;  %v13906_v41 = vld [vmem:[#allocation8 + $0x128] sm:$0xff]  ;;  %v13905_v6 = vld [vmem:[#allocation8 + $0x120] sm:$0xff] }
 0xf55   : > { %v8153_v63 = vpop.f32.mrf.mxu0  ;;  %v8581_v49 = vpop.f32.mrf.mxu3 }
 0xf56   : > { %v8158_v4 = vadd.f32 %v8153_v63, %v8051_v33  ;;  %v13879_v63 = vld [vmem:[#allocation8 + $0x68] sm:$0xff] }
 0xf57   : > { %8843 = vmatpush.bf16.msrb.mxu3 %v13879_v63  ;;  %v13936_v63 = vld [vmem:[%s19049_s10 + $0x40] sm:$0xff] }
 0xf58   : > { %v8265_v2 = vadd.f32 %v18802_v17, %v8158_v4  ;;  %v13883_v17 = vld [vmem:[#allocation8 + $0x80] sm:$0xff]  ;;  %v13877_v4 = vld [vmem:[#allocation8 + $0x58] sm:$0xff] }
 0xf59   : > { %9015 = vmatpush.bf16.msrb.mxu2 %v13883_v17  ;;  %v13916_v17 = vld [vmem:[#allocation8 + $0x170] sm:$0xff] }
 0xf5b   : > { %8844 = vmatpush.bf16.msrb.mxu3 %v13878_v40 }
 0xf5d   : > { %v8155_v7 = vpop.f32.mrf.mxu0  ;;  %v8583_v60 = vpop.f32.mrf.mxu3 }
 0xf5e   : > { %v8159_v14 = vadd.f32 %v8155_v7, %v8052_v30  ;;  %v13899_v7 = vld [vmem:[#allocation8 + $0xf8] sm:$0xff] }
 0xf5f   : > { %8845 = vmatpush.bf16.msrb.mxu3 %v13877_v4 }
 0xf60   : > { %v8266_v23 = vadd.f32 %v18804_v3, %v8159_v14  ;;  %v14026_v3 = vld [vmem:[%s19048_s9] ss:$0 sm:$0xff]  ;;  %v13895_v14 = vld [vmem:[#allocation8 + $0xd8] sm:$0xff] }
 0xf63   : > { %8846 = vmatpush.bf16.msrb.mxu3 %v13876_v62  ;;  %v13934_v62 = vld [vmem:[#allocation8 + $0x1f0] sm:$0xff] }
 0xf65   : > { %v8367_v26 = vpop.f32.mrf.mxu1 }
 0xf66   : > { %v8372_v10 = vadd.f32 %v8367_v26, %v8265_v2  ;;  %v13874_v2 = vld [vmem:[#allocation8 + $0x40] sm:$0xff]  ;;  %v13898_v26 = vld [vmem:[#allocation8 + $0xf0] sm:$0xff] }
 0xf67   : > { %8847 = vmatpush.bf16.msrb.mxu3 %v13875_v9  ;;  %v13933_v9 = vld [vmem:[#allocation8 + $0x1e8] sm:$0xff] }
 0xf6b   : > { %8848 = vmatpush.bf16.msrb.mxu3 %v13874_v2  ;;  %v13932_v2 = vld [vmem:[#allocation8 + $0x1e0] sm:$0xff] }
 0xf6d   : > { %v8369_v56 = vpop.f32.mrf.mxu1 }
 0xf6e   : > { %v8373_v51 = vadd.f32 %v8369_v56, %v8266_v23  ;;  %v13894_v23 = vld [vmem:[#allocation8 + $0xd0] sm:$0xff] }
 0xf6f   : > { %9115 = vmatpush.bf16.msra.mxu3 %v13899_v7  ;;  %v13931_v7 = vld [vmem:[#allocation8 + $0x1d8] sm:$0xff] }
 0xf73   : > { %9116 = vmatpush.bf16.msra.mxu3 %v13898_v26  ;;  %v13930_v26 = vld [vmem:[#allocation8 + $0x1d0] sm:$0xff] }
 0xf75   : > { %v8608_v61 = vpop.f32.mrf.mxu1  ;;  %v8474_v46 = vpop.f32.mrf.mxu0 }
 0xf76   : > { %v8479_v55 = vadd.f32 %v8474_v46, %v8372_v10  ;;  %v13897_v10 = vld [vmem:[#allocation8 + $0xe8] sm:$0xff] }
 0xf77   : > { %9117 = vmatpush.bf16.msra.mxu3 %v13897_v10  ;;  %v13944_v10 = vld [vmem:[#allocation8 + $0x238] sm:$0xff] }
 0xf78   : > { %v8586_v15 = vadd.f32 %v8581_v49, %v8479_v55  ;;  %v13915_v49 = vld [vmem:[#allocation8 + $0x168] sm:$0xff]  ;;  %v13914_v55 = vld [vmem:[#allocation8 + $0x160] sm:$0xff] }
 0xf7b   : > { %9118 = vmatpush.bf16.msra.mxu3 %v13896_v35  ;;  %v13929_v35 = vld [vmem:[#allocation8 + $0x1c8] sm:$0xff] }
 0xf7d   : > { %v8610_v1 = vpop.f32.mrf.mxu1  ;;  %v8476_v44 = vpop.f32.mrf.mxu0 }
 0xf7e   : > { %v8613_v22 = vpack.c.bf16 %v8610_v1, %v8608_v61  ;;  %v8480_v20 = vadd.f32 %v8476_v44, %v8373_v51  ;;  %v13893_v61 = vld [vmem:[#allocation8 + $0xc8] sm:$0xff]  ;;  %v13892_v1 = vld [vmem:[#allocation8 + $0xc0] sm:$0xff] }
 0xf7f   : > { %9119 = vmatpush.bf16.msra.mxu3 %v13895_v14  ;;  %v13900_v44 = vld [vmem:[%s19049_s10 + $0x20] sm:$0xff]  ;;  %v13943_v14 = vld [vmem:[#allocation8 + $0x230] sm:$0xff] }
 0xf80   : > { %8687 = vmatmul.bf16.vlgmr.msra.gmra.mxu2 %v8613_v22  ;;  %v8587_v54 = vadd.f32 %v8583_v60, %v8480_v20 }
 0xf83   : > { %9120 = vmatpush.bf16.msra.mxu3 %v13894_v23  ;;  %v13928_v23 = vld [vmem:[#allocation8 + $0x1c0] sm:$0xff] }
 0xf87   : > { %9121 = vmatpush.bf16.msra.mxu3 %v13893_v61  ;;  %v13941_v61 = vld [vmem:[#allocation8 + $0x220] sm:$0xff] }
 0xf8b   : > { %9122 = vmatpush.bf16.msra.mxu3 %v13892_v1 }
0x1003   : > { %v8688_v32 = vpop.f32.mrf.mxu2 }
0x1004   : > { %v8693_v33 = vadd.f32 %v8688_v32, %v8586_v15  ;;  %v13913_v15 = vld [vmem:[#allocation8 + $0x158] sm:$0xff] }
0x1006   : > { %v8699_v24 = vadd.f32 %v14026_v3, %v8693_v33  ;;  %v13912_v33 = vld [vmem:[#allocation8 + $0x150] sm:$0xff] }
0x1008   : > { %v8703_v52 = vmul.f32 0.2, %v8699_v24  ;;  %vm8701_vm10 = vcmp.ge.f32.partialorder %v8699_v24, 0.0 }
0x100a   : > { %v8705_v19 = vsel %vm8701_vm10, %v8699_v24, %v8703_v52  ;;  %v13909_v24 = vld [vmem:[%s19049_s10 + $0x28] sm:$0xff]  ;;  %v13918_v52 = vld [vmem:[%s19049_s10 + $0x30] sm:$0xff] }
0x100b   : > { %v8690_v13 = vpop.f32.mrf.mxu2 }
0x100c   : > { %v8694_v28 = vadd.f32 %v8690_v13, %v8587_v54  ;;  %v13910_v54 = vld [vmem:[#allocation8 + $0x140] sm:$0xff] }
0x100e   : > { %v8700_v34 = vadd.f32 %v14026_v3, %v8694_v28  ;;  %v13911_v3 = vld [vmem:[#allocation8 + $0x148] sm:$0xff] }
0x1010   : > { %vm8702_vm11 = vcmp.ge.f32.partialorder %v8700_v34, 0.0  ;;  %v8704_v30 = vmul.f32 0.2, %v8700_v34 }
0x1012   : > { %v8706_v12 = vsel %vm8702_vm11, %v8700_v34, %v8704_v30  ;;  %v13926_v34 = vld [vmem:[#allocation8 + $0x1b8] sm:$0xff] }
0x1013   : > { %v18815_v37 = vpack.c.bf16 %v8706_v12, %v8705_v19  ;;  %v13925_v19 = vld [vmem:[#allocation8 + $0x1b0] sm:$0xff]  ;;  %v13924_v12 = vld [vmem:[#allocation8 + $0x1a8] sm:$0xff] }
0x1015   : > { %8726 = vmatpush.bf16.msra.mxu0 %v18815_v37  ;;  %8768 = vmatpush.bf16.msrb.mxu1 %v18815_v37 }
0x1016   : > { %9256 = vmatpush.bf16.msra.mxu2 %v18815_v37 }
0x1018   : > { %12925 = vmatmul.msk.bf16.vlgmr.msra.gmra.mxu0 %vm8715_vm12, %v13864_v43  ;;  %12932 = vmatmul.msk.bf16.vlgmr.msrb.gmra.mxu1 %vm8715_vm12, %v13873_v45  ;;  %v13923_v43 = vld [vmem:[#allocation8 + $0x1a0] sm:$0xff] }
0x1019   : > { %8903 = vmatpush.bf16.msrb.mxu0 %v13872_v27  ;;  %8935 = vmatpush.bf16.msra.mxu1 %v18815_v37 }
0x101d   : > { %9042 = vmatpush.bf16.msrb.mxu1 %v18815_v37  ;;  %8904 = vmatpush.bf16.msrb.mxu0 %v13871_v11  ;;  %v13922_v11 = vld [vmem:[#allocation8 + $0x198] sm:$0xff] }
0x1021   : > { %8905 = vmatpush.bf16.msrb.mxu0 %v13870_v21  ;;  %v13921_v21 = vld [vmem:[#allocation8 + $0x190] sm:$0xff] }
0x1025   : > { %8906 = vmatpush.bf16.msrb.mxu0 %v13869_v57 }
0x1028   : > { %13003 = vmatmul.msk.bf16.vlgmr.msra.gmra.mxu1 %vm8715_vm12, %v13882_v18  ;;  %v13920_v18 = vld [vmem:[#allocation8 + $0x188] sm:$0xff] }
0x1029   : > { %8907 = vmatpush.bf16.msrb.mxu0 %v13868_v29  ;;  %9222 = vmatpush.bf16.msra.mxu1 %v13908_v38 }
0x102d   : > { %8908 = vmatpush.bf16.msrb.mxu0 %v13867_v31  ;;  %9223 = vmatpush.bf16.msra.mxu1 %v13907_v25 }
0x1031   : > { %8909 = vmatpush.bf16.msrb.mxu0 %v13866_v59  ;;  %9224 = vmatpush.bf16.msra.mxu1 %v13906_v41  ;;  %v13919_v41 = vld [vmem:[#allocation8 + $0x180] sm:$0xff] }
0x1035   : > { %8910 = vmatpush.bf16.msrb.mxu0 %v13865_v0  ;;  %9225 = vmatpush.bf16.msra.mxu1 %v13905_v6 }
0x1038   : > { %13042 = vmatmul.msk.bf16.vlgmr.msrb.gmra.mxu1 %vm8715_vm12, %v13891_v5 }
0x1039   : > { %9149 = vmatpush.bf16.msra.mxu0 %v18815_v37  ;;  %9226 = vmatpush.bf16.msra.mxu1 %v13904_v42  ;;  %v13935_v42 = vld [vmem:[#allocation8 + $0x1f8] sm:$0xff] }
0x103d   : > { %9227 = vmatpush.bf16.msra.mxu1 %v13903_v50 }
0x1041   : > { %9228 = vmatpush.bf16.msra.mxu1 %v13902_v48  ;;  %v13927_v48 = vld [vmem:[%s19049_s10 + $0x38] sm:$0xff] }
0x1045   : > { %9229 = vmatpush.bf16.msra.mxu1 %v13901_v36 }
0x1049   : > { %9470 = vmatpush.bf16.msrb.mxu1 %v18815_v37 }
0x1095   : > { %v8728_v56 = vpop.f32.mrf.mxu0  ;;  %v8770_v51 = vpop.f32.mrf.mxu1 }
0x109d   : > { %v8730_v22 = vpop.f32.mrf.mxu0  ;;  %v8772_v39 = vpop.f32.mrf.mxu1 }
0x109e   : > { %v8733_v8 = vpack.c.bf16 %v8730_v22, %v8728_v56  ;;  %v8775_v53 = vpack.c.bf16 %v8772_v39, %v8770_v51  ;;  %v13942_v56 = vld [vmem:[#allocation8 + $0x228] sm:$0xff]  ;;  %v13940_v22 = vld [vmem:[#allocation8 + $0x218] sm:$0xff] }
0x10a0   : > { %8911 = vmatmul.bf16.vlgmr.msrb.gmra.mxu0 %v8733_v8  ;;  %8849 = vmatmul.bf16.vlgmr.msrb.gmra.mxu3 %v8775_v53  ;;  %v13939_v53 = vld [vmem:[#allocation8 + $0x210] sm:$0xff] }
0x10a1   : > { %9329 = vmatpush.bf16.msrb.mxu0 %v13917_v16  ;;  %9436 = vmatpush.bf16.msrb.mxu3 %v13926_v34 }
0x10a5   : > { %9330 = vmatpush.bf16.msrb.mxu0 %v13916_v17  ;;  %v8937_v46 = vpop.f32.mrf.mxu1  ;;  %9437 = vmatpush.bf16.msrb.mxu3 %v13925_v19 }
0x10a9   : > { %9331 = vmatpush.bf16.msrb.mxu0 %v13915_v49  ;;  %9438 = vmatpush.bf16.msrb.mxu3 %v13924_v12  ;;  %v14027_v12 = vld [vmem:[%s19051_s12] ss:$0 sm:$0xff] }
0x10ad   : > { %9332 = vmatpush.bf16.msrb.mxu0 %v13914_v55  ;;  %v8939_v32 = vpop.f32.mrf.mxu1  ;;  %9439 = vmatpush.bf16.msrb.mxu3 %v13923_v43 }
0x10ae   : > { %v8942_v20 = vpack.c.bf16 %v8939_v32, %v8937_v46  ;;  %v13938_v46 = vld [vmem:[#allocation8 + $0x208] sm:$0xff] }
0x10b0   : > { %9016 = vmatmul.bf16.vlgmr.msrb.gmra.mxu2 %v8942_v20  ;;  %13081 = vmatmul.msk.bf16.vlgmr.msra.gmra.mxu0 %vm8715_vm12, %v13900_v44  ;;  %v13937_v44 = vld [vmem:[#allocation8 + $0x200] sm:$0xff] }
0x10b1   : > { %9333 = vmatpush.bf16.msrb.mxu0 %v13913_v15  ;;  %9363 = vmatpush.bf16.msrb.mxu2 %v18815_v37 }
0x10b2   : > { %9440 = vmatpush.bf16.msrb.mxu3 %v13922_v11 }
0x10b5   : > { %9334 = vmatpush.bf16.msrb.mxu0 %v13912_v33  ;;  %v9044_v60 = vpop.f32.mrf.mxu1 }
0x10b6   : > { %9441 = vmatpush.bf16.msrb.mxu3 %v13921_v21 }
0x10b9   : > { %9335 = vmatpush.bf16.msrb.mxu0 %v13911_v3 }
0x10ba   : > { %9442 = vmatpush.bf16.msrb.mxu3 %v13920_v18 }
0x10bd   : > { %9336 = vmatpush.bf16.msrb.mxu0 %v13910_v54  ;;  %v9046_v13 = vpop.f32.mrf.mxu1 }
0x10be   : > { %v9049_v28 = vpack.c.bf16 %v9046_v13, %v9044_v60  ;;  %9443 = vmatpush.bf16.msrb.mxu3 %v13919_v41 }
0x10c0   : > { %13120 = vmatmul.msk.bf16.vlgmr.msra.gmra.mxu2 %vm8715_vm12, %v13909_v24  ;;  %9123 = vmatmul.bf16.vlgmr.msra.gmra.mxu3 %v9049_v28 }
0x10c1   : > { %9577 = vmatpush.bf16.msra.mxu0 %v18815_v37  ;;  %9543 = vmatpush.bf16.msra.mxu2 %v13935_v42 }
0x10c5   : > { %9544 = vmatpush.bf16.msra.mxu2 %v13934_v62 }
0x10c9   : > { %9545 = vmatpush.bf16.msra.mxu2 %v13933_v9 }
0x10cd   : > { %9546 = vmatpush.bf16.msra.mxu2 %v13932_v2 }
0x10d0   : > { %13159 = vmatmul.msk.bf16.vlgmr.msrb.gmra.mxu2 %vm8715_vm12, %v13918_v52 }
0x10d1   : > { %9547 = vmatpush.bf16.msra.mxu2 %v13931_v7 }
0x10d5   : > { %9548 = vmatpush.bf16.msra.mxu2 %v13930_v26 }
0x10d9   : > { %9549 = vmatpush.bf16.msra.mxu2 %v13929_v35 }
0x10dd   : > { %9550 = vmatpush.bf16.msra.mxu2 %v13928_v23 }
0x111d   : > { %v8912_v30 = vpop.f32.mrf.mxu0 }
0x1123   : > { %v8850_v45 = vpop.f32.mrf.mxu3 }
0x1124   : > { %v8913_v57 = vadd.f32 %v8912_v30, %v8850_v45 }
0x1125   : > { %v8914_v27 = vpop.f32.mrf.mxu0 }
0x112b   : > { %v8852_v59 = vpop.f32.mrf.mxu3 }
0x112c   : > { %v8915_v0 = vadd.f32 %v8914_v27, %v8852_v59 }
0x112d   : > { %v9151_v37 = vpop.f32.mrf.mxu0 }
0x1133   : > { %v9017_v29 = vpop.f32.mrf.mxu2 }
0x1134   : > { %v9022_v38 = vadd.f32 %v9017_v29, %v8913_v57 }
0x1135   : > { %v9153_v31 = vpop.f32.mrf.mxu0 }
0x1136   : > { %v9156_v25 = vpack.c.bf16 %v9153_v31, %v9151_v37 }
0x1138   : > { %9230 = vmatmul.bf16.vlgmr.msra.gmra.mxu1 %v9156_v25 }
0x1139   : > { %9650 = vmatpush.bf16.msra.mxu1 %v13944_v10 }
0x113b   : > { %v9019_v6 = vpop.f32.mrf.mxu2 }
0x113c   : > { %v9023_v5 = vadd.f32 %v9019_v6, %v8915_v0 }
0x113d   : > { %9651 = vmatpush.bf16.msra.mxu1 %v13943_v14 }
0x1141   : > { %9652 = vmatpush.bf16.msra.mxu1 %v13942_v56 }
0x1143   : > { %v9258_v50 = vpop.f32.mrf.mxu2  ;;  %v9124_v51 = vpop.f32.mrf.mxu3 }
0x1144   : > { %v9129_v1 = vadd.f32 %v9124_v51, %v9022_v38 }
0x1145   : > { %9653 = vmatpush.bf16.msra.mxu1 %v13941_v61 }
0x1148   : > { %13198 = vmatmul.msk.bf16.vlgmr.msrb.gmra.mxu1 %vm8715_vm12, %v13927_v48 }
0x1149   : > { %9654 = vmatpush.bf16.msra.mxu1 %v13940_v22 }
0x114b   : > { %v9260_v36 = vpop.f32.mrf.mxu2  ;;  %v9126_v8 = vpop.f32.mrf.mxu3 }
0x114c   : > { %v9263_v58 = vpack.c.bf16 %v9260_v36, %v9258_v50  ;;  %v9130_v17 = vadd.f32 %v9126_v8, %v9023_v5 }
0x114d   : > { %9655 = vmatpush.bf16.msra.mxu1 %v13939_v53 }
0x114e   : > { %9337 = vmatmul.bf16.vlgmr.msrb.gmra.mxu0 %v9263_v58 }
0x1151   : > { %9656 = vmatpush.bf16.msra.mxu1 %v13938_v46 }
0x1153   : > { %v9365_v47 = vpop.f32.mrf.mxu2 }
0x1155   : > { %9657 = vmatpush.bf16.msra.mxu1 %v13937_v44 }
0x115b   : > { %v9367_v40 = vpop.f32.mrf.mxu2 }
0x115c   : > { %v9370_v4 = vpack.c.bf16 %v9367_v40, %v9365_v47 }
0x115e   : > { %9444 = vmatmul.bf16.vlgmr.msrb.gmra.mxu3 %v9370_v4  ;;  %13237 = vmatmul.msk.bf16.vlgmr.msra.gmra.mxu0 %vm8715_vm12, %v13936_v63 }
0x11b5   : > { %v9231_v39 = vpop.f32.mrf.mxu1 }
0x11b6   : > { %v9236_v16 = vadd.f32 %v9231_v39, %v9129_v1 }
0x11bd   : > { %v9233_v49 = vpop.f32.mrf.mxu1 }
0x11be   : > { %v9237_v55 = vadd.f32 %v9233_v49, %v9130_v17 }
0x11c5   : > { %v9472_v32 = vpop.f32.mrf.mxu1 }
0x11cb   : > { %v9338_v15 = vpop.f32.mrf.mxu0 }
0x11cc   : > { %v9343_v20 = vadd.f32 %v9338_v15, %v9236_v16 }
0x11cd   : > { %v9474_v33 = vpop.f32.mrf.mxu1 }
0x11ce   : > { %v9477_v3 = vpack.c.bf16 %v9474_v33, %v9472_v32 }
0x11d0   : > { %9551 = vmatmul.bf16.vlgmr.msra.gmra.mxu2 %v9477_v3 }
0x11d3   : > { %v9340_v60 = vpop.f32.mrf.mxu0 }
0x11d4   : > { %v9344_v54 = vadd.f32 %v9340_v60, %v9237_v55 }
0x11db   : > { %v9579_v24 = vpop.f32.mrf.mxu0 }
0x11e1   : > { %v9445_v52 = vpop.f32.mrf.mxu3 }
0x11e2   : > { %v9450_v30 = vadd.f32 %v9445_v52, %v9343_v20 }
0x11e3   : > { %v9581_v13 = vpop.f32.mrf.mxu0 }
0x11e4   : > { %v9584_v28 = vpack.c.bf16 %v9581_v13, %v9579_v24 }
0x11e6   : > { %9658 = vmatmul.bf16.vlgmr.msra.gmra.mxu1 %v9584_v28 }
0x11e9   : > { %v9447_v37 = vpop.f32.mrf.mxu3 }
0x11ea   : > { %v9451_v21 = vadd.f32 %v9447_v37, %v9344_v54 }
0x1253   : > { %v9552_v34 = vpop.f32.mrf.mxu2 }
0x1254   : > { %v9557_v19 = vadd.f32 %v9552_v34, %v9450_v30 }
0x125b   : > { %v9554_v11 = vpop.f32.mrf.mxu2 }
0x125c   : > { %v9558_v57 = vadd.f32 %v9554_v11, %v9451_v21 }
0x1263   : > { %v9659_v27 = vpop.f32.mrf.mxu1 }
0x1264   : > { %v9664_v43 = vadd.f32 %v9659_v27, %v9557_v19 }
0x1266   : > { %v9670_v45 = vadd.f32 %v14027_v12, %v9664_v43 }
0x1268   : > { %9675 = vst.msk [vmem:[%s9673_s15] sm:$0xff] %vm9674_vm13, %v9670_v45 }
0x126b   : > { %v9661_v29 = vpop.f32.mrf.mxu1 }
0x126c   : > { %v9665_v18 = vadd.f32 %v9661_v29, %v9558_v57  ;;  %9680 = sbr.rel (%p13271_p8) target bundleno = 5158 (0x1426), region = 92 }
0x126e   : > { %v9671_v38 = vadd.f32 %v14027_v12, %v9665_v18 }
0x1270   : > { %9676 = vst.msk [vmem:[%s9673_s15 + $0x8] sm:$0xff] %vm9674_vm13, %v9671_v38 }
0x1271   : > { %v14238_v35 = vmov 32.0   ;;  %vm9985_vm7 = vcmask 0  }
0x1272   : > { %14028 = vrcp.f32 %v14238_v35 }
0x1277   : > { %v18869_v31 = vld [vmem:[#allocation2] sm:$0xff]  ;;  %v18871_v25 = vld [vmem:[#allocation2 + $0x8] sm:$0xff]  ;;  %v18873_v59 = vld [vmem:[#allocation2 + $0x10] sm:$0xff] }
0x1278   : > { %v18875_v41 = vld [vmem:[#allocation2 + $0x18] sm:$0xff]  ;;  %v9689_v0 = vsel %vm9674_vm13, %v18869_v31, 0.0  ;;  %v9690_v6 = vsel %vm9674_vm13, %v18871_v25, 0.0  ;;  %v9692_v5 = vsel %vm9674_vm13, %v18873_v59, 0.0  ;;  %v9685_v42 = vld [vmem:[#allocation2 + $0x20] sm:$0xff]  ;;  %v9686_v50 = vld [vmem:[#allocation2 + $0x28] sm:$0xff]  ;;  %v14029_v14 = vpop.eup %14028 }
0x1279   : > { %v9691_v48 = vadd.f32 %v9690_v6, %v9689_v0  ;;  %v9687_v36 = vld [vmem:[#allocation2 + $0x30] sm:$0xff]  ;;  %v9714_v58 = vsel %vm9674_vm13, %v9685_v42, 0.0  ;;  %v9715_v47 = vsel %vm9674_vm13, %v9686_v50, 0.0  ;;  %v9694_v63 = vsel %vm9674_vm13, %v18875_v41, 0.0  ;;  %v9688_v2 = vld [vmem:[#allocation2 + $0x38] sm:$0xff] }
0x127a   : > { %v9716_v4 = vadd.f32 %v9715_v47, %v9714_v58  ;;  %v9717_v62 = vsel %vm9674_vm13, %v9687_v36, 0.0  ;;  %v9719_v26 = vsel %vm9674_vm13, %v9688_v2, 0.0  ;;  %v9706_v23 = vmul.f32 32.0, %v14029_v14 }
0x127b   : > { %v9693_v40 = vadd.f32 %v9692_v5, %v9691_v48  ;;  %vm9710_vm14 = vweird.f32 %v14029_v14 }
0x127c   : > { %v9718_v7 = vadd.f32 %v9717_v62, %v9716_v4  ;;  %v9707_v56 = vsub.f32 1.0, %v9706_v23 }
0x127d   : > { %v9695_v9 = vadd.f32 %v9694_v63, %v9693_v40 }
0x127e   : > { %v9720_v10 = vadd.f32 %v9719_v26, %v9718_v7  ;;  %v9708_v22 = vmul.f32 %v14029_v14, %v9707_v56 }
0x127f   : > { %9696 = vadd.xlane.f32.xlu0 %v9695_v9 }
0x1280   : > { %v9709_v8 = vadd.f32 %v14029_v14, %v9708_v22 }
0x1282   : > { %v9711_v44 = vsel %vm9710_vm14, %v14029_v14, %v9709_v8 }
0x1287   : > { %9721 = vadd.xlane.f32.xlu0 %v9720_v10 }
0x12f2   : > { %v9697_v51 = vpop.xlane.xlu0 %9696 }
0x12f3   : > { %v9698_v61 = vrot.slane %v9697_v51, 4 }
0x12f5   : > { %v9699_v1 = vadd.f32 %v9698_v61, %v9697_v51 }
0x12f7   : > { %v9700_v39 = vrot.slane %v9699_v1, 2 }
0x12f9   : > { %v9701_v16 = vadd.f32 %v9700_v39, %v9699_v1 }
0x12fa   : > { %v9722_v53 = vpop.xlane.xlu0 %9721 }
0x12fb   : > { %v9723_v17 = vrot.slane %v9722_v53, 4  ;;  %v9702_v46 = vrot.slane %v9701_v16, 1 }
0x12fd   : > { %v9724_v49 = vadd.f32 %v9723_v17, %v9722_v53  ;;  %v9703_v55 = vadd.f32 %v9702_v46, %v9701_v16 }
0x12ff   : > { %v9725_v32 = vrot.slane %v9724_v49, 2  ;;  %13953 = vpush %v9703_v55 }
0x1300   : > { %13955 = vpush %v9711_v44 }
0x1301   : > { %v9726_v15 = vadd.f32 %v9725_v32, %v9724_v49 }
0x1303   : > { %v9727_v20 = vrot.slane %v9726_v15, 1 }
0x1305   : > { %v9728_v33 = vadd.f32 %v9727_v20, %v9726_v15 }
0x1307   : > { %13957 = vpush %v9728_v33 }
0x1330   : > { %s13954_s16 = spop %13953 }
0x1331   : > { %s18889_s19 = spop %13955 }
0x1332   : > { %s9713_s20 = smul.f32 %s18889_s19, %s13954_s16 }
0x1334   : > { %v9739_v3 = vstv %s9713_s20 }
0x1335   : > { %v18892_v60 = vsub.f32 %v9685_v42, %v9739_v3  ;;  %v18894_v54 = vsub.f32 %v9686_v50, %v9739_v3  ;;  %v18896_v24 = vsub.f32 %v9687_v36, %v9739_v3  ;;  %v18898_v13 = vsub.f32 %v9688_v2, %v9739_v3 }
0x1337   : > { %v9753_v28 = vand.u32 2147483647, %v18892_v60  ;;  %v9754_v52 = vand.u32 2147483647, %v18894_v54  ;;  %v9755_v34 = vand.u32 2147483647, %v18896_v24 }
0x1338   : > { %s13958_s17 = spop %13957  ;;  %v9756_v30 = vand.u32 2147483647, %v18898_v13  ;;  %v9749_v63 = vmax.f32 %v18892_v60, 0.0  ;;  %v9750_v40 = vmax.f32 %v18894_v54, 0.0  ;;  %v9751_v9 = vmax.f32 %v18896_v24, 0.0 }
0x1339   : > { %s9738_s21 = smul.f32 %s13958_s17, %s18889_s19  ;;  %v9757_v19 = vsub.f32 0.0, %v9753_v28  ;;  %v9758_v12 = vsub.f32 0.0, %v9754_v52  ;;  %v9759_v27 = vsub.f32 0.0, %v9755_v34  ;;  %v9752_v2 = vmax.f32 %v18898_v13, 0.0 }
0x133a   : > { %v9760_v37 = vsub.f32 0.0, %v9756_v30 }
0x133b   : > { %v9744_v43 = vstv %s9738_s21  ;;  %v9761_v29 = vmul.f32 1.442695, %v9757_v19  ;;  %v9763_v18 = vmul.f32 1.442695, %v9758_v12  ;;  %v9765_v38 = vmul.f32 1.442695, %v9759_v27 }
0x133c   : > { %v18906_v45 = vsub.f32 %v18869_v31, %v9744_v43  ;;  %v18909_v11 = vsub.f32 %v18871_v25, %v9744_v43  ;;  %v18912_v21 = vsub.f32 %v18873_v59, %v9744_v43  ;;  %v18915_v57 = vsub.f32 %v18875_v41, %v9744_v43 }
0x133d   : > { %14030 = vpow2.f32 %v9761_v29  ;;  %v9767_v25 = vmul.f32 1.442695, %v9760_v37 }
0x133e   : > { %v9813_v0 = vand.u32 2147483647, %v18906_v45  ;;  %v9814_v6 = vand.u32 2147483647, %v18909_v11  ;;  %v9815_v5 = vand.u32 2147483647, %v18912_v21  ;;  %14032 = vpow2.f32 %v9763_v18 }
0x133f   : > { %v9816_v31 = vand.u32 2147483647, %v18915_v57  ;;  %14034 = vpow2.f32 %v9765_v38  ;;  %v9809_v62 = vmax.f32 %v18906_v45, 0.0  ;;  %v9810_v1 = vmax.f32 %v18909_v11, 0.0 }
0x1340   : > { %v9817_v42 = vsub.f32 0.0, %v9813_v0  ;;  %v9818_v50 = vsub.f32 0.0, %v9814_v6  ;;  %v9819_v59 = vsub.f32 0.0, %v9815_v5  ;;  %14036 = vpow2.f32 %v9767_v25 }
0x1341   : > { %v9820_v48 = vsub.f32 0.0, %v9816_v31  ;;  %v9811_v31 = vmax.f32 %v18912_v21, 0.0 }
0x1342   : > { %v9821_v41 = vmul.f32 1.442695, %v9817_v42  ;;  %v9823_v36 = vmul.f32 1.442695, %v9818_v50  ;;  %v9825_v58 = vmul.f32 1.442695, %v9819_v59 }
0x1343   : > { %v9827_v47 = vmul.f32 1.442695, %v9820_v48  ;;  %v14031_v4 = vpop.eup %14030 }
0x1344   : > { %14038 = vpow2.f32 %v9821_v41  ;;  %v14033_v7 = vpop.eup %14032  ;;  %v9769_v26 = vadd.f32 1.0, %v14031_v4  ;;  %v9772_v10 = vmul.f32 -0.5, %v14031_v4  ;;  %v9775_v35 = vand.u32 2147483647, %v14031_v4 }
0x1345   : > { %14040 = vpow2.f32 %v9823_v36  ;;  %v14035_v14 = vpop.eup %14034  ;;  %v9778_v23 = vadd.f32 1.0, %v14033_v7  ;;  %v9781_v56 = vmul.f32 -0.5, %v14033_v7  ;;  %v9784_v51 = vand.u32 2147483647, %v14033_v7 }
0x1346   : > { %14042 = vpow2.f32 %v9825_v58  ;;  %v14037_v61 = vpop.eup %14036  ;;  %v9773_v22 = vadd.f32 1.0, %v9772_v10  ;;  %v9787_v39 = vadd.f32 1.0, %v14035_v14  ;;  %vm18927_vm15 = vcmp.lt.f32.partialorder %v9775_v35, 0.0004427343 }
0x1347   : > { %14044 = vpow2.f32 %v9827_v47  ;;  %v9782_v8 = vadd.f32 1.0, %v9781_v56  ;;  %v9790_v53 = vmul.f32 -0.5, %v14035_v14  ;;  %vm18931_vm0 = vcmp.lt.f32.partialorder %v9784_v51, 0.0004427343 }
0x1348   : > { %14046 = vlog2.f32 %v9769_v26  ;;  %v9793_v49 = vand.u32 2147483647, %v14035_v14  ;;  %v9796_v55 = vadd.f32 1.0, %v14037_v61  ;;  %v9774_v32 = vmul.f32 %v14031_v4, %v9773_v22 }
0x1349   : > { %14048 = vlog2.f32 %v9778_v23  ;;  %v9791_v15 = vadd.f32 1.0, %v9790_v53  ;;  %v9799_v20 = vmul.f32 -0.5, %v14037_v61  ;;  %v9802_v33 = vand.u32 2147483647, %v14037_v61 }
0x134a   : > { %v14039_v17 = vpop.eup %14038  ;;  %14050 = vlog2.f32 %v9787_v39  ;;  %v9783_v28 = vmul.f32 %v14033_v7, %v9782_v8  ;;  %vm18939_vm1 = vcmp.lt.f32.partialorder %v9793_v49, 0.0004427343 }
0x134b   : > { %v14041_v44 = vpop.eup %14040  ;;  %14052 = vlog2.f32 %v9796_v55  ;;  %v9829_v52 = vadd.f32 1.0, %v14039_v17  ;;  %v9832_v34 = vmul.f32 -0.5, %v14039_v17  ;;  %v9792_v19 = vmul.f32 %v14035_v14, %v9791_v15 }
0x134c   : > { %v18935_v3 = vpop.eup %14042  ;;  %v9800_v27 = vadd.f32 1.0, %v9799_v20  ;;  %v9835_v43 = vand.u32 2147483647, %v14039_v17  ;;  %v9838_v18 = vadd.f32 1.0, %v14041_v44  ;;  %v9841_v38 = vmul.f32 -0.5, %v14041_v44 }
0x134d   : > { %v18937_v30 = vpop.eup %14044  ;;  %14054 = vlog2.f32 %v9829_v52  ;;  %v9833_v29 = vadd.f32 1.0, %v9832_v34  ;;  %vm18943_vm2 = vcmp.lt.f32.partialorder %v9802_v33, 0.0004427343  ;;  %v9844_v25 = vand.u32 2147483647, %v14041_v44 }
0x134e   : > { %v14047_v37 = vpop.eup %14046  ;;  %v9801_v5 = vmul.f32 %v14037_v61, %v9800_v27  ;;  %vm18947_vm3 = vcmp.lt.f32.partialorder %v9835_v43, 0.0004427343  ;;  %14056 = vlog2.f32 %v9838_v18  ;;  %v9842_v48 = vadd.f32 1.0, %v9841_v38 }
0x134f   : > { %v14049_v0 = vpop.eup %14048  ;;  %v9771_v6 = vmul.f32 0.6931472, %v14047_v37  ;;  %v9834_v58 = vmul.f32 %v14039_v17, %v9833_v29  ;;  %v9847_v47 = vadd.f32 1.0, %v18935_v3  ;;  %vm18958_vm4 = vcmp.lt.f32.partialorder %v9844_v25, 0.0004427343 }
0x1350   : > { %v14051_v42 = vpop.eup %14050  ;;  %v9780_v50 = vmul.f32 0.6931472, %v14049_v0  ;;  %v9850_v35 = vmul.f32 -0.5, %v18935_v3  ;;  %v9843_v39 = vmul.f32 %v14041_v44, %v9842_v48  ;;  %v9856_v29 = vadd.f32 1.0, %v18937_v30 }
0x1351   : > { %v9777_v41 = vsel %vm18927_vm15, %v9774_v32, %v9771_v6  ;;  %v9789_v36 = vmul.f32 0.6931472, %v14051_v42  ;;  %v14053_v4 = vpop.eup %14052  ;;  %14058 = vlog2.f32 %v9847_v47  ;;  %v9859_v18 = vmul.f32 -0.5, %v18937_v30 }
0x1352   : > { %v9786_v7 = vsel %vm18931_vm0, %v9783_v28, %v9780_v50  ;;  %v9805_v26 = vadd.f32 %v9777_v41, %v9749_v63  ;;  %v9798_v23 = vmul.f32 0.6931472, %v14053_v4  ;;  %v9851_v55 = vadd.f32 1.0, %v9850_v35 }
0x1353   : > { %v9795_v14 = vsel %vm18939_vm1, %v9792_v19, %v9789_v36  ;;  %v9806_v56 = vadd.f32 %v9786_v7, %v9750_v40  ;;  %v14055_v51 = vpop.eup %14054  ;;  %v9853_v19 = vand.u32 2147483647, %v18935_v3  ;;  %14060 = vlog2.f32 %v9856_v29 }
0x1354   : > { %v9807_v61 = vadd.f32 %v9795_v14, %v9751_v9  ;;  %v9869_v63 = vsel %vm9674_vm13, %v9805_v26, 0.0  ;;  %v9926_v22 = vsub.f32 %v9805_v26, %v18892_v60  ;;  %v9804_v16 = vsel %vm18943_vm2, %v9801_v5, %v9798_v23  ;;  %v14057_v46 = vpop.eup %14056 }
0x1355   : > { %v9870_v8 = vsel %vm9674_vm13, %v9806_v56, 0.0  ;;  %v9927_v53 = vsub.f32 %v9806_v56, %v18894_v54  ;;  %v9831_v17 = vmul.f32 0.6931472, %v14055_v51  ;;  %v9808_v40 = vadd.f32 %v9804_v16, %v9752_v2 }
0x1356   : > { %v9871_v49 = vadd.f32 %v9870_v8, %v9869_v63  ;;  %v9928_v9 = vsub.f32 %v9807_v61, %v18896_v24  ;;  %v9872_v32 = vsel %vm9674_vm13, %v9807_v61, 0.0  ;;  %v9930_v60 = vsel %vm9674_vm13, %v9926_v22, 0.0 }
0x1357   : > { %v9931_v44 = vsel %vm9674_vm13, %v9927_v53, 0.0  ;;  %v9840_v15 = vmul.f32 0.6931472, %v14057_v46  ;;  %v9929_v33 = vsub.f32 %v9808_v40, %v18898_v13  ;;  %v9837_v28 = vsel %vm18947_vm3, %v9834_v58, %v9831_v17  ;;  %v14059_v52 = vpop.eup %14058 }
0x1358   : > { %v9873_v20 = vadd.f32 %v9872_v32, %v9871_v49  ;;  %v9932_v54 = vadd.f32 %v9931_v44, %v9930_v60  ;;  %v9874_v2 = vsel %vm9674_vm13, %v9808_v40, 0.0  ;;  %v9933_v24 = vsel %vm9674_vm13, %v9928_v9, 0.0 }
0x1359   : > { %v9846_v34 = vsel %vm18958_vm4, %v9843_v39, %v9840_v15  ;;  %v9849_v43 = vmul.f32 0.6931472, %v14059_v52  ;;  %v9852_v37 = vmul.f32 %v18935_v3, %v9851_v55  ;;  %v9935_v13 = vsel %vm9674_vm13, %v9929_v33, 0.0  ;;  %v14061_v58 = vpop.eup %14060 }
0x135a   : > { %v9875_v12 = vadd.f32 %v9874_v2, %v9873_v20  ;;  %v9934_v27 = vadd.f32 %v9933_v24, %v9932_v54  ;;  %vm9854_vm5 = vcmp.lt.f32.partialorder %v9853_v19, 0.0004427343  ;;  %v9865_v6 = vadd.f32 %v9837_v28, %v9809_v62 }
0x135b   : > { %v9855_v0 = vsel %vm9854_vm5, %v9852_v37, %v9849_v43  ;;  %v9866_v5 = vadd.f32 %v9846_v34, %v9810_v1  ;;  %v9860_v48 = vadd.f32 1.0, %v9859_v18  ;;  %v9862_v41 = vand.u32 2147483647, %v18937_v30 }
0x135c   : > { %9876 = vadd.xlane.f32.xlu1 %v9875_v12  ;;  %v9936_v38 = vadd.f32 %v9935_v13, %v9934_v27  ;;  %v9895_v3 = vsub.f32 %v9865_v6, %v18906_v45  ;;  %v9867_v42 = vadd.f32 %v9855_v0, %v9811_v31  ;;  %v9956_v50 = vsel %vm9674_vm13, %v9865_v6, 0.0 }
0x135d   : > { %v9896_v25 = vsub.f32 %v9866_v5, %v18909_v11  ;;  %v9957_v59 = vsel %vm9674_vm13, %v9866_v5, 0.0  ;;  %v9858_v4 = vmul.f32 0.6931472, %v14061_v58  ;;  %v9861_v45 = vmul.f32 %v18937_v30, %v9860_v48 }
0x135e   : > { %9937 = vadd.xlane.f32.xlu2 %v9936_v38  ;;  %v9899_v62 = vsel %vm9674_vm13, %v9895_v3, 0.0  ;;  %v9958_v36 = vadd.f32 %v9957_v59, %v9956_v50  ;;  %v9897_v47 = vsub.f32 %v9867_v42, %v18912_v21  ;;  %v9812_v7 = vmax.f32 %v18915_v57, 0.0 }
0x135f   : > { %v9900_v1 = vsel %vm9674_vm13, %v9896_v25, 0.0  ;;  %vm9863_vm6 = vcmp.lt.f32.partialorder %v9862_v41, 0.0004427343  ;;  %v9959_v26 = vsel %vm9674_vm13, %v9867_v42, 0.0 }
0x1360   : > { %v9901_v11 = vadd.f32 %v9900_v1, %v9899_v62  ;;  %v9864_v10 = vsel %vm9863_vm6, %v9861_v45, %v9858_v4  ;;  %v9960_v35 = vadd.f32 %v9959_v26, %v9958_v36  ;;  %v9902_v23 = vsel %vm9674_vm13, %v9897_v47, 0.0 }
0x1361   : > { %v9868_v14 = vadd.f32 %v9864_v10, %v9812_v7 }
0x1362   : > { %v9903_v56 = vadd.f32 %v9902_v23, %v9901_v11 }
0x1363   : > { %v9961_v51 = vsel %vm9674_vm13, %v9868_v14, 0.0  ;;  %v9898_v61 = vsub.f32 %v9868_v14, %v18915_v57 }
0x1364   : > { %v9962_v21 = vadd.f32 %v9961_v51, %v9960_v35 }
0x1365   : > { %v9904_v63 = vsel %vm9674_vm13, %v9898_v61, 0.0 }
0x1366   : > { %9963 = vadd.xlane.f32.xlu2 %v9962_v21  ;;  %v9905_v30 = vadd.f32 %v9904_v63, %v9903_v56 }
0x1368   : > { %9906 = vadd.xlane.f32.xlu1 %v9905_v30 }
0x13cf   : > { %v9877_v22 = vpop.xlane.xlu1 %9876 }
0x13d0   : > { %v9878_v39 = vrot.slane %v9877_v22, 4 }
0x13d1   : > { %v9938_v53 = vpop.xlane.xlu2 %9937 }
0x13d2   : > { %v9879_v16 = vadd.f32 %v9878_v39, %v9877_v22  ;;  %v9939_v40 = vrot.slane %v9938_v53, 4 }
0x13d4   : > { %v9880_v8 = vrot.slane %v9879_v16, 2  ;;  %v9940_v9 = vadd.f32 %v9939_v40, %v9938_v53 }
0x13d6   : > { %v9881_v17 = vadd.f32 %v9880_v8, %v9879_v16  ;;  %v9941_v57 = vrot.slane %v9940_v9, 2 }
0x13d8   : > { %v9882_v46 = vrot.slane %v9881_v17, 1  ;;  %v9942_v54 = vadd.f32 %v9941_v57, %v9940_v9 }
0x13d9   : > { %v9964_v55 = vpop.xlane.xlu2 %9963 }
0x13da   : > { %v9883_v49 = vadd.f32 %v9882_v46, %v9881_v17  ;;  %v9965_v32 = vrot.slane %v9964_v55, 4  ;;  %v9943_v34 = vrot.slane %v9942_v54, 1 }
0x13db   : > { %v9907_v60 = vpop.xlane.xlu1 %9906 }
0x13dc   : > { %13959 = vpush %v9883_v49  ;;  %v9966_v44 = vadd.f32 %v9965_v32, %v9964_v55  ;;  %v9908_v15 = vrot.slane %v9907_v60, 4  ;;  %v9944_v43 = vadd.f32 %v9943_v34, %v9942_v54 }
0x13de   : > { %v9967_v20 = vrot.slane %v9966_v44, 2  ;;  %v9909_v33 = vadd.f32 %v9908_v15, %v9907_v60 }
0x13e0   : > { %v9968_v28 = vadd.f32 %v9967_v20, %v9966_v44  ;;  %v9910_v52 = vrot.slane %v9909_v33, 2 }
0x13e2   : > { %v9911_v2 = vadd.f32 %v9910_v52, %v9909_v33  ;;  %v9969_v24 = vrot.slane %v9968_v28, 1 }
0x13e4   : > { %v9912_v19 = vrot.slane %v9911_v2, 1  ;;  %v9970_v27 = vadd.f32 %v9969_v24, %v9968_v28 }
0x13e6   : > { %v9913_v12 = vadd.f32 %v9912_v19, %v9911_v2 }
0x13e8   : > { %13961 = vpush %v9913_v12 }
0x13e9   : > { %13963 = vpush %v9944_v43 }
0x13ea   : > { %13965 = vpush %v9970_v27 }
0x140d   : > { %s13960_s22 = spop %13959 }
0x140e   : > { %s9893_s18 = smul.f32 %s13960_s22, %s18889_s19 }
0x1410   : > { %s9894_s23 = smul.f32 0.5, %s9893_s18 }
0x1419   : > { %s13962_s24 = spop %13961 }
0x141a   : > { %s9923_s25 = smul.f32 %s13962_s24, %s18889_s19  ;;  %s13964_s26 = spop %13963 }
0x141b   : > { %s9954_s27 = smul.f32 %s13964_s26, %s18889_s19  ;;  %s13966_s28 = spop %13965 }
0x141c   : > { %s9924_s15 = smul.f32 0.5, %s9923_s25 }
0x141d   : > { %s9955_s16 = smul.f32 0.5, %s9954_s27 }
0x141e   : > { %s9925_s20 = sadd.f32 %s9924_s15, %s9894_s23  ;;  %s9980_s17 = smul.f32 %s13966_s28, %s18889_s19 }
0x1420   : > { %v9983_v37 = vstv %s9925_s20  ;;  %s9981_s21 = smul.f32 0.5, %s9980_s17 }
0x1421   : > { %9986 = vst.msk [vmem:[#allocation9] sm:$0x1] %vm9985_vm7, %v9983_v37 }
0x1422   : > { %s9982_s0 = sadd.f32 %s9981_s21, %s9955_s16 }
0x1424   : > { %v9987_v13 = vstv %s9982_s0 }
0x1425   : > { %9989 = vst.msk [vmem:[#allocation10] sm:$0x1] %vm9985_vm7, %v9987_v13 }
0x1426 PF: > { %p14003_p9 = scmp.eq.s32.totalorder %s14322_s30, 3  ;;  %s14239_s22 = smov [#allocation9]  }
0x1427   : > { %s9996_s18 = sshll.u32 %s14239_s22, 4  ;;  %s9998_s23 = sshll.u32 %s19052_s13, 4  ;;  %s9997_s18 = int_to_ptr.vmem [resolvable:$true] %s9996_s18  ;;  %s9999_s23 = int_to_ptr.hbm [resolvable:$true] %s9998_s23 }
0x1428   : > { %13980 = dma.vmem_to_hbm [thread:$0]  (%p14003_p9), %s9997_s18, 16, %s9999_s23, [#allocation5]  }
0x1429   : > { %s10010_s0 = sshll.u32 %s19053_s14, 4  ;;  %s14240_s27 = smov [#allocation10]   ;;  %s10011_s0 = int_to_ptr.hbm [resolvable:$true] %s10010_s0 }
0x142a   : > { %s10008_s28 = sshll.u32 %s14240_s27, 4  ;;  %s10009_s28 = int_to_ptr.vmem [resolvable:$true] %s10008_s28 }
0x142b   : > { %13982 = dma.vmem_to_hbm [thread:$0]  (%p14003_p9), %s10009_s28, 16, %s10011_s0, [#allocation11]  }
0x142c   : > { %14221 = dma.done.wait (%p14003_p9), [#allocation5], 16  }
0x142d   : > { %14223 = vsyncadd (%p14003_p9), [#allocation5], 4294967280 }
0x142e   : > { %14225 = dma.done.wait (%p14003_p9), [#allocation11], 16  }
0x142f   : > { %14227 = vsyncadd (%p14003_p9), [#allocation11], 4294967280 }
0x1430 PF: > { %s29_s29 = sadd.s32 1, %s14230_s29  }
0x1431   : > { %p26_p10 = scmp.ge.s32.totalorder %s29_s29, 6  }
0x1433   :  { %28 = sbr.rel (!%p26_p10) target bundleno = 6 (0x6), region = 193 }
0x1438   :  { %10029 = vsyncpa [#allocation4], 1 }
0x1439   :  { %10031 = vsyncpa [#allocation4 + $0x1], 1 }
0x143a   :  { %10032 = vsyncpa [#allocation7], 1 }
0x143b   :  { %10033 = vsyncpa [#allocation5], 1 }
0x143c   :  { %10035 = vsyncpa [#allocation5 + $0x1], 1 }
0x143d   :  { %10036 = vsyncpa [#allocation11], 1 }

</bundles_post_ra>
